<compile_context>
chip_gen: v5e
topology: v5e:2x2
jax: 0.10.0
libtpu: 0.0.40
codegen_flags: <defaults>
</compile_context>

<pallas_src>
import functools

import jax
import jax.numpy as jnp
from jax import lax
from jax.experimental import pallas as pl
from jax.experimental.pallas import tpu as pltpu

# Keep f32 matmuls at full precision everywhere (kernel + reference) so the
# correctness check below is meaningful on TPU and in interpret mode.
jax.config.update("jax_default_matmul_precision", "highest")


def _round_up(a, b):
    return (a + b - 1) // b * b


def _phase_taps(K, d, s):
    """taps[r] = [(k, (k*d)//s) for k if (k*d) % s == r]  (static Python)."""
    taps = [[] for _ in range(s)]
    for k in range(K):
        taps[(k * d) % s].append((k, (k * d) // s))
    return taps


def _make_kernel(sched, sh, Qh, BN, Mq, Cout_g):
    """One grid step = one (w-phase, group, batch block); computes all sh h-phases."""
    M = BN * Mq

    def kernel(x_ref, w_ref, o_ref):
        # x_ref: (BN, Hp, Qw_pad, TWC)   w-taps & channels pre-folded on last dim
        # w_ref: (KH, TWC, Cout_g)       resident weight slab for this (phase, group)
        # o_ref: (sh, BN, Mq, Cout_g)
        for rh in range(sh):
            entries = sched[rh]
            if not entries:
                # This h-phase receives no kernel taps: pure zeros.
                o_ref[rh] = jnp.zeros((BN, Mq, Cout_g), o_ref.dtype)
                continue
            acc = None
            for (row, oh) in entries:              # static unroll over h-taps
                xs = x_ref[:, oh:oh + Qh]          # (BN, Qh, Qw_pad, TWC): outer-dim slice
                xs = xs.reshape(M, xs.shape[-1])   # Qw_pad % sub == 0 -> free relabel
                part = jnp.dot(xs, w_ref[row],
                               preferred_element_type=jnp.float32)
                acc = part if acc is None else acc + part   # register accumulation
            o_ref[rh] = acc.reshape(BN, Mq, Cout_g).astype(o_ref.dtype)

    return kernel


@functools.partial(
    jax.jit,
    static_argnames=("stride", "padding", "output_padding", "dilation", "groups"))
def conv_transpose2d(x, weight, stride=(1, 1), padding=(0, 0),
                     output_padding=(0, 0), dilation=(1, 1), groups=1):
    """PyTorch-equivalent ConvTranspose2d forward (bias=False).

    x:      (N, Cin, H, W)                NCHW
    weight: (Cin, Cout//groups, KH, KW)   PyTorch ConvTranspose2d layout
    returns (N, Cout, Ho, Wo)             NCHW
    """
    N, Cin, H, W = x.shape
    Cin_w, Cout_g, KH, KW = weight.shape
    assert Cin_w == Cin and Cin % groups == 0
    G = groups
    Cin_g = Cin // G
    Cout = Cout_g * G
    sh, sw = stride
    ph, pw = padding
    oph, opw = output_padding
    dh, dw = dilation

    Ho = (H - 1) * sh - 2 * ph + dh * (KH - 1) + oph + 1
    Wo = (W - 1) * sw - 2 * pw + dw * (KW - 1) + opw + 1

    out_dtype = x.dtype
    itemsize = jnp.dtype(out_dtype).itemsize
    sub = 8 * max(1, 4 // itemsize)            # dtype-aware sublane tile (f32: 8)

    # ---- static phase-decomposition metadata --------------------------------
    taps_h = _phase_taps(KH, dh, sh)           # taps_h[rh] = [(kh, mh), ...]
    taps_w = _phase_taps(KW, dw, sw)
    Qh = -(-(Ho + ph) // sh)                   # phase-grid extents (ceil)
    Qw = -(-(Wo + pw) // sw)
    Qw_pad = _round_up(Qw, sub)
    padL_h = (dh * (KH - 1)) // sh
    padL_w = (dw * (KW - 1)) // sw
    Hp = padL_h + max(H, Qh)
    Wq = padL_w + max(W, Qw_pad)
    Mq = Qh * Qw_pad
    TWmax = max(1, max(len(t) for t in taps_w))
    TWC = TWmax * Cin_g

    # h-tap schedule: weight-slab rows ordered by (rh, tap); total rows == KH.
    sched, kh_order, row = [], [], 0
    for rh in range(sh):
        entries = []
        for (kh, mh) in taps_h[rh]:
            entries.append((row, padL_h - mh))
            kh_order.append(kh)
            row += 1
        sched.append(entries)
    KHt = row

    # ---- activations: NCHW -> (G, N, Hp, Wq, Cin_g), boundary-padded once ----
    xg = x.reshape(N, G, Cin_g, H, W).transpose(1, 0, 3, 4, 2)
    xp = jnp.pad(xg, ((0, 0), (0, 0),
                      (padL_h, Hp - padL_h - H),
                      (padL_w, Wq - padL_w - W),
                      (0, 0)))

    # ---- per-w-phase tap gather, built directly in the kernel layout --------
    slabs = []
    for rw in range(sw):
        ows = [padL_w - mw for (_kw, mw) in taps_w[rw]]
        ows = (ows + [padL_w] * TWmax)[:TWmax]       # pad tap list (zeroed weights)
        xw = jnp.stack([xp[:, :, :, o:o + Qw_pad, :] for o in ows], axis=4)
        slabs.append(xw)                             # (G, N, Hp, Qw_pad, TWmax, Cin_g)
    xall = jnp.stack(slabs, axis=0)                  # (sw, G, N, Hp, Qw_pad, TWmax, Cin_g)
    xall = xall.reshape(sw * G, N, Hp, Qw_pad, TWC)

    # ---- weight slabs: (sw*G, KH, TWmax*Cin_g, Cout_g) -----------------------
    w_g = weight.reshape(G, Cin_g, Cout_g, KH, KW)
    kh_idx = jnp.asarray(kh_order, jnp.int32)
    w_slabs = []
    for rw in range(sw):
        kw_list = [kw for (kw, _mw) in taps_w[rw]]
        nt = len(kw_list)
        kw_pad = (kw_list + [0] * TWmax)[:TWmax]
        wsel = jnp.take(w_g, kh_idx, axis=3)
        wsel = jnp.take(wsel, jnp.asarray(kw_pad, jnp.int32), axis=4)
        # (G, Cin_g, Cout_g, KH, TWmax); zero out padded tap slots
        if nt < TWmax:
            mask = jnp.asarray([1.0 if t < nt else 0.0 for t in range(TWmax)],
                               wsel.dtype)
            wsel = wsel * mask
        wsel = wsel.transpose(0, 3, 4, 1, 2)          # (G, KH, TWmax, Cin_g, Cout_g)
        w_slabs.append(wsel.reshape(G, KHt, TWC, Cout_g))
    wall = jnp.stack(w_slabs, axis=0).reshape(sw * G, KHt, TWC, Cout_g)

    # ---- batch-block size against an explicit VMEM budget --------------------
    bytes_per_n = (Hp * Qw_pad * TWC + sh * Mq * Cout_g) * itemsize * 2  # dbl-buffered
    w_bytes = KHt * TWC * Cout_g * itemsize * 2
    budget = 8 * 1024 * 1024          # safe under every generation's scoped VMEM
    BN = 1
    for d in range(1, N + 1):
        if N % d == 0 and d * bytes_per_n + w_bytes <= budget:
            BN = d
    nN = N // BN
    # TODO(synk): for very large images additionally tile the Qh axis; at these
    # sizes one (BN, Hp, Qw_pad, TWC) block fits VMEM with large margin.

    kernel = _make_kernel(sched, sh, Qh, BN, Mq, Cout_g)
    res = pl.pallas_call(
        kernel,
        out_shape=jax.ShapeDtypeStruct((sw * G, sh, N, Mq, Cout_g), out_dtype),
        grid_spec=pltpu.PrefetchScalarGridSpec(
            num_scalar_prefetch=0,
            grid=(sw, G, nN),          # nN innermost -> weight slab DMA skipped
            in_specs=[
                pl.BlockSpec((None, BN, Hp, Qw_pad, TWC),
                             lambda rw, g, nb: (rw * G + g, nb, 0, 0, 0)),
                pl.BlockSpec((None, KHt, TWC, Cout_g),
                             lambda rw, g, nb: (rw * G + g, 0, 0, 0)),
            ],
            out_specs=pl.BlockSpec((None, sh, BN, Mq, Cout_g),
                                   lambda rw, g, nb: (rw * G + g, 0, nb, 0, 0)),
        ),
        compiler_params=pltpu.CompilerParams(
            dimension_semantics=("parallel", "parallel", "parallel"),
            vmem_limit_bytes=32 * 1024 * 1024),
    )(xall, wall)

    # ---- interleave phases back into (N, Cout, Ho, Wo) -----------------------
    res = res.reshape(sw, G, sh, N, Qh, Qw_pad, Cout_g)[..., :Qw, :]
    full = res.transpose(3, 1, 6, 4, 2, 5, 0)         # (N, G, Cg, Qh, sh, Qw, sw)
    full = full.reshape(N, Cout, Qh * sh, Qw * sw)
    return full[:, :, ph:ph + Ho, pw:pw + Wo]


def conv_transpose2d_ref(x, weight, stride, padding, output_padding, dilation,
                         groups):
    """Pure-XLA reference (lhs-dilated conv identity), for correctness check."""
    sh, sw = stride
    ph, pw = padding
    oph, opw = output_padding
    dh, dw = dilation
    Cin = x.shape[1]
    _, Cout_g, KH, KW = weight.shape
    Cin_g = Cin // groups
    w_flip = weight[:, :, ::-1, ::-1]
    w_oihw = (w_flip.reshape(groups, Cin_g, Cout_g, KH, KW)
              .transpose(0, 2, 1, 3, 4)
              .reshape(groups * Cout_g, Cin_g, KH, KW))
    return lax.conv_general_dilated(
        x, w_oihw,
        window_strides=(1, 1),
        padding=[(dh * (KH - 1) - ph, dh * (KH - 1) - ph + oph),
                 (dw * (KW - 1) - pw, dw * (KW - 1) - pw + opw)],
        lhs_dilation=(sh, sw),
        rhs_dilation=(dh, dw),
        dimension_numbers=("NCHW", "OIHW", "NCHW"),
        feature_group_count=groups,
        precision=lax.Precision.HIGHEST)


if __name__ == "__main__":
    key = jax.random.PRNGKey(0)

    def run_case(N, Cin, Cout, H, W, ks, stride, padding, output_padding,
                 dilation, groups, kx, kw_key):
        x = jax.random.normal(kx, (N, Cin, H, W), dtype=jnp.float32)
        w = 0.1 * jax.random.normal(
            kw_key, (Cin, Cout // groups, ks[0], ks[1]), dtype=jnp.float32)
        out = conv_transpose2d(x, w, stride=stride, padding=padding,
                               output_padding=output_padding,
                               dilation=dilation, groups=groups)
        out = jax.block_until_ready(out)
        ref = conv_transpose2d_ref(x, w, stride, padding, output_padding,
                                   dilation, groups)
        assert out.shape == ref.shape, (out.shape, ref.shape)
        err = float(jnp.max(jnp.abs(out - ref)))
        assert jnp.allclose(out, ref, atol=2e-4, rtol=2e-4), err

    k = jax.random.split(key, 4)
    # Asymmetric kernel/stride/pad/output_padding/dilation + groups (module spec).
    run_case(2, 8, 16, 10, 12, (3, 5), (2, 3), (1, 2), (1, 2), (2, 1), 2,
             k[0], k[1])
    # Square kernel, stride 2, no dilation, groups=1.
    run_case(2, 4, 8, 9, 11, (3, 3), (2, 2), (1, 1), (1, 1), (1, 1), 1,
             k[2], k[3])
    print("KERNEL_OK")
</pallas_src>

<mosaic_0001>
module attributes {stable_mosaic.version = 11 : i64} {
  func.func @kernel(%arg0: i32, %arg1: i32, %arg2: i32, %arg3: memref<1x2x14x16x8xf32, #tpu.memory_space<vmem>>, %arg4: memref<1x3x8x8xf32, #tpu.memory_space<vmem>>, %arg5: memref<1x2x2x192x8xf32, #tpu.memory_space<vmem>>) attributes {dimension_semantics = [#tpu.dimension_semantics<parallel>, #tpu.dimension_semantics<parallel>, #tpu.dimension_semantics<parallel>], iteration_bounds = array<i64: 3, 2, 1>, scalar_prefetch = 0 : i64, scratch_operands = 0 : i64, tpu.core_type = #tpu.core_type<tc>, window_params = [{transform_indices = @transform_0, window_bounds = array<i64: 1, 2, 14, 16, 8>}, {transform_indices = @transform_1, window_bounds = array<i64: 1, 3, 8, 8>}, {transform_indices = @transform_2, window_bounds = array<i64: 1, 2, 2, 192, 8>}]} {
    %c0 = arith.constant 0 : index
    %c0_0 = arith.constant 0 : index
    %c2 = arith.constant 2 : index
    %c0_1 = arith.constant 0 : index
    %c0_2 = arith.constant 0 : index
    %0 = vector.load %arg3[%c0, %c0_0, %c2, %c0_1, %c0_2] : memref<1x2x14x16x8xf32, #tpu.memory_space<vmem>>, vector<1x2x12x16x8xf32>
    %1 = vector.shape_cast %0 : vector<1x2x12x16x8xf32> to vector<2x12x16x8xf32>
    %2 = vector.shape_cast %1 : vector<2x12x16x8xf32> to vector<384x8xf32>
    %c0_3 = arith.constant 0 : index
    %c0_4 = arith.constant 0 : index
    %c0_5 = arith.constant 0 : index
    %c0_6 = arith.constant 0 : index
    %3 = vector.load %arg4[%c0_3, %c0_4, %c0_5, %c0_6] : memref<1x3x8x8xf32, #tpu.memory_space<vmem>>, vector<1x1x8x8xf32>
    %4 = vector.shape_cast %3 : vector<1x1x8x8xf32> to vector<8x8xf32>
    %cst = arith.constant dense<0.000000e+00> : vector<384x8xf32>
    %5 = tpu.matmul %2, %4, %cst {dimension_numbers = #tpu.dot_dimension_numbers<[1], [0], [0], [1], [0, 0, 1, 1], [], []>, precision = #tpu.contract_precision<fp32>} : vector<384x8xf32>, vector<8x8xf32>, vector<384x8xf32> -> vector<384x8xf32>
    %c0_7 = arith.constant 0 : index
    %c0_8 = arith.constant 0 : index
    %c1 = arith.constant 1 : index
    %c0_9 = arith.constant 0 : index
    %c0_10 = arith.constant 0 : index
    %6 = vector.load %arg3[%c0_7, %c0_8, %c1, %c0_9, %c0_10] : memref<1x2x14x16x8xf32, #tpu.memory_space<vmem>>, vector<1x2x12x16x8xf32>
    %7 = vector.shape_cast %6 : vector<1x2x12x16x8xf32> to vector<2x12x16x8xf32>
    %8 = vector.shape_cast %7 : vector<2x12x16x8xf32> to vector<384x8xf32>
    %c0_11 = arith.constant 0 : index
    %c1_12 = arith.constant 1 : index
    %c0_13 = arith.constant 0 : index
    %c0_14 = arith.constant 0 : index
    %9 = vector.load %arg4[%c0_11, %c1_12, %c0_13, %c0_14] : memref<1x3x8x8xf32, #tpu.memory_space<vmem>>, vector<1x1x8x8xf32>
    %10 = vector.shape_cast %9 : vector<1x1x8x8xf32> to vector<8x8xf32>
    %cst_15 = arith.constant dense<0.000000e+00> : vector<384x8xf32>
    %11 = tpu.matmul %8, %10, %cst_15 {dimension_numbers = #tpu.dot_dimension_numbers<[1], [0], [0], [1], [0, 0, 1, 1], [], []>, precision = #tpu.contract_precision<fp32>} : vector<384x8xf32>, vector<8x8xf32>, vector<384x8xf32> -> vector<384x8xf32>
    %12 = arith.addf %5, %11 : vector<384x8xf32>
    %c0_16 = arith.constant 0 : index
    %c0_17 = arith.constant 0 : index
    %c0_18 = arith.constant 0 : index
    %c0_19 = arith.constant 0 : index
    %c0_20 = arith.constant 0 : index
    %13 = vector.load %arg3[%c0_16, %c0_17, %c0_18, %c0_19, %c0_20] : memref<1x2x14x16x8xf32, #tpu.memory_space<vmem>>, vector<1x2x12x16x8xf32>
    %14 = vector.shape_cast %13 : vector<1x2x12x16x8xf32> to vector<2x12x16x8xf32>
    %15 = vector.shape_cast %14 : vector<2x12x16x8xf32> to vector<384x8xf32>
    %c0_21 = arith.constant 0 : index
    %c2_22 = arith.constant 2 : index
    %c0_23 = arith.constant 0 : index
    %c0_24 = arith.constant 0 : index
    %16 = vector.load %arg4[%c0_21, %c2_22, %c0_23, %c0_24] : memref<1x3x8x8xf32, #tpu.memory_space<vmem>>, vector<1x1x8x8xf32>
    %17 = vector.shape_cast %16 : vector<1x1x8x8xf32> to vector<8x8xf32>
    %cst_25 = arith.constant dense<0.000000e+00> : vector<384x8xf32>
    %18 = tpu.matmul %15, %17, %cst_25 {dimension_numbers = #tpu.dot_dimension_numbers<[1], [0], [0], [1], [0, 0, 1, 1], [], []>, precision = #tpu.contract_precision<fp32>} : vector<384x8xf32>, vector<8x8xf32>, vector<384x8xf32> -> vector<384x8xf32>
    %19 = arith.addf %12, %18 : vector<384x8xf32>
    %20 = vector.shape_cast %19 : vector<384x8xf32> to vector<2x192x8xf32>
    %c0_26 = arith.constant 0 : index
    %c0_27 = arith.constant 0 : index
    %c0_28 = arith.constant 0 : index
    %c0_29 = arith.constant 0 : index
    %c0_30 = arith.constant 0 : index
    %21 = vector.load %arg5[%c0_26, %c0_27, %c0_28, %c0_29, %c0_30] : memref<1x2x2x192x8xf32, #tpu.memory_space<vmem>>, vector<1x1x2x192x8xf32>
    %22 = vector.shape_cast %21 : vector<1x1x2x192x8xf32> to vector<2x192x8xf32>
    %23 = vector.shape_cast %20 : vector<2x192x8xf32> to vector<1x1x2x192x8xf32>
    tpu.vector_store %arg5[%c0_26, %c0_27, %c0_28, %c0_29, %c0_30], %23 {strides = array<i32>} : memref<1x2x2x192x8xf32, #tpu.memory_space<vmem>>, vector<1x1x2x192x8xf32>,
    %cst_31 = arith.constant 0.000000e+00 : f32
    %24 = vector.broadcast %cst_31 : f32 to vector<2x192x8xf32>
    %c0_32 = arith.constant 0 : index
    %c1_33 = arith.constant 1 : index
    %c0_34 = arith.constant 0 : index
    %c0_35 = arith.constant 0 : index
    %c0_36 = arith.constant 0 : index
    %25 = vector.load %arg5[%c0_32, %c1_33, %c0_34, %c0_35, %c0_36] : memref<1x2x2x192x8xf32, #tpu.memory_space<vmem>>, vector<1x1x2x192x8xf32>
    %26 = vector.shape_cast %25 : vector<1x1x2x192x8xf32> to vector<2x192x8xf32>
    %27 = vector.shape_cast %24 : vector<2x192x8xf32> to vector<1x1x2x192x8xf32>
    tpu.vector_store %arg5[%c0_32, %c1_33, %c0_34, %c0_35, %c0_36], %27 {strides = array<i32>} : memref<1x2x2x192x8xf32, #tpu.memory_space<vmem>>, vector<1x1x2x192x8xf32>,
    return
  }
  func.func @transform_0(%arg0: i32, %arg1: i32, %arg2: i32) -> (i32, i32, i32, i32, i32) {
    %c2_i32 = arith.constant 2 : i32
    %0 = arith.muli %arg0, %c2_i32 : i32
    %1 = arith.addi %0, %arg1 : i32
    %c0_i32 = arith.constant 0 : i32
    %c0_i32_0 = arith.constant 0 : i32
    %c0_i32_1 = arith.constant 0 : i32
    %c0_i32_2 = arith.constant 0 : i32
    return %1, %arg2, %c0_i32, %c0_i32_0, %c0_i32_1 : i32, i32, i32, i32, i32
  }
  func.func @transform_1(%arg0: i32, %arg1: i32, %arg2: i32) -> (i32, i32, i32, i32) {
    %c2_i32 = arith.constant 2 : i32
    %0 = arith.muli %arg0, %c2_i32 : i32
    %1 = arith.addi %0, %arg1 : i32
    %c0_i32 = arith.constant 0 : i32
    %c0_i32_0 = arith.constant 0 : i32
    %c0_i32_1 = arith.constant 0 : i32
    %c0_i32_2 = arith.constant 0 : i32
    return %1, %c0_i32, %c0_i32_0, %c0_i32_1 : i32, i32, i32, i32
  }
  func.func @transform_2(%arg0: i32, %arg1: i32, %arg2: i32) -> (i32, i32, i32, i32, i32) {
    %c2_i32 = arith.constant 2 : i32
    %0 = arith.muli %arg0, %c2_i32 : i32
    %1 = arith.addi %0, %arg1 : i32
    %c0_i32 = arith.constant 0 : i32
    %c0_i32_0 = arith.constant 0 : i32
    %c0_i32_1 = arith.constant 0 : i32
    %c0_i32_2 = arith.constant 0 : i32
    return %1, %c0_i32, %arg2, %c0_i32_0, %c0_i32_1 : i32, i32, i32, i32, i32
  }
}

</mosaic_0001>

<bundles_post_ra>
// kernel: conv_transpose2d.1
= control target key start
LH: loop header
LB: loop body
LE: loop exit
PB: predicated region body
PF: predicated region fallthrough
CT: control target
= control target key end

     0   :  { %s6178_s9 = smov 0   ;;  %s6180_s10 = smov 0   ;;  %s9438_s0 = inlined_call_operand.vmem [shape: f32[6,2,14,16,8], index: 0, kind: input, shape index: {}]   ;;  %s9439_s1 = inlined_call_operand.vmem [shape: f32[6,3,8,8], index: 1, kind: input, shape index: {}]   ;;  %s9440_s2 = inlined_call_operand.vmem [shape: f32[6,2,2,192,8], index: 2, kind: output, shape index: {}]  }
   0x1   :  { %s6182_s11 = smov 0   ;;  %s6184_s12 = smov 0  }
   0x2   :  { %s6186_s13 = smov 0  }
   0x3 LB: > { %s27_s14 = sadd.s32 1, %s6152_s11  ;;  %s31_s15 = sadd.s32 1, %s6156_s12  ;;  %s6160_s13 = sphi %s6186_s13, %s12_s13   ;;  %s6156_s12 = sphi %s6184_s12, %s10624_s12   ;;  %s6152_s11 = sphi %s6182_s11, %s10623_s11   ;;  %s6148_s10 = sphi %s6180_s10, %s10622_s10   ;;  %s6144_s9 = sphi %s6178_s9, %s10621_s9  }
   0x4   : > { %p29_p0 = scmp.ge.s32.totalorder %s27_s14, 2  ;;  %p5921_p1 = scmp.ge.s32.totalorder %s6160_s13, 1 }
   0x5   : > { %p171_p2 = scmp.lt.s32.totalorder %s6160_s13, 7 }
   0x6   : > { %s10626_s14 = smov (%p29_p0, %s27_s14), 0  ;;  %s10628_s15 = smov (!%p29_p0, %s31_s15), %s6156_s12 }
   0x7   : > { %p172_p3 = pnand %p5921_p1, %p171_p2  ;;  %p33_p4 = scmp.ge.s32.totalorder %s10628_s15, 3 }
   0x9   : > { %s10630_s15 = smov (%p33_p4, %s10628_s15), 0  ;;  %175 = sbr.rel (%p172_p3) target bundleno = 1898 (0x76a), region = 28 }
   0xe   : > { %s5922_s16 = sshll.u32 %s6148_s10, 1  ;;  %vm354_vm0 = vcmask 64512  }
   0xf   : > { %s215_s17 = sadd.s32 %s6144_s9, %s5922_s16 }
  0x10   : > { %p217_p5 = scmp.lt.s32.totalorder %s215_s17, 5 }
  0x12   : > { %s10632_s17 = smov (!%p217_p5, %s215_s17), 5 }
  0x13   : > { %s6079_s18 = smul.u32 24, %s10632_s17 }
  0x14   : > { %s6078_s19 = smul.u32 448, %s10632_s17 }
  0x15   : > { %s6215_s22 = scalar_lea.vmem %s9439_s1, %s6079_s18  ;;  %s6080_s26 = smul.u32 768, %s10632_s17 }
  0x16   : > { %v6024_v0 = vld [vmem:[%s6215_s22 + $0x8] sm:$0xff]  ;;  %s6221_s25 = scalar_lea.vmem %s9438_s0, %s6078_s19 }
  0x17   : > { %v514_v1 = vand.u32 4294901760, %v6024_v0  ;;  %v6000_v2 = vld [vmem:[%s6221_s25 + $0xf0] sm:$0xff]  ;;  %v6001_v3 = vld [vmem:[%s6221_s25 + $0xf8] sm:$0xff]  ;;  %v6002_v8 = vld [vmem:[%s6221_s25 + $0x100] sm:$0xff]  ;;  %s8891_s29 = scalar_lea.vmem %s9440_s2, %s6080_s26 }
  0x18   : > { %v5976_v4 = vld [vmem:[%s6221_s25 + $0x10] sm:$0xff]  ;;  %v428_v5 = vsel %vm354_vm0, %v6000_v2, 0  ;;  %v431_v6 = vsel %vm354_vm0, %v6001_v3, 0  ;;  %v5977_v9 = vld [vmem:[%s6221_s25 + $0x18] sm:$0xff]  ;;  %v434_v14 = vsel %vm354_vm0, %v6002_v8, 0  ;;  %v5978_v16 = vld [vmem:[%s6221_s25 + $0x20] sm:$0xff] }
  0x19   : > { %v356_v7 = vsel %vm354_vm0, %v5976_v4, 0  ;;  %6076 = vmatpush.msra.mxu2 %v514_v1  ;;  %v917_v10 = vsub.f32 %v6024_v0, %v514_v1  ;;  %v6231_v11 = vand.u32 4294901760, %v428_v5  ;;  %v6233_v12 = vand.u32 4294901760, %v431_v6  ;;  %515 = vmatpush.msra.mxu0 %v514_v1  ;;  %v6003_v36 = vld [vmem:[%s6221_s25 + $0x108] sm:$0xff]  ;;  %v6004_v50 = vld [vmem:[%s6221_s25 + $0x110] sm:$0xff]  ;;  %v6005_v0 = vld [vmem:[%s6221_s25 + $0x118] sm:$0xff] }
  0x1a   : > { %v6235_v13 = vand.u32 4294901760, %v356_v7  ;;  %v359_v15 = vsel %vm354_vm0, %v5977_v9, 0  ;;  %v362_v25 = vsel %vm354_vm0, %v5978_v16, 0  ;;  %v6254_v26 = vand.u32 4294901760, %v434_v14  ;;  %v5979_v37 = vld [vmem:[%s6221_s25 + $0x28] sm:$0xff]  ;;  %v5980_v51 = vld [vmem:[%s6221_s25 + $0x30] sm:$0xff] }
  0x1b   : > { %9843 = vst [vmem:[#allocation2_spill] sm:$0xff] %v6231_v11  ;;  %v918_v17 = vand.u32 4294901760, %v917_v10  ;;  %v6241_v18 = vsub.f32 %v428_v5, %v6231_v11  ;;  %1132 = vmatpush.msrb.mxu2 %v917_v10  ;;  %v6244_v19 = vsub.f32 %v431_v6, %v6233_v12  ;;  %v6249_v21 = vand.u32 4294901760, %v359_v15 }
  0x1c   : > { %9844 = vst [vmem:[#allocation3_spill] sm:$0xff] %v6233_v12  ;;  %v6247_v20 = vsub.f32 %v356_v7, %v6235_v13  ;;  %v6267_v33 = vand.u32 4294901760, %v362_v25  ;;  %v6277_v39 = vsub.f32 %v434_v14, %v6254_v26  ;;  %v437_v41 = vsel %vm354_vm0, %v6003_v36, 0 }
  0x1d   : > { %9845 = vst [vmem:[#allocation4_spill] sm:$0xff] %v6241_v18  ;;  %v919_v22 = vsub.f32 %v917_v10, %v918_v17  ;;  %v9449_v23 = vand.u32 4294901760, %v6241_v18  ;;  %1698 = vmatpush.msrb.mxu0 %v918_v17  ;;  %v6257_v27 = vsub.f32 %v359_v15, %v6249_v21  ;;  %v9448_v30 = vand.u32 4294901760, %v6244_v19  ;;  %v6006_v17 = vld [vmem:[%s6221_s25 + $0x120] sm:$0xff] }
  0x1e   : > { %9846 = vst [vmem:[#allocation5_spill] sm:$0xff] %v6244_v19  ;;  %v9462_v24 = vand.u32 4294901760, %v6247_v20  ;;  %v6284_v42 = vsub.f32 %v362_v25, %v6267_v33  ;;  %v365_v43 = vsel %vm354_vm0, %v5979_v37, 0  ;;  %v9447_v45 = vand.u32 4294901760, %v6277_v39 }
  0x1f   : > { %9847 = vst [vmem:[#allocation6_spill] sm:$0xff] %v6254_v26  ;;  %v920_v28 = vand.u32 4294901760, %v919_v22  ;;  %v711_v29 = vsub.f32 %v6241_v18, %v9449_v23  ;;  %v9460_v32 = vand.u32 4294901760, %v6257_v27  ;;  %v719_v38 = vsub.f32 %v6244_v19, %v9448_v30  ;;  %v5982_v22 = vld [vmem:[%s6221_s25 + $0x40] sm:$0xff]  ;;  %v6011_v30 = vld [vmem:[%s6221_s25 + $0x148] sm:$0xff]  ;;  %v6021_v18 = vld [vmem:[%s6221_s25 + $0x198] sm:$0xff] }
  0x20   : > { %v519_v31 = vsub.f32 %v6247_v20, %v9462_v24  ;;  %9848 = vst [vmem:[#allocation7_spill] sm:$0xff] %v6277_v39  ;;  %v6288_v46 = vand.u32 4294901760, %v437_v41  ;;  %v9459_v48 = vand.u32 4294901760, %v6284_v42  ;;  %v6291_v49 = vand.u32 4294901760, %v365_v43 }
  0x21   : > { %6077 = vmatpush.msra.mxu3 %v920_v28  ;;  %v712_v34 = vand.u32 4294901760, %v711_v29  ;;  %921 = vmatpush.msra.mxu1 %v920_v28  ;;  %v527_v40 = vsub.f32 %v6257_v27, %v9460_v32  ;;  %v720_v44 = vand.u32 4294901760, %v719_v38  ;;  %v727_v52 = vsub.f32 %v6277_v39, %v9447_v45  ;;  %v6013_v32 = vld [vmem:[%s6221_s25 + $0x158] sm:$0xff]  ;;  %v6020_v39 = vld [vmem:[%s6221_s25 + $0x190] sm:$0xff] }
  0x22   : > { %v520_v35 = vand.u32 4294901760, %v519_v31  ;;  %1019 = vmatmul.f32.vlgmr.msra.gmra.mxu3 %v6231_v11  ;;  %923 = vmatmul.f32.vlgmr.msra.gmra.mxu1 %v6235_v13  ;;  %9849 = vst [vmem:[#allocation8_spill] sm:$0xff] %v6288_v46  ;;  %v6301_v53 = vsub.f32 %v437_v41, %v6288_v46  ;;  %v535_v54 = vsub.f32 %v6284_v42, %v9459_v48  ;;  %v440_v55 = vsel %vm354_vm0, %v6004_v50, 0 }
  0x23   : > { %713 = vmatmul.f32.vlgmr.msra.gmra.mxu2 %v712_v34  ;;  %1390 = vmatpush.msrb.mxu3 %v514_v1  ;;  %v528_v47 = vand.u32 4294901760, %v527_v40  ;;  %v6308_v56 = vsub.f32 %v365_v43, %v6291_v49  ;;  %v368_v57 = vsel %vm354_vm0, %v5980_v51, 0  ;;  %v728_v58 = vand.u32 4294901760, %v727_v52 }
  0x24   : > { %521 = vmatmul.f32.vlgmr.msra.gmra.mxu0 %v520_v35  ;;  %1908 = vmatpush.msrb.mxu1 %v514_v1  ;;  %9850 = vst [vmem:[#allocation9_spill] sm:$0xff] %v6301_v53  ;;  %v9445_v59 = vand.u32 4294901760, %v6301_v53  ;;  %v6312_v60 = vand.u32 4294901760, %v440_v55  ;;  %v536_v61 = vand.u32 4294901760, %v535_v54  ;;  %v6315_v63 = vand.u32 4294901760, %v368_v57  ;;  %v5981_v1 = vld [vmem:[%s6221_s25 + $0x38] sm:$0xff] }
  0x25   : > { %v9457_v62 = vand.u32 4294901760, %v6308_v56  ;;  %v443_v5 = vsel %vm354_vm0, %v6005_v0, 0  ;;  %v371_v7 = vsel %vm354_vm0, %v5981_v1, 0  ;;  %v446_v31 = vsel %vm354_vm0, %v6006_v17, 0 }
  0x26   : > { %9851 = vst [vmem:[#allocation10_spill] sm:$0xff] %v6312_v60  ;;  %v735_v2 = vsub.f32 %v6301_v53, %v9445_v59  ;;  %v6325_v3 = vsub.f32 %v440_v55, %v6312_v60  ;;  %v6332_v6 = vsub.f32 %v368_v57, %v6315_v63  ;;  %v6336_v10 = vand.u32 4294901760, %v443_v5 }
  0x27   : > { %v543_v4 = vsub.f32 %v6308_v56, %v9457_v62  ;;  %v6339_v16 = vand.u32 4294901760, %v371_v7  ;;  %v374_v35 = vsel %vm354_vm0, %v5982_v22, 0  ;;  %v6360_v38 = vand.u32 4294901760, %v446_v31 }
  0x28   : > { %9852 = vst [vmem:[#allocation11_spill] sm:$0xff] %v6325_v3  ;;  %v736_v8 = vand.u32 4294901760, %v735_v2  ;;  %v9444_v9 = vand.u32 4294901760, %v6325_v3  ;;  %v9456_v15 = vand.u32 4294901760, %v6332_v6  ;;  %v6349_v28 = vsub.f32 %v443_v5, %v6336_v10  ;;  %v6008_v5 = vld [vmem:[%s6221_s25 + $0x130] sm:$0xff] }
  0x29   : > { %9853 = vst [vmem:[#allocation12_spill] sm:$0xff] %v6336_v10  ;;  %v544_v14 = vand.u32 4294901760, %v543_v4  ;;  %v6356_v34 = vsub.f32 %v371_v7, %v6339_v16  ;;  %v6363_v43 = vand.u32 4294901760, %v374_v35  ;;  %v6373_v51 = vsub.f32 %v446_v31, %v6360_v38  ;;  %v5984_v7 = vld [vmem:[%s6221_s25 + $0x50] sm:$0xff] }
  0x2a   : > { %1023 = vmatmul.f32.gmra.mxu3 %v6233_v12  ;;  %927 = vmatmul.f32.gmra.mxu1 %v6249_v21  ;;  %v743_v25 = vsub.f32 %v6325_v3, %v9444_v9  ;;  %9854 = vst [vmem:[#allocation13_spill] sm:$0xff] %v6349_v28  ;;  %v551_v29 = vsub.f32 %v6332_v6, %v9456_v15  ;;  %v9443_v37 = vand.u32 4294901760, %v6349_v28  ;;  %v452_v22 = vsel %vm354_vm0, %v6008_v5, 0 }
  0x2b   : > { %721 = vmatmul.f32.gmra.mxu2 %v720_v44  ;;  %9855 = vst [vmem:[#allocation14_spill] sm:$0xff] %v6360_v38  ;;  %v9454_v41 = vand.u32 4294901760, %v6356_v34  ;;  %v6007_v44 = vld [vmem:[%s6221_s25 + $0x128] sm:$0xff]  ;;  %v6380_v55 = vsub.f32 %v374_v35, %v6363_v43 }
  0x2c   : > { %529 = vmatmul.f32.gmra.mxu0 %v528_v47  ;;  %v744_v36 = vand.u32 4294901760, %v743_v25  ;;  %v552_v40 = vand.u32 4294901760, %v551_v29  ;;  %v5983_v47 = vld [vmem:[%s6221_s25 + $0x48] sm:$0xff]  ;;  %v751_v50 = vsub.f32 %v6349_v28, %v9443_v37  ;;  %9856 = vst [vmem:[#allocation15_spill] sm:$0xff] %v6373_v51  ;;  %v449_v54 = vsel %vm354_vm0, %v6007_v44, 0 }
  0x2d   : > { %v559_v52 = vsub.f32 %v6356_v34, %v9454_v41  ;;  %v377_v57 = vsel %vm354_vm0, %v5983_v47, 0  ;;  %v6384_v0 = vand.u32 4294901760, %v449_v54  ;;  %v9453_v2 = vand.u32 4294901760, %v6380_v55  ;;  %v6012_v41 = vld [vmem:[%s6221_s25 + $0x150] sm:$0xff] }
  0x2e   : > { %v6387_v4 = vand.u32 4294901760, %v377_v57  ;;  %v380_v29 = vsel %vm354_vm0, %v5984_v7, 0 }
  0x2f   : > { %9857 = vst [vmem:[#allocation16_spill] sm:$0xff] %v6384_v0  ;;  %v560_v1 = vand.u32 4294901760, %v559_v52  ;;  %v567_v17 = vsub.f32 %v6380_v55, %v9453_v2  ;;  %v6411_v47 = vand.u32 4294901760, %v380_v29  ;;  %v5985_v52 = vld [vmem:[%s6221_s25 + $0x58] sm:$0xff] }
  0x30   : > { %v6404_v25 = vsub.f32 %v377_v57, %v6387_v4  ;;  %v383_v7 = vsel %vm354_vm0, %v5985_v52, 0 }
  0x31   : > { %v6428_v5 = vsub.f32 %v380_v29, %v6411_v47  ;;  %v5986_v29 = vld [vmem:[%s6221_s25 + $0x60] sm:$0xff] }
  0x32   : > { %1027 = vmatmul.f32.gmra.mxu3 %v6254_v26  ;;  %931 = vmatmul.f32.gmra.mxu1 %v6267_v33  ;;  %v9451_v44 = vand.u32 4294901760, %v6404_v25 }
  0x33   : > { %729 = vmatmul.f32.gmra.mxu2 %v728_v58  ;;  %v752_v58 = vand.u32 4294901760, %v751_v50  ;;  %v6009_v50 = vld [vmem:[%s6221_s25 + $0x138] sm:$0xff] }
  0x34   : > { %537 = vmatmul.f32.gmra.mxu0 %v536_v61  ;;  %v9442_v61 = vand.u32 4294901760, %v6373_v51 }
  0x3a   : > { %1031 = vmatmul.f32.gmra.mxu3 %v6288_v46  ;;  %935 = vmatmul.f32.gmra.mxu1 %v6291_v49 }
  0x3b   : > { %737 = vmatmul.f32.gmra.mxu2 %v736_v8  ;;  %v759_v8 = vsub.f32 %v6373_v51, %v9442_v61  ;;  %v6010_v61 = vld [vmem:[%s6221_s25 + $0x140] sm:$0xff] }
  0x3c   : > { %545 = vmatmul.f32.gmra.mxu0 %v544_v14  ;;  %v6397_v14 = vsub.f32 %v449_v54, %v6384_v0  ;;  %v6018_v51 = vld [vmem:[%s6221_s25 + $0x180] sm:$0xff] }
  0x3d   : > { %v760_v31 = vand.u32 4294901760, %v759_v8 }
  0x3e   : > { %9858 = vst [vmem:[#allocation17_spill] sm:$0xff] %v6397_v14  ;;  %v9441_v35 = vand.u32 4294901760, %v6397_v14 }
  0x40   : > { %v767_v54 = vsub.f32 %v6397_v14, %v9441_v35  ;;  %v6017_v14 = vld [vmem:[%s6221_s25 + $0x178] sm:$0xff] }
  0x42   : > { %1035 = vmatmul.f32.gmra.mxu3 %v6312_v60  ;;  %939 = vmatmul.f32.gmra.mxu1 %v6315_v63  ;;  %v768_v8 = vand.u32 4294901760, %v767_v54 }
  0x43   : > { %745 = vmatmul.f32.gmra.mxu2 %v744_v36  ;;  %v6408_v36 = vand.u32 4294901760, %v452_v22 }
  0x44   : > { %553 = vmatmul.f32.gmra.mxu0 %v552_v40  ;;  %v568_v40 = vand.u32 4294901760, %v567_v17 }
  0x45   : > { %9859 = vst [vmem:[#allocation18_spill] sm:$0xff] %v6408_v36  ;;  %v6421_v57 = vsub.f32 %v452_v22, %v6408_v36  ;;  %v9450_v22 = vand.u32 4294901760, %v6428_v5 }
  0x47   : > { %9860 = vst [vmem:[#allocation19_spill] sm:$0xff] %v6421_v57  ;;  %v9446_v17 = vand.u32 4294901760, %v6421_v57  ;;  %v583_v54 = vsub.f32 %v6428_v5, %v9450_v22 }
  0x49   : > { %v584_v45 = vand.u32 4294901760, %v583_v54  ;;  %v461_v54 = vsel %vm354_vm0, %v6011_v30, 0  ;;  %v5988_v30 = vld [vmem:[%s6221_s25 + $0x70] sm:$0xff] }
  0x4a   : > { %1039 = vmatmul.f32.gmra.mxu3 %v6336_v10  ;;  %943 = vmatmul.f32.gmra.mxu1 %v6339_v16 }
  0x4b   : > { %753 = vmatmul.f32.gmra.mxu2 %v752_v58  ;;  %v575_v58 = vsub.f32 %v6404_v25, %v9451_v44 }
  0x4c   : > { %561 = vmatmul.f32.gmra.mxu0 %v560_v1  ;;  %v455_v1 = vsel %vm354_vm0, %v6009_v50, 0  ;;  %v775_v50 = vsub.f32 %v6421_v57, %v9446_v17  ;;  %v6016_v57 = vld [vmem:[%s6221_s25 + $0x170] sm:$0xff] }
  0x4d   : > { %v576_v35 = vand.u32 4294901760, %v575_v58  ;;  %v458_v58 = vsel %vm354_vm0, %v6010_v61, 0  ;;  %v5987_v61 = vld [vmem:[%s6221_s25 + $0x68] sm:$0xff] }
  0x4e   : > { %v776_v9 = vand.u32 4294901760, %v775_v50  ;;  %v6456_v17 = vand.u32 4294901760, %v458_v58 }
  0x50   : > { %9863 = vst [vmem:[#allocation22_spill] sm:$0xff] %v6456_v17 }
  0x52   : > { %1043 = vmatmul.f32.gmra.mxu3 %v6360_v38  ;;  %947 = vmatmul.f32.gmra.mxu1 %v6363_v43 }
  0x53   : > { %761 = vmatmul.f32.gmra.mxu2 %v760_v31  ;;  %v6432_v31 = vand.u32 4294901760, %v455_v1 }
  0x54   : > { %569 = vmatmul.f32.gmra.mxu0 %v568_v40  ;;  %v6435_v40 = vand.u32 4294901760, %v383_v7 }
  0x55   : > { %9861 = vst [vmem:[#allocation20_spill] sm:$0xff] %v6432_v31  ;;  %v6445_v52 = vsub.f32 %v455_v1, %v6432_v31 }
  0x56   : > { %v6452_v37 = vsub.f32 %v383_v7, %v6435_v40 }
  0x57   : > { %9862 = vst [vmem:[#allocation21_spill] sm:$0xff] %v6445_v52  ;;  %v9452_v59 = vand.u32 4294901760, %v6445_v52 }
  0x58   : > { %v9455_v1 = vand.u32 4294901760, %v6452_v37 }
  0x59   : > { %v783_v7 = vsub.f32 %v6445_v52, %v9452_v59  ;;  %v6480_v59 = vand.u32 4294901760, %v461_v54  ;;  %v6015_v52 = vld [vmem:[%s6221_s25 + $0x168] sm:$0xff] }
  0x5a   : > { %1047 = vmatmul.f32.gmra.mxu3 %v6384_v0  ;;  %951 = vmatmul.f32.gmra.mxu1 %v6387_v4  ;;  %v591_v50 = vsub.f32 %v6452_v37, %v9455_v1 }
  0x5b   : > { %769 = vmatmul.f32.gmra.mxu2 %v768_v8  ;;  %v386_v8 = vsel %vm354_vm0, %v5986_v29, 0  ;;  %v6469_v29 = vsub.f32 %v458_v58, %v6456_v17  ;;  %v784_v22 = vand.u32 4294901760, %v783_v7  ;;  %9865 = vst [vmem:[#allocation24_spill] sm:$0xff] %v6480_v59 }
  0x5c   : > { %577 = vmatmul.f32.gmra.mxu0 %v576_v35  ;;  %v6459_v35 = vand.u32 4294901760, %v386_v8  ;;  %v592_v2 = vand.u32 4294901760, %v591_v50  ;;  %v464_v50 = vsel %vm354_vm0, %v6012_v41, 0  ;;  %v5989_v41 = vld [vmem:[%s6221_s25 + $0x78] sm:$0xff] }
  0x5d   : > { %9864 = vst [vmem:[#allocation23_spill] sm:$0xff] %v6469_v29  ;;  %v9458_v44 = vand.u32 4294901760, %v6469_v29 }
  0x5e   : > { %v6476_v23 = vsub.f32 %v386_v8, %v6459_v35 }
  0x5f   : > { %v791_v8 = vsub.f32 %v6469_v29, %v9458_v44  ;;  %v6504_v44 = vand.u32 4294901760, %v464_v50  ;;  %v6014_v29 = vld [vmem:[%s6221_s25 + $0x160] sm:$0xff] }
  0x60   : > { %v9461_v58 = vand.u32 4294901760, %v6476_v23 }
  0x61   : > { %v792_v15 = vand.u32 4294901760, %v791_v8  ;;  %9867 = vst [vmem:[#allocation26_spill] sm:$0xff] %v6504_v44 }
  0x62   : > { %1051 = vmatmul.f32.gmra.mxu3 %v6408_v36  ;;  %955 = vmatmul.f32.gmra.mxu1 %v6411_v47  ;;  %v599_v7 = vsub.f32 %v6476_v23, %v9461_v58 }
  0x63   : > { %777 = vmatmul.f32.gmra.mxu2 %v776_v9  ;;  %v389_v9 = vsel %vm354_vm0, %v5987_v61, 0  ;;  %v6493_v61 = vsub.f32 %v461_v54, %v6480_v59 }
  0x64   : > { %585 = vmatmul.f32.gmra.mxu0 %v584_v45  ;;  %v6483_v45 = vand.u32 4294901760, %v389_v9  ;;  %v600_v48 = vand.u32 4294901760, %v599_v7  ;;  %v467_v7 = vsel %vm354_vm0, %v6013_v32, 0  ;;  %v5990_v32 = vld [vmem:[%s6221_s25 + $0x80] sm:$0xff] }
  0x65   : > { %9866 = vst [vmem:[#allocation25_spill] sm:$0xff] %v6493_v61  ;;  %v9465_v62 = vand.u32 4294901760, %v6493_v61 }
  0x66   : > { %v6500_v1 = vsub.f32 %v389_v9, %v6483_v45 }
  0x67   : > { %v799_v9 = vsub.f32 %v6493_v61, %v9465_v62  ;;  %v6528_v62 = vand.u32 4294901760, %v467_v7 }
  0x68   : > { %v9470_v54 = vand.u32 4294901760, %v6500_v1 }
  0x69   : > { %v800_v24 = vand.u32 4294901760, %v799_v9  ;;  %9869 = vst [vmem:[#allocation28_spill] sm:$0xff] %v6528_v62 }
  0x6a   : > { %1055 = vmatmul.f32.gmra.mxu3 %v6432_v31  ;;  %959 = vmatmul.f32.gmra.mxu1 %v6435_v40  ;;  %v607_v8 = vsub.f32 %v6500_v1, %v9470_v54 }
  0x6b   : > { %785 = vmatmul.f32.gmra.mxu2 %v784_v22  ;;  %v392_v22 = vsel %vm354_vm0, %v5988_v30, 0  ;;  %v6517_v30 = vsub.f32 %v464_v50, %v6504_v44 }
  0x6c   : > { %593 = vmatmul.f32.gmra.mxu0 %v592_v2  ;;  %v6507_v2 = vand.u32 4294901760, %v392_v22  ;;  %v608_v61 = vand.u32 4294901760, %v607_v8  ;;  %v470_v8 = vsel %vm354_vm0, %v6014_v29, 0  ;;  %v5991_v29 = vld [vmem:[%s6221_s25 + $0x88] sm:$0xff] }
  0x6d   : > { %9868 = vst [vmem:[#allocation27_spill] sm:$0xff] %v6517_v30 }
  0x6e   : > { %v6524_v58 = vsub.f32 %v392_v22, %v6507_v2 }
  0x70   : > { %v9480_v50 = vand.u32 4294901760, %v6524_v58 }
  0x72   : > { %1059 = vmatmul.f32.gmra.mxu3 %v6456_v17  ;;  %963 = vmatmul.f32.gmra.mxu1 %v6459_v35  ;;  %v9475_v17 = vand.u32 4294901760, %v6517_v30  ;;  %v615_v9 = vsub.f32 %v6524_v58, %v9480_v50 }
  0x73   : > { %793 = vmatmul.f32.gmra.mxu2 %v792_v15  ;;  %v395_v15 = vsel %vm354_vm0, %v5989_v41, 0  ;;  %v6541_v41 = vsub.f32 %v467_v7, %v6528_v62 }
  0x74   : > { %601 = vmatmul.f32.gmra.mxu0 %v600_v48  ;;  %v6531_v48 = vand.u32 4294901760, %v395_v15  ;;  %v807_v22 = vsub.f32 %v6517_v30, %v9475_v17  ;;  %v6552_v17 = vand.u32 4294901760, %v470_v8  ;;  %v616_v30 = vand.u32 4294901760, %v615_v9 }
  0x75   : > { %9870 = vst [vmem:[#allocation29_spill] sm:$0xff] %v6541_v41  ;;  %v9485_v31 = vand.u32 4294901760, %v6541_v41  ;;  %v473_v9 = vsel %vm354_vm0, %v6015_v52, 0  ;;  %v5992_v52 = vld [vmem:[%s6221_s25 + $0x90] sm:$0xff] }
  0x76   : > { %v6548_v54 = vsub.f32 %v395_v15, %v6531_v48  ;;  %9871 = vst [vmem:[#allocation30_spill] sm:$0xff] %v6552_v17 }
  0x77   : > { %v815_v15 = vsub.f32 %v6541_v41, %v9485_v31  ;;  %v6576_v31 = vand.u32 4294901760, %v473_v9 }
  0x78   : > { %v9490_v7 = vand.u32 4294901760, %v6548_v54 }
  0x79   : > { %9873 = vst [vmem:[#allocation32_spill] sm:$0xff] %v6576_v31 }
  0x7a   : > { %1063 = vmatmul.f32.gmra.mxu3 %v6480_v59  ;;  %967 = vmatmul.f32.gmra.mxu1 %v6483_v45  ;;  %v808_v59 = vand.u32 4294901760, %v807_v22  ;;  %v623_v22 = vsub.f32 %v6548_v54, %v9490_v7 }
  0x7b   : > { %801 = vmatmul.f32.gmra.mxu2 %v800_v24  ;;  %v398_v24 = vsel %vm354_vm0, %v5990_v32, 0  ;;  %v6565_v32 = vsub.f32 %v470_v8, %v6552_v17 }
  0x7c   : > { %609 = vmatmul.f32.gmra.mxu0 %v608_v61  ;;  %v6555_v61 = vand.u32 4294901760, %v398_v24  ;;  %v624_v41 = vand.u32 4294901760, %v623_v22  ;;  %v476_v22 = vsel %vm354_vm0, %v6016_v57, 0  ;;  %v5993_v57 = vld [vmem:[%s6221_s25 + $0x98] sm:$0xff] }
  0x7d   : > { %9872 = vst [vmem:[#allocation31_spill] sm:$0xff] %v6565_v32  ;;  %v9495_v36 = vand.u32 4294901760, %v6565_v32 }
  0x7e   : > { %v6572_v50 = vsub.f32 %v398_v24, %v6555_v61 }
  0x7f   : > { %v823_v24 = vsub.f32 %v6565_v32, %v9495_v36  ;;  %v6600_v36 = vand.u32 4294901760, %v476_v22 }
  0x80   : > { %v9500_v8 = vand.u32 4294901760, %v6572_v50 }
  0x81   : > { %9875 = vst [vmem:[#allocation34_spill] sm:$0xff] %v6600_v36 }
  0x82   : > { %1067 = vmatmul.f32.gmra.mxu3 %v6504_v44  ;;  %971 = vmatmul.f32.gmra.mxu1 %v6507_v2  ;;  %v816_v44 = vand.u32 4294901760, %v815_v15  ;;  %v631_v15 = vsub.f32 %v6572_v50, %v9500_v8 }
  0x83   : > { %809 = vmatmul.f32.gmra.mxu2 %v808_v59  ;;  %v401_v59 = vsel %vm354_vm0, %v5991_v29, 0  ;;  %v6589_v29 = vsub.f32 %v473_v9, %v6576_v31 }
  0x84   : > { %617 = vmatmul.f32.gmra.mxu0 %v616_v30  ;;  %v6579_v30 = vand.u32 4294901760, %v401_v59  ;;  %v632_v32 = vand.u32 4294901760, %v631_v15  ;;  %v479_v15 = vsel %vm354_vm0, %v6017_v14, 0  ;;  %v5994_v14 = vld [vmem:[%s6221_s25 + $0xa0] sm:$0xff] }
  0x85   : > { %9874 = vst [vmem:[#allocation33_spill] sm:$0xff] %v6589_v29  ;;  %v9505_v0 = vand.u32 4294901760, %v6589_v29 }
  0x86   : > { %v6596_v7 = vsub.f32 %v401_v59, %v6579_v30 }
  0x87   : > { %v831_v59 = vsub.f32 %v6589_v29, %v9505_v0  ;;  %v6624_v0 = vand.u32 4294901760, %v479_v15 }
  0x88   : > { %v9510_v9 = vand.u32 4294901760, %v6596_v7 }
  0x89   : > { %9877 = vst [vmem:[#allocation36_spill] sm:$0xff] %v6624_v0 }
  0x8a   : > { %1071 = vmatmul.f32.gmra.mxu3 %v6528_v62  ;;  %975 = vmatmul.f32.gmra.mxu1 %v6531_v48  ;;  %v824_v62 = vand.u32 4294901760, %v823_v24  ;;  %v639_v24 = vsub.f32 %v6596_v7, %v9510_v9 }
  0x8b   : > { %817 = vmatmul.f32.gmra.mxu2 %v816_v44  ;;  %v404_v44 = vsel %vm354_vm0, %v5992_v52, 0  ;;  %v6613_v52 = vsub.f32 %v476_v22, %v6600_v36 }
  0x8c   : > { %625 = vmatmul.f32.gmra.mxu0 %v624_v41  ;;  %v6603_v41 = vand.u32 4294901760, %v404_v44  ;;  %v640_v29 = vand.u32 4294901760, %v639_v24  ;;  %v482_v24 = vsel %vm354_vm0, %v6018_v51, 0  ;;  %v6019_v51 = vld [vmem:[%s6221_s25 + $0x188] sm:$0xff] }
  0x8d   : > { %9876 = vst [vmem:[#allocation35_spill] sm:$0xff] %v6613_v52  ;;  %v9515_v38 = vand.u32 4294901760, %v6613_v52  ;;  %v485_v60 = vsel %vm354_vm0, %v6019_v51, 0 }
  0x8e   : > { %v6620_v8 = vsub.f32 %v404_v44, %v6603_v41  ;;  %v6680_v53 = vand.u32 4294901760, %v485_v60 }
  0x8f   : > { %v839_v44 = vsub.f32 %v6613_v52, %v9515_v38 }
  0x90   : > { %v9520_v22 = vand.u32 4294901760, %v6620_v8  ;;  %9885 = vst [vmem:[#allocation44_spill] sm:$0xff] %v6680_v53 }
  0x92   : > { %1075 = vmatmul.f32.gmra.mxu3 %v6552_v17  ;;  %979 = vmatmul.f32.gmra.mxu1 %v6555_v61  ;;  %v832_v17 = vand.u32 4294901760, %v831_v59  ;;  %v647_v59 = vsub.f32 %v6620_v8, %v9520_v22 }
  0x93   : > { %825 = vmatmul.f32.gmra.mxu2 %v824_v62  ;;  %v407_v62 = vsel %vm354_vm0, %v5993_v57, 0  ;;  %v6637_v57 = vsub.f32 %v479_v15, %v6624_v0  ;;  %v6650_v15 = vand.u32 4294901760, %v482_v24 }
  0x94   : > { %633 = vmatmul.f32.gmra.mxu0 %v632_v32  ;;  %v6627_v32 = vand.u32 4294901760, %v407_v62 }
  0x95   : > { %9878 = vst [vmem:[#allocation37_spill] sm:$0xff] %v6637_v57  ;;  %v9529_v38 = vand.u32 4294901760, %v6637_v57 }
  0x96   : > { %v6644_v9 = vsub.f32 %v407_v62, %v6627_v32  ;;  %9879 = vst [vmem:[#allocation38_spill] sm:$0xff] %v6650_v15  ;;  %v5995_v62 = vld [vmem:[%s6221_s25 + $0xa8] sm:$0xff] }
  0x97   : > { %v413_v3 = vsel %vm354_vm0, %v5995_v62, 0 }
  0x98   : > { %v9534_v52 = vand.u32 4294901760, %v6644_v9  ;;  %v6683_v26 = vand.u32 4294901760, %v413_v3 }
  0x9a   : > { %1079 = vmatmul.f32.gmra.mxu3 %v6576_v31  ;;  %983 = vmatmul.f32.gmra.mxu1 %v6579_v30  ;;  %v840_v31 = vand.u32 4294901760, %v839_v44  ;;  %v6665_v44 = vsub.f32 %v482_v24, %v6650_v15  ;;  %9886 = vst [vmem:[#allocation45_spill] sm:$0xff] %v6683_v26 }
  0x9b   : > { %833 = vmatmul.f32.gmra.mxu2 %v832_v17  ;;  %v410_v17 = vsel %vm354_vm0, %v5994_v14, 0  ;;  %v847_v14 = vsub.f32 %v6637_v57, %v9529_v38 }
  0x9c   : > { %641 = vmatmul.f32.gmra.mxu0 %v640_v29  ;;  %v648_v29 = vand.u32 4294901760, %v647_v59  ;;  %v6653_v28 = vand.u32 4294901760, %v410_v17  ;;  %9881 = vst [vmem:[#allocation40_spill] sm:$0xff] %v6665_v44  ;;  %v655_v59 = vsub.f32 %v6644_v9, %v9534_v52 }
  0x9d   : > { %v848_v24 = vand.u32 4294901760, %v847_v14  ;;  %v6695_v14 = vsub.f32 %v485_v60, %v6680_v53 }
  0x9e   : > { %9880 = vst [vmem:[#allocation39_spill] sm:$0xff] %v6653_v28  ;;  %v656_v52 = vand.u32 4294901760, %v655_v59 }
  0x9f   : > { %v6647_v10 = vpop.f32.mrf.mxu1  ;;  %9887 = vst [vmem:[#allocation46_spill] sm:$0xff] %v6695_v14 }
  0xa1   : > { %v6655_v22 = vpop.f32.mrf.mxu0 }
  0xa2   : > { %1083 = vmatmul.f32.gmra.mxu3 %v6600_v36  ;;  %987 = vmatmul.f32.gmra.mxu1 %v6603_v41  ;;  %v6672_v36 = vsub.f32 %v410_v17, %v6653_v28 }
  0xa3   : > { %841 = vmatmul.f32.gmra.mxu2 %v840_v31 }
  0xa4   : > { %649 = vmatmul.f32.gmra.mxu0 %v648_v29  ;;  %9882 = vst [vmem:[#allocation41_spill] sm:$0xff] %v6672_v36  ;;  %v9543_v29 = vand.u32 4294901760, %v6665_v44  ;;  %v9548_v51 = vand.u32 4294901760, %v6672_v36 }
  0xa5   : > { %v1020_v31 = vpop.f32.mrf.mxu3 }
  0xa6   : > { %v714_v46 = vpop.f32.mrf.mxu2  ;;  %v855_v62 = vsub.f32 %v6665_v44, %v9543_v29  ;;  %v663_v59 = vsub.f32 %v6672_v36, %v9548_v51 }
  0xa7   : > { %v6675_v38 = vadd.f32 %v1020_v31, %v714_v46  ;;  %v6677_v57 = vpop.f32.mrf.mxu1  ;;  %v5996_v46 = vld [vmem:[%s6221_s25 + $0xb0] sm:$0xff]  ;;  %v488_v31 = vsel %vm354_vm0, %v6020_v39, 0 }
  0xa8   : > { %9884 = vst [vmem:[#allocation43_spill] sm:$0xff] %v6677_v57  ;;  %v856_v60 = vand.u32 4294901760, %v855_v62  ;;  %v6710_v19 = vand.u32 4294901760, %v488_v31  ;;  %v664_v51 = vand.u32 4294901760, %v663_v59 }
  0xa9   : > { %9883 = vst [vmem:[#allocation42_spill] sm:$0xff] %v6675_v38  ;;  %v6685_v17 = vpop.f32.mrf.mxu0  ;;  %v416_v38 = vsel %vm354_vm0, %v5996_v46, 0 }
  0xaa   : > { %1087 = vmatmul.f32.gmra.mxu3 %v6624_v0  ;;  %991 = vmatmul.f32.gmra.mxu1 %v6627_v32  ;;  %v6702_v0 = vsub.f32 %v413_v3, %v6683_v26  ;;  %9891 = vst [vmem:[#allocation50_spill] sm:$0xff] %v6710_v19  ;;  %v6713_v11 = vand.u32 4294901760, %v416_v38  ;;  %v6725_v62 = vsub.f32 %v488_v31, %v6710_v19 }
  0xab   : > { %849 = vmatmul.f32.gmra.mxu2 %v848_v24 }
  0xac   : > { %657 = vmatmul.f32.gmra.mxu0 %v656_v52  ;;  %9888 = vst [vmem:[#allocation47_spill] sm:$0xff] %v6702_v0  ;;  %v9555_v52 = vand.u32 4294901760, %v6695_v14  ;;  %v9558_v39 = vand.u32 4294901760, %v6702_v0 }
  0xad   : > { %v1024_v24 = vpop.f32.mrf.mxu3  ;;  %9892 = vst [vmem:[#allocation51_spill] sm:$0xff] %v6713_v11 }
  0xae   : > { %v722_v12 = vpop.f32.mrf.mxu2  ;;  %v863_v46 = vsub.f32 %v6695_v14, %v9555_v52  ;;  %9894 = vst [vmem:[#allocation53_spill] sm:$0xff] %v6725_v62  ;;  %v671_v59 = vsub.f32 %v6702_v0, %v9558_v39 }
  0xaf   : > { %v6705_v29 = vadd.f32 %v1024_v24, %v722_v12  ;;  %v6707_v44 = vpop.f32.mrf.mxu1  ;;  %v5997_v12 = vld [vmem:[%s6221_s25 + $0xb8] sm:$0xff]  ;;  %v491_v24 = vsel %vm354_vm0, %v6021_v18, 0 }
  0xb0   : > { %9890 = vst [vmem:[#allocation49_spill] sm:$0xff] %v6707_v44  ;;  %v864_v31 = vand.u32 4294901760, %v863_v46  ;;  %v672_v39 = vand.u32 4294901760, %v671_v59 }
  0xb1   : > { %9889 = vst [vmem:[#allocation48_spill] sm:$0xff] %v6705_v29  ;;  %v6715_v3 = vpop.f32.mrf.mxu0  ;;  %v419_v29 = vsel %vm354_vm0, %v5997_v12, 0 }
  0xb2   : > { %9893 = vst [vmem:[#allocation52_spill] sm:$0xff] %v6715_v3  ;;  %1091 = vmatmul.f32.gmra.mxu3 %v6650_v15  ;;  %995 = vmatmul.f32.gmra.mxu1 %v6653_v28  ;;  %v6732_v15 = vsub.f32 %v416_v38, %v6713_v11  ;;  %v6740_v3 = vand.u32 4294901760, %v491_v24  ;;  %v6743_v0 = vand.u32 4294901760, %v419_v29  ;;  %v6022_v28 = vld [vmem:[%s6221_s25 + $0x1a0] sm:$0xff] }
  0xb3   : > { %857 = vmatmul.f32.gmra.mxu2 %v856_v60 }
  0xb4   : > { %665 = vmatmul.f32.gmra.mxu0 %v664_v51  ;;  %9895 = vst [vmem:[#allocation54_spill] sm:$0xff] %v6732_v15  ;;  %v9565_v51 = vand.u32 4294901760, %v6725_v62  ;;  %v9568_v18 = vand.u32 4294901760, %v6732_v15  ;;  %v6755_v46 = vsub.f32 %v491_v24, %v6740_v3 }
  0xb5   : > { %v1028_v60 = vpop.f32.mrf.mxu3  ;;  %9898 = vst [vmem:[#allocation57_spill] sm:$0xff] %v6740_v3 }
  0xb6   : > { %v730_v44 = vpop.f32.mrf.mxu2  ;;  %v871_v12 = vsub.f32 %v6725_v62, %v9565_v51  ;;  %9900 = vst [vmem:[#allocation59_spill] sm:$0xff] %v6755_v46  ;;  %v679_v59 = vsub.f32 %v6732_v15, %v9568_v18  ;;  %v9577_v62 = vand.u32 4294901760, %v6755_v46 }
  0xb7   : > { %v6735_v52 = vadd.f32 %v1028_v60, %v730_v44  ;;  %v6737_v14 = vpop.f32.mrf.mxu1  ;;  %v5998_v44 = vld [vmem:[%s6221_s25 + $0xc0] sm:$0xff]  ;;  %v494_v60 = vsel %vm354_vm0, %v6022_v28, 0 }
  0xb8   : > { %9897 = vst [vmem:[#allocation56_spill] sm:$0xff] %v6737_v14  ;;  %v872_v24 = vand.u32 4294901760, %v871_v12  ;;  %v680_v18 = vand.u32 4294901760, %v679_v59  ;;  %v302_v59 = vld [vmem:[%s6215_s22] sm:$0xff] }
  0xb9   : > { %9896 = vst [vmem:[#allocation55_spill] sm:$0xff] %v6735_v52  ;;  %v6745_v38 = vpop.f32.mrf.mxu0  ;;  %v422_v52 = vsel %vm354_vm0, %v5998_v44, 0  ;;  %v879_v44 = vsub.f32 %v6755_v46, %v9577_v62 }
  0xba   : > { %9899 = vst [vmem:[#allocation58_spill] sm:$0xff] %v6745_v38  ;;  %1095 = vmatmul.f32.gmra.mxu3 %v6680_v53  ;;  %999 = vmatmul.f32.gmra.mxu1 %v6683_v26  ;;  %v6762_v53 = vsub.f32 %v419_v29, %v6743_v0  ;;  %v6770_v38 = vand.u32 4294901760, %v494_v60  ;;  %v6773_v29 = vand.u32 4294901760, %v422_v52  ;;  %v6023_v26 = vld [vmem:[%s6221_s25 + $0x1a8] sm:$0xff] }
  0xbb   : > { %865 = vmatmul.f32.gmra.mxu2 %v864_v31 }
  0xbc   : > { %673 = vmatmul.f32.gmra.mxu0 %v672_v39  ;;  %9901 = vst [vmem:[#allocation60_spill] sm:$0xff] %v6762_v53  ;;  %v9580_v28 = vand.u32 4294901760, %v6762_v53  ;;  %v6785_v12 = vsub.f32 %v494_v60, %v6770_v38 }
  0xbd   : > { %v1032_v31 = vpop.f32.mrf.mxu3  ;;  %9904 = vst [vmem:[#allocation63_spill] sm:$0xff] %v6770_v38 }
  0xbe   : > { %v738_v14 = vpop.f32.mrf.mxu2  ;;  %9906 = vst [vmem:[#allocation65_spill] sm:$0xff] %v6785_v12 }
  0xbf   : > { %v6765_v51 = vadd.f32 %v1032_v31, %v738_v14  ;;  %v6767_v39 = vpop.f32.mrf.mxu1  ;;  %v5999_v14 = vld [vmem:[%s6221_s25 + $0xc8] sm:$0xff]  ;;  %v687_v31 = vsub.f32 %v6762_v53, %v9580_v28  ;;  %v9587_v28 = vand.u32 4294901760, %v6785_v12 }
  0xc0   : > { %9903 = vst [vmem:[#allocation62_spill] sm:$0xff] %v6767_v39  ;;  %v2261_v39 = vand.u32 4294901760, %v302_v59 }
  0xc1   : > { %9902 = vst [vmem:[#allocation61_spill] sm:$0xff] %v6765_v51  ;;  %v6775_v15 = vpop.f32.mrf.mxu0  ;;  %v497_v51 = vsel %vm354_vm0, %v6023_v26, 0  ;;  %v688_v26 = vand.u32 4294901760, %v687_v31 }
  0xc2   : > { %9905 = vst [vmem:[#allocation64_spill] sm:$0xff] %v6775_v15  ;;  %1099 = vmatmul.f32.gmra.mxu3 %v6710_v19  ;;  %1003 = vmatmul.f32.gmra.mxu1 %v6713_v11  ;;  %v6793_v19 = vsub.f32 %v422_v52, %v6773_v29  ;;  %v425_v15 = vsel %vm354_vm0, %v5999_v14, 0  ;;  %v2664_v62 = vsub.f32 %v302_v59, %v2261_v39  ;;  %v6801_v53 = vand.u32 4294901760, %v497_v51 }
  0xc3   : > { %873 = vmatmul.f32.gmra.mxu2 %v872_v24  ;;  %3137 = vmatpush.msra.mxu1 %v2261_v39  ;;  %v6804_v36 = vand.u32 4294901760, %v425_v15 }
  0xc4   : > { %681 = vmatmul.f32.gmra.mxu0 %v680_v18  ;;  %2262 = vmatpush.msra.mxu2 %v2261_v39  ;;  %v880_v18 = vand.u32 4294901760, %v879_v44  ;;  %9909 = vst [vmem:[#allocation68_spill] sm:$0xff] %v6801_v53  ;;  %v9590_v52 = vand.u32 4294901760, %v6793_v19  ;;  %v2665_v57 = vand.u32 4294901760, %v2664_v62  ;;  %v887_v44 = vsub.f32 %v6785_v12, %v9587_v28 }
  0xc5   : > { %v1036_v24 = vpop.f32.mrf.mxu3  ;;  %2879 = vmatpush.msra.mxu0 %v2664_v62  ;;  %v6814_v59 = vsub.f32 %v497_v51, %v6801_v53 }
  0xc6   : > { %v746_v11 = vpop.f32.mrf.mxu2  ;;  %v695_v31 = vsub.f32 %v6793_v19, %v9590_v52 }
  0xc7   : > { %v6796_v60 = vadd.f32 %v1036_v24, %v746_v11  ;;  %v6798_v46 = vpop.f32.mrf.mxu1  ;;  %v2666_v11 = vsub.f32 %v2664_v62, %v2665_v57  ;;  %9911 = vst [vmem:[#allocation70_spill] sm:$0xff] %v6814_v59  ;;  %v6820_v24 = vsub.f32 %v425_v15, %v6804_v36  ;;  %v9593_v51 = vand.u32 4294901760, %v6814_v59 }
  0xc8   : > { %9908 = vst [vmem:[#allocation67_spill] sm:$0xff] %v6798_v46  ;;  %v696_v28 = vand.u32 4294901760, %v695_v31 }
  0xc9   : > { %9907 = vst [vmem:[#allocation66_spill] sm:$0xff] %v6796_v60  ;;  %v6806_v14 = vpop.f32.mrf.mxu0  ;;  %v895_v15 = vsub.f32 %v6814_v59, %v9593_v51  ;;  %v9951_v59 = vld [vmem:[#allocation39_spill] sm:$0xff] }
  0xca   : > { %9910 = vst [vmem:[#allocation69_spill] sm:$0xff] %v6806_v14  ;;  %1103 = vmatmul.f32.gmra.mxu3 %v6740_v3  ;;  %1007 = vmatmul.f32.gmra.mxu1 %v6743_v0  ;;  %v2667_v3 = vand.u32 4294901760, %v2666_v11 }
  0xcb   : > { %881 = vmatmul.f32.gmra.mxu2 %v880_v18  ;;  %v888_v18 = vand.u32 4294901760, %v887_v44  ;;  %v896_v44 = vand.u32 4294901760, %v895_v15  ;;  %v9913_v15 = vand.u32 4294901760, %v6247_v20 }
  0xcc   : > { %689 = vmatmul.f32.gmra.mxu0 %v688_v26  ;;  %2668 = vmatpush.msra.mxu3 %v2667_v3  ;;  %v9594_v26 = vand.u32 4294901760, %v6820_v24 }
  0xcd   : > { %v1040_v60 = vpop.f32.mrf.mxu3 }
  0xce   : > { %v754_v46 = vpop.f32.mrf.mxu2  ;;  %v703_v3 = vsub.f32 %v6820_v24, %v9594_v26 }
  0xcf   : > { %v6822_v62 = vadd.f32 %v1040_v60, %v754_v46  ;;  %v6824_v14 = vpop.f32.mrf.mxu1 }
  0xd0   : > { %v704_v52 = vand.u32 4294901760, %v703_v3 }
  0xd1   : > { %v6828_v12 = vpop.f32.mrf.mxu0 }
  0xd2   : > { %1107 = vmatmul.f32.gmra.mxu3 %v6770_v38  ;;  %1011 = vmatmul.f32.gmra.mxu1 %v6773_v29 }
  0xd3   : > { %889 = vmatmul.f32.gmra.mxu2 %v888_v18 }
  0xd4   : > { %697 = vmatmul.f32.gmra.mxu0 %v696_v28 }
  0xd5   : > { %v1044_v46 = vpop.f32.mrf.mxu3 }
  0xd6   : > { %v762_v60 = vpop.f32.mrf.mxu2 }
  0xd7   : > { %v6838_v11 = vadd.f32 %v1044_v46, %v762_v60  ;;  %v6840_v31 = vpop.f32.mrf.mxu1 }
  0xd9   : > { %v6842_v38 = vpop.f32.mrf.mxu0 }
  0xda   : > { %1111 = vmatmul.f32.gmra.mxu3 %v6801_v53  ;;  %1015 = vmatmul.f32.gmra.mxu1 %v6804_v36  ;;  %v9949_v53 = vld [vmem:[#allocation41_spill] sm:$0xff] }
  0xdb   : > { %897 = vmatmul.f32.gmra.mxu2 %v896_v44 }
  0xdc   : > { %705 = vmatmul.f32.gmra.mxu0 %v704_v52 }
  0xdd   : > { %v1048_v28 = vpop.f32.mrf.mxu3 }
  0xde   : > { %v770_v18 = vpop.f32.mrf.mxu2 }
  0xdf   : > { %v6846_v51 = vadd.f32 %v1048_v28, %v770_v18  ;;  %v6848_v26 = vpop.f32.mrf.mxu1  ;;  %v9915_v18 = vand.u32 4294901760, %v6257_v27 }
  0xe1   : > { %9912 = vst [vmem:[#allocation71_spill] sm:$0xff] %v6846_v51  ;;  %v6850_v46 = vpop.f32.mrf.mxu0 }
  0xe2   : > { %1394 = vmatmul.f32.vlgmr.msrb.gmra.mxu3 %v9913_v15  ;;  %1910 = vmatmul.f32.vlgmr.msrb.gmra.mxu1 %v6235_v13 }
  0xe3   : > { %1135 = vmatmul.f32.vlgmr.msrb.gmra.mxu2 %v6247_v20  ;;  %3655 = vmatpush.msrb.mxu3 %v2261_v39 }
  0xe4   : > { %1700 = vmatmul.f32.vlgmr.msrb.gmra.mxu0 %v6235_v13  ;;  %3445 = vmatpush.msrb.mxu2 %v2665_v57 }
  0xe5   : > { %v1052_v52 = vpop.f32.mrf.mxu3 }
  0xe6   : > { %v778_v3 = vpop.f32.mrf.mxu2 }
  0xe7   : > { %v6857_v60 = vadd.f32 %v1052_v52, %v778_v3  ;;  %v6859_v44 = vpop.f32.mrf.mxu1  ;;  %v9917_v52 = vand.u32 4294901760, %v6284_v42 }
  0xe9   : > { %9914 = vst [vmem:[#allocation72_spill] sm:$0xff] %v6857_v60  ;;  %v6861_v28 = vpop.f32.mrf.mxu0 }
  0xea   : > { %1400 = vmatmul.f32.gmra.mxu3 %v9915_v18  ;;  %1914 = vmatmul.f32.gmra.mxu1 %v6249_v21 }
  0xeb   : > { %1140 = vmatmul.f32.gmra.mxu2 %v6257_v27 }
  0xec   : > { %1704 = vmatmul.f32.gmra.mxu0 %v6249_v21 }
  0xed   : > { %v1056_v20 = vpop.f32.mrf.mxu3 }
  0xee   : > { %v786_v13 = vpop.f32.mrf.mxu2 }
  0xef   : > { %v6868_v57 = vadd.f32 %v1056_v20, %v786_v13  ;;  %v6870_v39 = vpop.f32.mrf.mxu1  ;;  %v9919_v13 = vand.u32 4294901760, %v6308_v56 }
  0xf1   : > { %9916 = vst [vmem:[#allocation73_spill] sm:$0xff] %v6868_v57  ;;  %v6872_v15 = vpop.f32.mrf.mxu0 }
  0xf2   : > { %1406 = vmatmul.f32.gmra.mxu3 %v9917_v52  ;;  %1918 = vmatmul.f32.gmra.mxu1 %v6267_v33 }
  0xf3   : > { %1145 = vmatmul.f32.gmra.mxu2 %v6284_v42 }
  0xf4   : > { %1708 = vmatmul.f32.gmra.mxu0 %v6267_v33 }
  0xf5   : > { %v1060_v27 = vpop.f32.mrf.mxu3 }
  0xf6   : > { %v794_v3 = vpop.f32.mrf.mxu2 }
  0xf7   : > { %v6879_v21 = vadd.f32 %v1060_v27, %v794_v3  ;;  %v6881_v18 = vpop.f32.mrf.mxu1  ;;  %v9921_v3 = vand.u32 4294901760, %v6332_v6 }
  0xf9   : > { %9918 = vst [vmem:[#allocation74_spill] sm:$0xff] %v6879_v21  ;;  %v6883_v20 = vpop.f32.mrf.mxu0 }
  0xfa   : > { %1412 = vmatmul.f32.gmra.mxu3 %v9919_v13  ;;  %1922 = vmatmul.f32.gmra.mxu1 %v6291_v49 }
  0xfb   : > { %1150 = vmatmul.f32.gmra.mxu2 %v6308_v56 }
  0xfc   : > { %1712 = vmatmul.f32.gmra.mxu0 %v6291_v49 }
  0xfd   : > { %v1064_v42 = vpop.f32.mrf.mxu3 }
  0xfe   : > { %v802_v52 = vpop.f32.mrf.mxu2 }
  0xff   : > { %v6890_v33 = vadd.f32 %v1064_v42, %v802_v52  ;;  %v6892_v57 = vpop.f32.mrf.mxu1  ;;  %v9923_v52 = vand.u32 4294901760, %v6356_v34 }
 0x101   : > { %9920 = vst [vmem:[#allocation75_spill] sm:$0xff] %v6890_v33  ;;  %v6894_v27 = vpop.f32.mrf.mxu0 }
 0x102   : > { %1418 = vmatmul.f32.gmra.mxu3 %v9921_v3  ;;  %1926 = vmatmul.f32.gmra.mxu1 %v6315_v63 }
 0x103   : > { %1155 = vmatmul.f32.gmra.mxu2 %v6332_v6 }
 0x104   : > { %1716 = vmatmul.f32.gmra.mxu0 %v6315_v63 }
 0x105   : > { %v1068_v56 = vpop.f32.mrf.mxu3 }
 0x106   : > { %v810_v13 = vpop.f32.mrf.mxu2 }
 0x107   : > { %v6901_v49 = vadd.f32 %v1068_v56, %v810_v13  ;;  %v6903_v21 = vpop.f32.mrf.mxu1  ;;  %v9925_v13 = vand.u32 4294901760, %v6380_v55 }
 0x109   : > { %9922 = vst [vmem:[#allocation76_spill] sm:$0xff] %v6901_v49  ;;  %v6905_v42 = vpop.f32.mrf.mxu0 }
 0x10a   : > { %1424 = vmatmul.f32.gmra.mxu3 %v9923_v52  ;;  %1930 = vmatmul.f32.gmra.mxu1 %v6339_v16 }
 0x10b   : > { %1160 = vmatmul.f32.gmra.mxu2 %v6356_v34 }
 0x10c   : > { %1720 = vmatmul.f32.gmra.mxu0 %v6339_v16 }
 0x10d   : > { %v1072_v6 = vpop.f32.mrf.mxu3 }
 0x10e   : > { %v818_v3 = vpop.f32.mrf.mxu2 }
 0x10f   : > { %v6912_v63 = vadd.f32 %v1072_v6, %v818_v3  ;;  %v6914_v33 = vpop.f32.mrf.mxu1  ;;  %v9927_v3 = vand.u32 4294901760, %v6404_v25 }
 0x111   : > { %9924 = vst [vmem:[#allocation77_spill] sm:$0xff] %v6912_v63  ;;  %v6916_v56 = vpop.f32.mrf.mxu0 }
 0x112   : > { %1430 = vmatmul.f32.gmra.mxu3 %v9925_v13  ;;  %1934 = vmatmul.f32.gmra.mxu1 %v6363_v43 }
 0x113   : > { %1165 = vmatmul.f32.gmra.mxu2 %v6380_v55 }
 0x114   : > { %1724 = vmatmul.f32.gmra.mxu0 %v6363_v43 }
 0x115   : > { %v1076_v34 = vpop.f32.mrf.mxu3 }
 0x116   : > { %v826_v52 = vpop.f32.mrf.mxu2 }
 0x117   : > { %v6923_v16 = vadd.f32 %v1076_v34, %v826_v52  ;;  %v6925_v49 = vpop.f32.mrf.mxu1  ;;  %v9929_v52 = vand.u32 4294901760, %v6428_v5 }
 0x119   : > { %9926 = vst [vmem:[#allocation78_spill] sm:$0xff] %v6923_v16  ;;  %v6927_v6 = vpop.f32.mrf.mxu0 }
 0x11a   : > { %1436 = vmatmul.f32.gmra.mxu3 %v9927_v3  ;;  %1938 = vmatmul.f32.gmra.mxu1 %v6387_v4 }
 0x11b   : > { %1170 = vmatmul.f32.gmra.mxu2 %v6404_v25 }
 0x11c   : > { %1728 = vmatmul.f32.gmra.mxu0 %v6387_v4 }
 0x11d   : > { %v1080_v55 = vpop.f32.mrf.mxu3 }
 0x11e   : > { %v834_v13 = vpop.f32.mrf.mxu2 }
 0x11f   : > { %v6934_v43 = vadd.f32 %v1080_v55, %v834_v13  ;;  %v6936_v63 = vpop.f32.mrf.mxu1  ;;  %v9931_v13 = vand.u32 4294901760, %v6452_v37 }
 0x121   : > { %9928 = vst [vmem:[#allocation79_spill] sm:$0xff] %v6934_v43  ;;  %v6938_v34 = vpop.f32.mrf.mxu0 }
 0x122   : > { %1442 = vmatmul.f32.gmra.mxu3 %v9929_v52  ;;  %1942 = vmatmul.f32.gmra.mxu1 %v6411_v47 }
 0x123   : > { %1175 = vmatmul.f32.gmra.mxu2 %v6428_v5 }
 0x124   : > { %1732 = vmatmul.f32.gmra.mxu0 %v6411_v47 }
 0x125   : > { %v1084_v25 = vpop.f32.mrf.mxu3 }
 0x126   : > { %v842_v3 = vpop.f32.mrf.mxu2 }
 0x127   : > { %v6945_v4 = vadd.f32 %v1084_v25, %v842_v3  ;;  %v6947_v16 = vpop.f32.mrf.mxu1  ;;  %v9933_v3 = vand.u32 4294901760, %v6476_v23 }
 0x129   : > { %9930 = vst [vmem:[#allocation80_spill] sm:$0xff] %v6945_v4  ;;  %v6949_v55 = vpop.f32.mrf.mxu0 }
 0x12a   : > { %1448 = vmatmul.f32.gmra.mxu3 %v9931_v13  ;;  %1946 = vmatmul.f32.gmra.mxu1 %v6435_v40 }
 0x12b   : > { %1180 = vmatmul.f32.gmra.mxu2 %v6452_v37 }
 0x12c   : > { %1736 = vmatmul.f32.gmra.mxu0 %v6435_v40 }
 0x12d   : > { %v1088_v5 = vpop.f32.mrf.mxu3 }
 0x12e   : > { %v850_v52 = vpop.f32.mrf.mxu2 }
 0x12f   : > { %v6956_v47 = vadd.f32 %v1088_v5, %v850_v52  ;;  %v6958_v43 = vpop.f32.mrf.mxu1  ;;  %v9935_v52 = vand.u32 4294901760, %v6500_v1 }
 0x131   : > { %9932 = vst [vmem:[#allocation81_spill] sm:$0xff] %v6956_v47  ;;  %v6960_v25 = vpop.f32.mrf.mxu0 }
 0x132   : > { %1454 = vmatmul.f32.gmra.mxu3 %v9933_v3  ;;  %1950 = vmatmul.f32.gmra.mxu1 %v6459_v35 }
 0x133   : > { %1185 = vmatmul.f32.gmra.mxu2 %v6476_v23 }
 0x134   : > { %1740 = vmatmul.f32.gmra.mxu0 %v6459_v35 }
 0x135   : > { %v1092_v37 = vpop.f32.mrf.mxu3 }
 0x136   : > { %v858_v13 = vpop.f32.mrf.mxu2 }
 0x137   : > { %v6967_v40 = vadd.f32 %v1092_v37, %v858_v13  ;;  %v6969_v4 = vpop.f32.mrf.mxu1  ;;  %v9937_v13 = vand.u32 4294901760, %v6524_v58 }
 0x139   : > { %9934 = vst [vmem:[#allocation82_spill] sm:$0xff] %v6967_v40  ;;  %v6971_v5 = vpop.f32.mrf.mxu0 }
 0x13a   : > { %1460 = vmatmul.f32.gmra.mxu3 %v9935_v52  ;;  %1954 = vmatmul.f32.gmra.mxu1 %v6483_v45 }
 0x13b   : > { %1190 = vmatmul.f32.gmra.mxu2 %v6500_v1 }
 0x13c   : > { %1744 = vmatmul.f32.gmra.mxu0 %v6483_v45 }
 0x13d   : > { %v1096_v23 = vpop.f32.mrf.mxu3 }
 0x13e   : > { %v866_v3 = vpop.f32.mrf.mxu2 }
 0x13f   : > { %v6978_v35 = vadd.f32 %v1096_v23, %v866_v3  ;;  %v6980_v47 = vpop.f32.mrf.mxu1  ;;  %v9939_v3 = vand.u32 4294901760, %v6548_v54 }
 0x141   : > { %9936 = vst [vmem:[#allocation83_spill] sm:$0xff] %v6978_v35  ;;  %v6982_v37 = vpop.f32.mrf.mxu0 }
 0x142   : > { %1466 = vmatmul.f32.gmra.mxu3 %v9937_v13  ;;  %1958 = vmatmul.f32.gmra.mxu1 %v6507_v2 }
 0x143   : > { %1195 = vmatmul.f32.gmra.mxu2 %v6524_v58 }
 0x144   : > { %1748 = vmatmul.f32.gmra.mxu0 %v6507_v2 }
 0x145   : > { %v1100_v1 = vpop.f32.mrf.mxu3 }
 0x146   : > { %v874_v52 = vpop.f32.mrf.mxu2 }
 0x147   : > { %v6989_v45 = vadd.f32 %v1100_v1, %v874_v52  ;;  %v6991_v40 = vpop.f32.mrf.mxu1  ;;  %v9941_v52 = vand.u32 4294901760, %v6572_v50 }
 0x149   : > { %9938 = vst [vmem:[#allocation84_spill] sm:$0xff] %v6989_v45  ;;  %v6993_v23 = vpop.f32.mrf.mxu0 }
 0x14a   : > { %1472 = vmatmul.f32.gmra.mxu3 %v9939_v3  ;;  %1962 = vmatmul.f32.gmra.mxu1 %v6531_v48 }
 0x14b   : > { %1200 = vmatmul.f32.gmra.mxu2 %v6548_v54 }
 0x14c   : > { %1752 = vmatmul.f32.gmra.mxu0 %v6531_v48 }
 0x14d   : > { %v1104_v58 = vpop.f32.mrf.mxu3 }
 0x14e   : > { %v882_v13 = vpop.f32.mrf.mxu2 }
 0x14f   : > { %v7000_v2 = vadd.f32 %v1104_v58, %v882_v13  ;;  %v7002_v35 = vpop.f32.mrf.mxu1  ;;  %v9943_v13 = vand.u32 4294901760, %v6596_v7 }
 0x151   : > { %9940 = vst [vmem:[#allocation85_spill] sm:$0xff] %v7000_v2  ;;  %v7004_v1 = vpop.f32.mrf.mxu0 }
 0x152   : > { %1478 = vmatmul.f32.gmra.mxu3 %v9941_v52  ;;  %1966 = vmatmul.f32.gmra.mxu1 %v6555_v61 }
 0x153   : > { %1205 = vmatmul.f32.gmra.mxu2 %v6572_v50 }
 0x154   : > { %1756 = vmatmul.f32.gmra.mxu0 %v6555_v61 }
 0x155   : > { %v1108_v54 = vpop.f32.mrf.mxu3 }
 0x156   : > { %v890_v3 = vpop.f32.mrf.mxu2 }
 0x157   : > { %v7011_v48 = vadd.f32 %v1108_v54, %v890_v3  ;;  %v7013_v45 = vpop.f32.mrf.mxu1  ;;  %v9945_v3 = vand.u32 4294901760, %v6620_v8 }
 0x159   : > { %9942 = vst [vmem:[#allocation86_spill] sm:$0xff] %v7011_v48  ;;  %v7015_v58 = vpop.f32.mrf.mxu0 }
 0x15a   : > { %1484 = vmatmul.f32.gmra.mxu3 %v9943_v13  ;;  %1970 = vmatmul.f32.gmra.mxu1 %v6579_v30 }
 0x15b   : > { %1210 = vmatmul.f32.gmra.mxu2 %v6596_v7  ;;  %v925_v7 = vadd.f32 %v6647_v10, %v6655_v22 }
 0x15c   : > { %1760 = vmatmul.f32.gmra.mxu0 %v6579_v30 }
 0x15d   : > { %v1112_v50 = vpop.f32.mrf.mxu3 }
 0x15e   : > { %v898_v52 = vpop.f32.mrf.mxu2 }
 0x15f   : > { %v7022_v61 = vadd.f32 %v1112_v50, %v898_v52  ;;  %v1911_v2 = vpop.f32.mrf.mxu1 }
 0x161   : > { %9944 = vst [vmem:[#allocation87_spill] sm:$0xff] %v7022_v61  ;;  %v1701_v54 = vpop.f32.mrf.mxu0  ;;  %v9946_v61 = vand.u32 4294901760, %v6644_v9 }
 0x162   : > { %1490 = vmatmul.f32.gmra.mxu3 %v9945_v3  ;;  %1974 = vmatmul.f32.gmra.mxu1 %v6603_v41 }
 0x163   : > { %1215 = vmatmul.f32.gmra.mxu2 %v6620_v8  ;;  %v9947_v8 = vld [vmem:[#allocation43_spill] sm:$0xff] }
 0x164   : > { %1764 = vmatmul.f32.gmra.mxu0 %v6603_v41  ;;  %v929_v41 = vadd.f32 %v9947_v8, %v6685_v17 }
 0x165   : > { %v1395_v13 = vpop.f32.mrf.mxu3 }
 0x166   : > { %v1136_v30 = vpop.f32.mrf.mxu2 }
 0x167   : > { %v1137_v48 = vadd.f32 %v1136_v30, %v925_v7  ;;  %v1915_v60 = vpop.f32.mrf.mxu1 }
 0x169   : > { %v1396_v50 = vadd.f32 %v1395_v13, %v1137_v48  ;;  %v1705_v52 = vpop.f32.mrf.mxu0 }
 0x16a   : > { %1496 = vmatmul.f32.gmra.mxu3 %v9946_v61  ;;  %1978 = vmatmul.f32.gmra.mxu1 %v6627_v32  ;;  %v9950_v61 = vand.u32 4294901760, %v9949_v53 }
 0x16b   : > { %v1702_v3 = vadd.f32 %v1701_v54, %v1396_v50  ;;  %1220 = vmatmul.f32.gmra.mxu2 %v6644_v9  ;;  %v9952_v9 = vld [vmem:[#allocation52_spill] sm:$0xff] }
 0x16c   : > { %1768 = vmatmul.f32.gmra.mxu0 %v6627_v32  ;;  %v9953_v32 = vld [vmem:[#allocation49_spill] sm:$0xff] }
 0x16d   : > { %v7038_v10 = vadd.f32 %v1911_v2, %v1702_v3  ;;  %v1401_v22 = vpop.f32.mrf.mxu3  ;;  %v933_v17 = vadd.f32 %v9953_v32, %v9952_v9 }
 0x16e   : > { %v1141_v7 = vpop.f32.mrf.mxu2 }
 0x16f   : > { %9948 = vst [vmem:[#allocation43_spill] sm:$0xff] %v7038_v10  ;;  %v1142_v30 = vadd.f32 %v1141_v7, %v929_v41  ;;  %v1919_v48 = vpop.f32.mrf.mxu1  ;;  %v9957_v10 = vld [vmem:[#allocation45_spill] sm:$0xff] }
 0x171   : > { %v1402_v13 = vadd.f32 %v1401_v22, %v1142_v30  ;;  %v1709_v51 = vpop.f32.mrf.mxu0  ;;  %v9955_v30 = vld [vmem:[#allocation47_spill] sm:$0xff] }
 0x172   : > { %1502 = vmatmul.f32.gmra.mxu3 %v9950_v61  ;;  %1982 = vmatmul.f32.gmra.mxu1 %v9951_v59  ;;  %v9956_v61 = vand.u32 4294901760, %v9955_v30 }
 0x173   : > { %v1706_v54 = vadd.f32 %v1705_v52, %v1402_v13  ;;  %1225 = vmatmul.f32.gmra.mxu2 %v9949_v53  ;;  %v9958_v53 = vld [vmem:[#allocation58_spill] sm:$0xff] }
 0x174   : > { %1772 = vmatmul.f32.gmra.mxu0 %v9951_v59  ;;  %v9959_v59 = vld [vmem:[#allocation56_spill] sm:$0xff] }
 0x175   : > { %v7047_v2 = vadd.f32 %v1915_v60, %v1706_v54  ;;  %v1407_v50 = vpop.f32.mrf.mxu3  ;;  %v937_v60 = vadd.f32 %v9959_v59, %v9958_v53 }
 0x176   : > { %v1146_v3 = vpop.f32.mrf.mxu2 }
 0x177   : > { %9954 = vst [vmem:[#allocation41_spill] sm:$0xff] %v7047_v2  ;;  %v1147_v8 = vadd.f32 %v1146_v3, %v933_v17  ;;  %v1923_v41 = vpop.f32.mrf.mxu1  ;;  %v9962_v2 = vld [vmem:[#allocation51_spill] sm:$0xff] }
 0x179   : > { %v1408_v22 = vadd.f32 %v1407_v50, %v1147_v8  ;;  %v1713_v7 = vpop.f32.mrf.mxu0  ;;  %v9960_v8 = vld [vmem:[#allocation54_spill] sm:$0xff] }
 0x17a   : > { %1508 = vmatmul.f32.gmra.mxu3 %v9956_v61  ;;  %1986 = vmatmul.f32.gmra.mxu1 %v9957_v10  ;;  %v9961_v61 = vand.u32 4294901760, %v9960_v8 }
 0x17b   : > { %v1710_v52 = vadd.f32 %v1709_v51, %v1408_v22  ;;  %1230 = vmatmul.f32.gmra.mxu2 %v9955_v30  ;;  %v9964_v22 = vld [vmem:[#allocation62_spill] sm:$0xff] }
 0x17c   : > { %1776 = vmatmul.f32.gmra.mxu0 %v9957_v10  ;;  %v9963_v10 = vld [vmem:[#allocation64_spill] sm:$0xff] }
 0x17d   : > { %v7056_v13 = vadd.f32 %v1919_v48, %v1710_v52  ;;  %v1413_v54 = vpop.f32.mrf.mxu3  ;;  %v941_v48 = vadd.f32 %v9964_v22, %v9963_v10 }
 0x17e   : > { %v1151_v9 = vpop.f32.mrf.mxu2 }
 0x17f   : > { %v1152_v32 = vadd.f32 %v1151_v9, %v937_v60  ;;  %v1927_v17 = vpop.f32.mrf.mxu1 }
 0x181   : > { %v1414_v50 = vadd.f32 %v1413_v54, %v1152_v32  ;;  %v1717_v3 = vpop.f32.mrf.mxu0  ;;  %v9965_v32 = vld [vmem:[#allocation60_spill] sm:$0xff] }
 0x182   : > { %1514 = vmatmul.f32.gmra.mxu3 %v9961_v61  ;;  %1990 = vmatmul.f32.gmra.mxu1 %v9962_v2  ;;  %v9966_v61 = vand.u32 4294901760, %v9965_v32 }
 0x183   : > { %v1714_v51 = vadd.f32 %v1713_v7, %v1414_v50  ;;  %1235 = vmatmul.f32.gmra.mxu2 %v9960_v8  ;;  %v9968_v50 = vld [vmem:[#allocation67_spill] sm:$0xff] }
 0x184   : > { %1780 = vmatmul.f32.gmra.mxu0 %v9962_v2  ;;  %v9967_v2 = vld [vmem:[#allocation69_spill] sm:$0xff] }
 0x185   : > { %v7065_v30 = vadd.f32 %v1923_v41, %v1714_v51  ;;  %v1419_v52 = vpop.f32.mrf.mxu3  ;;  %v945_v41 = vadd.f32 %v9968_v50, %v9967_v2 }
 0x186   : > { %v1156_v53 = vpop.f32.mrf.mxu2 }
 0x187   : > { %v1157_v59 = vadd.f32 %v1156_v53, %v941_v48  ;;  %v1931_v60 = vpop.f32.mrf.mxu1 }
 0x189   : > { %v1420_v54 = vadd.f32 %v1419_v52, %v1157_v59  ;;  %v1721_v9 = vpop.f32.mrf.mxu0  ;;  %v9969_v59 = vand.u32 4294901760, %v6793_v19 }
 0x18a   : > { %1520 = vmatmul.f32.gmra.mxu3 %v9966_v61  ;;  %1994 = vmatmul.f32.gmra.mxu1 %v6743_v0 }
 0x18b   : > { %v1718_v7 = vadd.f32 %v1717_v3, %v1420_v54  ;;  %1240 = vmatmul.f32.gmra.mxu2 %v9965_v32 }
 0x18c   : > { %1784 = vmatmul.f32.gmra.mxu0 %v6743_v0  ;;  %v949_v0 = vadd.f32 %v6824_v14, %v6828_v12 }
 0x18d   : > { %v7074_v8 = vadd.f32 %v1927_v17, %v1718_v7  ;;  %v1425_v51 = vpop.f32.mrf.mxu3 }
 0x18e   : > { %v1161_v10 = vpop.f32.mrf.mxu2 }
 0x18f   : > { %v1162_v22 = vadd.f32 %v1161_v10, %v945_v41  ;;  %v1935_v48 = vpop.f32.mrf.mxu1  ;;  %v9970_v41 = vand.u32 4294901760, %v6820_v24 }
 0x191   : > { %v1426_v52 = vadd.f32 %v1425_v51, %v1162_v22  ;;  %v1725_v53 = vpop.f32.mrf.mxu0 }
 0x192   : > { %1526 = vmatmul.f32.gmra.mxu3 %v9969_v59  ;;  %1998 = vmatmul.f32.gmra.mxu1 %v6773_v29 }
 0x193   : > { %v1722_v3 = vadd.f32 %v1721_v9, %v1426_v52  ;;  %1245 = vmatmul.f32.gmra.mxu2 %v6793_v19  ;;  %v953_v19 = vadd.f32 %v6840_v31, %v6842_v38  ;;  %v9971_v52 = vld [vmem:[#allocation4_spill] sm:$0xff] }
 0x194   : > { %1788 = vmatmul.f32.gmra.mxu0 %v6773_v29  ;;  %v9972_v59 = vand.u32 4294901760, %v9971_v52 }
 0x195   : > { %v7083_v17 = vadd.f32 %v1931_v60, %v1722_v3  ;;  %v1431_v54 = vpop.f32.mrf.mxu3  ;;  %v9973_v3 = vld [vmem:[#allocation2_spill] sm:$0xff] }
 0x196   : > { %v1166_v32 = vpop.f32.mrf.mxu2 }
 0x197   : > { %v1167_v61 = vadd.f32 %v1166_v32, %v949_v0  ;;  %v1939_v7 = vpop.f32.mrf.mxu1 }
 0x199   : > { %v1432_v2 = vadd.f32 %v1431_v54, %v1167_v61  ;;  %v1729_v50 = vpop.f32.mrf.mxu0  ;;  %v9974_v61 = vld [vmem:[#allocation5_spill] sm:$0xff] }
 0x19a   : > { %1532 = vmatmul.f32.gmra.mxu3 %v9970_v41  ;;  %2002 = vmatmul.f32.gmra.mxu1 %v6804_v36  ;;  %v9976_v41 = vld [vmem:[#allocation3_spill] sm:$0xff] }
 0x19b   : > { %v1726_v9 = vadd.f32 %v1725_v53, %v1432_v2  ;;  %1250 = vmatmul.f32.gmra.mxu2 %v6820_v24  ;;  %v9975_v2 = vand.u32 4294901760, %v9974_v61 }
 0x19c   : > { %1792 = vmatmul.f32.gmra.mxu0 %v6804_v36  ;;  %v957_v36 = vadd.f32 %v6848_v26, %v6850_v46  ;;  %v961_v26 = vadd.f32 %v6859_v44, %v6861_v28  ;;  %v965_v44 = vadd.f32 %v6870_v39, %v6872_v15  ;;  %v969_v39 = vadd.f32 %v6881_v18, %v6883_v20 }
 0x19d   : > { %v7092_v29 = vadd.f32 %v1935_v48, %v1726_v9  ;;  %v1437_v12 = vpop.f32.mrf.mxu3  ;;  %v973_v18 = vadd.f32 %v6892_v57, %v6894_v27  ;;  %v977_v57 = vadd.f32 %v6903_v21, %v6905_v42  ;;  %v981_v21 = vadd.f32 %v6914_v33, %v6916_v56 }
 0x19e   : > { %v1171_v14 = vpop.f32.mrf.mxu2  ;;  %v985_v33 = vadd.f32 %v6925_v49, %v6927_v6  ;;  %v989_v49 = vadd.f32 %v6936_v63, %v6938_v34  ;;  %v993_v63 = vadd.f32 %v6947_v16, %v6949_v55  ;;  %v997_v16 = vadd.f32 %v6958_v43, %v6960_v25 }
 0x19f   : > { %v1172_v60 = vadd.f32 %v1171_v14, %v953_v19  ;;  %v1943_v51 = vpop.f32.mrf.mxu1  ;;  %v1001_v43 = vadd.f32 %v6969_v4, %v6971_v5  ;;  %v1005_v4 = vadd.f32 %v6980_v47, %v6982_v37  ;;  %v1009_v47 = vadd.f32 %v6991_v40, %v6993_v23 }
 0x1a0   : > { %v1013_v40 = vadd.f32 %v7002_v35, %v7004_v1  ;;  %v1017_v35 = vadd.f32 %v7013_v45, %v7015_v58 }
 0x1a1   : > { %v1438_v10 = vadd.f32 %v1437_v12, %v1172_v60  ;;  %v1733_v22 = vpop.f32.mrf.mxu0 }
 0x1a2   : > { %1538 = vmatmul.f32.gmra.mxu3 %v9972_v59  ;;  %2006 = vmatmul.f32.gmra.mxu1 %v9973_v3  ;;  %v9979_v59 = vld [vmem:[#allocation6_spill] sm:$0xff] }
 0x1a3   : > { %v1730_v53 = vadd.f32 %v1729_v50, %v1438_v10  ;;  %1255 = vmatmul.f32.gmra.mxu2 %v9971_v52  ;;  %v9977_v10 = vld [vmem:[#allocation7_spill] sm:$0xff] }
 0x1a4   : > { %1796 = vmatmul.f32.gmra.mxu0 %v9973_v3  ;;  %v9978_v52 = vand.u32 4294901760, %v9977_v10 }
 0x1a5   : > { %v7101_v38 = vadd.f32 %v1939_v7, %v1730_v53  ;;  %v1443_v24 = vpop.f32.mrf.mxu3 }
 0x1a6   : > { %v1176_v31 = vpop.f32.mrf.mxu2 }
 0x1a7   : > { %v1177_v48 = vadd.f32 %v1176_v31, %v957_v36  ;;  %v1947_v0 = vpop.f32.mrf.mxu1 }
 0x1a9   : > { %v1444_v54 = vadd.f32 %v1443_v24, %v1177_v48  ;;  %v1737_v32 = vpop.f32.mrf.mxu0  ;;  %v9980_v48 = vld [vmem:[#allocation9_spill] sm:$0xff] }
 0x1aa   : > { %1544 = vmatmul.f32.gmra.mxu3 %v9975_v2  ;;  %2010 = vmatmul.f32.gmra.mxu1 %v9976_v41 }
 0x1ab   : > { %v1734_v50 = vadd.f32 %v1733_v22, %v1444_v54  ;;  %1260 = vmatmul.f32.gmra.mxu2 %v9974_v61  ;;  %v9981_v54 = vand.u32 4294901760, %v9980_v48  ;;  %v9982_v61 = vld [vmem:[#allocation8_spill] sm:$0xff] }
 0x1ac   : > { %1800 = vmatmul.f32.gmra.mxu0 %v9976_v41 }
 0x1ad   : > { %v7110_v46 = vadd.f32 %v1943_v51, %v1734_v50  ;;  %v1449_v7 = vpop.f32.mrf.mxu3 }
 0x1ae   : > { %v1181_v9 = vpop.f32.mrf.mxu2 }
 0x1af   : > { %v1182_v19 = vadd.f32 %v1181_v9, %v961_v26  ;;  %v1951_v12 = vpop.f32.mrf.mxu1  ;;  %v9983_v9 = vld [vmem:[#allocation11_spill] sm:$0xff] }
 0x1b1   : > { %v1450_v14 = vadd.f32 %v1449_v7, %v1182_v19  ;;  %v1741_v60 = vpop.f32.mrf.mxu0  ;;  %v9984_v19 = vand.u32 4294901760, %v9983_v9 }
 0x1b2   : > { %1550 = vmatmul.f32.gmra.mxu3 %v9978_v52  ;;  %2014 = vmatmul.f32.gmra.mxu1 %v9979_v59 }
 0x1b3   : > { %v1738_v22 = vadd.f32 %v1737_v32, %v1450_v14  ;;  %1265 = vmatmul.f32.gmra.mxu2 %v9977_v10  ;;  %v9985_v14 = vld [vmem:[#allocation10_spill] sm:$0xff] }
 0x1b4   : > { %1804 = vmatmul.f32.gmra.mxu0 %v9979_v59 }
 0x1b5   : > { %v7119_v28 = vadd.f32 %v1947_v0, %v1738_v22  ;;  %v1455_v51 = vpop.f32.mrf.mxu3 }
 0x1b6   : > { %v1186_v3 = vpop.f32.mrf.mxu2 }
 0x1b7   : > { %v1187_v53 = vadd.f32 %v1186_v3, %v965_v44  ;;  %v1955_v36 = vpop.f32.mrf.mxu1 }
 0x1b9   : > { %v1456_v24 = vadd.f32 %v1455_v51, %v1187_v53  ;;  %v1745_v31 = vpop.f32.mrf.mxu0  ;;  %v9986_v51 = vld [vmem:[#allocation13_spill] sm:$0xff]  ;;  %v9988_v53 = vld [vmem:[#allocation12_spill] sm:$0xff] }
 0x1ba   : > { %1556 = vmatmul.f32.gmra.mxu3 %v9981_v54  ;;  %2018 = vmatmul.f32.gmra.mxu1 %v9982_v61  ;;  %v9987_v3 = vand.u32 4294901760, %v9986_v51 }
 0x1bb   : > { %v1742_v32 = vadd.f32 %v1741_v60, %v1456_v24  ;;  %1270 = vmatmul.f32.gmra.mxu2 %v9980_v48 }
 0x1bc   : > { %1808 = vmatmul.f32.gmra.mxu0 %v9982_v61 }
 0x1bd   : > { %v7128_v15 = vadd.f32 %v1951_v12, %v1742_v32  ;;  %v1461_v0 = vpop.f32.mrf.mxu3 }
 0x1be   : > { %v1191_v2 = vpop.f32.mrf.mxu2 }
 0x1bf   : > { %v1192_v41 = vadd.f32 %v1191_v2, %v969_v39  ;;  %v1959_v50 = vpop.f32.mrf.mxu1  ;;  %v9989_v39 = vld [vmem:[#allocation15_spill] sm:$0xff]  ;;  %v9991_v2 = vld [vmem:[#allocation14_spill] sm:$0xff] }
 0x1c1   : > { %v1462_v26 = vadd.f32 %v1461_v0, %v1192_v41  ;;  %v1749_v7 = vpop.f32.mrf.mxu0  ;;  %v9990_v0 = vand.u32 4294901760, %v9989_v39 }
 0x1c2   : > { %1562 = vmatmul.f32.gmra.mxu3 %v9984_v19  ;;  %2022 = vmatmul.f32.gmra.mxu1 %v9985_v14 }
 0x1c3   : > { %v1746_v60 = vadd.f32 %v1745_v31, %v1462_v26  ;;  %1275 = vmatmul.f32.gmra.mxu2 %v9983_v9 }
 0x1c4   : > { %1812 = vmatmul.f32.gmra.mxu0 %v9985_v14 }
 0x1c5   : > { %v7137_v20 = vadd.f32 %v1955_v36, %v1746_v60  ;;  %v1467_v12 = vpop.f32.mrf.mxu3  ;;  %v9992_v60 = vld [vmem:[#allocation17_spill] sm:$0xff] }
 0x1c6   : > { %v1196_v10 = vpop.f32.mrf.mxu2 }
 0x1c7   : > { %v1197_v52 = vadd.f32 %v1196_v10, %v973_v18  ;;  %v1963_v59 = vpop.f32.mrf.mxu1  ;;  %v9993_v18 = vand.u32 4294901760, %v9992_v60 }
 0x1c9   : > { %v1468_v22 = vadd.f32 %v1467_v12, %v1197_v52  ;;  %v1753_v44 = vpop.f32.mrf.mxu0  ;;  %v9994_v12 = vld [vmem:[#allocation16_spill] sm:$0xff] }
 0x1ca   : > { %1568 = vmatmul.f32.gmra.mxu3 %v9987_v3  ;;  %2026 = vmatmul.f32.gmra.mxu1 %v9988_v53 }
 0x1cb   : > { %v1750_v24 = vadd.f32 %v1749_v7, %v1468_v22  ;;  %1280 = vmatmul.f32.gmra.mxu2 %v9986_v51 }
 0x1cc   : > { %1816 = vmatmul.f32.gmra.mxu0 %v9988_v53  ;;  %v9995_v53 = vld [vmem:[#allocation19_spill] sm:$0xff] }
 0x1cd   : > { %v7146_v27 = vadd.f32 %v1959_v50, %v1750_v24  ;;  %v1473_v36 = vpop.f32.mrf.mxu3  ;;  %v9996_v24 = vand.u32 4294901760, %v9995_v53 }
 0x1ce   : > { %v1201_v31 = vpop.f32.mrf.mxu2 }
 0x1cf   : > { %v1202_v48 = vadd.f32 %v1201_v31, %v977_v57  ;;  %v1967_v54 = vpop.f32.mrf.mxu1  ;;  %v9997_v57 = vld [vmem:[#allocation18_spill] sm:$0xff] }
 0x1d1   : > { %v1474_v61 = vadd.f32 %v1473_v36, %v1202_v48  ;;  %v1757_v32 = vpop.f32.mrf.mxu0 }
 0x1d2   : > { %1574 = vmatmul.f32.gmra.mxu3 %v9990_v0  ;;  %2030 = vmatmul.f32.gmra.mxu1 %v9991_v2  ;;  %v9998_v0 = vld [vmem:[#allocation21_spill] sm:$0xff] }
 0x1d3   : > { %v1754_v41 = vadd.f32 %v1753_v44, %v1474_v61  ;;  %1285 = vmatmul.f32.gmra.mxu2 %v9989_v39 }
 0x1d4   : > { %1820 = vmatmul.f32.gmra.mxu0 %v9991_v2  ;;  %v9999_v2 = vand.u32 4294901760, %v9998_v0 }
 0x1d5   : > { %v7155_v42 = vadd.f32 %v1963_v59, %v1754_v41  ;;  %v1479_v50 = vpop.f32.mrf.mxu3  ;;  %v10000_v41 = vld [vmem:[#allocation20_spill] sm:$0xff] }
 0x1d6   : > { %v1206_v26 = vpop.f32.mrf.mxu2 }
 0x1d7   : > { %v1207_v7 = vadd.f32 %v1206_v26, %v981_v21  ;;  %v1971_v9 = vpop.f32.mrf.mxu1 }
 0x1d9   : > { %v1480_v19 = vadd.f32 %v1479_v50, %v1207_v7  ;;  %v1761_v14 = vpop.f32.mrf.mxu0 }
 0x1da   : > { %1580 = vmatmul.f32.gmra.mxu3 %v9993_v18  ;;  %2034 = vmatmul.f32.gmra.mxu1 %v9994_v12 }
 0x1db   : > { %v1758_v10 = vadd.f32 %v1757_v32, %v1480_v19  ;;  %1290 = vmatmul.f32.gmra.mxu2 %v9992_v60  ;;  %v10001_v60 = vld [vmem:[#allocation23_spill] sm:$0xff] }
 0x1dc   : > { %1824 = vmatmul.f32.gmra.mxu0 %v9994_v12  ;;  %v10002_v18 = vand.u32 4294901760, %v10001_v60  ;;  %v10003_v12 = vld [vmem:[#allocation22_spill] sm:$0xff] }
 0x1dd   : > { %v7164_v56 = vadd.f32 %v1967_v54, %v1758_v10  ;;  %v1485_v52 = vpop.f32.mrf.mxu3 }
 0x1de   : > { %v1211_v59 = vpop.f32.mrf.mxu2 }
 0x1df   : > { %v1212_v22 = vadd.f32 %v1211_v59, %v985_v33  ;;  %v1975_v44 = vpop.f32.mrf.mxu1 }
 0x1e1   : > { %v1486_v51 = vadd.f32 %v1485_v52, %v1212_v22  ;;  %v1765_v3 = vpop.f32.mrf.mxu0 }
 0x1e2   : > { %1586 = vmatmul.f32.gmra.mxu3 %v9996_v24  ;;  %2038 = vmatmul.f32.gmra.mxu1 %v9997_v57  ;;  %v10006_v24 = vld [vmem:[#allocation24_spill] sm:$0xff] }
 0x1e3   : > { %v1762_v36 = vadd.f32 %v1761_v14, %v1486_v51  ;;  %1295 = vmatmul.f32.gmra.mxu2 %v9995_v53 }
 0x1e4   : > { %1828 = vmatmul.f32.gmra.mxu0 %v9997_v57 }
 0x1e5   : > { %v7173_v6 = vadd.f32 %v1971_v9, %v1762_v36  ;;  %v1491_v31 = vpop.f32.mrf.mxu3 }
 0x1e6   : > { %v1216_v48 = vpop.f32.mrf.mxu2 }
 0x1e7   : > { %v1217_v54 = vadd.f32 %v1216_v48, %v989_v49  ;;  %v1979_v61 = vpop.f32.mrf.mxu1 }
 0x1e9   : > { %v1492_v32 = vadd.f32 %v1491_v31, %v1217_v54  ;;  %v1769_v39 = vpop.f32.mrf.mxu0 }
 0x1ea   : > { %1592 = vmatmul.f32.gmra.mxu3 %v9999_v2  ;;  %2042 = vmatmul.f32.gmra.mxu1 %v10000_v41 }
 0x1eb   : > { %v1766_v21 = vadd.f32 %v1765_v3, %v1492_v32  ;;  %1300 = vmatmul.f32.gmra.mxu2 %v9998_v0  ;;  %v10004_v3 = vld [vmem:[#allocation25_spill] sm:$0xff]  ;;  %v10007_v32 = vld [vmem:[#allocation27_spill] sm:$0xff]  ;;  %v10009_v0 = vld [vmem:[#allocation26_spill] sm:$0xff] }
 0x1ec   : > { %1832 = vmatmul.f32.gmra.mxu0 %v10000_v41  ;;  %v10005_v53 = vand.u32 4294901760, %v10004_v3 }
 0x1ed   : > { %v7182_v34 = vadd.f32 %v1975_v44, %v1766_v21  ;;  %v1497_v50 = vpop.f32.mrf.mxu3 }
 0x1ee   : > { %v1221_v26 = vpop.f32.mrf.mxu2 }
 0x1ef   : > { %v1222_v7 = vadd.f32 %v1221_v26, %v993_v63  ;;  %v1983_v9 = vpop.f32.mrf.mxu1 }
 0x1f1   : > { %v1498_v19 = vadd.f32 %v1497_v50, %v1222_v7  ;;  %v1773_v14 = vpop.f32.mrf.mxu0 }
 0x1f2   : > { %1598 = vmatmul.f32.gmra.mxu3 %v10002_v18  ;;  %2046 = vmatmul.f32.gmra.mxu1 %v10003_v12 }
 0x1f3   : > { %v1770_v10 = vadd.f32 %v1769_v39, %v1498_v19  ;;  %1305 = vmatmul.f32.gmra.mxu2 %v10001_v60  ;;  %v10008_v39 = vand.u32 4294901760, %v10007_v32 }
 0x1f4   : > { %1836 = vmatmul.f32.gmra.mxu0 %v10003_v12 }
 0x1f5   : > { %v7191_v55 = vadd.f32 %v1979_v61, %v1770_v10  ;;  %v1503_v33 = vpop.f32.mrf.mxu3 }
 0x1f6   : > { %v1226_v52 = vpop.f32.mrf.mxu2 }
 0x1f7   : > { %v1227_v59 = vadd.f32 %v1226_v52, %v997_v16  ;;  %v1987_v22 = vpop.f32.mrf.mxu1 }
 0x1f9   : > { %v1504_v44 = vadd.f32 %v1503_v33, %v1227_v59  ;;  %v1777_v51 = vpop.f32.mrf.mxu0  ;;  %v10013_v59 = vld [vmem:[#allocation31_spill] sm:$0xff] }
 0x1fa   : > { %1604 = vmatmul.f32.gmra.mxu3 %v10005_v53  ;;  %2050 = vmatmul.f32.gmra.mxu1 %v10006_v24 }
 0x1fb   : > { %v1774_v57 = vadd.f32 %v1773_v14, %v1504_v44  ;;  %1310 = vmatmul.f32.gmra.mxu2 %v10004_v3  ;;  %v10012_v14 = vld [vmem:[#allocation28_spill] sm:$0xff]  ;;  %v10015_v44 = vld [vmem:[#allocation30_spill] sm:$0xff] }
 0x1fc   : > { %1840 = vmatmul.f32.gmra.mxu0 %v10006_v24 }
 0x1fd   : > { %v7200_v25 = vadd.f32 %v1983_v9, %v1774_v57  ;;  %v1509_v36 = vpop.f32.mrf.mxu3  ;;  %v10010_v9 = vld [vmem:[#allocation29_spill] sm:$0xff] }
 0x1fe   : > { %v1231_v49 = vpop.f32.mrf.mxu2  ;;  %v10011_v19 = vand.u32 4294901760, %v10010_v9 }
 0x1ff   : > { %v1232_v31 = vadd.f32 %v1231_v49, %v1001_v43  ;;  %v1991_v48 = vpop.f32.mrf.mxu1  ;;  %v10016_v49 = vld [vmem:[#allocation33_spill] sm:$0xff] }
 0x201   : > { %v1510_v54 = vadd.f32 %v1509_v36, %v1232_v31  ;;  %v1781_v61 = vpop.f32.mrf.mxu0  ;;  %v10017_v31 = vand.u32 4294901760, %v10016_v49 }
 0x202   : > { %1610 = vmatmul.f32.gmra.mxu3 %v10008_v39  ;;  %2054 = vmatmul.f32.gmra.mxu1 %v10009_v0 }
 0x203   : > { %v1778_v2 = vadd.f32 %v1777_v51, %v1510_v54  ;;  %1315 = vmatmul.f32.gmra.mxu2 %v10007_v32 }
 0x204   : > { %1844 = vmatmul.f32.gmra.mxu0 %v10009_v0 }
 0x205   : > { %v7209_v5 = vadd.f32 %v1987_v22, %v1778_v2  ;;  %v1515_v41 = vpop.f32.mrf.mxu3  ;;  %v10014_v22 = vand.u32 4294901760, %v10013_v59 }
 0x206   : > { %v1236_v21 = vpop.f32.mrf.mxu2 }
 0x207   : > { %v1237_v63 = vadd.f32 %v1236_v21, %v1005_v4  ;;  %v1995_v50 = vpop.f32.mrf.mxu1 }
 0x209   : > { %v1516_v26 = vadd.f32 %v1515_v41, %v1237_v63  ;;  %v1785_v7 = vpop.f32.mrf.mxu0  ;;  %v10019_v41 = vld [vmem:[#allocation35_spill] sm:$0xff]  ;;  %v10021_v63 = vld [vmem:[#allocation34_spill] sm:$0xff] }
 0x20a   : > { %1616 = vmatmul.f32.gmra.mxu3 %v10011_v19  ;;  %2058 = vmatmul.f32.gmra.mxu1 %v10012_v14  ;;  %v10020_v21 = vand.u32 4294901760, %v10019_v41 }
 0x20b   : > { %v1782_v60 = vadd.f32 %v1781_v61, %v1516_v26  ;;  %1320 = vmatmul.f32.gmra.mxu2 %v10010_v9 }
 0x20c   : > { %1848 = vmatmul.f32.gmra.mxu0 %v10012_v14 }
 0x20d   : > { %v7218_v37 = vadd.f32 %v1991_v48, %v1782_v60  ;;  %v1521_v18 = vpop.f32.mrf.mxu3  ;;  %v10018_v48 = vld [vmem:[#allocation32_spill] sm:$0xff] }
 0x20e   : > { %v1241_v12 = vpop.f32.mrf.mxu2 }
 0x20f   : > { %v1242_v10 = vadd.f32 %v1241_v12, %v1009_v47  ;;  %v1999_v16 = vpop.f32.mrf.mxu1  ;;  %v10023_v47 = vld [vmem:[#allocation37_spill] sm:$0xff]  ;;  %v10025_v12 = vld [vmem:[#allocation36_spill] sm:$0xff] }
 0x211   : > { %v1522_v33 = vadd.f32 %v1521_v18, %v1242_v10  ;;  %v1789_v52 = vpop.f32.mrf.mxu0  ;;  %v10024_v18 = vand.u32 4294901760, %v10023_v47 }
 0x212   : > { %1622 = vmatmul.f32.gmra.mxu3 %v10014_v22  ;;  %2062 = vmatmul.f32.gmra.mxu1 %v10015_v44 }
 0x213   : > { %v1786_v51 = vadd.f32 %v1785_v7, %v1522_v33  ;;  %1325 = vmatmul.f32.gmra.mxu2 %v10013_v59  ;;  %v10022_v7 = vld [vmem:[#allocation42_spill] sm:$0xff]  ;;  %v10026_v59 = vld [vmem:[#allocation48_spill] sm:$0xff] }
 0x214   : > { %1852 = vmatmul.f32.gmra.mxu0 %v10015_v44 }
 0x215   : > { %v7227_v23 = vadd.f32 %v1995_v50, %v1786_v51  ;;  %v1527_v3 = vpop.f32.mrf.mxu3 }
 0x216   : > { %v1246_v53 = vpop.f32.mrf.mxu2 }
 0x217   : > { %v1247_v24 = vadd.f32 %v1246_v53, %v1013_v40  ;;  %v2003_v57 = vpop.f32.mrf.mxu1 }
 0x219   : > { %v1528_v43 = vadd.f32 %v1527_v3, %v1247_v24  ;;  %v1793_v36 = vpop.f32.mrf.mxu0  ;;  %v10027_v3 = vld [vmem:[#allocation40_spill] sm:$0xff]  ;;  %v10029_v24 = vld [vmem:[#allocation38_spill] sm:$0xff] }
 0x21a   : > { %1628 = vmatmul.f32.gmra.mxu3 %v10017_v31  ;;  %2066 = vmatmul.f32.gmra.mxu1 %v10018_v48  ;;  %v10028_v53 = vand.u32 4294901760, %v10027_v3  ;;  %v10030_v31 = vld [vmem:[#allocation55_spill] sm:$0xff] }
 0x21b   : > { %v1790_v54 = vadd.f32 %v1789_v52, %v1528_v43  ;;  %1330 = vmatmul.f32.gmra.mxu2 %v10016_v49 }
 0x21c   : > { %1856 = vmatmul.f32.gmra.mxu0 %v10018_v48 }
 0x21d   : > { %v7236_v1 = vadd.f32 %v1999_v16, %v1790_v54  ;;  %v1533_v61 = vpop.f32.mrf.mxu3 }
 0x21e   : > { %v1251_v32 = vpop.f32.mrf.mxu2 }
 0x21f   : > { %v1252_v39 = vadd.f32 %v1251_v32, %v1017_v35  ;;  %v2007_v0 = vpop.f32.mrf.mxu1  ;;  %v10031_v32 = vld [vmem:[#allocation46_spill] sm:$0xff] }
 0x221   : > { %v1534_v2 = vadd.f32 %v1533_v61, %v1252_v39  ;;  %v1797_v4 = vpop.f32.mrf.mxu0  ;;  %v10032_v39 = vand.u32 4294901760, %v10031_v32 }
 0x222   : > { %1634 = vmatmul.f32.gmra.mxu3 %v10020_v21  ;;  %2070 = vmatmul.f32.gmra.mxu1 %v10021_v63 }
 0x223   : > { %v1794_v50 = vadd.f32 %v1793_v36, %v1534_v2  ;;  %1335 = vmatmul.f32.gmra.mxu2 %v10019_v41 }
 0x224   : > { %1860 = vmatmul.f32.gmra.mxu0 %v10021_v63  ;;  %v10034_v63 = vld [vmem:[#allocation61_spill] sm:$0xff] }
 0x225   : > { %v7243_v26 = vadd.f32 %v2003_v57, %v1794_v50  ;;  %v1539_v45 = vpop.f32.mrf.mxu3 }
 0x226   : > { %v1256_v58 = vpop.f32.mrf.mxu2 }
 0x227   : > { %v1257_v9 = vadd.f32 %v1256_v58, %v10022_v7  ;;  %v2011_v19 = vpop.f32.mrf.mxu1 }
 0x229   : > { %v1540_v14 = vadd.f32 %v1539_v45, %v1257_v9  ;;  %v1801_v60 = vpop.f32.mrf.mxu0  ;;  %v10035_v9 = vld [vmem:[#allocation53_spill] sm:$0xff] }
 0x22a   : > { %1640 = vmatmul.f32.gmra.mxu3 %v10024_v18  ;;  %2074 = vmatmul.f32.gmra.mxu1 %v10025_v12 }
 0x22b   : > { %v1798_v10 = vadd.f32 %v1797_v4, %v1540_v14  ;;  %1340 = vmatmul.f32.gmra.mxu2 %v10023_v47  ;;  %v10037_v14 = vld [vmem:[#allocation50_spill] sm:$0xff] }
 0x22c   : > { %1864 = vmatmul.f32.gmra.mxu0 %v10025_v12 }
 0x22d   : > { %v7251_v16 = vadd.f32 %v2007_v0, %v1798_v10  ;;  %v1545_v33 = vpop.f32.mrf.mxu3  ;;  %v10033_v0 = vld [vmem:[#allocation44_spill] sm:$0xff]  ;;  %v10038_v10 = vld [vmem:[#allocation66_spill] sm:$0xff] }
 0x22e   : > { %v1261_v52 = vpop.f32.mrf.mxu2 }
 0x22f   : > { %v1262_v22 = vadd.f32 %v1261_v52, %v10026_v59  ;;  %v2015_v44 = vpop.f32.mrf.mxu1 }
 0x231   : > { %v1546_v51 = vadd.f32 %v1545_v33, %v1262_v22  ;;  %v1805_v40 = vpop.f32.mrf.mxu0 }
 0x232   : > { %1646 = vmatmul.f32.gmra.mxu3 %v10028_v53  ;;  %2078 = vmatmul.f32.gmra.mxu1 %v10029_v24 }
 0x233   : > { %v1802_v57 = vadd.f32 %v1801_v60, %v1546_v51  ;;  %1345 = vmatmul.f32.gmra.mxu2 %v10027_v3  ;;  %v10039_v51 = vld [vmem:[#allocation59_spill] sm:$0xff]  ;;  %v10041_v3 = vld [vmem:[#allocation57_spill] sm:$0xff] }
 0x234   : > { %1868 = vmatmul.f32.gmra.mxu0 %v10029_v24 }
 0x235   : > { %v7259_v43 = vadd.f32 %v2011_v19, %v1802_v57  ;;  %v1551_v36 = vpop.f32.mrf.mxu3  ;;  %v10036_v19 = vand.u32 4294901760, %v10035_v9 }
 0x236   : > { %v1266_v49 = vpop.f32.mrf.mxu2 }
 0x237   : > { %v1267_v48 = vadd.f32 %v1266_v49, %v10030_v31  ;;  %v2019_v54 = vpop.f32.mrf.mxu1  ;;  %v6025_v49 = vld [vmem:[%s6215_s22 + $0x10] sm:$0xff] }
 0x239   : > { %v1552_v35 = vadd.f32 %v1551_v36, %v1267_v48  ;;  %v1809_v61 = vpop.f32.mrf.mxu0  ;;  %v4058_v48 = vand.u32 4294901760, %v6025_v49 }
 0x23a   : > { %1652 = vmatmul.f32.gmra.mxu3 %v10032_v39  ;;  %2082 = vmatmul.f32.gmra.mxu1 %v10033_v0 }
 0x23b   : > { %v1806_v2 = vadd.f32 %v1805_v40, %v1552_v35  ;;  %1350 = vmatmul.f32.gmra.mxu2 %v10031_v32  ;;  %v10040_v40 = vand.u32 4294901760, %v10039_v51  ;;  %4059 = vmatpush.msrb.mxu0 %v4058_v48  ;;  %v4461_v32 = vsub.f32 %v6025_v49, %v4058_v48 }
 0x23c   : > { %1872 = vmatmul.f32.gmra.mxu0 %v10033_v0 }
 0x23d   : > { %v7267_v4 = vadd.f32 %v2015_v44, %v1806_v2  ;;  %v1557_v41 = vpop.f32.mrf.mxu3  ;;  %v5928_v44 = vld [vmem:[%s6221_s25 + $0x20] sm:$0xff]  ;;  %v5929_v2 = vld [vmem:[%s6221_s25 + $0x28] sm:$0xff] }
 0x23e   : > { %v1271_v21 = vpop.f32.mrf.mxu2  ;;  %v2103_v24 = vsel %vm354_vm0, %v5928_v44, 0  ;;  %v5930_v44 = vld [vmem:[%s6221_s25 + $0x30] sm:$0xff] }
 0x23f   : > { %v1272_v50 = vadd.f32 %v1271_v21, %v10034_v63  ;;  %v2023_v45 = vpop.f32.mrf.mxu1  ;;  %v10044_v63 = vld [vmem:[#allocation63_spill] sm:$0xff] }
 0x241   : > { %v1558_v58 = vadd.f32 %v1557_v41, %v1272_v50  ;;  %v1813_v7 = vpop.f32.mrf.mxu0  ;;  %v10042_v41 = vld [vmem:[#allocation65_spill] sm:$0xff]  ;;  %v4462_v50 = vand.u32 4294901760, %v4461_v32 }
 0x242   : > { %1658 = vmatmul.f32.gmra.mxu3 %v10036_v19  ;;  %2086 = vmatmul.f32.gmra.mxu1 %v10037_v14  ;;  %v10043_v21 = vand.u32 4294901760, %v10042_v41 }
 0x243   : > { %v1810_v60 = vadd.f32 %v1809_v61, %v1558_v58  ;;  %1355 = vmatmul.f32.gmra.mxu2 %v10035_v9  ;;  %v7289_v61 = vand.u32 4294901760, %v2103_v24  ;;  %v2106_v58 = vsel %vm354_vm0, %v5929_v2, 0 }
 0x244   : > { %1876 = vmatmul.f32.gmra.mxu0 %v10037_v14 }
 0x245   : > { %v7275_v47 = vadd.f32 %v2019_v54, %v1810_v60  ;;  %v1563_v18 = vpop.f32.mrf.mxu3 }
 0x246   : > { %v1276_v12 = vpop.f32.mrf.mxu2 }
 0x247   : > { %v1277_v33 = vadd.f32 %v1276_v12, %v10038_v10  ;;  %v2027_v52 = vpop.f32.mrf.mxu1 }
 0x249   : > { %v1564_v59 = vadd.f32 %v1563_v18, %v1277_v33  ;;  %v1817_v22 = vpop.f32.mrf.mxu0  ;;  %v7302_v33 = vand.u32 4294901760, %v2106_v58 }
 0x24a   : > { %1664 = vmatmul.f32.gmra.mxu3 %v10040_v40  ;;  %2090 = vmatmul.f32.gmra.mxu1 %v10041_v3 }
 0x24b   : > { %v1814_v53 = vadd.f32 %v1813_v7, %v1564_v59  ;;  %1360 = vmatmul.f32.gmra.mxu2 %v10039_v51  ;;  %v4463_v7 = vsub.f32 %v4461_v32, %v4462_v50  ;;  %v10045_v51 = vld [vmem:[#allocation70_spill] sm:$0xff] }
 0x24c   : > { %1880 = vmatmul.f32.gmra.mxu0 %v10041_v3  ;;  %v10046_v40 = vand.u32 4294901760, %v10045_v51  ;;  %v10047_v3 = vld [vmem:[#allocation68_spill] sm:$0xff] }
 0x24d   : > { %v7285_v57 = vadd.f32 %v2023_v45, %v1814_v53  ;;  %v1569_v36 = vpop.f32.mrf.mxu3  ;;  %v4464_v60 = vand.u32 4294901760, %v4463_v7  ;;  %v5931_v7 = vld [vmem:[%s6221_s25 + $0x38] sm:$0xff] }
 0x24e   : > { %v1281_v31 = vpop.f32.mrf.mxu2 }
 0x24f   : > { %v1282_v54 = vadd.f32 %v1281_v31, %v6822_v62  ;;  %v2031_v35 = vpop.f32.mrf.mxu1  ;;  %v2264_v62 = vsub.f32 %v2103_v24, %v7289_v61  ;;  %4465 = vmatpush.msrb.mxu1 %v4464_v60  ;;  %v2109_v24 = vsel %vm354_vm0, %v5930_v44, 0  ;;  %v10049_v44 = vld [vmem:[#allocation72_spill] sm:$0xff] }
 0x251   : > { %v1570_v39 = vadd.f32 %v1569_v36, %v1282_v54  ;;  %v1821_v0 = vpop.f32.mrf.mxu0  ;;  %v2265_v10 = vand.u32 4294901760, %v2264_v62  ;;  %v10048_v54 = vld [vmem:[#allocation71_spill] sm:$0xff] }
 0x252   : > { %1670 = vmatmul.f32.gmra.mxu3 %v10043_v21  ;;  %2094 = vmatmul.f32.gmra.mxu1 %v10044_v63 }
 0x253   : > { %v1818_v45 = vadd.f32 %v1817_v22, %v1570_v39  ;;  %1365 = vmatmul.f32.gmra.mxu2 %v10042_v41  ;;  %v2266_v53 = vsub.f32 %v2264_v62, %v2265_v10 }
 0x254   : > { %1884 = vmatmul.f32.gmra.mxu0 %v10044_v63 }
 0x255   : > { %v7299_v9 = vadd.f32 %v2027_v52, %v1818_v45  ;;  %v1575_v19 = vpop.f32.mrf.mxu3  ;;  %v2267_v2 = vand.u32 4294901760, %v2266_v53 }
 0x256   : > { %v1286_v14 = vpop.f32.mrf.mxu2 }
 0x257   : > { %v1287_v18 = vadd.f32 %v1286_v14, %v6838_v11  ;;  %v2035_v12 = vpop.f32.mrf.mxu1  ;;  %v2272_v11 = vsub.f32 %v2106_v58, %v7302_v33  ;;  %v2112_v14 = vsel %vm354_vm0, %v5931_v7, 0 }
 0x259   : > { %v1576_v59 = vadd.f32 %v1575_v19, %v1287_v18  ;;  %v1825_v22 = vpop.f32.mrf.mxu0  ;;  %v2273_v21 = vand.u32 4294901760, %v2272_v11 }
 0x25a   : > { %1676 = vmatmul.f32.gmra.mxu3 %v10046_v40  ;;  %2098 = vmatmul.f32.gmra.mxu1 %v10047_v3 }
 0x25b   : > { %v1822_v52 = vadd.f32 %v1821_v0, %v1576_v59  ;;  %1370 = vmatmul.f32.gmra.mxu2 %v10045_v51  ;;  %v7315_v0 = vand.u32 4294901760, %v2109_v24  ;;  %v2274_v19 = vsub.f32 %v2272_v11, %v2273_v21 }
 0x25c   : > { %1888 = vmatmul.f32.gmra.mxu0 %v10047_v3  ;;  %v7324_v3 = vand.u32 4294901760, %v2112_v14 }
 0x25d   : > { %v7312_v36 = vadd.f32 %v2031_v35, %v1822_v52  ;;  %v1581_v49 = vpop.f32.mrf.mxu3  ;;  %v2280_v35 = vsub.f32 %v2109_v24, %v7315_v0  ;;  %v5932_v24 = vld [vmem:[%s6221_s25 + $0x40] sm:$0xff] }
 0x25e   : > { %v1291_v31 = vpop.f32.mrf.mxu2 }
 0x25f   : > { %v1292_v39 = vadd.f32 %v1291_v31, %v10048_v54  ;;  %v2039_v41 = vpop.f32.mrf.mxu1  ;;  %v2281_v40 = vand.u32 4294901760, %v2280_v35  ;;  %v10050_v54 = vld [vmem:[#allocation73_spill] sm:$0xff] }
 0x261   : > { %v1582_v63 = vadd.f32 %v1581_v49, %v1292_v39  ;;  %v1829_v45 = vpop.f32.mrf.mxu0 }
 0x262   : > { %2670 = vmatmul.f32.vlgmr.msra.gmra.mxu3 %v7289_v61  ;;  %3141 = vmatmul.f32.vlgmr.msra.gmra.mxu1 %v2265_v10  ;;  %v2275_v10 = vand.u32 4294901760, %v2274_v19  ;;  %v5933_v19 = vld [vmem:[%s6221_s25 + $0x48] sm:$0xff] }
 0x263   : > { %v1826_v58 = vadd.f32 %v1825_v22, %v1582_v63  ;;  %2268 = vmatmul.f32.vlgmr.msra.gmra.mxu2 %v2267_v2  ;;  %4934 = vmatpush.msra.mxu3 %v4058_v48 }
 0x264   : > { %2882 = vmatmul.f32.vlgmr.msra.gmra.mxu0 %v2264_v62  ;;  %4676 = vmatpush.msra.mxu2 %v4461_v32  ;;  %v2282_v62 = vsub.f32 %v2280_v35, %v2281_v40 }
 0x265   : > { %v7321_v60 = vadd.f32 %v2035_v12, %v1826_v58  ;;  %v1587_v18 = vpop.f32.mrf.mxu3  ;;  %5242 = vmatpush.msra.mxu0 %v4462_v50  ;;  %5452 = vmatpush.msra.mxu1 %v4058_v48  ;;  %v2288_v48 = vsub.f32 %v2112_v14, %v7324_v3  ;;  %v2115_v50 = vsel %vm354_vm0, %v5932_v24, 0 }
 0x266   : > { %v1296_v59 = vpop.f32.mrf.mxu2  ;;  %v2283_v2 = vand.u32 4294901760, %v2282_v62  ;;  %v7333_v58 = vand.u32 4294901760, %v2115_v50 }
 0x267   : > { %v1297_v51 = vadd.f32 %v1296_v59, %v10049_v44  ;;  %v2043_v22 = vpop.f32.mrf.mxu1  ;;  %v2289_v7 = vand.u32 4294901760, %v2288_v48 }
 0x268   : > { %10051 = vst [vmem:[#allocation39_spill] sm:$0xff] %v7333_v58  ;;  %v2296_v14 = vsub.f32 %v2115_v50, %v7333_v58 }
 0x269   : > { %v1588_v52 = vadd.f32 %v1587_v18, %v1297_v51  ;;  %v1833_v53 = vpop.f32.mrf.mxu0  ;;  %v2118_v18 = vsel %vm354_vm0, %v5933_v19, 0  ;;  %v10054_v19 = vld [vmem:[#allocation75_spill] sm:$0xff] }
 0x26a   : > { %2674 = vmatmul.f32.gmra.mxu3 %v7302_v33  ;;  %3147 = vmatmul.f32.gmra.mxu1 %v2273_v21  ;;  %v2297_v62 = vand.u32 4294901760, %v2296_v14 }
 0x26b   : > { %v1830_v32 = vadd.f32 %v1829_v45, %v1588_v52  ;;  %2276 = vmatmul.f32.gmra.mxu2 %v2275_v10  ;;  %v10052_v10 = vld [vmem:[#allocation74_spill] sm:$0xff] }
 0x26c   : > { %2887 = vmatmul.f32.gmra.mxu0 %v2272_v11 }
 0x26d   : > { %v7330_v12 = vadd.f32 %v2039_v41, %v1830_v32  ;;  %v1593_v49 = vpop.f32.mrf.mxu3  ;;  %v2290_v41 = vsub.f32 %v2288_v48, %v2289_v7 }
 0x26e   : > { %v1301_v31 = vpop.f32.mrf.mxu2 }
 0x26f   : > { %v1302_v39 = vadd.f32 %v1301_v31, %v10050_v54  ;;  %v2047_v63 = vpop.f32.mrf.mxu1  ;;  %v2291_v24 = vand.u32 4294901760, %v2290_v41  ;;  %v5934_v31 = vld [vmem:[%s6221_s25 + $0x50] sm:$0xff] }
 0x270   : > { %v2121_v54 = vsel %vm354_vm0, %v5934_v31, 0 }
 0x271   : > { %v1594_v21 = vadd.f32 %v1593_v49, %v1302_v39  ;;  %v1837_v45 = vpop.f32.mrf.mxu0  ;;  %v7342_v49 = vand.u32 4294901760, %v2118_v18 }
 0x272   : > { %2678 = vmatmul.f32.gmra.mxu3 %v7315_v0  ;;  %3153 = vmatmul.f32.gmra.mxu1 %v2281_v40 }
 0x273   : > { %v1834_v11 = vadd.f32 %v1833_v53, %v1594_v21  ;;  %2284 = vmatmul.f32.gmra.mxu2 %v2283_v2  ;;  %10053 = vst [vmem:[#allocation52_spill] sm:$0xff] %v7342_v49  ;;  %v2304_v50 = vsub.f32 %v2118_v18, %v7342_v49 }
 0x274   : > { %2892 = vmatmul.f32.gmra.mxu0 %v2280_v35 }
 0x275   : > { %v7339_v59 = vadd.f32 %v2043_v22, %v1834_v11  ;;  %v1599_v44 = vpop.f32.mrf.mxu3  ;;  %v2298_v22 = vsub.f32 %v2296_v14, %v2297_v62 }
 0x276   : > { %v1306_v51 = vpop.f32.mrf.mxu2 }
 0x277   : > { %v1307_v52 = vadd.f32 %v1306_v51, %v10052_v10  ;;  %v2051_v32 = vpop.f32.mrf.mxu1  ;;  %v2299_v41 = vand.u32 4294901760, %v2298_v22  ;;  %v2305_v51 = vand.u32 4294901760, %v2304_v50  ;;  %v7351_v10 = vand.u32 4294901760, %v2121_v54  ;;  %v10057_v22 = vld [vmem:[#allocation76_spill] sm:$0xff] }
 0x279   : > { %v1600_v40 = vadd.f32 %v1599_v44, %v1307_v52  ;;  %v1841_v53 = vpop.f32.mrf.mxu0  ;;  %10055 = vst [vmem:[#allocation49_spill] sm:$0xff] %v7351_v10  ;;  %v5935_v52 = vld [vmem:[%s6221_s25 + $0x58] sm:$0xff]  ;;  %v2312_v18 = vsub.f32 %v2121_v54, %v7351_v10 }
 0x27a   : > { %2682 = vmatmul.f32.gmra.mxu3 %v7324_v3  ;;  %3159 = vmatmul.f32.gmra.mxu1 %v2289_v7 }
 0x27b   : > { %v1838_v35 = vadd.f32 %v1837_v45, %v1600_v40  ;;  %2292 = vmatmul.f32.gmra.mxu2 %v2291_v24  ;;  %v2124_v24 = vsel %vm354_vm0, %v5935_v52, 0 }
 0x27c   : > { %2897 = vmatmul.f32.gmra.mxu0 %v2288_v48 }
 0x27d   : > { %v7348_v39 = vadd.f32 %v2047_v63, %v1838_v35  ;;  %v1605_v2 = vpop.f32.mrf.mxu3  ;;  %v2306_v63 = vsub.f32 %v2304_v50, %v2305_v51 }
 0x27e   : > { %v1311_v21 = vpop.f32.mrf.mxu2 }
 0x27f   : > { %v1312_v11 = vadd.f32 %v1311_v21, %v10054_v19  ;;  %v2055_v44 = vpop.f32.mrf.mxu1  ;;  %v2307_v21 = vand.u32 4294901760, %v2306_v63 }
 0x281   : > { %v1606_v7 = vadd.f32 %v1605_v2, %v1312_v11  ;;  %v1845_v45 = vpop.f32.mrf.mxu0  ;;  %v2313_v11 = vand.u32 4294901760, %v2312_v18 }
 0x282   : > { %2686 = vmatmul.f32.gmra.mxu3 %v7333_v58  ;;  %3165 = vmatmul.f32.gmra.mxu1 %v2297_v62  ;;  %v7360_v58 = vand.u32 4294901760, %v2124_v24 }
 0x283   : > { %v1842_v48 = vadd.f32 %v1841_v53, %v1606_v7  ;;  %2300 = vmatmul.f32.gmra.mxu2 %v2299_v41  ;;  %v5936_v41 = vld [vmem:[%s6221_s25 + $0x60] sm:$0xff] }
 0x284   : > { %2902 = vmatmul.f32.gmra.mxu0 %v2296_v14  ;;  %10058 = vst [vmem:[#allocation45_spill] sm:$0xff] %v7360_v58  ;;  %v2320_v54 = vsub.f32 %v2124_v24, %v7360_v58  ;;  %v2127_v7 = vsel %vm354_vm0, %v5936_v41, 0 }
 0x285   : > { %v7357_v40 = vadd.f32 %v2051_v32, %v1842_v48  ;;  %v1611_v31 = vpop.f32.mrf.mxu3  ;;  %v2314_v32 = vsub.f32 %v2312_v18, %v2313_v11 }
 0x286   : > { %v1316_v35 = vpop.f32.mrf.mxu2 }
 0x287   : > { %10056 = vst [vmem:[#allocation47_spill] sm:$0xff] %v7357_v40  ;;  %v1317_v2 = vadd.f32 %v1316_v35, %v10057_v22  ;;  %v2059_v19 = vpop.f32.mrf.mxu1  ;;  %v10060_v35 = vld [vmem:[#allocation77_spill] sm:$0xff]  ;;  %v2315_v22 = vand.u32 4294901760, %v2314_v32  ;;  %v2321_v40 = vand.u32 4294901760, %v2320_v54 }
 0x289   : > { %v1612_v62 = vadd.f32 %v1611_v31, %v1317_v2  ;;  %v1849_v53 = vpop.f32.mrf.mxu0 }
 0x28a   : > { %2690 = vmatmul.f32.gmra.mxu3 %v7342_v49  ;;  %3171 = vmatmul.f32.gmra.mxu1 %v2305_v51  ;;  %v7369_v49 = vand.u32 4294901760, %v2127_v7 }
 0x28b   : > { %v1846_v14 = vadd.f32 %v1845_v45, %v1612_v62  ;;  %2308 = vmatmul.f32.gmra.mxu2 %v2307_v21  ;;  %v5937_v21 = vld [vmem:[%s6221_s25 + $0x68] sm:$0xff] }
 0x28c   : > { %2907 = vmatmul.f32.gmra.mxu0 %v2304_v50  ;;  %10061 = vst [vmem:[#allocation56_spill] sm:$0xff] %v7369_v49  ;;  %v2328_v24 = vsub.f32 %v2127_v7, %v7369_v49  ;;  %v2130_v62 = vsel %vm354_vm0, %v5937_v21, 0 }
 0x28d   : > { %v7366_v52 = vadd.f32 %v2055_v44, %v1846_v14  ;;  %v1617_v48 = vpop.f32.mrf.mxu3  ;;  %v2322_v44 = vsub.f32 %v2320_v54, %v2321_v40 }
 0x28e   : > { %v1321_v63 = vpop.f32.mrf.mxu2 }
 0x28f   : > { %10059 = vst [vmem:[#allocation58_spill] sm:$0xff] %v7366_v52  ;;  %v1322_v31 = vadd.f32 %v1321_v63, %v10060_v35  ;;  %v2063_v2 = vpop.f32.mrf.mxu1  ;;  %v10063_v63 = vld [vmem:[#allocation78_spill] sm:$0xff]  ;;  %v2323_v35 = vand.u32 4294901760, %v2322_v44  ;;  %v2329_v52 = vand.u32 4294901760, %v2328_v24 }
 0x291   : > { %v1618_v51 = vadd.f32 %v1617_v48, %v1322_v31  ;;  %v1853_v45 = vpop.f32.mrf.mxu0 }
 0x292   : > { %2694 = vmatmul.f32.gmra.mxu3 %v7351_v10  ;;  %3177 = vmatmul.f32.gmra.mxu1 %v2313_v11  ;;  %v7378_v10 = vand.u32 4294901760, %v2130_v62 }
 0x293   : > { %v1850_v50 = vadd.f32 %v1849_v53, %v1618_v51  ;;  %2316 = vmatmul.f32.gmra.mxu2 %v2315_v22  ;;  %v5938_v22 = vld [vmem:[%s6221_s25 + $0x70] sm:$0xff] }
 0x294   : > { %2912 = vmatmul.f32.gmra.mxu0 %v2312_v18  ;;  %10064 = vst [vmem:[#allocation51_spill] sm:$0xff] %v7378_v10  ;;  %v2336_v7 = vsub.f32 %v2130_v62, %v7378_v10  ;;  %v2133_v51 = vsel %vm354_vm0, %v5938_v22, 0 }
 0x295   : > { %v7375_v41 = vadd.f32 %v2059_v19, %v1850_v50  ;;  %v1623_v14 = vpop.f32.mrf.mxu3  ;;  %v2330_v19 = vsub.f32 %v2328_v24, %v2329_v52 }
 0x296   : > { %v1326_v32 = vpop.f32.mrf.mxu2 }
 0x297   : > { %10062 = vst [vmem:[#allocation54_spill] sm:$0xff] %v7375_v41  ;;  %v1327_v48 = vadd.f32 %v1326_v32, %v10063_v63  ;;  %v2067_v31 = vpop.f32.mrf.mxu1  ;;  %v10066_v32 = vld [vmem:[#allocation79_spill] sm:$0xff]  ;;  %v2331_v63 = vand.u32 4294901760, %v2330_v19  ;;  %v2337_v41 = vand.u32 4294901760, %v2336_v7 }
 0x299   : > { %v1624_v11 = vadd.f32 %v1623_v14, %v1327_v48  ;;  %v1857_v53 = vpop.f32.mrf.mxu0 }
 0x29a   : > { %2698 = vmatmul.f32.gmra.mxu3 %v7360_v58  ;;  %3183 = vmatmul.f32.gmra.mxu1 %v2321_v40  ;;  %v7387_v58 = vand.u32 4294901760, %v2133_v51 }
 0x29b   : > { %v1854_v18 = vadd.f32 %v1853_v45, %v1624_v11  ;;  %2324 = vmatmul.f32.gmra.mxu2 %v2323_v35  ;;  %v5939_v35 = vld [vmem:[%s6221_s25 + $0x78] sm:$0xff] }
 0x29c   : > { %2917 = vmatmul.f32.gmra.mxu0 %v2320_v54  ;;  %10067 = vst [vmem:[#allocation62_spill] sm:$0xff] %v7387_v58  ;;  %v2344_v62 = vsub.f32 %v2133_v51, %v7387_v58  ;;  %v2136_v11 = vsel %vm354_vm0, %v5939_v35, 0 }
 0x29d   : > { %v7384_v21 = vadd.f32 %v2063_v2, %v1854_v18  ;;  %v1629_v50 = vpop.f32.mrf.mxu3  ;;  %v2338_v2 = vsub.f32 %v2336_v7, %v2337_v41 }
 0x29e   : > { %v1331_v44 = vpop.f32.mrf.mxu2 }
 0x29f   : > { %10065 = vst [vmem:[#allocation64_spill] sm:$0xff] %v7384_v21  ;;  %v1332_v14 = vadd.f32 %v1331_v44, %v10066_v32  ;;  %v2071_v48 = vpop.f32.mrf.mxu1  ;;  %v10069_v44 = vld [vmem:[#allocation80_spill] sm:$0xff]  ;;  %v2339_v32 = vand.u32 4294901760, %v2338_v2  ;;  %v2345_v21 = vand.u32 4294901760, %v2344_v62 }
 0x2a1   : > { %v1630_v40 = vadd.f32 %v1629_v50, %v1332_v14  ;;  %v1861_v45 = vpop.f32.mrf.mxu0 }
 0x2a2   : > { %2702 = vmatmul.f32.gmra.mxu3 %v7369_v49  ;;  %3189 = vmatmul.f32.gmra.mxu1 %v2329_v52  ;;  %v7396_v49 = vand.u32 4294901760, %v2136_v11 }
 0x2a3   : > { %v1858_v54 = vadd.f32 %v1857_v53, %v1630_v40  ;;  %2332 = vmatmul.f32.gmra.mxu2 %v2331_v63  ;;  %v5940_v63 = vld [vmem:[%s6221_s25 + $0x80] sm:$0xff] }
 0x2a4   : > { %2922 = vmatmul.f32.gmra.mxu0 %v2328_v24  ;;  %10070 = vst [vmem:[#allocation69_spill] sm:$0xff] %v7396_v49  ;;  %v2352_v51 = vsub.f32 %v2136_v11, %v7396_v49  ;;  %v2139_v40 = vsel %vm354_vm0, %v5940_v63, 0 }
 0x2a5   : > { %v7393_v22 = vadd.f32 %v2067_v31, %v1858_v54  ;;  %v1635_v18 = vpop.f32.mrf.mxu3  ;;  %v2346_v31 = vsub.f32 %v2344_v62, %v2345_v21 }
 0x2a6   : > { %v1336_v19 = vpop.f32.mrf.mxu2 }
 0x2a7   : > { %10068 = vst [vmem:[#allocation60_spill] sm:$0xff] %v7393_v22  ;;  %v1337_v50 = vadd.f32 %v1336_v19, %v10069_v44  ;;  %v2075_v14 = vpop.f32.mrf.mxu1  ;;  %v10072_v19 = vld [vmem:[#allocation81_spill] sm:$0xff]  ;;  %v2347_v44 = vand.u32 4294901760, %v2346_v31  ;;  %v2353_v22 = vand.u32 4294901760, %v2352_v51 }
 0x2a9   : > { %v1636_v52 = vadd.f32 %v1635_v18, %v1337_v50  ;;  %v1865_v53 = vpop.f32.mrf.mxu0 }
 0x2aa   : > { %2706 = vmatmul.f32.gmra.mxu3 %v7378_v10  ;;  %3195 = vmatmul.f32.gmra.mxu1 %v2337_v41  ;;  %v7405_v10 = vand.u32 4294901760, %v2139_v40 }
 0x2ab   : > { %v1862_v24 = vadd.f32 %v1861_v45, %v1636_v52  ;;  %2340 = vmatmul.f32.gmra.mxu2 %v2339_v32  ;;  %v5941_v32 = vld [vmem:[%s6221_s25 + $0x88] sm:$0xff] }
 0x2ac   : > { %2927 = vmatmul.f32.gmra.mxu0 %v2336_v7  ;;  %10073 = vst [vmem:[#allocation4_spill] sm:$0xff] %v7405_v10  ;;  %v2360_v11 = vsub.f32 %v2139_v40, %v7405_v10  ;;  %v2142_v52 = vsel %vm354_vm0, %v5941_v32, 0 }
 0x2ad   : > { %v7402_v35 = vadd.f32 %v2071_v48, %v1862_v24  ;;  %v1641_v54 = vpop.f32.mrf.mxu3  ;;  %v2354_v48 = vsub.f32 %v2352_v51, %v2353_v22 }
 0x2ae   : > { %v1341_v2 = vpop.f32.mrf.mxu2 }
 0x2af   : > { %10071 = vst [vmem:[#allocation67_spill] sm:$0xff] %v7402_v35  ;;  %v1342_v18 = vadd.f32 %v1341_v2, %v10072_v19  ;;  %v2079_v50 = vpop.f32.mrf.mxu1  ;;  %v10075_v2 = vld [vmem:[#allocation82_spill] sm:$0xff]  ;;  %v2355_v19 = vand.u32 4294901760, %v2354_v48  ;;  %v2361_v35 = vand.u32 4294901760, %v2360_v11 }
 0x2b1   : > { %v1642_v41 = vadd.f32 %v1641_v54, %v1342_v18  ;;  %v1869_v45 = vpop.f32.mrf.mxu0 }
 0x2b2   : > { %2710 = vmatmul.f32.gmra.mxu3 %v7387_v58  ;;  %3201 = vmatmul.f32.gmra.mxu1 %v2345_v21  ;;  %v7414_v58 = vand.u32 4294901760, %v2142_v52 }
 0x2b3   : > { %v1866_v7 = vadd.f32 %v1865_v53, %v1642_v41  ;;  %2348 = vmatmul.f32.gmra.mxu2 %v2347_v44  ;;  %v5942_v44 = vld [vmem:[%s6221_s25 + $0x90] sm:$0xff] }
 0x2b4   : > { %2932 = vmatmul.f32.gmra.mxu0 %v2344_v62  ;;  %10076 = vst [vmem:[#allocation5_spill] sm:$0xff] %v7414_v58  ;;  %v2368_v40 = vsub.f32 %v2142_v52, %v7414_v58  ;;  %v2145_v41 = vsel %vm354_vm0, %v5942_v44, 0 }
 0x2b5   : > { %v7411_v63 = vadd.f32 %v2075_v14, %v1866_v7  ;;  %v1647_v24 = vpop.f32.mrf.mxu3  ;;  %v2362_v14 = vsub.f32 %v2360_v11, %v2361_v35 }
 0x2b6   : > { %v1346_v31 = vpop.f32.mrf.mxu2 }
 0x2b7   : > { %10074 = vst [vmem:[#allocation2_spill] sm:$0xff] %v7411_v63  ;;  %v1347_v54 = vadd.f32 %v1346_v31, %v10075_v2  ;;  %v2083_v18 = vpop.f32.mrf.mxu1  ;;  %v10078_v31 = vld [vmem:[#allocation83_spill] sm:$0xff]  ;;  %v2363_v2 = vand.u32 4294901760, %v2362_v14  ;;  %v2369_v63 = vand.u32 4294901760, %v2368_v40 }
 0x2b9   : > { %v1648_v21 = vadd.f32 %v1647_v24, %v1347_v54  ;;  %v1873_v53 = vpop.f32.mrf.mxu0 }
 0x2ba   : > { %2714 = vmatmul.f32.gmra.mxu3 %v7396_v49  ;;  %3207 = vmatmul.f32.gmra.mxu1 %v2353_v22  ;;  %v7423_v49 = vand.u32 4294901760, %v2145_v41 }
 0x2bb   : > { %v1870_v62 = vadd.f32 %v1869_v45, %v1648_v21  ;;  %2356 = vmatmul.f32.gmra.mxu2 %v2355_v19  ;;  %v5943_v19 = vld [vmem:[%s6221_s25 + $0x98] sm:$0xff] }
 0x2bc   : > { %2937 = vmatmul.f32.gmra.mxu0 %v2352_v51  ;;  %10079 = vst [vmem:[#allocation7_spill] sm:$0xff] %v7423_v49  ;;  %v2376_v52 = vsub.f32 %v2145_v41, %v7423_v49  ;;  %v2148_v21 = vsel %vm354_vm0, %v5943_v19, 0 }
 0x2bd   : > { %v7420_v32 = vadd.f32 %v2079_v50, %v1870_v62  ;;  %v1653_v7 = vpop.f32.mrf.mxu3  ;;  %v2370_v50 = vsub.f32 %v2368_v40, %v2369_v63 }
 0x2be   : > { %v1351_v48 = vpop.f32.mrf.mxu2 }
 0x2bf   : > { %10077 = vst [vmem:[#allocation3_spill] sm:$0xff] %v7420_v32  ;;  %v1352_v24 = vadd.f32 %v1351_v48, %v10078_v31  ;;  %v2087_v54 = vpop.f32.mrf.mxu1  ;;  %v10081_v48 = vld [vmem:[#allocation84_spill] sm:$0xff]  ;;  %v2371_v31 = vand.u32 4294901760, %v2370_v50  ;;  %v2377_v32 = vand.u32 4294901760, %v2376_v52 }
 0x2c1   : > { %v1654_v22 = vadd.f32 %v1653_v7, %v1352_v24  ;;  %v1877_v45 = vpop.f32.mrf.mxu0 }
 0x2c2   : > { %2718 = vmatmul.f32.gmra.mxu3 %v7405_v10  ;;  %3213 = vmatmul.f32.gmra.mxu1 %v2361_v35  ;;  %v7432_v10 = vand.u32 4294901760, %v2148_v21 }
 0x2c3   : > { %v1874_v51 = vadd.f32 %v1873_v53, %v1654_v22  ;;  %2364 = vmatmul.f32.gmra.mxu2 %v2363_v2  ;;  %v5944_v2 = vld [vmem:[%s6221_s25 + $0xa0] sm:$0xff] }
 0x2c4   : > { %2942 = vmatmul.f32.gmra.mxu0 %v2360_v11  ;;  %10082 = vst [vmem:[#allocation9_spill] sm:$0xff] %v7432_v10  ;;  %v2384_v41 = vsub.f32 %v2148_v21, %v7432_v10  ;;  %v2151_v22 = vsel %vm354_vm0, %v5944_v2, 0 }
 0x2c5   : > { %v7429_v44 = vadd.f32 %v2083_v18, %v1874_v51  ;;  %v1659_v62 = vpop.f32.mrf.mxu3  ;;  %v2378_v18 = vsub.f32 %v2376_v52, %v2377_v32 }
 0x2c6   : > { %v1356_v14 = vpop.f32.mrf.mxu2 }
 0x2c7   : > { %10080 = vst [vmem:[#allocation6_spill] sm:$0xff] %v7429_v44  ;;  %v1357_v7 = vadd.f32 %v1356_v14, %v10081_v48  ;;  %v2091_v24 = vpop.f32.mrf.mxu1  ;;  %v10084_v14 = vld [vmem:[#allocation85_spill] sm:$0xff]  ;;  %v2379_v48 = vand.u32 4294901760, %v2378_v18  ;;  %v2385_v44 = vand.u32 4294901760, %v2384_v41 }
 0x2c9   : > { %v1660_v35 = vadd.f32 %v1659_v62, %v1357_v7  ;;  %v1881_v53 = vpop.f32.mrf.mxu0 }
 0x2ca   : > { %2722 = vmatmul.f32.gmra.mxu3 %v7414_v58  ;;  %3219 = vmatmul.f32.gmra.mxu1 %v2369_v63  ;;  %v7441_v58 = vand.u32 4294901760, %v2151_v22 }
 0x2cb   : > { %v1878_v11 = vadd.f32 %v1877_v45, %v1660_v35  ;;  %2372 = vmatmul.f32.gmra.mxu2 %v2371_v31  ;;  %v5945_v31 = vld [vmem:[%s6221_s25 + $0xa8] sm:$0xff] }
 0x2cc   : > { %2947 = vmatmul.f32.gmra.mxu0 %v2368_v40  ;;  %10085 = vst [vmem:[#allocation11_spill] sm:$0xff] %v7441_v58  ;;  %v2392_v21 = vsub.f32 %v2151_v22, %v7441_v58  ;;  %v2154_v35 = vsel %vm354_vm0, %v5945_v31, 0 }
 0x2cd   : > { %v7438_v19 = vadd.f32 %v2087_v54, %v1878_v11  ;;  %v1665_v51 = vpop.f32.mrf.mxu3  ;;  %v2386_v54 = vsub.f32 %v2384_v41, %v2385_v44 }
 0x2ce   : > { %v1361_v50 = vpop.f32.mrf.mxu2 }
 0x2cf   : > { %10083 = vst [vmem:[#allocation8_spill] sm:$0xff] %v7438_v19  ;;  %v1362_v62 = vadd.f32 %v1361_v50, %v10084_v14  ;;  %v2095_v7 = vpop.f32.mrf.mxu1  ;;  %v10087_v50 = vld [vmem:[#allocation86_spill] sm:$0xff]  ;;  %v2387_v14 = vand.u32 4294901760, %v2386_v54  ;;  %v2393_v19 = vand.u32 4294901760, %v2392_v21 }
 0x2d1   : > { %v1666_v63 = vadd.f32 %v1665_v51, %v1362_v62  ;;  %v1885_v45 = vpop.f32.mrf.mxu0 }
 0x2d2   : > { %2726 = vmatmul.f32.gmra.mxu3 %v7423_v49  ;;  %3225 = vmatmul.f32.gmra.mxu1 %v2377_v32  ;;  %v7450_v49 = vand.u32 4294901760, %v2154_v35 }
 0x2d3   : > { %v1882_v40 = vadd.f32 %v1881_v53, %v1666_v63  ;;  %2380 = vmatmul.f32.gmra.mxu2 %v2379_v48  ;;  %v5946_v48 = vld [vmem:[%s6221_s25 + $0xb0] sm:$0xff] }
 0x2d4   : > { %2952 = vmatmul.f32.gmra.mxu0 %v2376_v52  ;;  %10088 = vst [vmem:[#allocation13_spill] sm:$0xff] %v7450_v49  ;;  %v2400_v22 = vsub.f32 %v2154_v35, %v7450_v49  ;;  %v2157_v63 = vsel %vm354_vm0, %v5946_v48, 0 }
 0x2d5   : > { %v7447_v2 = vadd.f32 %v2091_v24, %v1882_v40  ;;  %v1671_v11 = vpop.f32.mrf.mxu3  ;;  %v2394_v24 = vsub.f32 %v2392_v21, %v2393_v19 }
 0x2d6   : > { %v1366_v18 = vpop.f32.mrf.mxu2 }
 0x2d7   : > { %10086 = vst [vmem:[#allocation10_spill] sm:$0xff] %v7447_v2  ;;  %v1367_v51 = vadd.f32 %v1366_v18, %v10087_v50  ;;  %v2099_v62 = vpop.f32.mrf.mxu1  ;;  %v10090_v18 = vld [vmem:[#allocation87_spill] sm:$0xff]  ;;  %v2395_v50 = vand.u32 4294901760, %v2394_v24  ;;  %v2401_v2 = vand.u32 4294901760, %v2400_v22 }
 0x2d9   : > { %v1672_v32 = vadd.f32 %v1671_v11, %v1367_v51  ;;  %v1889_v53 = vpop.f32.mrf.mxu0 }
 0x2da   : > { %2730 = vmatmul.f32.gmra.mxu3 %v7432_v10  ;;  %3231 = vmatmul.f32.gmra.mxu1 %v2385_v44  ;;  %v7459_v10 = vand.u32 4294901760, %v2157_v63 }
 0x2db   : > { %v1886_v52 = vadd.f32 %v1885_v45, %v1672_v32  ;;  %2388 = vmatmul.f32.gmra.mxu2 %v2387_v14  ;;  %v5947_v14 = vld [vmem:[%s6221_s25 + $0xb8] sm:$0xff] }
 0x2dc   : > { %2957 = vmatmul.f32.gmra.mxu0 %v2384_v41  ;;  %10091 = vst [vmem:[#allocation15_spill] sm:$0xff] %v7459_v10  ;;  %v2408_v35 = vsub.f32 %v2157_v63, %v7459_v10  ;;  %v2160_v32 = vsel %vm354_vm0, %v5947_v14, 0 }
 0x2dd   : > { %v7456_v31 = vadd.f32 %v2095_v7, %v1886_v52  ;;  %v1677_v40 = vpop.f32.mrf.mxu3  ;;  %v2402_v7 = vsub.f32 %v2400_v22, %v2401_v2 }
 0x2de   : > { %v1371_v54 = vpop.f32.mrf.mxu2 }
 0x2df   : > { %10089 = vst [vmem:[#allocation12_spill] sm:$0xff] %v7456_v31  ;;  %v1372_v11 = vadd.f32 %v1371_v54, %v10090_v18  ;;  %v3142_v51 = vpop.f32.mrf.mxu1  ;;  %v10093_v54 = vld [vmem:[#allocation43_spill] sm:$0xff]  ;;  %v2403_v18 = vand.u32 4294901760, %v2402_v7  ;;  %v2409_v31 = vand.u32 4294901760, %v2408_v35 }
 0x2e1   : > { %v1678_v44 = vadd.f32 %v1677_v40, %v1372_v11  ;;  %v2883_v45 = vpop.f32.mrf.mxu0 }
 0x2e2   : > { %2734 = vmatmul.f32.gmra.mxu3 %v7441_v58  ;;  %3237 = vmatmul.f32.gmra.mxu1 %v2393_v19  ;;  %v7468_v58 = vand.u32 4294901760, %v2160_v32 }
 0x2e3   : > { %v1890_v41 = vadd.f32 %v1889_v53, %v1678_v44  ;;  %2396 = vmatmul.f32.gmra.mxu2 %v2395_v50  ;;  %v5948_v50 = vld [vmem:[%s6221_s25 + $0xc0] sm:$0xff] }
 0x2e4   : > { %2962 = vmatmul.f32.gmra.mxu0 %v2392_v21  ;;  %10094 = vst [vmem:[#allocation17_spill] sm:$0xff] %v7468_v58  ;;  %v2416_v63 = vsub.f32 %v2160_v32, %v7468_v58  ;;  %v2163_v44 = vsel %vm354_vm0, %v5948_v50, 0 }
 0x2e5   : > { %v7465_v48 = vadd.f32 %v2099_v62, %v1890_v41  ;;  %v2671_v52 = vpop.f32.mrf.mxu3  ;;  %v2410_v62 = vsub.f32 %v2408_v35, %v2409_v31 }
 0x2e6   : > { %v2269_v24 = vpop.f32.mrf.mxu2 }
 0x2e7   : > { %10092 = vst [vmem:[#allocation14_spill] sm:$0xff] %v7465_v48  ;;  %v2270_v40 = vadd.f32 %v2269_v24, %v10093_v54  ;;  %v3148_v11 = vpop.f32.mrf.mxu1  ;;  %v10095_v24 = vld [vmem:[#allocation41_spill] sm:$0xff]  ;;  %v2411_v54 = vand.u32 4294901760, %v2410_v62  ;;  %v2417_v48 = vand.u32 4294901760, %v2416_v63 }
 0x2e9   : > { %v2672_v19 = vadd.f32 %v2671_v52, %v2270_v40  ;;  %v2888_v53 = vpop.f32.mrf.mxu0 }
 0x2ea   : > { %2738 = vmatmul.f32.gmra.mxu3 %v7450_v49  ;;  %3243 = vmatmul.f32.gmra.mxu1 %v2401_v2  ;;  %v7477_v49 = vand.u32 4294901760, %v2163_v44 }
 0x2eb   : > { %v2884_v21 = vadd.f32 %v2883_v45, %v2672_v19  ;;  %2404 = vmatmul.f32.gmra.mxu2 %v2403_v18  ;;  %v5949_v18 = vld [vmem:[%s6221_s25 + $0xc8] sm:$0xff] }
 0x2ec   : > { %2967 = vmatmul.f32.gmra.mxu0 %v2400_v22  ;;  %10096 = vst [vmem:[#allocation16_spill] sm:$0xff] %v7477_v49  ;;  %v2424_v32 = vsub.f32 %v2163_v44, %v7477_v49  ;;  %v2166_v19 = vsel %vm354_vm0, %v5949_v18, 0 }
 0x2ed   : > { %v7474_v14 = vadd.f32 %v3142_v51, %v2884_v21  ;;  %v2675_v41 = vpop.f32.mrf.mxu3  ;;  %v2418_v51 = vsub.f32 %v2416_v63, %v2417_v48 }
 0x2ee   : > { %v2277_v7 = vpop.f32.mrf.mxu2 }
 0x2ef   : > { %v2278_v52 = vadd.f32 %v2277_v7, %v10095_v24  ;;  %v3154_v40 = vpop.f32.mrf.mxu1  ;;  %v2419_v7 = vand.u32 4294901760, %v2418_v51 }
 0x2f1   : > { %v2676_v2 = vadd.f32 %v2675_v41, %v2278_v52  ;;  %v2893_v45 = vpop.f32.mrf.mxu0  ;;  %v2425_v52 = vand.u32 4294901760, %v2424_v32 }
 0x2f2   : > { %2742 = vmatmul.f32.gmra.mxu3 %v7459_v10  ;;  %3249 = vmatmul.f32.gmra.mxu1 %v2409_v31  ;;  %v7486_v10 = vand.u32 4294901760, %v2166_v19 }
 0x2f3   : > { %v2889_v22 = vadd.f32 %v2888_v53, %v2676_v2  ;;  %2412 = vmatmul.f32.gmra.mxu2 %v2411_v54  ;;  %v5950_v54 = vld [vmem:[%s6221_s25 + $0xd0] sm:$0xff] }
 0x2f4   : > { %2972 = vmatmul.f32.gmra.mxu0 %v2408_v35  ;;  %10097 = vst [vmem:[#allocation19_spill] sm:$0xff] %v7486_v10  ;;  %v2432_v44 = vsub.f32 %v2166_v19, %v7486_v10 }
 0x2f5   : > { %v7483_v50 = vadd.f32 %v3148_v11, %v2889_v22  ;;  %v2679_v21 = vpop.f32.mrf.mxu3  ;;  %v2426_v11 = vsub.f32 %v2424_v32, %v2425_v52 }
 0x2f6   : > { %v2285_v62 = vpop.f32.mrf.mxu2 }
 0x2f7   : > { %v2286_v41 = vadd.f32 %v2285_v62, %v7056_v13  ;;  %v3160_v24 = vpop.f32.mrf.mxu1  ;;  %v2169_v13 = vsel %vm354_vm0, %v5950_v54, 0 }
 0x2f9   : > { %v2680_v31 = vadd.f32 %v2679_v21, %v2286_v41  ;;  %v2898_v53 = vpop.f32.mrf.mxu0  ;;  %v2427_v21 = vand.u32 4294901760, %v2426_v11  ;;  %v2433_v41 = vand.u32 4294901760, %v2432_v44 }
 0x2fa   : > { %2746 = vmatmul.f32.gmra.mxu3 %v7468_v58  ;;  %3255 = vmatmul.f32.gmra.mxu1 %v2417_v48  ;;  %v7495_v58 = vand.u32 4294901760, %v2169_v13 }
 0x2fb   : > { %v2894_v35 = vadd.f32 %v2893_v45, %v2680_v31  ;;  %2420 = vmatmul.f32.gmra.mxu2 %v2419_v7  ;;  %v5951_v7 = vld [vmem:[%s6221_s25 + $0xd8] sm:$0xff] }
 0x2fc   : > { %2977 = vmatmul.f32.gmra.mxu0 %v2416_v63  ;;  %10098 = vst [vmem:[#allocation18_spill] sm:$0xff] %v7495_v58  ;;  %v2440_v19 = vsub.f32 %v2169_v13, %v7495_v58 }
 0x2fd   : > { %v7492_v2 = vadd.f32 %v3154_v40, %v2894_v35  ;;  %v2683_v18 = vpop.f32.mrf.mxu3  ;;  %v2434_v40 = vsub.f32 %v2432_v44, %v2433_v41 }
 0x2fe   : > { %v2293_v22 = vpop.f32.mrf.mxu2 }
 0x2ff   : > { %v2294_v51 = vadd.f32 %v2293_v22, %v7065_v30  ;;  %v3166_v62 = vpop.f32.mrf.mxu1  ;;  %v2172_v30 = vsel %vm354_vm0, %v5951_v7, 0 }
 0x301   : > { %v2684_v48 = vadd.f32 %v2683_v18, %v2294_v51  ;;  %v2903_v45 = vpop.f32.mrf.mxu0  ;;  %v2435_v18 = vand.u32 4294901760, %v2434_v40  ;;  %v2441_v51 = vand.u32 4294901760, %v2440_v19 }
 0x302   : > { %2750 = vmatmul.f32.gmra.mxu3 %v7477_v49  ;;  %3261 = vmatmul.f32.gmra.mxu1 %v2425_v52  ;;  %v7504_v49 = vand.u32 4294901760, %v2172_v30 }
 0x303   : > { %v2899_v63 = vadd.f32 %v2898_v53, %v2684_v48  ;;  %2428 = vmatmul.f32.gmra.mxu2 %v2427_v21  ;;  %v5952_v21 = vld [vmem:[%s6221_s25 + $0x100] sm:$0xff] }
 0x304   : > { %2982 = vmatmul.f32.gmra.mxu0 %v2424_v32  ;;  %10099 = vst [vmem:[#allocation21_spill] sm:$0xff] %v7504_v49  ;;  %v2448_v13 = vsub.f32 %v2172_v30, %v7504_v49 }
 0x305   : > { %v7501_v31 = vadd.f32 %v3160_v24, %v2899_v63  ;;  %v2687_v54 = vpop.f32.mrf.mxu3  ;;  %v2442_v24 = vsub.f32 %v2440_v19, %v2441_v51 }
 0x306   : > { %v2301_v35 = vpop.f32.mrf.mxu2 }
 0x307   : > { %v2302_v11 = vadd.f32 %v2301_v35, %v7074_v8  ;;  %v3172_v22 = vpop.f32.mrf.mxu1  ;;  %v2175_v8 = vsel %vm354_vm0, %v5952_v21, 0 }
 0x309   : > { %v2688_v52 = vadd.f32 %v2687_v54, %v2302_v11  ;;  %v2908_v53 = vpop.f32.mrf.mxu0  ;;  %v2443_v54 = vand.u32 4294901760, %v2442_v24  ;;  %v2449_v11 = vand.u32 4294901760, %v2448_v13 }
 0x30a   : > { %2754 = vmatmul.f32.gmra.mxu3 %v7486_v10  ;;  %3267 = vmatmul.f32.gmra.mxu1 %v2433_v41  ;;  %v7513_v10 = vand.u32 4294901760, %v2175_v8 }
 0x30b   : > { %v2904_v32 = vadd.f32 %v2903_v45, %v2688_v52  ;;  %2436 = vmatmul.f32.gmra.mxu2 %v2435_v18  ;;  %v5953_v18 = vld [vmem:[%s6221_s25 + $0x108] sm:$0xff] }
 0x30c   : > { %2987 = vmatmul.f32.gmra.mxu0 %v2432_v44  ;;  %10100 = vst [vmem:[#allocation20_spill] sm:$0xff] %v7513_v10  ;;  %v2456_v30 = vsub.f32 %v2175_v8, %v7513_v10 }
 0x30d   : > { %v7510_v48 = vadd.f32 %v3166_v62, %v2904_v32  ;;  %v2691_v7 = vpop.f32.mrf.mxu3  ;;  %v2450_v62 = vsub.f32 %v2448_v13, %v2449_v11 }
 0x30e   : > { %v2309_v63 = vpop.f32.mrf.mxu2 }
 0x30f   : > { %v2310_v40 = vadd.f32 %v2309_v63, %v7083_v17  ;;  %v3178_v35 = vpop.f32.mrf.mxu1  ;;  %v2178_v17 = vsel %vm354_vm0, %v5953_v18, 0 }
 0x311   : > { %v2692_v41 = vadd.f32 %v2691_v7, %v2310_v40  ;;  %v2913_v45 = vpop.f32.mrf.mxu0  ;;  %v2451_v7 = vand.u32 4294901760, %v2450_v62  ;;  %v2457_v40 = vand.u32 4294901760, %v2456_v30 }
 0x312   : > { %2758 = vmatmul.f32.gmra.mxu3 %v7495_v58  ;;  %3273 = vmatmul.f32.gmra.mxu1 %v2441_v51  ;;  %v7522_v58 = vand.u32 4294901760, %v2178_v17 }
 0x313   : > { %v2909_v44 = vadd.f32 %v2908_v53, %v2692_v41  ;;  %2444 = vmatmul.f32.gmra.mxu2 %v2443_v54  ;;  %v5954_v54 = vld [vmem:[%s6221_s25 + $0x110] sm:$0xff] }
 0x314   : > { %2992 = vmatmul.f32.gmra.mxu0 %v2440_v19  ;;  %10101 = vst [vmem:[#allocation23_spill] sm:$0xff] %v7522_v58  ;;  %v2464_v8 = vsub.f32 %v2178_v17, %v7522_v58 }
 0x315   : > { %v7519_v52 = vadd.f32 %v3172_v22, %v2909_v44  ;;  %v2695_v21 = vpop.f32.mrf.mxu3  ;;  %v2458_v22 = vsub.f32 %v2456_v30, %v2457_v40 }
 0x316   : > { %v2317_v32 = vpop.f32.mrf.mxu2 }
 0x317   : > { %v2318_v24 = vadd.f32 %v2317_v32, %v7092_v29  ;;  %v3184_v63 = vpop.f32.mrf.mxu1  ;;  %v2181_v29 = vsel %vm354_vm0, %v5954_v54, 0 }
 0x319   : > { %v2696_v51 = vadd.f32 %v2695_v21, %v2318_v24  ;;  %v2918_v53 = vpop.f32.mrf.mxu0  ;;  %v2459_v21 = vand.u32 4294901760, %v2458_v22  ;;  %v2465_v24 = vand.u32 4294901760, %v2464_v8 }
 0x31a   : > { %2762 = vmatmul.f32.gmra.mxu3 %v7504_v49  ;;  %3279 = vmatmul.f32.gmra.mxu1 %v2449_v11  ;;  %v7531_v49 = vand.u32 4294901760, %v2181_v29 }
 0x31b   : > { %v2914_v19 = vadd.f32 %v2913_v45, %v2696_v51  ;;  %2452 = vmatmul.f32.gmra.mxu2 %v2451_v7  ;;  %v5955_v7 = vld [vmem:[%s6221_s25 + $0x118] sm:$0xff] }
 0x31c   : > { %2997 = vmatmul.f32.gmra.mxu0 %v2448_v13  ;;  %10102 = vst [vmem:[#allocation22_spill] sm:$0xff] %v7531_v49  ;;  %v2472_v17 = vsub.f32 %v2181_v29, %v7531_v49 }
 0x31d   : > { %v7528_v41 = vadd.f32 %v3178_v35, %v2914_v19  ;;  %v2699_v18 = vpop.f32.mrf.mxu3  ;;  %v2466_v35 = vsub.f32 %v2464_v8, %v2465_v24 }
 0x31e   : > { %v2325_v44 = vpop.f32.mrf.mxu2 }
 0x31f   : > { %v2326_v62 = vadd.f32 %v2325_v44, %v7101_v38  ;;  %v3190_v32 = vpop.f32.mrf.mxu1  ;;  %v2184_v38 = vsel %vm354_vm0, %v5955_v7, 0 }
 0x321   : > { %v2700_v11 = vadd.f32 %v2699_v18, %v2326_v62  ;;  %v2923_v45 = vpop.f32.mrf.mxu0  ;;  %v2467_v18 = vand.u32 4294901760, %v2466_v35  ;;  %v2473_v62 = vand.u32 4294901760, %v2472_v17 }
 0x322   : > { %2766 = vmatmul.f32.gmra.mxu3 %v7513_v10  ;;  %3285 = vmatmul.f32.gmra.mxu1 %v2457_v40  ;;  %v7540_v10 = vand.u32 4294901760, %v2184_v38 }
 0x323   : > { %v2919_v13 = vadd.f32 %v2918_v53, %v2700_v11  ;;  %2460 = vmatmul.f32.gmra.mxu2 %v2459_v21  ;;  %v5956_v21 = vld [vmem:[%s6221_s25 + $0x120] sm:$0xff] }
 0x324   : > { %3002 = vmatmul.f32.gmra.mxu0 %v2456_v30  ;;  %10103 = vst [vmem:[#allocation25_spill] sm:$0xff] %v7540_v10  ;;  %v2480_v29 = vsub.f32 %v2184_v38, %v7540_v10 }
 0x325   : > { %v7537_v51 = vadd.f32 %v3184_v63, %v2919_v13  ;;  %v2703_v54 = vpop.f32.mrf.mxu3  ;;  %v2474_v63 = vsub.f32 %v2472_v17, %v2473_v62 }
 0x326   : > { %v2333_v19 = vpop.f32.mrf.mxu2 }
 0x327   : > { %v2334_v22 = vadd.f32 %v2333_v19, %v7110_v46  ;;  %v3196_v44 = vpop.f32.mrf.mxu1  ;;  %v2187_v46 = vsel %vm354_vm0, %v5956_v21, 0 }
 0x329   : > { %v2704_v40 = vadd.f32 %v2703_v54, %v2334_v22  ;;  %v2928_v53 = vpop.f32.mrf.mxu0  ;;  %v2475_v54 = vand.u32 4294901760, %v2474_v63  ;;  %v2481_v22 = vand.u32 4294901760, %v2480_v29 }
 0x32a   : > { %2770 = vmatmul.f32.gmra.mxu3 %v7522_v58  ;;  %3291 = vmatmul.f32.gmra.mxu1 %v2465_v24  ;;  %v7549_v58 = vand.u32 4294901760, %v2187_v46 }
 0x32b   : > { %v2924_v30 = vadd.f32 %v2923_v45, %v2704_v40  ;;  %2468 = vmatmul.f32.gmra.mxu2 %v2467_v18  ;;  %v5957_v18 = vld [vmem:[%s6221_s25 + $0x128] sm:$0xff] }
 0x32c   : > { %3007 = vmatmul.f32.gmra.mxu0 %v2464_v8  ;;  %10104 = vst [vmem:[#allocation24_spill] sm:$0xff] %v7549_v58  ;;  %v2488_v38 = vsub.f32 %v2187_v46, %v7549_v58 }
 0x32d   : > { %v7546_v11 = vadd.f32 %v3190_v32, %v2924_v30  ;;  %v2707_v7 = vpop.f32.mrf.mxu3  ;;  %v2482_v32 = vsub.f32 %v2480_v29, %v2481_v22 }
 0x32e   : > { %v2341_v13 = vpop.f32.mrf.mxu2 }
 0x32f   : > { %v2342_v35 = vadd.f32 %v2341_v13, %v7119_v28  ;;  %v3202_v19 = vpop.f32.mrf.mxu1  ;;  %v2190_v28 = vsel %vm354_vm0, %v5957_v18, 0 }
 0x331   : > { %v2708_v24 = vadd.f32 %v2707_v7, %v2342_v35  ;;  %v2933_v45 = vpop.f32.mrf.mxu0  ;;  %v2483_v7 = vand.u32 4294901760, %v2482_v32  ;;  %v2489_v35 = vand.u32 4294901760, %v2488_v38 }
 0x332   : > { %2774 = vmatmul.f32.gmra.mxu3 %v7531_v49  ;;  %3297 = vmatmul.f32.gmra.mxu1 %v2473_v62  ;;  %v7558_v49 = vand.u32 4294901760, %v2190_v28 }
 0x333   : > { %v2929_v8 = vadd.f32 %v2928_v53, %v2708_v24  ;;  %2476 = vmatmul.f32.gmra.mxu2 %v2475_v54  ;;  %v5958_v54 = vld [vmem:[%s6221_s25 + $0x130] sm:$0xff] }
 0x334   : > { %3012 = vmatmul.f32.gmra.mxu0 %v2472_v17  ;;  %10105 = vst [vmem:[#allocation27_spill] sm:$0xff] %v7558_v49  ;;  %v2496_v46 = vsub.f32 %v2190_v28, %v7558_v49 }
 0x335   : > { %v7555_v40 = vadd.f32 %v3196_v44, %v2929_v8  ;;  %v2711_v21 = vpop.f32.mrf.mxu3  ;;  %v2490_v44 = vsub.f32 %v2488_v38, %v2489_v35 }
 0x336   : > { %v2349_v30 = vpop.f32.mrf.mxu2 }
 0x337   : > { %v2350_v63 = vadd.f32 %v2349_v30, %v7128_v15  ;;  %v3208_v13 = vpop.f32.mrf.mxu1  ;;  %v2193_v15 = vsel %vm354_vm0, %v5958_v54, 0 }
 0x339   : > { %v2712_v62 = vadd.f32 %v2711_v21, %v2350_v63  ;;  %v2938_v53 = vpop.f32.mrf.mxu0  ;;  %v2491_v21 = vand.u32 4294901760, %v2490_v44  ;;  %v2497_v63 = vand.u32 4294901760, %v2496_v46 }
 0x33a   : > { %2778 = vmatmul.f32.gmra.mxu3 %v7540_v10  ;;  %3303 = vmatmul.f32.gmra.mxu1 %v2481_v22  ;;  %v7567_v10 = vand.u32 4294901760, %v2193_v15 }
 0x33b   : > { %v2934_v17 = vadd.f32 %v2933_v45, %v2712_v62  ;;  %2484 = vmatmul.f32.gmra.mxu2 %v2483_v7  ;;  %v5959_v7 = vld [vmem:[%s6221_s25 + $0x138] sm:$0xff] }
 0x33c   : > { %3017 = vmatmul.f32.gmra.mxu0 %v2480_v29  ;;  %10106 = vst [vmem:[#allocation26_spill] sm:$0xff] %v7567_v10  ;;  %v2504_v28 = vsub.f32 %v2193_v15, %v7567_v10 }
 0x33d   : > { %v7564_v24 = vadd.f32 %v3202_v19, %v2934_v17  ;;  %v2715_v18 = vpop.f32.mrf.mxu3  ;;  %v2498_v19 = vsub.f32 %v2496_v46, %v2497_v63 }
 0x33e   : > { %v2357_v8 = vpop.f32.mrf.mxu2 }
 0x33f   : > { %v2358_v32 = vadd.f32 %v2357_v8, %v7137_v20  ;;  %v3214_v30 = vpop.f32.mrf.mxu1  ;;  %v2196_v20 = vsel %vm354_vm0, %v5959_v7, 0 }
 0x341   : > { %v2716_v22 = vadd.f32 %v2715_v18, %v2358_v32  ;;  %v2943_v45 = vpop.f32.mrf.mxu0  ;;  %v2499_v18 = vand.u32 4294901760, %v2498_v19  ;;  %v2505_v32 = vand.u32 4294901760, %v2504_v28 }
 0x342   : > { %2782 = vmatmul.f32.gmra.mxu3 %v7549_v58  ;;  %3309 = vmatmul.f32.gmra.mxu1 %v2489_v35  ;;  %v7576_v58 = vand.u32 4294901760, %v2196_v20 }
 0x343   : > { %v2939_v29 = vadd.f32 %v2938_v53, %v2716_v22  ;;  %2492 = vmatmul.f32.gmra.mxu2 %v2491_v21  ;;  %v5960_v21 = vld [vmem:[%s6221_s25 + $0x140] sm:$0xff] }
 0x344   : > { %3022 = vmatmul.f32.gmra.mxu0 %v2488_v38  ;;  %10107 = vst [vmem:[#allocation29_spill] sm:$0xff] %v7576_v58  ;;  %v2512_v15 = vsub.f32 %v2196_v20, %v7576_v58 }
 0x345   : > { %v7573_v62 = vadd.f32 %v3208_v13, %v2939_v29  ;;  %v2719_v54 = vpop.f32.mrf.mxu3  ;;  %v2506_v13 = vsub.f32 %v2504_v28, %v2505_v32 }
 0x346   : > { %v2365_v17 = vpop.f32.mrf.mxu2 }
 0x347   : > { %v2366_v44 = vadd.f32 %v2365_v17, %v7146_v27  ;;  %v3220_v8 = vpop.f32.mrf.mxu1  ;;  %v2199_v27 = vsel %vm354_vm0, %v5960_v21, 0 }
 0x349   : > { %v2720_v35 = vadd.f32 %v2719_v54, %v2366_v44  ;;  %v2948_v53 = vpop.f32.mrf.mxu0  ;;  %v2507_v54 = vand.u32 4294901760, %v2506_v13  ;;  %v2513_v44 = vand.u32 4294901760, %v2512_v15 }
 0x34a   : > { %2786 = vmatmul.f32.gmra.mxu3 %v7558_v49  ;;  %3315 = vmatmul.f32.gmra.mxu1 %v2497_v63  ;;  %v7585_v49 = vand.u32 4294901760, %v2199_v27 }
 0x34b   : > { %v2944_v38 = vadd.f32 %v2943_v45, %v2720_v35  ;;  %2500 = vmatmul.f32.gmra.mxu2 %v2499_v18  ;;  %v5961_v18 = vld [vmem:[%s6221_s25 + $0x148] sm:$0xff] }
 0x34c   : > { %3027 = vmatmul.f32.gmra.mxu0 %v2496_v46  ;;  %10108 = vst [vmem:[#allocation28_spill] sm:$0xff] %v7585_v49  ;;  %v2520_v20 = vsub.f32 %v2199_v27, %v7585_v49 }
 0x34d   : > { %v7582_v22 = vadd.f32 %v3214_v30, %v2944_v38  ;;  %v2723_v7 = vpop.f32.mrf.mxu3  ;;  %v2514_v30 = vsub.f32 %v2512_v15, %v2513_v44 }
 0x34e   : > { %v2373_v29 = vpop.f32.mrf.mxu2 }
 0x34f   : > { %v2374_v19 = vadd.f32 %v2373_v29, %v7155_v42  ;;  %v3226_v17 = vpop.f32.mrf.mxu1  ;;  %v2202_v42 = vsel %vm354_vm0, %v5961_v18, 0 }
 0x351   : > { %v2724_v63 = vadd.f32 %v2723_v7, %v2374_v19  ;;  %v2953_v45 = vpop.f32.mrf.mxu0  ;;  %v2515_v7 = vand.u32 4294901760, %v2514_v30  ;;  %v2521_v19 = vand.u32 4294901760, %v2520_v20 }
 0x352   : > { %2790 = vmatmul.f32.gmra.mxu3 %v7567_v10  ;;  %3321 = vmatmul.f32.gmra.mxu1 %v2505_v32  ;;  %v7594_v10 = vand.u32 4294901760, %v2202_v42 }
 0x353   : > { %v2949_v46 = vadd.f32 %v2948_v53, %v2724_v63  ;;  %2508 = vmatmul.f32.gmra.mxu2 %v2507_v54  ;;  %v5962_v54 = vld [vmem:[%s6221_s25 + $0x150] sm:$0xff] }
 0x354   : > { %3032 = vmatmul.f32.gmra.mxu0 %v2504_v28  ;;  %10109 = vst [vmem:[#allocation31_spill] sm:$0xff] %v7594_v10  ;;  %v2528_v27 = vsub.f32 %v2202_v42, %v7594_v10 }
 0x355   : > { %v7591_v35 = vadd.f32 %v3220_v8, %v2949_v46  ;;  %v2727_v21 = vpop.f32.mrf.mxu3  ;;  %v2522_v8 = vsub.f32 %v2520_v20, %v2521_v19 }
 0x356   : > { %v2381_v38 = vpop.f32.mrf.mxu2 }
 0x357   : > { %v2382_v13 = vadd.f32 %v2381_v38, %v7164_v56  ;;  %v3232_v29 = vpop.f32.mrf.mxu1  ;;  %v2205_v56 = vsel %vm354_vm0, %v5962_v54, 0 }
 0x359   : > { %v2728_v32 = vadd.f32 %v2727_v21, %v2382_v13  ;;  %v2958_v53 = vpop.f32.mrf.mxu0  ;;  %v2523_v21 = vand.u32 4294901760, %v2522_v8  ;;  %v2529_v13 = vand.u32 4294901760, %v2528_v27 }
 0x35a   : > { %2794 = vmatmul.f32.gmra.mxu3 %v7576_v58  ;;  %3327 = vmatmul.f32.gmra.mxu1 %v2513_v44  ;;  %v7603_v58 = vand.u32 4294901760, %v2205_v56 }
 0x35b   : > { %v2954_v28 = vadd.f32 %v2953_v45, %v2728_v32  ;;  %2516 = vmatmul.f32.gmra.mxu2 %v2515_v7  ;;  %v5963_v7 = vld [vmem:[%s6221_s25 + $0x158] sm:$0xff] }
 0x35c   : > { %3037 = vmatmul.f32.gmra.mxu0 %v2512_v15  ;;  %10110 = vst [vmem:[#allocation30_spill] sm:$0xff] %v7603_v58  ;;  %v2536_v42 = vsub.f32 %v2205_v56, %v7603_v58 }
 0x35d   : > { %v7600_v63 = vadd.f32 %v3226_v17, %v2954_v28  ;;  %v2731_v18 = vpop.f32.mrf.mxu3  ;;  %v2530_v17 = vsub.f32 %v2528_v27, %v2529_v13 }
 0x35e   : > { %v2389_v46 = vpop.f32.mrf.mxu2 }
 0x35f   : > { %v2390_v30 = vadd.f32 %v2389_v46, %v7173_v6  ;;  %v3238_v38 = vpop.f32.mrf.mxu1  ;;  %v2208_v6 = vsel %vm354_vm0, %v5963_v7, 0 }
 0x361   : > { %v2732_v44 = vadd.f32 %v2731_v18, %v2390_v30  ;;  %v2963_v45 = vpop.f32.mrf.mxu0  ;;  %v2531_v18 = vand.u32 4294901760, %v2530_v17  ;;  %v2537_v30 = vand.u32 4294901760, %v2536_v42 }
 0x362   : > { %2798 = vmatmul.f32.gmra.mxu3 %v7585_v49  ;;  %3333 = vmatmul.f32.gmra.mxu1 %v2521_v19  ;;  %v7612_v49 = vand.u32 4294901760, %v2208_v6 }
 0x363   : > { %v2959_v15 = vadd.f32 %v2958_v53, %v2732_v44  ;;  %2524 = vmatmul.f32.gmra.mxu2 %v2523_v21  ;;  %v5964_v21 = vld [vmem:[%s6221_s25 + $0x160] sm:$0xff] }
 0x364   : > { %3042 = vmatmul.f32.gmra.mxu0 %v2520_v20  ;;  %10111 = vst [vmem:[#allocation33_spill] sm:$0xff] %v7612_v49  ;;  %v2544_v56 = vsub.f32 %v2208_v6, %v7612_v49 }
 0x365   : > { %v7609_v32 = vadd.f32 %v3232_v29, %v2959_v15  ;;  %v2735_v54 = vpop.f32.mrf.mxu3  ;;  %v2538_v29 = vsub.f32 %v2536_v42, %v2537_v30 }
 0x366   : > { %v2397_v28 = vpop.f32.mrf.mxu2 }
 0x367   : > { %v2398_v8 = vadd.f32 %v2397_v28, %v7182_v34  ;;  %v3244_v46 = vpop.f32.mrf.mxu1  ;;  %v2211_v34 = vsel %vm354_vm0, %v5964_v21, 0 }
 0x369   : > { %v2736_v19 = vadd.f32 %v2735_v54, %v2398_v8  ;;  %v2968_v53 = vpop.f32.mrf.mxu0  ;;  %v2539_v54 = vand.u32 4294901760, %v2538_v29  ;;  %v2545_v8 = vand.u32 4294901760, %v2544_v56 }
 0x36a   : > { %2802 = vmatmul.f32.gmra.mxu3 %v7594_v10  ;;  %3339 = vmatmul.f32.gmra.mxu1 %v2529_v13  ;;  %v7621_v10 = vand.u32 4294901760, %v2211_v34 }
 0x36b   : > { %v2964_v20 = vadd.f32 %v2963_v45, %v2736_v19  ;;  %2532 = vmatmul.f32.gmra.mxu2 %v2531_v18  ;;  %v5965_v18 = vld [vmem:[%s6221_s25 + $0x168] sm:$0xff] }
 0x36c   : > { %3047 = vmatmul.f32.gmra.mxu0 %v2528_v27  ;;  %10112 = vst [vmem:[#allocation32_spill] sm:$0xff] %v7621_v10  ;;  %v2552_v6 = vsub.f32 %v2211_v34, %v7621_v10 }
 0x36d   : > { %v7618_v44 = vadd.f32 %v3238_v38, %v2964_v20  ;;  %v2739_v7 = vpop.f32.mrf.mxu3  ;;  %v2546_v38 = vsub.f32 %v2544_v56, %v2545_v8 }
 0x36e   : > { %v2405_v15 = vpop.f32.mrf.mxu2 }
 0x36f   : > { %v2406_v17 = vadd.f32 %v2405_v15, %v7191_v55  ;;  %v3250_v28 = vpop.f32.mrf.mxu1  ;;  %v2214_v55 = vsel %vm354_vm0, %v5965_v18, 0 }
 0x371   : > { %v2740_v13 = vadd.f32 %v2739_v7, %v2406_v17  ;;  %v2973_v45 = vpop.f32.mrf.mxu0  ;;  %v2547_v7 = vand.u32 4294901760, %v2546_v38  ;;  %v2553_v17 = vand.u32 4294901760, %v2552_v6 }
 0x372   : > { %2806 = vmatmul.f32.gmra.mxu3 %v7603_v58  ;;  %3345 = vmatmul.f32.gmra.mxu1 %v2537_v30  ;;  %v7630_v58 = vand.u32 4294901760, %v2214_v55 }
 0x373   : > { %v2969_v27 = vadd.f32 %v2968_v53, %v2740_v13  ;;  %2540 = vmatmul.f32.gmra.mxu2 %v2539_v54  ;;  %v5966_v54 = vld [vmem:[%s6221_s25 + $0x170] sm:$0xff] }
 0x374   : > { %3052 = vmatmul.f32.gmra.mxu0 %v2536_v42  ;;  %10113 = vst [vmem:[#allocation35_spill] sm:$0xff] %v7630_v58  ;;  %v2560_v34 = vsub.f32 %v2214_v55, %v7630_v58 }
 0x375   : > { %v7627_v19 = vadd.f32 %v3244_v46, %v2969_v27  ;;  %v2743_v21 = vpop.f32.mrf.mxu3  ;;  %v2554_v46 = vsub.f32 %v2552_v6, %v2553_v17 }
 0x376   : > { %v2413_v20 = vpop.f32.mrf.mxu2 }
 0x377   : > { %v2414_v29 = vadd.f32 %v2413_v20, %v7200_v25  ;;  %v3256_v15 = vpop.f32.mrf.mxu1  ;;  %v2217_v25 = vsel %vm354_vm0, %v5966_v54, 0 }
 0x379   : > { %v2744_v30 = vadd.f32 %v2743_v21, %v2414_v29  ;;  %v2978_v53 = vpop.f32.mrf.mxu0  ;;  %v2555_v21 = vand.u32 4294901760, %v2554_v46  ;;  %v2561_v29 = vand.u32 4294901760, %v2560_v34 }
 0x37a   : > { %2810 = vmatmul.f32.gmra.mxu3 %v7612_v49  ;;  %3351 = vmatmul.f32.gmra.mxu1 %v2545_v8  ;;  %v7639_v49 = vand.u32 4294901760, %v2217_v25 }
 0x37b   : > { %v2974_v42 = vadd.f32 %v2973_v45, %v2744_v30  ;;  %2548 = vmatmul.f32.gmra.mxu2 %v2547_v7  ;;  %v5967_v7 = vld [vmem:[%s6221_s25 + $0x178] sm:$0xff] }
 0x37c   : > { %3057 = vmatmul.f32.gmra.mxu0 %v2544_v56  ;;  %10114 = vst [vmem:[#allocation34_spill] sm:$0xff] %v7639_v49  ;;  %v2568_v55 = vsub.f32 %v2217_v25, %v7639_v49 }
 0x37d   : > { %v7636_v13 = vadd.f32 %v3250_v28, %v2974_v42  ;;  %v2747_v18 = vpop.f32.mrf.mxu3  ;;  %v2562_v28 = vsub.f32 %v2560_v34, %v2561_v29 }
 0x37e   : > { %v2421_v27 = vpop.f32.mrf.mxu2 }
 0x37f   : > { %v2422_v38 = vadd.f32 %v2421_v27, %v7209_v5  ;;  %v3262_v20 = vpop.f32.mrf.mxu1  ;;  %v2220_v5 = vsel %vm354_vm0, %v5967_v7, 0 }
 0x381   : > { %v2748_v8 = vadd.f32 %v2747_v18, %v2422_v38  ;;  %v2983_v45 = vpop.f32.mrf.mxu0  ;;  %v2563_v18 = vand.u32 4294901760, %v2562_v28  ;;  %v2569_v38 = vand.u32 4294901760, %v2568_v55 }
 0x382   : > { %2814 = vmatmul.f32.gmra.mxu3 %v7621_v10  ;;  %3357 = vmatmul.f32.gmra.mxu1 %v2553_v17  ;;  %v7648_v10 = vand.u32 4294901760, %v2220_v5 }
 0x383   : > { %v2979_v56 = vadd.f32 %v2978_v53, %v2748_v8  ;;  %2556 = vmatmul.f32.gmra.mxu2 %v2555_v21  ;;  %v5968_v21 = vld [vmem:[%s6221_s25 + $0x180] sm:$0xff] }
 0x384   : > { %3062 = vmatmul.f32.gmra.mxu0 %v2552_v6  ;;  %10115 = vst [vmem:[#allocation42_spill] sm:$0xff] %v7648_v10  ;;  %v2576_v25 = vsub.f32 %v2220_v5, %v7648_v10 }
 0x385   : > { %v7645_v30 = vadd.f32 %v3256_v15, %v2979_v56  ;;  %v2751_v54 = vpop.f32.mrf.mxu3  ;;  %v2570_v15 = vsub.f32 %v2568_v55, %v2569_v38 }
 0x386   : > { %v2429_v42 = vpop.f32.mrf.mxu2 }
 0x387   : > { %v2430_v46 = vadd.f32 %v2429_v42, %v7218_v37  ;;  %v3268_v27 = vpop.f32.mrf.mxu1  ;;  %v2223_v37 = vsel %vm354_vm0, %v5968_v21, 0 }
 0x389   : > { %v2752_v17 = vadd.f32 %v2751_v54, %v2430_v46  ;;  %v2988_v53 = vpop.f32.mrf.mxu0  ;;  %v2571_v54 = vand.u32 4294901760, %v2570_v15  ;;  %v2577_v46 = vand.u32 4294901760, %v2576_v25 }
 0x38a   : > { %2818 = vmatmul.f32.gmra.mxu3 %v7630_v58  ;;  %3363 = vmatmul.f32.gmra.mxu1 %v2561_v29  ;;  %v7657_v58 = vand.u32 4294901760, %v2223_v37 }
 0x38b   : > { %v2984_v6 = vadd.f32 %v2983_v45, %v2752_v17  ;;  %2564 = vmatmul.f32.gmra.mxu2 %v2563_v18  ;;  %v5969_v18 = vld [vmem:[%s6221_s25 + $0x188] sm:$0xff] }
 0x38c   : > { %3067 = vmatmul.f32.gmra.mxu0 %v2560_v34  ;;  %10116 = vst [vmem:[#allocation37_spill] sm:$0xff] %v7657_v58  ;;  %v2584_v5 = vsub.f32 %v2223_v37, %v7657_v58 }
 0x38d   : > { %v7654_v8 = vadd.f32 %v3262_v20, %v2984_v6  ;;  %v2755_v7 = vpop.f32.mrf.mxu3  ;;  %v2578_v20 = vsub.f32 %v2576_v25, %v2577_v46 }
 0x38e   : > { %v2437_v56 = vpop.f32.mrf.mxu2 }
 0x38f   : > { %v2438_v28 = vadd.f32 %v2437_v56, %v7227_v23  ;;  %v3274_v42 = vpop.f32.mrf.mxu1  ;;  %v2226_v23 = vsel %vm354_vm0, %v5969_v18, 0 }
 0x391   : > { %v2756_v29 = vadd.f32 %v2755_v7, %v2438_v28  ;;  %v2993_v45 = vpop.f32.mrf.mxu0  ;;  %v2579_v7 = vand.u32 4294901760, %v2578_v20  ;;  %v2585_v28 = vand.u32 4294901760, %v2584_v5 }
 0x392   : > { %2822 = vmatmul.f32.gmra.mxu3 %v7639_v49  ;;  %3369 = vmatmul.f32.gmra.mxu1 %v2569_v38  ;;  %v7666_v49 = vand.u32 4294901760, %v2226_v23 }
 0x393   : > { %v2989_v34 = vadd.f32 %v2988_v53, %v2756_v29  ;;  %2572 = vmatmul.f32.gmra.mxu2 %v2571_v54  ;;  %v5970_v54 = vld [vmem:[%s6221_s25 + $0x190] sm:$0xff] }
 0x394   : > { %3072 = vmatmul.f32.gmra.mxu0 %v2568_v55  ;;  %10117 = vst [vmem:[#allocation36_spill] sm:$0xff] %v7666_v49  ;;  %v2592_v37 = vsub.f32 %v2226_v23, %v7666_v49 }
 0x395   : > { %v7663_v17 = vadd.f32 %v3268_v27, %v2989_v34  ;;  %v2759_v21 = vpop.f32.mrf.mxu3  ;;  %v2586_v27 = vsub.f32 %v2584_v5, %v2585_v28 }
 0x396   : > { %v2445_v6 = vpop.f32.mrf.mxu2 }
 0x397   : > { %v2446_v15 = vadd.f32 %v2445_v6, %v7236_v1  ;;  %v3280_v56 = vpop.f32.mrf.mxu1  ;;  %v2229_v1 = vsel %vm354_vm0, %v5970_v54, 0 }
 0x399   : > { %v2760_v38 = vadd.f32 %v2759_v21, %v2446_v15  ;;  %v2998_v53 = vpop.f32.mrf.mxu0  ;;  %v2587_v21 = vand.u32 4294901760, %v2586_v27  ;;  %v2593_v15 = vand.u32 4294901760, %v2592_v37 }
 0x39a   : > { %2826 = vmatmul.f32.gmra.mxu3 %v7648_v10  ;;  %3375 = vmatmul.f32.gmra.mxu1 %v2577_v46  ;;  %v7675_v10 = vand.u32 4294901760, %v2229_v1 }
 0x39b   : > { %v2994_v55 = vadd.f32 %v2993_v45, %v2760_v38  ;;  %2580 = vmatmul.f32.gmra.mxu2 %v2579_v7  ;;  %v5971_v7 = vld [vmem:[%s6221_s25 + $0x198] sm:$0xff] }
 0x39c   : > { %3077 = vmatmul.f32.gmra.mxu0 %v2576_v25  ;;  %10118 = vst [vmem:[#allocation48_spill] sm:$0xff] %v7675_v10  ;;  %v2600_v23 = vsub.f32 %v2229_v1, %v7675_v10 }
 0x39d   : > { %v7672_v29 = vadd.f32 %v3274_v42, %v2994_v55  ;;  %v2763_v18 = vpop.f32.mrf.mxu3  ;;  %v2594_v42 = vsub.f32 %v2592_v37, %v2593_v15 }
 0x39e   : > { %v2453_v34 = vpop.f32.mrf.mxu2 }
 0x39f   : > { %v2454_v20 = vadd.f32 %v2453_v34, %v7243_v26  ;;  %v3286_v6 = vpop.f32.mrf.mxu1  ;;  %v2232_v26 = vsel %vm354_vm0, %v5971_v7, 0 }
 0x3a1   : > { %v2764_v46 = vadd.f32 %v2763_v18, %v2454_v20  ;;  %v3003_v45 = vpop.f32.mrf.mxu0  ;;  %v2595_v18 = vand.u32 4294901760, %v2594_v42  ;;  %v2601_v20 = vand.u32 4294901760, %v2600_v23 }
 0x3a2   : > { %2830 = vmatmul.f32.gmra.mxu3 %v7657_v58  ;;  %3381 = vmatmul.f32.gmra.mxu1 %v2585_v28  ;;  %v7684_v58 = vand.u32 4294901760, %v2232_v26 }
 0x3a3   : > { %v2999_v25 = vadd.f32 %v2998_v53, %v2764_v46  ;;  %2588 = vmatmul.f32.gmra.mxu2 %v2587_v21  ;;  %v5972_v21 = vld [vmem:[%s6221_s25 + $0x1a0] sm:$0xff] }
 0x3a4   : > { %3082 = vmatmul.f32.gmra.mxu0 %v2584_v5  ;;  %10119 = vst [vmem:[#allocation40_spill] sm:$0xff] %v7684_v58  ;;  %v2608_v1 = vsub.f32 %v2232_v26, %v7684_v58 }
 0x3a5   : > { %v7681_v38 = vadd.f32 %v3280_v56, %v2999_v25  ;;  %v2767_v54 = vpop.f32.mrf.mxu3  ;;  %v2602_v56 = vsub.f32 %v2600_v23, %v2601_v20 }
 0x3a6   : > { %v2461_v55 = vpop.f32.mrf.mxu2 }
 0x3a7   : > { %v2462_v27 = vadd.f32 %v2461_v55, %v7251_v16  ;;  %v3292_v34 = vpop.f32.mrf.mxu1  ;;  %v2235_v16 = vsel %vm354_vm0, %v5972_v21, 0 }
 0x3a9   : > { %v2768_v28 = vadd.f32 %v2767_v54, %v2462_v27  ;;  %v3008_v53 = vpop.f32.mrf.mxu0  ;;  %v2603_v54 = vand.u32 4294901760, %v2602_v56  ;;  %v2609_v27 = vand.u32 4294901760, %v2608_v1 }
 0x3aa   : > { %2834 = vmatmul.f32.gmra.mxu3 %v7666_v49  ;;  %3387 = vmatmul.f32.gmra.mxu1 %v2593_v15  ;;  %v7693_v49 = vand.u32 4294901760, %v2235_v16 }
 0x3ab   : > { %v3004_v5 = vadd.f32 %v3003_v45, %v2768_v28  ;;  %2596 = vmatmul.f32.gmra.mxu2 %v2595_v18  ;;  %v5973_v18 = vld [vmem:[%s6221_s25 + $0x1a8] sm:$0xff] }
 0x3ac   : > { %3087 = vmatmul.f32.gmra.mxu0 %v2592_v37  ;;  %10120 = vst [vmem:[#allocation38_spill] sm:$0xff] %v7693_v49  ;;  %v2616_v26 = vsub.f32 %v2235_v16, %v7693_v49 }
 0x3ad   : > { %v7690_v46 = vadd.f32 %v3286_v6, %v3004_v5  ;;  %v2771_v7 = vpop.f32.mrf.mxu3  ;;  %v2610_v6 = vsub.f32 %v2608_v1, %v2609_v27 }
 0x3ae   : > { %v2469_v25 = vpop.f32.mrf.mxu2 }
 0x3af   : > { %v2470_v42 = vadd.f32 %v2469_v25, %v7259_v43  ;;  %v3298_v55 = vpop.f32.mrf.mxu1  ;;  %v2238_v43 = vsel %vm354_vm0, %v5973_v18, 0 }
 0x3b1   : > { %v2772_v15 = vadd.f32 %v2771_v7, %v2470_v42  ;;  %v3013_v45 = vpop.f32.mrf.mxu0  ;;  %v2611_v7 = vand.u32 4294901760, %v2610_v6  ;;  %v2617_v42 = vand.u32 4294901760, %v2616_v26 }
 0x3b2   : > { %2838 = vmatmul.f32.gmra.mxu3 %v7675_v10  ;;  %3393 = vmatmul.f32.gmra.mxu1 %v2601_v20  ;;  %v7702_v10 = vand.u32 4294901760, %v2238_v43 }
 0x3b3   : > { %v3009_v37 = vadd.f32 %v3008_v53, %v2772_v15  ;;  %2604 = vmatmul.f32.gmra.mxu2 %v2603_v54  ;;  %v5974_v54 = vld [vmem:[%s6221_s25 + $0x1b0] sm:$0xff] }
 0x3b4   : > { %3092 = vmatmul.f32.gmra.mxu0 %v2600_v23  ;;  %v2624_v16 = vsub.f32 %v2238_v43, %v7702_v10 }
 0x3b5   : > { %v7699_v28 = vadd.f32 %v3292_v34, %v3009_v37  ;;  %v2775_v21 = vpop.f32.mrf.mxu3  ;;  %v2618_v34 = vsub.f32 %v2616_v26, %v2617_v42 }
 0x3b6   : > { %v2477_v5 = vpop.f32.mrf.mxu2 }
 0x3b7   : > { %v2478_v56 = vadd.f32 %v2477_v5, %v7267_v4  ;;  %v3304_v25 = vpop.f32.mrf.mxu1  ;;  %v2241_v4 = vsel %vm354_vm0, %v5974_v54, 0 }
 0x3b9   : > { %v2776_v20 = vadd.f32 %v2775_v21, %v2478_v56  ;;  %v3018_v53 = vpop.f32.mrf.mxu0  ;;  %v2619_v21 = vand.u32 4294901760, %v2618_v34  ;;  %v2625_v56 = vand.u32 4294901760, %v2624_v16 }
 0x3ba   : > { %2842 = vmatmul.f32.gmra.mxu3 %v7684_v58  ;;  %3399 = vmatmul.f32.gmra.mxu1 %v2609_v27  ;;  %v7711_v58 = vand.u32 4294901760, %v2241_v4 }
 0x3bb   : > { %v3014_v23 = vadd.f32 %v3013_v45, %v2776_v20  ;;  %2612 = vmatmul.f32.gmra.mxu2 %v2611_v7  ;;  %v5975_v7 = vld [vmem:[%s6221_s25 + $0x1b8] sm:$0xff]  ;;  %v2626_v43 = vsub.f32 %v2624_v16, %v2625_v56 }
 0x3bc   : > { %3097 = vmatmul.f32.gmra.mxu0 %v2608_v1 }
 0x3bd   : > { %v7708_v15 = vadd.f32 %v3298_v55, %v3014_v23  ;;  %v2779_v18 = vpop.f32.mrf.mxu3  ;;  %v2632_v55 = vsub.f32 %v2241_v4, %v7711_v58  ;;  %v3849_v4 = vld [vmem:[%s6221_s25] sm:$0xff] }
 0x3be   : > { %v2485_v37 = vpop.f32.mrf.mxu2 }
 0x3bf   : > { %v2486_v6 = vadd.f32 %v2485_v37, %v7275_v47  ;;  %v3310_v5 = vpop.f32.mrf.mxu1  ;;  %v2244_v47 = vsel %vm354_vm0, %v5975_v7, 0  ;;  %v3900_v7 = vsel %vm354_vm0, %v3849_v4, 0 }
 0x3c1   : > { %v2780_v27 = vadd.f32 %v2779_v18, %v2486_v6  ;;  %v3023_v45 = vpop.f32.mrf.mxu0  ;;  %v2627_v18 = vand.u32 4294901760, %v2626_v43  ;;  %v2633_v6 = vand.u32 4294901760, %v2632_v55 }
 0x3c2   : > { %2846 = vmatmul.f32.gmra.mxu3 %v7693_v49  ;;  %3405 = vmatmul.f32.gmra.mxu1 %v2617_v42  ;;  %v7720_v49 = vand.u32 4294901760, %v2244_v47 }
 0x3c3   : > { %v3019_v1 = vadd.f32 %v3018_v53, %v2780_v27  ;;  %2620 = vmatmul.f32.gmra.mxu2 %v2619_v21  ;;  %v2634_v21 = vsub.f32 %v2632_v55, %v2633_v6 }
 0x3c4   : > { %3102 = vmatmul.f32.gmra.mxu0 %v2616_v26 }
 0x3c5   : > { %v7717_v20 = vadd.f32 %v3304_v25, %v3019_v1  ;;  %v2783_v54 = vpop.f32.mrf.mxu3  ;;  %v2640_v25 = vsub.f32 %v2244_v47, %v7720_v49  ;;  %v3850_v47 = vld [vmem:[%s6221_s25 + $0x8] sm:$0xff] }
 0x3c6   : > { %v2493_v23 = vpop.f32.mrf.mxu2 }
 0x3c7   : > { %v2494_v34 = vadd.f32 %v2493_v23, %v7285_v57  ;;  %v3316_v37 = vpop.f32.mrf.mxu1 }
 0x3c9   : > { %v2784_v42 = vadd.f32 %v2783_v54, %v2494_v34  ;;  %v3028_v53 = vpop.f32.mrf.mxu0  ;;  %v2635_v54 = vand.u32 4294901760, %v2634_v21  ;;  %v2641_v34 = vand.u32 4294901760, %v2640_v25 }
 0x3ca   : > { %2850 = vmatmul.f32.gmra.mxu3 %v7702_v10  ;;  %3411 = vmatmul.f32.gmra.mxu1 %v2625_v56  ;;  %v7729_v56 = vand.u32 4294901760, %v3900_v7 }
 0x3cb   : > { %v3024_v26 = vadd.f32 %v3023_v45, %v2784_v42  ;;  %2628 = vmatmul.f32.gmra.mxu2 %v2627_v18 }
 0x3cc   : > { %3107 = vmatmul.f32.gmra.mxu0 %v2624_v16  ;;  %10121 = vst [vmem:[#allocation55_spill] sm:$0xff] %v7729_v56  ;;  %v7734_v42 = vsub.f32 %v3900_v7, %v7729_v56 }
 0x3cd   : > { %v7725_v27 = vadd.f32 %v3310_v5, %v3024_v26  ;;  %v2787_v57 = vpop.f32.mrf.mxu3  ;;  %v2642_v5 = vsub.f32 %v2640_v25, %v2641_v34  ;;  %v3903_v26 = vsel %vm354_vm0, %v3850_v47, 0 }
 0x3ce   : > { %v2501_v1 = vpop.f32.mrf.mxu2 }
 0x3cf   : > { %v2502_v43 = vadd.f32 %v2501_v1, %v7299_v9  ;;  %v3322_v23 = vpop.f32.mrf.mxu1  ;;  %v2643_v1 = vand.u32 4294901760, %v2642_v5 }
 0x3d1   : > { %v2788_v45 = vadd.f32 %v2787_v57, %v2502_v43  ;;  %v3033_v18 = vpop.f32.mrf.mxu0 }
 0x3d2   : > { %2854 = vmatmul.f32.gmra.mxu3 %v7711_v58  ;;  %3417 = vmatmul.f32.gmra.mxu1 %v2633_v6  ;;  %v9681_v6 = vand.u32 4294901760, %v7734_v42 }
 0x3d3   : > { %v3029_v16 = vadd.f32 %v3028_v53, %v2788_v45  ;;  %2636 = vmatmul.f32.gmra.mxu2 %v2635_v54  ;;  %v7741_v53 = vand.u32 4294901760, %v3903_v26 }
 0x3d4   : > { %3112 = vmatmul.f32.gmra.mxu0 %v2632_v55  ;;  %v3851_v55 = vld [vmem:[%s6221_s25 + $0x10] sm:$0xff] }
 0x3d5   : > { %v7736_v9 = vadd.f32 %v3316_v37, %v3029_v16  ;;  %v2791_v4 = vpop.f32.mrf.mxu3  ;;  %10122 = vst [vmem:[#allocation46_spill] sm:$0xff] %v7741_v53  ;;  %v7749_v7 = vsub.f32 %v3903_v26, %v7741_v53  ;;  %v3906_v5 = vsel %vm354_vm0, %v3851_v55, 0 }
 0x3d6   : > { %v2509_v21 = vpop.f32.mrf.mxu2 }
 0x3d7   : > { %v2510_v57 = vadd.f32 %v2509_v21, %v7312_v36  ;;  %v3328_v43 = vpop.f32.mrf.mxu1  ;;  %v4063_v36 = vsub.f32 %v7734_v42, %v9681_v6 }
 0x3d9   : > { %v2792_v54 = vadd.f32 %v2791_v4, %v2510_v57  ;;  %v3038_v45 = vpop.f32.mrf.mxu0  ;;  %v7756_v57 = vand.u32 4294901760, %v3906_v5 }
 0x3da   : > { %2858 = vmatmul.f32.gmra.mxu3 %v7720_v49  ;;  %3423 = vmatmul.f32.gmra.mxu1 %v2641_v34 }
 0x3db   : > { %v3034_v37 = vadd.f32 %v3033_v18, %v2792_v54  ;;  %2644 = vmatmul.f32.gmra.mxu2 %v2643_v1  ;;  %v4064_v18 = vand.u32 4294901760, %v4063_v36  ;;  %10123 = vst [vmem:[#allocation44_spill] sm:$0xff] %v7756_v57  ;;  %v7766_v55 = vsub.f32 %v3906_v5, %v7756_v57 }
 0x3dc   : > { %3117 = vmatmul.f32.gmra.mxu0 %v2640_v25  ;;  %v9684_v25 = vand.u32 4294901760, %v7749_v7 }
 0x3dd   : > { %v7751_v47 = vadd.f32 %v3322_v23, %v3034_v37  ;;  %v2795_v16 = vpop.f32.mrf.mxu3  ;;  %v3852_v23 = vld [vmem:[%s6221_s25 + $0x18] sm:$0xff] }
 0x3de   : > { %v2517_v4 = vpop.f32.mrf.mxu2 }
 0x3df   : > { %v2518_v34 = vadd.f32 %v2517_v4, %v7321_v60  ;;  %v3334_v21 = vpop.f32.mrf.mxu1  ;;  %v4071_v60 = vsub.f32 %v7749_v7, %v9684_v25 }
 0x3e1   : > { %v2796_v1 = vadd.f32 %v2795_v16, %v2518_v34  ;;  %v3043_v54 = vpop.f32.mrf.mxu0  ;;  %v3909_v16 = vsel %vm354_vm0, %v3852_v23, 0 }
 0x3e2   : > { %3657 = vmatmul.f32.vlgmr.msrb.gmra.mxu3 %v7289_v61  ;;  %4467 = vmatmul.f32.vlgmr.msrb.gmra.mxu1 %v7729_v56 }
 0x3e3   : > { %v3039_v26 = vadd.f32 %v3038_v45, %v2796_v1  ;;  %3447 = vmatmul.f32.vlgmr.msrb.gmra.mxu2 %v7289_v61  ;;  %v4072_v1 = vand.u32 4294901760, %v4071_v60  ;;  %v9687_v61 = vand.u32 4294901760, %v7766_v55 }
 0x3e4   : > { %4065 = vmatmul.f32.vlgmr.msrb.gmra.mxu0 %v4064_v18  ;;  %v7773_v18 = vand.u32 4294901760, %v3909_v16 }
 0x3e5   : > { %v7768_v37 = vadd.f32 %v3328_v43, %v3039_v26  ;;  %v2799_v36 = vpop.f32.mrf.mxu3  ;;  %v3853_v43 = vld [vmem:[%s6221_s25 + $0x20] sm:$0xff] }
 0x3e6   : > { %v2525_v4 = vpop.f32.mrf.mxu2  ;;  %10124 = vst [vmem:[#allocation61_spill] sm:$0xff] %v7773_v18  ;;  %v7783_v23 = vsub.f32 %v3909_v16, %v7773_v18 }
 0x3e7   : > { %v2526_v34 = vadd.f32 %v2525_v4, %v7330_v12  ;;  %v3340_v45 = vpop.f32.mrf.mxu1  ;;  %v4079_v12 = vsub.f32 %v7766_v55, %v9687_v61 }
 0x3e8   : > { %10125 = vst [vmem:[#allocation53_spill] sm:$0xff] %v7783_v23 }
 0x3e9   : > { %v2800_v6 = vadd.f32 %v2799_v36, %v2526_v34  ;;  %v3048_v56 = vpop.f32.mrf.mxu0  ;;  %v3912_v36 = vsel %vm354_vm0, %v3853_v43, 0 }
 0x3ea   : > { %3661 = vmatmul.f32.gmra.mxu3 %v7302_v33  ;;  %4471 = vmatmul.f32.gmra.mxu1 %v7741_v53 }
 0x3eb   : > { %v3044_v5 = vadd.f32 %v3043_v54, %v2800_v6  ;;  %3451 = vmatmul.f32.gmra.mxu2 %v7302_v33  ;;  %v4080_v54 = vand.u32 4294901760, %v4079_v12  ;;  %v9690_v33 = vand.u32 4294901760, %v7783_v23 }
 0x3ec   : > { %4073 = vmatmul.f32.gmra.mxu0 %v4072_v1  ;;  %v7790_v1 = vand.u32 4294901760, %v3912_v36 }
 0x3ed   : > { %v7785_v26 = vadd.f32 %v3334_v21, %v3044_v5  ;;  %v2803_v60 = vpop.f32.mrf.mxu3  ;;  %v3854_v21 = vld [vmem:[%s6221_s25 + $0x28] sm:$0xff] }
 0x3ee   : > { %v2533_v4 = vpop.f32.mrf.mxu2  ;;  %10126 = vst [vmem:[#allocation50_spill] sm:$0xff] %v7790_v1  ;;  %v7800_v43 = vsub.f32 %v3912_v36, %v7790_v1 }
 0x3ef   : > { %v2534_v34 = vadd.f32 %v2533_v4, %v7339_v59  ;;  %v3346_v6 = vpop.f32.mrf.mxu1  ;;  %v4087_v59 = vsub.f32 %v7783_v23, %v9690_v33 }
 0x3f0   : > { %10127 = vst [vmem:[#allocation66_spill] sm:$0xff] %v7800_v43 }
 0x3f1   : > { %v2804_v25 = vadd.f32 %v2803_v60, %v2534_v34  ;;  %v3053_v53 = vpop.f32.mrf.mxu0  ;;  %v3915_v60 = vsel %vm354_vm0, %v3854_v21, 0 }
 0x3f2   : > { %3665 = vmatmul.f32.gmra.mxu3 %v7315_v0  ;;  %4475 = vmatmul.f32.gmra.mxu1 %v7756_v57 }
 0x3f3   : > { %v3049_v16 = vadd.f32 %v3048_v56, %v2804_v25  ;;  %3455 = vmatmul.f32.gmra.mxu2 %v7315_v0  ;;  %v4088_v25 = vand.u32 4294901760, %v4087_v59  ;;  %v9695_v0 = vand.u32 4294901760, %v7800_v43 }
 0x3f4   : > { %4081 = vmatmul.f32.gmra.mxu0 %v4080_v54  ;;  %v7807_v54 = vand.u32 4294901760, %v3915_v60 }
 0x3f5   : > { %v7802_v5 = vadd.f32 %v3340_v45, %v3049_v16  ;;  %v2807_v12 = vpop.f32.mrf.mxu3  ;;  %v3855_v45 = vld [vmem:[%s6221_s25 + $0x30] sm:$0xff] }
 0x3f6   : > { %v2541_v4 = vpop.f32.mrf.mxu2  ;;  %10128 = vst [vmem:[#allocation59_spill] sm:$0xff] %v7807_v54  ;;  %v7817_v21 = vsub.f32 %v3915_v60, %v7807_v54 }
 0x3f7   : > { %v2542_v34 = vadd.f32 %v2541_v4, %v7348_v39  ;;  %v3352_v56 = vpop.f32.mrf.mxu1  ;;  %v4095_v39 = vsub.f32 %v7800_v43, %v9695_v0  ;;  %v10133_v0 = vld [vmem:[#allocation39_spill] sm:$0xff] }
 0x3f8   : > { %10129 = vst [vmem:[#allocation57_spill] sm:$0xff] %v7817_v21 }
 0x3f9   : > { %v2808_v61 = vadd.f32 %v2807_v12, %v2542_v34  ;;  %v3058_v57 = vpop.f32.mrf.mxu0  ;;  %v3918_v12 = vsel %vm354_vm0, %v3855_v45, 0  ;;  %v10131_v34 = vld [vmem:[#allocation47_spill] sm:$0xff] }
 0x3fa   : > { %3669 = vmatmul.f32.gmra.mxu3 %v7324_v3  ;;  %4479 = vmatmul.f32.gmra.mxu1 %v7773_v18 }
 0x3fb   : > { %v3054_v36 = vadd.f32 %v3053_v53, %v2808_v61  ;;  %3459 = vmatmul.f32.gmra.mxu2 %v7324_v3  ;;  %v4096_v61 = vand.u32 4294901760, %v4095_v39  ;;  %v9700_v3 = vand.u32 4294901760, %v7817_v21 }
 0x3fc   : > { %4089 = vmatmul.f32.gmra.mxu0 %v4088_v25  ;;  %v7824_v25 = vand.u32 4294901760, %v3918_v12 }
 0x3fd   : > { %v7819_v16 = vadd.f32 %v3346_v6, %v3054_v36  ;;  %v2811_v59 = vpop.f32.mrf.mxu3  ;;  %v3856_v6 = vld [vmem:[%s6221_s25 + $0x38] sm:$0xff]  ;;  %v4103_v45 = vsub.f32 %v7817_v21, %v9700_v3  ;;  %v10138_v3 = vld [vmem:[#allocation52_spill] sm:$0xff] }
 0x3fe   : > { %v2549_v4 = vpop.f32.mrf.mxu2  ;;  %10132 = vst [vmem:[#allocation63_spill] sm:$0xff] %v7824_v25  ;;  %v7834_v36 = vsub.f32 %v3918_v12, %v7824_v25 }
 0x3ff   : > { %10130 = vst [vmem:[#allocation65_spill] sm:$0xff] %v7819_v16  ;;  %v2550_v33 = vadd.f32 %v2549_v4, %v10131_v34  ;;  %v3358_v53 = vpop.f32.mrf.mxu1  ;;  %v10136_v34 = vld [vmem:[#allocation58_spill] sm:$0xff] }
 0x400   : > { %10134 = vst [vmem:[#allocation70_spill] sm:$0xff] %v7834_v36 }
 0x401   : > { %v2812_v18 = vadd.f32 %v2811_v59, %v2550_v33  ;;  %v3063_v23 = vpop.f32.mrf.mxu0  ;;  %v3921_v59 = vsel %vm354_vm0, %v3856_v6, 0 }
 0x402   : > { %3673 = vmatmul.f32.gmra.mxu3 %v10133_v0  ;;  %4483 = vmatmul.f32.gmra.mxu1 %v7790_v1 }
 0x403   : > { %v3059_v60 = vadd.f32 %v3058_v57, %v2812_v18  ;;  %3463 = vmatmul.f32.gmra.mxu2 %v10133_v0  ;;  %v4104_v18 = vand.u32 4294901760, %v4103_v45  ;;  %v9705_v0 = vand.u32 4294901760, %v7834_v36 }
 0x404   : > { %4097 = vmatmul.f32.gmra.mxu0 %v4096_v61  ;;  %v7841_v61 = vand.u32 4294901760, %v3921_v59 }
 0x405   : > { %v7836_v39 = vadd.f32 %v3352_v56, %v3059_v60  ;;  %v2815_v33 = vpop.f32.mrf.mxu3  ;;  %v3857_v56 = vld [vmem:[%s6221_s25 + $0x40] sm:$0xff]  ;;  %v4111_v6 = vsub.f32 %v7834_v36, %v9705_v0  ;;  %v10143_v0 = vld [vmem:[#allocation49_spill] sm:$0xff] }
 0x406   : > { %v2557_v4 = vpop.f32.mrf.mxu2  ;;  %10137 = vst [vmem:[#allocation71_spill] sm:$0xff] %v7841_v61  ;;  %v7851_v60 = vsub.f32 %v3921_v59, %v7841_v61 }
 0x407   : > { %10135 = vst [vmem:[#allocation68_spill] sm:$0xff] %v7836_v39  ;;  %v2558_v1 = vadd.f32 %v2557_v4, %v10136_v34  ;;  %v3364_v57 = vpop.f32.mrf.mxu1  ;;  %v10141_v34 = vld [vmem:[#allocation54_spill] sm:$0xff] }
 0x408   : > { %10139 = vst [vmem:[#allocation72_spill] sm:$0xff] %v7851_v60 }
 0x409   : > { %v2816_v43 = vadd.f32 %v2815_v33, %v2558_v1  ;;  %v3068_v16 = vpop.f32.mrf.mxu0  ;;  %v3924_v33 = vsel %vm354_vm0, %v3857_v56, 0 }
 0x40a   : > { %3677 = vmatmul.f32.gmra.mxu3 %v10138_v3  ;;  %4487 = vmatmul.f32.gmra.mxu1 %v7807_v54 }
 0x40b   : > { %v3064_v12 = vadd.f32 %v3063_v23, %v2816_v43  ;;  %3467 = vmatmul.f32.gmra.mxu2 %v10138_v3  ;;  %v4112_v43 = vand.u32 4294901760, %v4111_v6  ;;  %v9710_v3 = vand.u32 4294901760, %v7851_v60 }
 0x40c   : > { %4105 = vmatmul.f32.gmra.mxu0 %v4104_v18  ;;  %v7858_v18 = vand.u32 4294901760, %v3924_v33 }
 0x40d   : > { %v7853_v45 = vadd.f32 %v3358_v53, %v3064_v12  ;;  %v2819_v1 = vpop.f32.mrf.mxu3  ;;  %v3858_v53 = vld [vmem:[%s6221_s25 + $0x48] sm:$0xff]  ;;  %v4119_v56 = vsub.f32 %v7851_v60, %v9710_v3  ;;  %v10148_v3 = vld [vmem:[#allocation45_spill] sm:$0xff] }
 0x40e   : > { %v2565_v4 = vpop.f32.mrf.mxu2  ;;  %10142 = vst [vmem:[#allocation74_spill] sm:$0xff] %v7858_v18  ;;  %v7868_v12 = vsub.f32 %v3924_v33, %v7858_v18 }
 0x40f   : > { %10140 = vst [vmem:[#allocation73_spill] sm:$0xff] %v7853_v45  ;;  %v2566_v54 = vadd.f32 %v2565_v4, %v10141_v34  ;;  %v3370_v23 = vpop.f32.mrf.mxu1  ;;  %v10146_v34 = vld [vmem:[#allocation64_spill] sm:$0xff] }
 0x410   : > { %10144 = vst [vmem:[#allocation75_spill] sm:$0xff] %v7868_v12 }
 0x411   : > { %v2820_v21 = vadd.f32 %v2819_v1, %v2566_v54  ;;  %v3073_v39 = vpop.f32.mrf.mxu0  ;;  %v3927_v1 = vsel %vm354_vm0, %v3858_v53, 0 }
 0x412   : > { %3681 = vmatmul.f32.gmra.mxu3 %v10143_v0  ;;  %4491 = vmatmul.f32.gmra.mxu1 %v7824_v25 }
 0x413   : > { %v3069_v59 = vadd.f32 %v3068_v16, %v2820_v21  ;;  %3471 = vmatmul.f32.gmra.mxu2 %v10143_v0  ;;  %v4120_v16 = vand.u32 4294901760, %v4119_v56  ;;  %v9715_v0 = vand.u32 4294901760, %v7868_v12 }
 0x414   : > { %4113 = vmatmul.f32.gmra.mxu0 %v4112_v43  ;;  %v7875_v43 = vand.u32 4294901760, %v3927_v1 }
 0x415   : > { %v7870_v6 = vadd.f32 %v3364_v57, %v3069_v59  ;;  %v2823_v54 = vpop.f32.mrf.mxu3  ;;  %v3859_v57 = vld [vmem:[%s6221_s25 + $0x50] sm:$0xff]  ;;  %v4127_v53 = vsub.f32 %v7868_v12, %v9715_v0 }
 0x416   : > { %v2573_v4 = vpop.f32.mrf.mxu2  ;;  %10147 = vst [vmem:[#allocation77_spill] sm:$0xff] %v7875_v43  ;;  %v7885_v59 = vsub.f32 %v3927_v1, %v7875_v43  ;;  %v10153_v0 = vld [vmem:[#allocation56_spill] sm:$0xff] }
 0x417   : > { %10145 = vst [vmem:[#allocation76_spill] sm:$0xff] %v7870_v6  ;;  %v2574_v25 = vadd.f32 %v2573_v4, %v10146_v34  ;;  %v3376_v21 = vpop.f32.mrf.mxu1  ;;  %v10151_v34 = vld [vmem:[#allocation60_spill] sm:$0xff] }
 0x418   : > { %10149 = vst [vmem:[#allocation78_spill] sm:$0xff] %v7885_v59 }
 0x419   : > { %v2824_v36 = vadd.f32 %v2823_v54, %v2574_v25  ;;  %v3078_v45 = vpop.f32.mrf.mxu0  ;;  %v3930_v54 = vsel %vm354_vm0, %v3859_v57, 0 }
 0x41a   : > { %3685 = vmatmul.f32.gmra.mxu3 %v10148_v3  ;;  %4495 = vmatmul.f32.gmra.mxu1 %v7841_v61 }
 0x41b   : > { %v3074_v33 = vadd.f32 %v3073_v39, %v2824_v36  ;;  %3475 = vmatmul.f32.gmra.mxu2 %v10148_v3  ;;  %v4128_v39 = vand.u32 4294901760, %v4127_v53  ;;  %v9720_v3 = vand.u32 4294901760, %v7885_v59 }
 0x41c   : > { %4121 = vmatmul.f32.gmra.mxu0 %v4120_v16  ;;  %v7892_v16 = vand.u32 4294901760, %v3930_v54 }
 0x41d   : > { %v7887_v56 = vadd.f32 %v3370_v23, %v3074_v33  ;;  %v2827_v25 = vpop.f32.mrf.mxu3  ;;  %v3860_v23 = vld [vmem:[%s6221_s25 + $0x58] sm:$0xff]  ;;  %v4135_v57 = vsub.f32 %v7885_v59, %v9720_v3  ;;  %v10158_v3 = vld [vmem:[#allocation51_spill] sm:$0xff] }
 0x41e   : > { %v2581_v4 = vpop.f32.mrf.mxu2  ;;  %10152 = vst [vmem:[#allocation80_spill] sm:$0xff] %v7892_v16  ;;  %v7902_v33 = vsub.f32 %v3930_v54, %v7892_v16 }
 0x41f   : > { %10150 = vst [vmem:[#allocation79_spill] sm:$0xff] %v7887_v56  ;;  %v2582_v61 = vadd.f32 %v2581_v4, %v10151_v34  ;;  %v3382_v36 = vpop.f32.mrf.mxu1  ;;  %v10156_v34 = vld [vmem:[#allocation67_spill] sm:$0xff] }
 0x420   : > { %10154 = vst [vmem:[#allocation81_spill] sm:$0xff] %v7902_v33 }
 0x421   : > { %v2828_v60 = vadd.f32 %v2827_v25, %v2582_v61  ;;  %v3083_v6 = vpop.f32.mrf.mxu0  ;;  %v3933_v25 = vsel %vm354_vm0, %v3860_v23, 0 }
 0x422   : > { %3689 = vmatmul.f32.gmra.mxu3 %v10153_v0  ;;  %4499 = vmatmul.f32.gmra.mxu1 %v7858_v18 }
 0x423   : > { %v3079_v1 = vadd.f32 %v3078_v45, %v2828_v60  ;;  %3479 = vmatmul.f32.gmra.mxu2 %v10153_v0  ;;  %v4136_v45 = vand.u32 4294901760, %v4135_v57  ;;  %v9725_v0 = vand.u32 4294901760, %v7902_v33 }
 0x424   : > { %4129 = vmatmul.f32.gmra.mxu0 %v4128_v39  ;;  %v7909_v39 = vand.u32 4294901760, %v3933_v25 }
 0x425   : > { %v7904_v53 = vadd.f32 %v3376_v21, %v3079_v1  ;;  %v2831_v61 = vpop.f32.mrf.mxu3  ;;  %v3861_v21 = vld [vmem:[%s6221_s25 + $0x60] sm:$0xff]  ;;  %v4143_v23 = vsub.f32 %v7902_v33, %v9725_v0 }
 0x426   : > { %v2589_v4 = vpop.f32.mrf.mxu2  ;;  %10157 = vst [vmem:[#allocation83_spill] sm:$0xff] %v7909_v39  ;;  %v7919_v1 = vsub.f32 %v3933_v25, %v7909_v39  ;;  %v10163_v0 = vld [vmem:[#allocation62_spill] sm:$0xff] }
 0x427   : > { %10155 = vst [vmem:[#allocation82_spill] sm:$0xff] %v7904_v53  ;;  %v2590_v18 = vadd.f32 %v2589_v4, %v10156_v34  ;;  %v3388_v60 = vpop.f32.mrf.mxu1  ;;  %v10161_v34 = vld [vmem:[#allocation2_spill] sm:$0xff] }
 0x428   : > { %10159 = vst [vmem:[#allocation84_spill] sm:$0xff] %v7919_v1 }
 0x429   : > { %v2832_v12 = vadd.f32 %v2831_v61, %v2590_v18  ;;  %v3088_v56 = vpop.f32.mrf.mxu0  ;;  %v3936_v61 = vsel %vm354_vm0, %v3861_v21, 0 }
 0x42a   : > { %3693 = vmatmul.f32.gmra.mxu3 %v10158_v3  ;;  %4503 = vmatmul.f32.gmra.mxu1 %v7875_v43 }
 0x42b   : > { %v3084_v54 = vadd.f32 %v3083_v6, %v2832_v12  ;;  %3483 = vmatmul.f32.gmra.mxu2 %v10158_v3  ;;  %v4144_v6 = vand.u32 4294901760, %v4143_v23  ;;  %v9730_v3 = vand.u32 4294901760, %v7919_v1 }
 0x42c   : > { %4137 = vmatmul.f32.gmra.mxu0 %v4136_v45  ;;  %v7926_v45 = vand.u32 4294901760, %v3936_v61 }
 0x42d   : > { %v7921_v57 = vadd.f32 %v3382_v36, %v3084_v54  ;;  %v2835_v18 = vpop.f32.mrf.mxu3  ;;  %v3862_v36 = vld [vmem:[%s6221_s25 + $0x68] sm:$0xff]  ;;  %v4151_v21 = vsub.f32 %v7919_v1, %v9730_v3  ;;  %v10168_v3 = vld [vmem:[#allocation69_spill] sm:$0xff] }
 0x42e   : > { %v2597_v4 = vpop.f32.mrf.mxu2  ;;  %10162 = vst [vmem:[#allocation86_spill] sm:$0xff] %v7926_v45  ;;  %v7936_v54 = vsub.f32 %v3936_v61, %v7926_v45 }
 0x42f   : > { %10160 = vst [vmem:[#allocation85_spill] sm:$0xff] %v7921_v57  ;;  %v2598_v43 = vadd.f32 %v2597_v4, %v10161_v34  ;;  %v3394_v12 = vpop.f32.mrf.mxu1  ;;  %v10166_v34 = vld [vmem:[#allocation3_spill] sm:$0xff] }
 0x430   : > { %10164 = vst [vmem:[#allocation87_spill] sm:$0xff] %v7936_v54 }
 0x431   : > { %v2836_v59 = vadd.f32 %v2835_v18, %v2598_v43  ;;  %v3093_v53 = vpop.f32.mrf.mxu0  ;;  %v3939_v18 = vsel %vm354_vm0, %v3862_v36, 0 }
 0x432   : > { %3697 = vmatmul.f32.gmra.mxu3 %v10163_v0  ;;  %4507 = vmatmul.f32.gmra.mxu1 %v7892_v16 }
 0x433   : > { %v3089_v25 = vadd.f32 %v3088_v56, %v2836_v59  ;;  %3487 = vmatmul.f32.gmra.mxu2 %v10163_v0  ;;  %v4152_v56 = vand.u32 4294901760, %v4151_v21  ;;  %v9735_v0 = vand.u32 4294901760, %v7936_v54 }
 0x434   : > { %4145 = vmatmul.f32.gmra.mxu0 %v4144_v6  ;;  %v7943_v6 = vand.u32 4294901760, %v3939_v18 }
 0x435   : > { %v7938_v23 = vadd.f32 %v3388_v60, %v3089_v25  ;;  %v2839_v43 = vpop.f32.mrf.mxu3  ;;  %v3863_v60 = vld [vmem:[%s6221_s25 + $0x70] sm:$0xff]  ;;  %v4159_v36 = vsub.f32 %v7936_v54, %v9735_v0 }
 0x436   : > { %v2605_v4 = vpop.f32.mrf.mxu2  ;;  %10167 = vst [vmem:[#allocation41_spill] sm:$0xff] %v7943_v6  ;;  %v7953_v25 = vsub.f32 %v3939_v18, %v7943_v6  ;;  %v10173_v0 = vld [vmem:[#allocation4_spill] sm:$0xff] }
 0x437   : > { %10165 = vst [vmem:[#allocation43_spill] sm:$0xff] %v7938_v23  ;;  %v2606_v16 = vadd.f32 %v2605_v4, %v10166_v34  ;;  %v3400_v59 = vpop.f32.mrf.mxu1  ;;  %v10171_v34 = vld [vmem:[#allocation6_spill] sm:$0xff] }
 0x438   : > { %10169 = vst [vmem:[#allocation47_spill] sm:$0xff] %v7953_v25 }
 0x439   : > { %v2840_v33 = vadd.f32 %v2839_v43, %v2606_v16  ;;  %v3098_v57 = vpop.f32.mrf.mxu0  ;;  %v3942_v43 = vsel %vm354_vm0, %v3863_v60, 0 }
 0x43a   : > { %3701 = vmatmul.f32.gmra.mxu3 %v10168_v3  ;;  %4511 = vmatmul.f32.gmra.mxu1 %v7909_v39 }
 0x43b   : > { %v3094_v61 = vadd.f32 %v3093_v53, %v2840_v33  ;;  %3491 = vmatmul.f32.gmra.mxu2 %v10168_v3  ;;  %v4160_v53 = vand.u32 4294901760, %v4159_v36  ;;  %v9740_v3 = vand.u32 4294901760, %v7953_v25 }
 0x43c   : > { %4153 = vmatmul.f32.gmra.mxu0 %v4152_v56  ;;  %v7960_v56 = vand.u32 4294901760, %v3942_v43 }
 0x43d   : > { %v7955_v21 = vadd.f32 %v3394_v12, %v3094_v61  ;;  %v2843_v16 = vpop.f32.mrf.mxu3  ;;  %v3864_v12 = vld [vmem:[%s6221_s25 + $0x78] sm:$0xff]  ;;  %v4167_v60 = vsub.f32 %v7953_v25, %v9740_v3 }
 0x43e   : > { %v2613_v4 = vpop.f32.mrf.mxu2  ;;  %10172 = vst [vmem:[#allocation58_spill] sm:$0xff] %v7960_v56  ;;  %v7970_v61 = vsub.f32 %v3942_v43, %v7960_v56  ;;  %v10178_v3 = vld [vmem:[#allocation5_spill] sm:$0xff] }
 0x43f   : > { %10170 = vst [vmem:[#allocation39_spill] sm:$0xff] %v7955_v21  ;;  %v2614_v39 = vadd.f32 %v2613_v4, %v10171_v34  ;;  %v3406_v33 = vpop.f32.mrf.mxu1  ;;  %v10176_v34 = vld [vmem:[#allocation8_spill] sm:$0xff] }
 0x440   : > { %10174 = vst [vmem:[#allocation52_spill] sm:$0xff] %v7970_v61 }
 0x441   : > { %v2844_v1 = vadd.f32 %v2843_v16, %v2614_v39  ;;  %v3103_v23 = vpop.f32.mrf.mxu0  ;;  %v3945_v16 = vsel %vm354_vm0, %v3864_v12, 0 }
 0x442   : > { %3705 = vmatmul.f32.gmra.mxu3 %v10173_v0  ;;  %4515 = vmatmul.f32.gmra.mxu1 %v7926_v45 }
 0x443   : > { %v3099_v18 = vadd.f32 %v3098_v57, %v2844_v1  ;;  %3495 = vmatmul.f32.gmra.mxu2 %v10173_v0  ;;  %v4168_v57 = vand.u32 4294901760, %v4167_v60  ;;  %v9745_v0 = vand.u32 4294901760, %v7970_v61 }
 0x444   : > { %4161 = vmatmul.f32.gmra.mxu0 %v4160_v53  ;;  %v7977_v53 = vand.u32 4294901760, %v3945_v16 }
 0x445   : > { %v7972_v36 = vadd.f32 %v3400_v59, %v3099_v18  ;;  %v2847_v39 = vpop.f32.mrf.mxu3  ;;  %v3865_v59 = vld [vmem:[%s6221_s25 + $0x80] sm:$0xff]  ;;  %v4175_v12 = vsub.f32 %v7970_v61, %v9745_v0  ;;  %v10182_v0 = vld [vmem:[#allocation7_spill] sm:$0xff] }
 0x446   : > { %v2621_v4 = vpop.f32.mrf.mxu2  ;;  %10177 = vst [vmem:[#allocation49_spill] sm:$0xff] %v7977_v53  ;;  %v7987_v18 = vsub.f32 %v3945_v16, %v7977_v53 }
 0x447   : > { %10175 = vst [vmem:[#allocation54_spill] sm:$0xff] %v7972_v36  ;;  %v2622_v45 = vadd.f32 %v2621_v4, %v10176_v34  ;;  %v3412_v1 = vpop.f32.mrf.mxu1  ;;  %v10181_v34 = vld [vmem:[#allocation10_spill] sm:$0xff] }
 0x448   : > { %10179 = vst [vmem:[#allocation64_spill] sm:$0xff] %v7987_v18 }
 0x449   : > { %v2848_v54 = vadd.f32 %v2847_v39, %v2622_v45  ;;  %v3108_v21 = vpop.f32.mrf.mxu0  ;;  %v3948_v39 = vsel %vm354_vm0, %v3865_v59, 0 }
 0x44a   : > { %3709 = vmatmul.f32.gmra.mxu3 %v10178_v3  ;;  %4519 = vmatmul.f32.gmra.mxu1 %v7943_v6 }
 0x44b   : > { %v3104_v43 = vadd.f32 %v3103_v23, %v2848_v54  ;;  %3499 = vmatmul.f32.gmra.mxu2 %v10178_v3  ;;  %v4176_v23 = vand.u32 4294901760, %v4175_v12  ;;  %v9750_v3 = vand.u32 4294901760, %v7987_v18 }
 0x44c   : > { %4169 = vmatmul.f32.gmra.mxu0 %v4168_v57  ;;  %v7994_v57 = vand.u32 4294901760, %v3948_v39 }
 0x44d   : > { %v7989_v60 = vadd.f32 %v3406_v33, %v3104_v43  ;;  %v2851_v45 = vpop.f32.mrf.mxu3  ;;  %v3866_v33 = vld [vmem:[%s6221_s25 + $0x88] sm:$0xff]  ;;  %v4183_v59 = vsub.f32 %v7987_v18, %v9750_v3  ;;  %v10184_v3 = vld [vmem:[#allocation9_spill] sm:$0xff] }
 0x44e   : > { %v2629_v4 = vpop.f32.mrf.mxu2  ;;  %v8004_v43 = vsub.f32 %v3948_v39, %v7994_v57 }
 0x44f   : > { %10180 = vst [vmem:[#allocation45_spill] sm:$0xff] %v7989_v60  ;;  %v2630_v6 = vadd.f32 %v2629_v4, %v10181_v34  ;;  %v3418_v54 = vpop.f32.mrf.mxu1  ;;  %v10183_v34 = vld [vmem:[#allocation12_spill] sm:$0xff] }
 0x451   : > { %v2852_v25 = vadd.f32 %v2851_v45, %v2630_v6  ;;  %v3113_v36 = vpop.f32.mrf.mxu0  ;;  %v3951_v45 = vsel %vm354_vm0, %v3866_v33, 0 }
 0x452   : > { %3713 = vmatmul.f32.gmra.mxu3 %v10182_v0  ;;  %4523 = vmatmul.f32.gmra.mxu1 %v7960_v56 }
 0x453   : > { %v3109_v16 = vadd.f32 %v3108_v21, %v2852_v25  ;;  %3503 = vmatmul.f32.gmra.mxu2 %v10182_v0  ;;  %v4184_v21 = vand.u32 4294901760, %v4183_v59  ;;  %v9755_v0 = vand.u32 4294901760, %v8004_v43 }
 0x454   : > { %4177 = vmatmul.f32.gmra.mxu0 %v4176_v23  ;;  %v8011_v23 = vand.u32 4294901760, %v3951_v45 }
 0x455   : > { %v8006_v12 = vadd.f32 %v3412_v1, %v3109_v16  ;;  %v2855_v6 = vpop.f32.mrf.mxu3  ;;  %v3867_v1 = vld [vmem:[%s6221_s25 + $0x90] sm:$0xff]  ;;  %v4191_v33 = vsub.f32 %v8004_v43, %v9755_v0 }
 0x456   : > { %v2637_v4 = vpop.f32.mrf.mxu2  ;;  %v8021_v16 = vsub.f32 %v3951_v45, %v8011_v23  ;;  %v10189_v45 = vld [vmem:[#allocation11_spill] sm:$0xff] }
 0x457   : > { %v2638_v56 = vadd.f32 %v2637_v4, %v10183_v34  ;;  %v3424_v25 = vpop.f32.mrf.mxu1  ;;  %v10185_v34 = vld [vmem:[#allocation14_spill] sm:$0xff] }
 0x459   : > { %v2856_v61 = vadd.f32 %v2855_v6, %v2638_v56  ;;  %v3118_v60 = vpop.f32.mrf.mxu0  ;;  %v3954_v6 = vsel %vm354_vm0, %v3867_v1, 0 }
 0x45a   : > { %3717 = vmatmul.f32.gmra.mxu3 %v10184_v3  ;;  %4527 = vmatmul.f32.gmra.mxu1 %v7977_v53 }
 0x45b   : > { %v3114_v39 = vadd.f32 %v3113_v36, %v2856_v61  ;;  %3507 = vmatmul.f32.gmra.mxu2 %v10184_v3  ;;  %v4192_v36 = vand.u32 4294901760, %v4191_v33  ;;  %v9756_v3 = vand.u32 4294901760, %v8021_v16 }
 0x45c   : > { %4185 = vmatmul.f32.gmra.mxu0 %v4184_v21  ;;  %v8030_v21 = vand.u32 4294901760, %v3954_v6 }
 0x45d   : > { %v8023_v59 = vadd.f32 %v3418_v54, %v3114_v39  ;;  %v2859_v56 = vpop.f32.mrf.mxu3  ;;  %v3868_v54 = vld [vmem:[%s6221_s25 + $0x98] sm:$0xff]  ;;  %v4199_v1 = vsub.f32 %v8021_v16, %v9756_v3 }
 0x45e   : > { %v2645_v4 = vpop.f32.mrf.mxu2  ;;  %10187 = vst [vmem:[#allocation56_spill] sm:$0xff] %v8030_v21  ;;  %v8042_v33 = vsub.f32 %v3954_v6, %v8030_v21  ;;  %v10194_v6 = vld [vmem:[#allocation13_spill] sm:$0xff] }
 0x45f   : > { %v2646_v53 = vadd.f32 %v2645_v4, %v10185_v34  ;;  %v8027_v61 = vpop.f32.mrf.mxu1  ;;  %v3957_v4 = vsel %vm354_vm0, %v3868_v54, 0 }
 0x460   : > { %10186 = vst [vmem:[#allocation60_spill] sm:$0xff] %v8027_v61 }
 0x461   : > { %v2860_v18 = vadd.f32 %v2859_v56, %v2646_v53  ;;  %v8032_v0 = vpop.f32.mrf.mxu0 }
 0x462   : > { %10188 = vst [vmem:[#allocation67_spill] sm:$0xff] %v8032_v0  ;;  %3721 = vmatmul.f32.gmra.mxu3 %v10189_v45  ;;  %4531 = vmatmul.f32.gmra.mxu1 %v7994_v57 }
 0x463   : > { %v3119_v39 = vadd.f32 %v3118_v60, %v2860_v18  ;;  %3511 = vmatmul.f32.gmra.mxu2 %v10189_v45  ;;  %v4200_v60 = vand.u32 4294901760, %v4199_v1  ;;  %v8051_v45 = vand.u32 4294901760, %v3957_v4 }
 0x464   : > { %4193 = vmatmul.f32.gmra.mxu0 %v4192_v36  ;;  %v9757_v36 = vand.u32 4294901760, %v8042_v33 }
 0x465   : > { %v8044_v53 = vadd.f32 %v3424_v25, %v3119_v39  ;;  %v3658_v56 = vpop.f32.mrf.mxu3  ;;  %10191 = vst [vmem:[#allocation2_spill] sm:$0xff] %v8051_v45  ;;  %v3869_v25 = vld [vmem:[%s6221_s25 + $0xa0] sm:$0xff]  ;;  %v8065_v54 = vsub.f32 %v3957_v4, %v8051_v45  ;;  %v3870_v4 = vld [vmem:[%s6221_s25 + $0xa8] sm:$0xff] }
 0x466   : > { %v3448_v34 = vpop.f32.mrf.mxu2  ;;  %v3960_v39 = vsel %vm354_vm0, %v3869_v25, 0 }
 0x467   : > { %v3449_v61 = vadd.f32 %v3448_v34, %v7474_v14  ;;  %v8048_v18 = vpop.f32.mrf.mxu1  ;;  %v4207_v14 = vsub.f32 %v8042_v33, %v9757_v36  ;;  %v10199_v36 = vld [vmem:[#allocation15_spill] sm:$0xff] }
 0x468   : > { %10190 = vst [vmem:[#allocation51_spill] sm:$0xff] %v8048_v18  ;;  %v8072_v18 = vand.u32 4294901760, %v3960_v39 }
 0x469   : > { %v8053_v0 = vadd.f32 %v3658_v56, %v3449_v61  ;;  %v8055_v3 = vpop.f32.mrf.mxu0 }
 0x46a   : > { %10193 = vst [vmem:[#allocation3_spill] sm:$0xff] %v8055_v3  ;;  %3725 = vmatmul.f32.gmra.mxu3 %v10194_v6  ;;  %4535 = vmatmul.f32.gmra.mxu1 %v8011_v23  ;;  %v8086_v25 = vsub.f32 %v3960_v39, %v8072_v18  ;;  %v3871_v39 = vld [vmem:[%s6221_s25 + $0xb0] sm:$0xff] }
 0x46b   : > { %10192 = vst [vmem:[#allocation62_spill] sm:$0xff] %v8053_v0  ;;  %3515 = vmatmul.f32.gmra.mxu2 %v10194_v6  ;;  %v4208_v0 = vand.u32 4294901760, %v4207_v14  ;;  %v9760_v6 = vand.u32 4294901760, %v8065_v54 }
 0x46c   : > { %4201 = vmatmul.f32.gmra.mxu0 %v4200_v60  ;;  %10196 = vst [vmem:[#allocation6_spill] sm:$0xff] %v8072_v18 }
 0x46d   : > { %v3662_v61 = vpop.f32.mrf.mxu3 }
 0x46e   : > { %v3452_v1 = vpop.f32.mrf.mxu2 }
 0x46f   : > { %v3453_v56 = vadd.f32 %v3452_v1, %v7483_v50  ;;  %v8069_v34 = vpop.f32.mrf.mxu1  ;;  %v4215_v50 = vsub.f32 %v8065_v54, %v9760_v6  ;;  %v10204_v6 = vld [vmem:[#allocation17_spill] sm:$0xff] }
 0x470   : > { %10195 = vst [vmem:[#allocation69_spill] sm:$0xff] %v8069_v34 }
 0x471   : > { %v8074_v60 = vadd.f32 %v3662_v61, %v3453_v56  ;;  %v8076_v3 = vpop.f32.mrf.mxu0  ;;  %v3963_v61 = vsel %vm354_vm0, %v3870_v4, 0  ;;  %v4216_v34 = vand.u32 4294901760, %v4215_v50 }
 0x472   : > { %10198 = vst [vmem:[#allocation8_spill] sm:$0xff] %v8076_v3  ;;  %3729 = vmatmul.f32.gmra.mxu3 %v10199_v36  ;;  %4539 = vmatmul.f32.gmra.mxu1 %v8030_v21  ;;  %v8093_v3 = vand.u32 4294901760, %v3963_v61 }
 0x473   : > { %10197 = vst [vmem:[#allocation4_spill] sm:$0xff] %v8074_v60  ;;  %3519 = vmatmul.f32.gmra.mxu2 %v10199_v36  ;;  %v9763_v36 = vand.u32 4294901760, %v8086_v25 }
 0x474   : > { %4209 = vmatmul.f32.gmra.mxu0 %v4208_v0  ;;  %10201 = vst [vmem:[#allocation10_spill] sm:$0xff] %v8093_v3  ;;  %v8107_v4 = vsub.f32 %v3963_v61, %v8093_v3  ;;  %v3872_v61 = vld [vmem:[%s6221_s25 + $0xb8] sm:$0xff] }
 0x475   : > { %v3666_v14 = vpop.f32.mrf.mxu3 }
 0x476   : > { %v3456_v1 = vpop.f32.mrf.mxu2 }
 0x477   : > { %v3457_v56 = vadd.f32 %v3456_v1, %v7492_v2  ;;  %v8090_v60 = vpop.f32.mrf.mxu1  ;;  %v4223_v2 = vsub.f32 %v8086_v25, %v9763_v36  ;;  %v10209_v36 = vld [vmem:[#allocation16_spill] sm:$0xff] }
 0x478   : > { %10200 = vst [vmem:[#allocation5_spill] sm:$0xff] %v8090_v60 }
 0x479   : > { %v8095_v0 = vadd.f32 %v3666_v14, %v3457_v56  ;;  %v8097_v21 = vpop.f32.mrf.mxu0  ;;  %v3966_v14 = vsel %vm354_vm0, %v3871_v39, 0  ;;  %v4224_v60 = vand.u32 4294901760, %v4223_v2 }
 0x47a   : > { %10203 = vst [vmem:[#allocation12_spill] sm:$0xff] %v8097_v21  ;;  %3733 = vmatmul.f32.gmra.mxu3 %v10204_v6  ;;  %4543 = vmatmul.f32.gmra.mxu1 %v8051_v45  ;;  %v8114_v21 = vand.u32 4294901760, %v3966_v14 }
 0x47b   : > { %10202 = vst [vmem:[#allocation7_spill] sm:$0xff] %v8095_v0  ;;  %3523 = vmatmul.f32.gmra.mxu2 %v10204_v6  ;;  %v9766_v6 = vand.u32 4294901760, %v8107_v4 }
 0x47c   : > { %4217 = vmatmul.f32.gmra.mxu0 %v4216_v34  ;;  %10206 = vst [vmem:[#allocation14_spill] sm:$0xff] %v8114_v21  ;;  %v8128_v39 = vsub.f32 %v3966_v14, %v8114_v21  ;;  %v3873_v14 = vld [vmem:[%s6221_s25 + $0xe0] sm:$0xff] }
 0x47d   : > { %v3670_v50 = vpop.f32.mrf.mxu3 }
 0x47e   : > { %v3460_v1 = vpop.f32.mrf.mxu2 }
 0x47f   : > { %v3461_v56 = vadd.f32 %v3460_v1, %v7501_v31  ;;  %v8111_v0 = vpop.f32.mrf.mxu1  ;;  %v4231_v31 = vsub.f32 %v8107_v4, %v9766_v6  ;;  %v10214_v6 = vld [vmem:[#allocation19_spill] sm:$0xff] }
 0x480   : > { %10205 = vst [vmem:[#allocation9_spill] sm:$0xff] %v8111_v0 }
 0x481   : > { %v8116_v34 = vadd.f32 %v3670_v50, %v3461_v56  ;;  %v8118_v45 = vpop.f32.mrf.mxu0  ;;  %v3969_v50 = vsel %vm354_vm0, %v3872_v61, 0  ;;  %v4232_v0 = vand.u32 4294901760, %v4231_v31 }
 0x482   : > { %10208 = vst [vmem:[#allocation13_spill] sm:$0xff] %v8118_v45  ;;  %3737 = vmatmul.f32.gmra.mxu3 %v10209_v36  ;;  %4547 = vmatmul.f32.gmra.mxu1 %v8072_v18  ;;  %v8135_v45 = vand.u32 4294901760, %v3969_v50 }
 0x483   : > { %10207 = vst [vmem:[#allocation11_spill] sm:$0xff] %v8116_v34  ;;  %3527 = vmatmul.f32.gmra.mxu2 %v10209_v36  ;;  %v9769_v36 = vand.u32 4294901760, %v8128_v39 }
 0x484   : > { %4225 = vmatmul.f32.gmra.mxu0 %v4224_v60  ;;  %10211 = vst [vmem:[#allocation17_spill] sm:$0xff] %v8135_v45  ;;  %v8149_v61 = vsub.f32 %v3969_v50, %v8135_v45  ;;  %v3874_v50 = vld [vmem:[%s6221_s25 + $0xe8] sm:$0xff] }
 0x485   : > { %v3674_v2 = vpop.f32.mrf.mxu3 }
 0x486   : > { %v3464_v1 = vpop.f32.mrf.mxu2 }
 0x487   : > { %v3465_v56 = vadd.f32 %v3464_v1, %v7510_v48  ;;  %v8132_v34 = vpop.f32.mrf.mxu1  ;;  %v4239_v48 = vsub.f32 %v8128_v39, %v9769_v36  ;;  %v10219_v36 = vld [vmem:[#allocation18_spill] sm:$0xff] }
 0x488   : > { %10210 = vst [vmem:[#allocation15_spill] sm:$0xff] %v8132_v34 }
 0x489   : > { %v8137_v60 = vadd.f32 %v3674_v2, %v3465_v56  ;;  %v8139_v18 = vpop.f32.mrf.mxu0  ;;  %v3972_v2 = vsel %vm354_vm0, %v3873_v14, 0  ;;  %v4240_v34 = vand.u32 4294901760, %v4239_v48 }
 0x48a   : > { %10213 = vst [vmem:[#allocation88_spill] sm:$0xff] %v8139_v18  ;;  %3741 = vmatmul.f32.gmra.mxu3 %v10214_v6  ;;  %4551 = vmatmul.f32.gmra.mxu1 %v8093_v3  ;;  %v8156_v18 = vand.u32 4294901760, %v3972_v2 }
 0x48b   : > { %10212 = vst [vmem:[#allocation16_spill] sm:$0xff] %v8137_v60  ;;  %3531 = vmatmul.f32.gmra.mxu2 %v10214_v6  ;;  %v9772_v6 = vand.u32 4294901760, %v8149_v61 }
 0x48c   : > { %4233 = vmatmul.f32.gmra.mxu0 %v4232_v0  ;;  %10216 = vst [vmem:[#allocation89_spill] sm:$0xff] %v8156_v18  ;;  %v8170_v14 = vsub.f32 %v3972_v2, %v8156_v18  ;;  %v3875_v2 = vld [vmem:[%s6221_s25 + $0xf0] sm:$0xff] }
 0x48d   : > { %v3678_v31 = vpop.f32.mrf.mxu3 }
 0x48e   : > { %v3468_v1 = vpop.f32.mrf.mxu2 }
 0x48f   : > { %v3469_v56 = vadd.f32 %v3468_v1, %v7519_v52  ;;  %v8153_v60 = vpop.f32.mrf.mxu1  ;;  %v4247_v52 = vsub.f32 %v8149_v61, %v9772_v6  ;;  %v10224_v6 = vld [vmem:[#allocation21_spill] sm:$0xff] }
 0x490   : > { %10215 = vst [vmem:[#allocation19_spill] sm:$0xff] %v8153_v60 }
 0x491   : > { %v8158_v0 = vadd.f32 %v3678_v31, %v3469_v56  ;;  %v8160_v3 = vpop.f32.mrf.mxu0  ;;  %v3975_v31 = vsel %vm354_vm0, %v3874_v50, 0  ;;  %v4248_v60 = vand.u32 4294901760, %v4247_v52 }
 0x492   : > { %10218 = vst [vmem:[#allocation91_spill] sm:$0xff] %v8160_v3  ;;  %3745 = vmatmul.f32.gmra.mxu3 %v10219_v36  ;;  %4555 = vmatmul.f32.gmra.mxu1 %v8114_v21  ;;  %v8177_v3 = vand.u32 4294901760, %v3975_v31 }
 0x493   : > { %10217 = vst [vmem:[#allocation90_spill] sm:$0xff] %v8158_v0  ;;  %3535 = vmatmul.f32.gmra.mxu2 %v10219_v36  ;;  %v9775_v36 = vand.u32 4294901760, %v8170_v14 }
 0x494   : > { %4241 = vmatmul.f32.gmra.mxu0 %v4240_v34  ;;  %10221 = vst [vmem:[#allocation92_spill] sm:$0xff] %v8177_v3  ;;  %v8191_v50 = vsub.f32 %v3975_v31, %v8177_v3  ;;  %v3876_v31 = vld [vmem:[%s6221_s25 + $0xf8] sm:$0xff] }
 0x495   : > { %v3682_v48 = vpop.f32.mrf.mxu3 }
 0x496   : > { %v3472_v1 = vpop.f32.mrf.mxu2 }
 0x497   : > { %v3473_v56 = vadd.f32 %v3472_v1, %v7528_v41  ;;  %v8174_v0 = vpop.f32.mrf.mxu1  ;;  %v4255_v41 = vsub.f32 %v8170_v14, %v9775_v36  ;;  %v10229_v36 = vld [vmem:[#allocation20_spill] sm:$0xff] }
 0x498   : > { %10220 = vst [vmem:[#allocation18_spill] sm:$0xff] %v8174_v0 }
 0x499   : > { %v8179_v34 = vadd.f32 %v3682_v48, %v3473_v56  ;;  %v8181_v21 = vpop.f32.mrf.mxu0  ;;  %v3978_v48 = vsel %vm354_vm0, %v3875_v2, 0  ;;  %v4256_v0 = vand.u32 4294901760, %v4255_v41 }
 0x49a   : > { %10223 = vst [vmem:[#allocation94_spill] sm:$0xff] %v8181_v21  ;;  %3749 = vmatmul.f32.gmra.mxu3 %v10224_v6  ;;  %4559 = vmatmul.f32.gmra.mxu1 %v8135_v45  ;;  %v8198_v21 = vand.u32 4294901760, %v3978_v48 }
 0x49b   : > { %10222 = vst [vmem:[#allocation93_spill] sm:$0xff] %v8179_v34  ;;  %3539 = vmatmul.f32.gmra.mxu2 %v10224_v6  ;;  %v9778_v6 = vand.u32 4294901760, %v8191_v50 }
 0x49c   : > { %4249 = vmatmul.f32.gmra.mxu0 %v4248_v60  ;;  %10226 = vst [vmem:[#allocation95_spill] sm:$0xff] %v8198_v21  ;;  %v8212_v2 = vsub.f32 %v3978_v48, %v8198_v21  ;;  %v3877_v48 = vld [vmem:[%s6221_s25 + $0x100] sm:$0xff] }
 0x49d   : > { %v3686_v52 = vpop.f32.mrf.mxu3 }
 0x49e   : > { %v3476_v1 = vpop.f32.mrf.mxu2 }
 0x49f   : > { %v3477_v56 = vadd.f32 %v3476_v1, %v7537_v51  ;;  %v8195_v34 = vpop.f32.mrf.mxu1  ;;  %v4263_v51 = vsub.f32 %v8191_v50, %v9778_v6  ;;  %v10234_v6 = vld [vmem:[#allocation23_spill] sm:$0xff] }
 0x4a0   : > { %10225 = vst [vmem:[#allocation21_spill] sm:$0xff] %v8195_v34 }
 0x4a1   : > { %v8200_v60 = vadd.f32 %v3686_v52, %v3477_v56  ;;  %v8202_v45 = vpop.f32.mrf.mxu0  ;;  %v3981_v52 = vsel %vm354_vm0, %v3876_v31, 0  ;;  %v4264_v34 = vand.u32 4294901760, %v4263_v51 }
 0x4a2   : > { %10228 = vst [vmem:[#allocation97_spill] sm:$0xff] %v8202_v45  ;;  %3753 = vmatmul.f32.gmra.mxu3 %v10229_v36  ;;  %4563 = vmatmul.f32.gmra.mxu1 %v8156_v18  ;;  %v8219_v45 = vand.u32 4294901760, %v3981_v52 }
 0x4a3   : > { %10227 = vst [vmem:[#allocation96_spill] sm:$0xff] %v8200_v60  ;;  %3543 = vmatmul.f32.gmra.mxu2 %v10229_v36  ;;  %v9781_v36 = vand.u32 4294901760, %v8212_v2 }
 0x4a4   : > { %4257 = vmatmul.f32.gmra.mxu0 %v4256_v0  ;;  %10231 = vst [vmem:[#allocation98_spill] sm:$0xff] %v8219_v45  ;;  %v8233_v31 = vsub.f32 %v3981_v52, %v8219_v45  ;;  %v3878_v52 = vld [vmem:[%s6221_s25 + $0x108] sm:$0xff] }
 0x4a5   : > { %v3690_v41 = vpop.f32.mrf.mxu3 }
 0x4a6   : > { %v3480_v1 = vpop.f32.mrf.mxu2 }
 0x4a7   : > { %v3481_v56 = vadd.f32 %v3480_v1, %v7546_v11  ;;  %v8216_v60 = vpop.f32.mrf.mxu1  ;;  %v4271_v11 = vsub.f32 %v8212_v2, %v9781_v36  ;;  %v10239_v36 = vld [vmem:[#allocation22_spill] sm:$0xff] }
 0x4a8   : > { %10230 = vst [vmem:[#allocation20_spill] sm:$0xff] %v8216_v60 }
 0x4a9   : > { %v8221_v0 = vadd.f32 %v3690_v41, %v3481_v56  ;;  %v8223_v18 = vpop.f32.mrf.mxu0  ;;  %v3984_v41 = vsel %vm354_vm0, %v3877_v48, 0  ;;  %v4272_v60 = vand.u32 4294901760, %v4271_v11 }
 0x4aa   : > { %10233 = vst [vmem:[#allocation100_spill] sm:$0xff] %v8223_v18  ;;  %3757 = vmatmul.f32.gmra.mxu3 %v10234_v6  ;;  %4567 = vmatmul.f32.gmra.mxu1 %v8177_v3  ;;  %v8240_v18 = vand.u32 4294901760, %v3984_v41 }
 0x4ab   : > { %10232 = vst [vmem:[#allocation99_spill] sm:$0xff] %v8221_v0  ;;  %3547 = vmatmul.f32.gmra.mxu2 %v10234_v6  ;;  %v9784_v6 = vand.u32 4294901760, %v8233_v31 }
 0x4ac   : > { %4265 = vmatmul.f32.gmra.mxu0 %v4264_v34  ;;  %10236 = vst [vmem:[#allocation101_spill] sm:$0xff] %v8240_v18  ;;  %v8254_v48 = vsub.f32 %v3984_v41, %v8240_v18  ;;  %v3879_v41 = vld [vmem:[%s6221_s25 + $0x110] sm:$0xff] }
 0x4ad   : > { %v3694_v51 = vpop.f32.mrf.mxu3 }
 0x4ae   : > { %v3484_v1 = vpop.f32.mrf.mxu2 }
 0x4af   : > { %v3485_v56 = vadd.f32 %v3484_v1, %v7555_v40  ;;  %v8237_v0 = vpop.f32.mrf.mxu1  ;;  %v4279_v40 = vsub.f32 %v8233_v31, %v9784_v6  ;;  %v10244_v6 = vld [vmem:[#allocation25_spill] sm:$0xff] }
 0x4b0   : > { %10235 = vst [vmem:[#allocation23_spill] sm:$0xff] %v8237_v0 }
 0x4b1   : > { %v8242_v34 = vadd.f32 %v3694_v51, %v3485_v56  ;;  %v8244_v3 = vpop.f32.mrf.mxu0  ;;  %v3987_v51 = vsel %vm354_vm0, %v3878_v52, 0  ;;  %v4280_v0 = vand.u32 4294901760, %v4279_v40 }
 0x4b2   : > { %10238 = vst [vmem:[#allocation103_spill] sm:$0xff] %v8244_v3  ;;  %3761 = vmatmul.f32.gmra.mxu3 %v10239_v36  ;;  %4571 = vmatmul.f32.gmra.mxu1 %v8198_v21  ;;  %v8261_v3 = vand.u32 4294901760, %v3987_v51 }
 0x4b3   : > { %10237 = vst [vmem:[#allocation102_spill] sm:$0xff] %v8242_v34  ;;  %3551 = vmatmul.f32.gmra.mxu2 %v10239_v36  ;;  %v9787_v36 = vand.u32 4294901760, %v8254_v48 }
 0x4b4   : > { %4273 = vmatmul.f32.gmra.mxu0 %v4272_v60  ;;  %10241 = vst [vmem:[#allocation104_spill] sm:$0xff] %v8261_v3  ;;  %v8275_v52 = vsub.f32 %v3987_v51, %v8261_v3  ;;  %v3880_v51 = vld [vmem:[%s6221_s25 + $0x118] sm:$0xff] }
 0x4b5   : > { %v3698_v11 = vpop.f32.mrf.mxu3 }
 0x4b6   : > { %v3488_v1 = vpop.f32.mrf.mxu2 }
 0x4b7   : > { %v3489_v56 = vadd.f32 %v3488_v1, %v7564_v24  ;;  %v8258_v34 = vpop.f32.mrf.mxu1  ;;  %v4287_v24 = vsub.f32 %v8254_v48, %v9787_v36  ;;  %v10249_v36 = vld [vmem:[#allocation24_spill] sm:$0xff] }
 0x4b8   : > { %10240 = vst [vmem:[#allocation22_spill] sm:$0xff] %v8258_v34 }
 0x4b9   : > { %v8263_v60 = vadd.f32 %v3698_v11, %v3489_v56  ;;  %v8265_v21 = vpop.f32.mrf.mxu0  ;;  %v3990_v11 = vsel %vm354_vm0, %v3879_v41, 0  ;;  %v4288_v34 = vand.u32 4294901760, %v4287_v24 }
 0x4ba   : > { %10243 = vst [vmem:[#allocation106_spill] sm:$0xff] %v8265_v21  ;;  %3765 = vmatmul.f32.gmra.mxu3 %v10244_v6  ;;  %4575 = vmatmul.f32.gmra.mxu1 %v8219_v45  ;;  %v8282_v21 = vand.u32 4294901760, %v3990_v11 }
 0x4bb   : > { %10242 = vst [vmem:[#allocation105_spill] sm:$0xff] %v8263_v60  ;;  %3555 = vmatmul.f32.gmra.mxu2 %v10244_v6  ;;  %v9790_v6 = vand.u32 4294901760, %v8275_v52 }
 0x4bc   : > { %4281 = vmatmul.f32.gmra.mxu0 %v4280_v0  ;;  %10246 = vst [vmem:[#allocation107_spill] sm:$0xff] %v8282_v21  ;;  %v8296_v41 = vsub.f32 %v3990_v11, %v8282_v21  ;;  %v3881_v11 = vld [vmem:[%s6221_s25 + $0x120] sm:$0xff] }
 0x4bd   : > { %v3702_v40 = vpop.f32.mrf.mxu3 }
 0x4be   : > { %v3492_v1 = vpop.f32.mrf.mxu2 }
 0x4bf   : > { %v3493_v56 = vadd.f32 %v3492_v1, %v7573_v62  ;;  %v8279_v60 = vpop.f32.mrf.mxu1  ;;  %v4295_v62 = vsub.f32 %v8275_v52, %v9790_v6  ;;  %v10254_v6 = vld [vmem:[#allocation27_spill] sm:$0xff] }
 0x4c0   : > { %10245 = vst [vmem:[#allocation25_spill] sm:$0xff] %v8279_v60 }
 0x4c1   : > { %v8284_v0 = vadd.f32 %v3702_v40, %v3493_v56  ;;  %v8286_v45 = vpop.f32.mrf.mxu0  ;;  %v3993_v40 = vsel %vm354_vm0, %v3880_v51, 0  ;;  %v4296_v60 = vand.u32 4294901760, %v4295_v62 }
 0x4c2   : > { %10248 = vst [vmem:[#allocation109_spill] sm:$0xff] %v8286_v45  ;;  %3769 = vmatmul.f32.gmra.mxu3 %v10249_v36  ;;  %4579 = vmatmul.f32.gmra.mxu1 %v8240_v18  ;;  %v8303_v45 = vand.u32 4294901760, %v3993_v40 }
 0x4c3   : > { %10247 = vst [vmem:[#allocation108_spill] sm:$0xff] %v8284_v0  ;;  %3559 = vmatmul.f32.gmra.mxu2 %v10249_v36  ;;  %v9793_v36 = vand.u32 4294901760, %v8296_v41 }
 0x4c4   : > { %4289 = vmatmul.f32.gmra.mxu0 %v4288_v34  ;;  %10251 = vst [vmem:[#allocation110_spill] sm:$0xff] %v8303_v45  ;;  %v8317_v51 = vsub.f32 %v3993_v40, %v8303_v45  ;;  %v3882_v40 = vld [vmem:[%s6221_s25 + $0x128] sm:$0xff] }
 0x4c5   : > { %v3706_v24 = vpop.f32.mrf.mxu3 }
 0x4c6   : > { %v3496_v1 = vpop.f32.mrf.mxu2 }
 0x4c7   : > { %v3497_v56 = vadd.f32 %v3496_v1, %v7582_v22  ;;  %v8300_v0 = vpop.f32.mrf.mxu1  ;;  %v4303_v22 = vsub.f32 %v8296_v41, %v9793_v36  ;;  %v10259_v36 = vld [vmem:[#allocation26_spill] sm:$0xff] }
 0x4c8   : > { %10250 = vst [vmem:[#allocation24_spill] sm:$0xff] %v8300_v0 }
 0x4c9   : > { %v8305_v34 = vadd.f32 %v3706_v24, %v3497_v56  ;;  %v8307_v18 = vpop.f32.mrf.mxu0  ;;  %v3996_v24 = vsel %vm354_vm0, %v3881_v11, 0  ;;  %v4304_v0 = vand.u32 4294901760, %v4303_v22 }
 0x4ca   : > { %10253 = vst [vmem:[#allocation112_spill] sm:$0xff] %v8307_v18  ;;  %3773 = vmatmul.f32.gmra.mxu3 %v10254_v6  ;;  %4583 = vmatmul.f32.gmra.mxu1 %v8261_v3  ;;  %v8324_v18 = vand.u32 4294901760, %v3996_v24 }
 0x4cb   : > { %10252 = vst [vmem:[#allocation111_spill] sm:$0xff] %v8305_v34  ;;  %3563 = vmatmul.f32.gmra.mxu2 %v10254_v6  ;;  %v9796_v6 = vand.u32 4294901760, %v8317_v51 }
 0x4cc   : > { %4297 = vmatmul.f32.gmra.mxu0 %v4296_v60  ;;  %10256 = vst [vmem:[#allocation113_spill] sm:$0xff] %v8324_v18  ;;  %v8338_v11 = vsub.f32 %v3996_v24, %v8324_v18  ;;  %v3883_v24 = vld [vmem:[%s6221_s25 + $0x130] sm:$0xff] }
 0x4cd   : > { %v3710_v62 = vpop.f32.mrf.mxu3 }
 0x4ce   : > { %v3500_v1 = vpop.f32.mrf.mxu2 }
 0x4cf   : > { %v3501_v56 = vadd.f32 %v3500_v1, %v7591_v35  ;;  %v8321_v34 = vpop.f32.mrf.mxu1  ;;  %v4311_v35 = vsub.f32 %v8317_v51, %v9796_v6  ;;  %v10264_v6 = vld [vmem:[#allocation29_spill] sm:$0xff] }
 0x4d0   : > { %10255 = vst [vmem:[#allocation27_spill] sm:$0xff] %v8321_v34 }
 0x4d1   : > { %v8326_v60 = vadd.f32 %v3710_v62, %v3501_v56  ;;  %v8328_v3 = vpop.f32.mrf.mxu0  ;;  %v3999_v62 = vsel %vm354_vm0, %v3882_v40, 0  ;;  %v4312_v34 = vand.u32 4294901760, %v4311_v35 }
 0x4d2   : > { %10258 = vst [vmem:[#allocation115_spill] sm:$0xff] %v8328_v3  ;;  %3777 = vmatmul.f32.gmra.mxu3 %v10259_v36  ;;  %4587 = vmatmul.f32.gmra.mxu1 %v8282_v21  ;;  %v8345_v3 = vand.u32 4294901760, %v3999_v62 }
 0x4d3   : > { %10257 = vst [vmem:[#allocation114_spill] sm:$0xff] %v8326_v60  ;;  %3567 = vmatmul.f32.gmra.mxu2 %v10259_v36  ;;  %v9799_v36 = vand.u32 4294901760, %v8338_v11 }
 0x4d4   : > { %4305 = vmatmul.f32.gmra.mxu0 %v4304_v0  ;;  %10261 = vst [vmem:[#allocation116_spill] sm:$0xff] %v8345_v3  ;;  %v8359_v40 = vsub.f32 %v3999_v62, %v8345_v3  ;;  %v3884_v62 = vld [vmem:[%s6221_s25 + $0x138] sm:$0xff] }
 0x4d5   : > { %v3714_v22 = vpop.f32.mrf.mxu3 }
 0x4d6   : > { %v3504_v1 = vpop.f32.mrf.mxu2 }
 0x4d7   : > { %v3505_v56 = vadd.f32 %v3504_v1, %v7600_v63  ;;  %v8342_v60 = vpop.f32.mrf.mxu1  ;;  %v4319_v63 = vsub.f32 %v8338_v11, %v9799_v36  ;;  %v10269_v36 = vld [vmem:[#allocation28_spill] sm:$0xff] }
 0x4d8   : > { %10260 = vst [vmem:[#allocation26_spill] sm:$0xff] %v8342_v60 }
 0x4d9   : > { %v8347_v0 = vadd.f32 %v3714_v22, %v3505_v56  ;;  %v8349_v21 = vpop.f32.mrf.mxu0  ;;  %v4002_v22 = vsel %vm354_vm0, %v3883_v24, 0  ;;  %v4320_v60 = vand.u32 4294901760, %v4319_v63 }
 0x4da   : > { %10263 = vst [vmem:[#allocation118_spill] sm:$0xff] %v8349_v21  ;;  %3781 = vmatmul.f32.gmra.mxu3 %v10264_v6  ;;  %4591 = vmatmul.f32.gmra.mxu1 %v8303_v45  ;;  %v8366_v21 = vand.u32 4294901760, %v4002_v22 }
 0x4db   : > { %10262 = vst [vmem:[#allocation117_spill] sm:$0xff] %v8347_v0  ;;  %3571 = vmatmul.f32.gmra.mxu2 %v10264_v6  ;;  %v9802_v6 = vand.u32 4294901760, %v8359_v40 }
 0x4dc   : > { %4313 = vmatmul.f32.gmra.mxu0 %v4312_v34  ;;  %10266 = vst [vmem:[#allocation119_spill] sm:$0xff] %v8366_v21  ;;  %v8380_v24 = vsub.f32 %v4002_v22, %v8366_v21  ;;  %v3885_v22 = vld [vmem:[%s6221_s25 + $0x140] sm:$0xff] }
 0x4dd   : > { %v3718_v35 = vpop.f32.mrf.mxu3 }
 0x4de   : > { %v3508_v1 = vpop.f32.mrf.mxu2 }
 0x4df   : > { %v3509_v56 = vadd.f32 %v3508_v1, %v7609_v32  ;;  %v8363_v0 = vpop.f32.mrf.mxu1  ;;  %v4327_v32 = vsub.f32 %v8359_v40, %v9802_v6  ;;  %v10274_v6 = vld [vmem:[#allocation31_spill] sm:$0xff] }
 0x4e0   : > { %10265 = vst [vmem:[#allocation29_spill] sm:$0xff] %v8363_v0 }
 0x4e1   : > { %v8368_v34 = vadd.f32 %v3718_v35, %v3509_v56  ;;  %v8370_v45 = vpop.f32.mrf.mxu0  ;;  %v4005_v35 = vsel %vm354_vm0, %v3884_v62, 0  ;;  %v4328_v0 = vand.u32 4294901760, %v4327_v32 }
 0x4e2   : > { %10268 = vst [vmem:[#allocation121_spill] sm:$0xff] %v8370_v45  ;;  %3785 = vmatmul.f32.gmra.mxu3 %v10269_v36  ;;  %4595 = vmatmul.f32.gmra.mxu1 %v8324_v18  ;;  %v8387_v45 = vand.u32 4294901760, %v4005_v35 }
 0x4e3   : > { %10267 = vst [vmem:[#allocation120_spill] sm:$0xff] %v8368_v34  ;;  %3575 = vmatmul.f32.gmra.mxu2 %v10269_v36  ;;  %v9805_v36 = vand.u32 4294901760, %v8380_v24 }
 0x4e4   : > { %4321 = vmatmul.f32.gmra.mxu0 %v4320_v60  ;;  %10271 = vst [vmem:[#allocation122_spill] sm:$0xff] %v8387_v45  ;;  %v8401_v62 = vsub.f32 %v4005_v35, %v8387_v45  ;;  %v3886_v35 = vld [vmem:[%s6221_s25 + $0x148] sm:$0xff] }
 0x4e5   : > { %v3722_v63 = vpop.f32.mrf.mxu3 }
 0x4e6   : > { %v3512_v1 = vpop.f32.mrf.mxu2 }
 0x4e7   : > { %v3513_v56 = vadd.f32 %v3512_v1, %v7618_v44  ;;  %v8384_v34 = vpop.f32.mrf.mxu1  ;;  %v4335_v44 = vsub.f32 %v8380_v24, %v9805_v36  ;;  %v10279_v36 = vld [vmem:[#allocation30_spill] sm:$0xff] }
 0x4e8   : > { %10270 = vst [vmem:[#allocation28_spill] sm:$0xff] %v8384_v34 }
 0x4e9   : > { %v8389_v60 = vadd.f32 %v3722_v63, %v3513_v56  ;;  %v8391_v18 = vpop.f32.mrf.mxu0  ;;  %v4008_v63 = vsel %vm354_vm0, %v3885_v22, 0  ;;  %v4336_v34 = vand.u32 4294901760, %v4335_v44 }
 0x4ea   : > { %10273 = vst [vmem:[#allocation124_spill] sm:$0xff] %v8391_v18  ;;  %3789 = vmatmul.f32.gmra.mxu3 %v10274_v6  ;;  %4599 = vmatmul.f32.gmra.mxu1 %v8345_v3  ;;  %v8408_v18 = vand.u32 4294901760, %v4008_v63 }
 0x4eb   : > { %10272 = vst [vmem:[#allocation123_spill] sm:$0xff] %v8389_v60  ;;  %3579 = vmatmul.f32.gmra.mxu2 %v10274_v6  ;;  %v9808_v6 = vand.u32 4294901760, %v8401_v62 }
 0x4ec   : > { %4329 = vmatmul.f32.gmra.mxu0 %v4328_v0  ;;  %10276 = vst [vmem:[#allocation125_spill] sm:$0xff] %v8408_v18  ;;  %v8422_v22 = vsub.f32 %v4008_v63, %v8408_v18  ;;  %v3887_v63 = vld [vmem:[%s6221_s25 + $0x150] sm:$0xff] }
 0x4ed   : > { %v3726_v32 = vpop.f32.mrf.mxu3 }
 0x4ee   : > { %v3516_v1 = vpop.f32.mrf.mxu2 }
 0x4ef   : > { %v3517_v56 = vadd.f32 %v3516_v1, %v7627_v19  ;;  %v8405_v60 = vpop.f32.mrf.mxu1  ;;  %v4343_v19 = vsub.f32 %v8401_v62, %v9808_v6  ;;  %v10284_v6 = vld [vmem:[#allocation33_spill] sm:$0xff] }
 0x4f0   : > { %10275 = vst [vmem:[#allocation31_spill] sm:$0xff] %v8405_v60 }
 0x4f1   : > { %v8410_v0 = vadd.f32 %v3726_v32, %v3517_v56  ;;  %v8412_v3 = vpop.f32.mrf.mxu0  ;;  %v4011_v32 = vsel %vm354_vm0, %v3886_v35, 0  ;;  %v4344_v60 = vand.u32 4294901760, %v4343_v19 }
 0x4f2   : > { %10278 = vst [vmem:[#allocation127_spill] sm:$0xff] %v8412_v3  ;;  %3793 = vmatmul.f32.gmra.mxu3 %v10279_v36  ;;  %4603 = vmatmul.f32.gmra.mxu1 %v8366_v21  ;;  %v8429_v3 = vand.u32 4294901760, %v4011_v32 }
 0x4f3   : > { %10277 = vst [vmem:[#allocation126_spill] sm:$0xff] %v8410_v0  ;;  %3583 = vmatmul.f32.gmra.mxu2 %v10279_v36  ;;  %v9811_v36 = vand.u32 4294901760, %v8422_v22 }
 0x4f4   : > { %4337 = vmatmul.f32.gmra.mxu0 %v4336_v34  ;;  %10281 = vst [vmem:[#allocation128_spill] sm:$0xff] %v8429_v3  ;;  %v8443_v35 = vsub.f32 %v4011_v32, %v8429_v3  ;;  %v3888_v32 = vld [vmem:[%s6221_s25 + $0x158] sm:$0xff] }
 0x4f5   : > { %v3730_v44 = vpop.f32.mrf.mxu3 }
 0x4f6   : > { %v3520_v1 = vpop.f32.mrf.mxu2 }
 0x4f7   : > { %v3521_v56 = vadd.f32 %v3520_v1, %v7636_v13  ;;  %v8426_v0 = vpop.f32.mrf.mxu1  ;;  %v4351_v13 = vsub.f32 %v8422_v22, %v9811_v36  ;;  %v10289_v36 = vld [vmem:[#allocation32_spill] sm:$0xff] }
 0x4f8   : > { %10280 = vst [vmem:[#allocation30_spill] sm:$0xff] %v8426_v0 }
 0x4f9   : > { %v8431_v34 = vadd.f32 %v3730_v44, %v3521_v56  ;;  %v8433_v21 = vpop.f32.mrf.mxu0  ;;  %v4014_v44 = vsel %vm354_vm0, %v3887_v63, 0  ;;  %v4352_v0 = vand.u32 4294901760, %v4351_v13 }
 0x4fa   : > { %10283 = vst [vmem:[#allocation130_spill] sm:$0xff] %v8433_v21  ;;  %3797 = vmatmul.f32.gmra.mxu3 %v10284_v6  ;;  %4607 = vmatmul.f32.gmra.mxu1 %v8387_v45  ;;  %v8450_v21 = vand.u32 4294901760, %v4014_v44 }
 0x4fb   : > { %10282 = vst [vmem:[#allocation129_spill] sm:$0xff] %v8431_v34  ;;  %3587 = vmatmul.f32.gmra.mxu2 %v10284_v6  ;;  %v9814_v6 = vand.u32 4294901760, %v8443_v35 }
 0x4fc   : > { %4345 = vmatmul.f32.gmra.mxu0 %v4344_v60  ;;  %10286 = vst [vmem:[#allocation131_spill] sm:$0xff] %v8450_v21  ;;  %v8464_v63 = vsub.f32 %v4014_v44, %v8450_v21  ;;  %v3889_v44 = vld [vmem:[%s6221_s25 + $0x160] sm:$0xff] }
 0x4fd   : > { %v3734_v19 = vpop.f32.mrf.mxu3 }
 0x4fe   : > { %v3524_v1 = vpop.f32.mrf.mxu2 }
 0x4ff   : > { %v3525_v56 = vadd.f32 %v3524_v1, %v7645_v30  ;;  %v8447_v34 = vpop.f32.mrf.mxu1  ;;  %v4359_v30 = vsub.f32 %v8443_v35, %v9814_v6  ;;  %v10294_v6 = vld [vmem:[#allocation35_spill] sm:$0xff] }
 0x500   : > { %10285 = vst [vmem:[#allocation33_spill] sm:$0xff] %v8447_v34 }
 0x501   : > { %v8452_v60 = vadd.f32 %v3734_v19, %v3525_v56  ;;  %v8454_v45 = vpop.f32.mrf.mxu0  ;;  %v4017_v19 = vsel %vm354_vm0, %v3888_v32, 0  ;;  %v4360_v34 = vand.u32 4294901760, %v4359_v30 }
 0x502   : > { %10288 = vst [vmem:[#allocation133_spill] sm:$0xff] %v8454_v45  ;;  %3801 = vmatmul.f32.gmra.mxu3 %v10289_v36  ;;  %4611 = vmatmul.f32.gmra.mxu1 %v8408_v18  ;;  %v8471_v45 = vand.u32 4294901760, %v4017_v19 }
 0x503   : > { %10287 = vst [vmem:[#allocation132_spill] sm:$0xff] %v8452_v60  ;;  %3591 = vmatmul.f32.gmra.mxu2 %v10289_v36  ;;  %v9817_v36 = vand.u32 4294901760, %v8464_v63 }
 0x504   : > { %4353 = vmatmul.f32.gmra.mxu0 %v4352_v0  ;;  %10291 = vst [vmem:[#allocation134_spill] sm:$0xff] %v8471_v45  ;;  %v8485_v32 = vsub.f32 %v4017_v19, %v8471_v45  ;;  %v3890_v19 = vld [vmem:[%s6221_s25 + $0x168] sm:$0xff] }
 0x505   : > { %v3738_v13 = vpop.f32.mrf.mxu3 }
 0x506   : > { %v3528_v1 = vpop.f32.mrf.mxu2 }
 0x507   : > { %v3529_v56 = vadd.f32 %v3528_v1, %v7654_v8  ;;  %v8468_v60 = vpop.f32.mrf.mxu1  ;;  %v4367_v8 = vsub.f32 %v8464_v63, %v9817_v36  ;;  %v10299_v36 = vld [vmem:[#allocation34_spill] sm:$0xff] }
 0x508   : > { %10290 = vst [vmem:[#allocation32_spill] sm:$0xff] %v8468_v60 }
 0x509   : > { %v8473_v0 = vadd.f32 %v3738_v13, %v3529_v56  ;;  %v8475_v18 = vpop.f32.mrf.mxu0  ;;  %v4020_v13 = vsel %vm354_vm0, %v3889_v44, 0  ;;  %v4368_v60 = vand.u32 4294901760, %v4367_v8 }
 0x50a   : > { %10293 = vst [vmem:[#allocation136_spill] sm:$0xff] %v8475_v18  ;;  %3805 = vmatmul.f32.gmra.mxu3 %v10294_v6  ;;  %4615 = vmatmul.f32.gmra.mxu1 %v8429_v3  ;;  %v8492_v18 = vand.u32 4294901760, %v4020_v13 }
 0x50b   : > { %10292 = vst [vmem:[#allocation135_spill] sm:$0xff] %v8473_v0  ;;  %3595 = vmatmul.f32.gmra.mxu2 %v10294_v6  ;;  %v9820_v6 = vand.u32 4294901760, %v8485_v32 }
 0x50c   : > { %4361 = vmatmul.f32.gmra.mxu0 %v4360_v34  ;;  %10296 = vst [vmem:[#allocation137_spill] sm:$0xff] %v8492_v18  ;;  %v8506_v44 = vsub.f32 %v4020_v13, %v8492_v18  ;;  %v3891_v13 = vld [vmem:[%s6221_s25 + $0x170] sm:$0xff] }
 0x50d   : > { %v3742_v30 = vpop.f32.mrf.mxu3 }
 0x50e   : > { %v3532_v1 = vpop.f32.mrf.mxu2 }
 0x50f   : > { %v3533_v56 = vadd.f32 %v3532_v1, %v7663_v17  ;;  %v8489_v0 = vpop.f32.mrf.mxu1  ;;  %v4375_v17 = vsub.f32 %v8485_v32, %v9820_v6  ;;  %v10304_v6 = vld [vmem:[#allocation42_spill] sm:$0xff] }
 0x510   : > { %10295 = vst [vmem:[#allocation35_spill] sm:$0xff] %v8489_v0 }
 0x511   : > { %v8494_v34 = vadd.f32 %v3742_v30, %v3533_v56  ;;  %v8496_v3 = vpop.f32.mrf.mxu0  ;;  %v4023_v30 = vsel %vm354_vm0, %v3890_v19, 0  ;;  %v4376_v0 = vand.u32 4294901760, %v4375_v17 }
 0x512   : > { %10298 = vst [vmem:[#allocation139_spill] sm:$0xff] %v8496_v3  ;;  %3809 = vmatmul.f32.gmra.mxu3 %v10299_v36  ;;  %4619 = vmatmul.f32.gmra.mxu1 %v8450_v21  ;;  %v8513_v3 = vand.u32 4294901760, %v4023_v30 }
 0x513   : > { %10297 = vst [vmem:[#allocation138_spill] sm:$0xff] %v8494_v34  ;;  %3599 = vmatmul.f32.gmra.mxu2 %v10299_v36  ;;  %v9823_v36 = vand.u32 4294901760, %v8506_v44 }
 0x514   : > { %4369 = vmatmul.f32.gmra.mxu0 %v4368_v60  ;;  %10301 = vst [vmem:[#allocation140_spill] sm:$0xff] %v8513_v3  ;;  %v8527_v19 = vsub.f32 %v4023_v30, %v8513_v3  ;;  %v3892_v30 = vld [vmem:[%s6221_s25 + $0x178] sm:$0xff] }
 0x515   : > { %v3746_v8 = vpop.f32.mrf.mxu3 }
 0x516   : > { %v3536_v1 = vpop.f32.mrf.mxu2 }
 0x517   : > { %v3537_v56 = vadd.f32 %v3536_v1, %v7672_v29  ;;  %v8510_v34 = vpop.f32.mrf.mxu1  ;;  %v4383_v29 = vsub.f32 %v8506_v44, %v9823_v36  ;;  %v10309_v36 = vld [vmem:[#allocation37_spill] sm:$0xff] }
 0x518   : > { %10300 = vst [vmem:[#allocation34_spill] sm:$0xff] %v8510_v34 }
 0x519   : > { %v8515_v60 = vadd.f32 %v3746_v8, %v3537_v56  ;;  %v8517_v21 = vpop.f32.mrf.mxu0  ;;  %v4026_v8 = vsel %vm354_vm0, %v3891_v13, 0  ;;  %v4384_v34 = vand.u32 4294901760, %v4383_v29 }
 0x51a   : > { %10303 = vst [vmem:[#allocation142_spill] sm:$0xff] %v8517_v21  ;;  %3813 = vmatmul.f32.gmra.mxu3 %v10304_v6  ;;  %4623 = vmatmul.f32.gmra.mxu1 %v8471_v45  ;;  %v8534_v21 = vand.u32 4294901760, %v4026_v8 }
 0x51b   : > { %10302 = vst [vmem:[#allocation141_spill] sm:$0xff] %v8515_v60  ;;  %3603 = vmatmul.f32.gmra.mxu2 %v10304_v6  ;;  %v9826_v6 = vand.u32 4294901760, %v8527_v19 }
 0x51c   : > { %4377 = vmatmul.f32.gmra.mxu0 %v4376_v0  ;;  %10306 = vst [vmem:[#allocation143_spill] sm:$0xff] %v8534_v21  ;;  %v8548_v13 = vsub.f32 %v4026_v8, %v8534_v21  ;;  %v3893_v8 = vld [vmem:[%s6221_s25 + $0x180] sm:$0xff] }
 0x51d   : > { %v3750_v17 = vpop.f32.mrf.mxu3 }
 0x51e   : > { %v3540_v1 = vpop.f32.mrf.mxu2 }
 0x51f   : > { %v3541_v56 = vadd.f32 %v3540_v1, %v7681_v38  ;;  %v8531_v60 = vpop.f32.mrf.mxu1  ;;  %v4391_v38 = vsub.f32 %v8527_v19, %v9826_v6  ;;  %v10314_v6 = vld [vmem:[#allocation36_spill] sm:$0xff] }
 0x520   : > { %10305 = vst [vmem:[#allocation42_spill] sm:$0xff] %v8531_v60 }
 0x521   : > { %v8536_v0 = vadd.f32 %v3750_v17, %v3541_v56  ;;  %v8538_v45 = vpop.f32.mrf.mxu0  ;;  %v4029_v17 = vsel %vm354_vm0, %v3892_v30, 0  ;;  %v4392_v60 = vand.u32 4294901760, %v4391_v38 }
 0x522   : > { %10308 = vst [vmem:[#allocation145_spill] sm:$0xff] %v8538_v45  ;;  %3817 = vmatmul.f32.gmra.mxu3 %v10309_v36  ;;  %4627 = vmatmul.f32.gmra.mxu1 %v8492_v18  ;;  %v8555_v45 = vand.u32 4294901760, %v4029_v17 }
 0x523   : > { %10307 = vst [vmem:[#allocation144_spill] sm:$0xff] %v8536_v0  ;;  %3607 = vmatmul.f32.gmra.mxu2 %v10309_v36  ;;  %v9829_v36 = vand.u32 4294901760, %v8548_v13 }
 0x524   : > { %4385 = vmatmul.f32.gmra.mxu0 %v4384_v34  ;;  %10311 = vst [vmem:[#allocation146_spill] sm:$0xff] %v8555_v45  ;;  %v8569_v30 = vsub.f32 %v4029_v17, %v8555_v45  ;;  %v3894_v17 = vld [vmem:[%s6221_s25 + $0x188] sm:$0xff] }
 0x525   : > { %v3754_v29 = vpop.f32.mrf.mxu3 }
 0x526   : > { %v3544_v1 = vpop.f32.mrf.mxu2 }
 0x527   : > { %v3545_v56 = vadd.f32 %v3544_v1, %v7690_v46  ;;  %v8552_v0 = vpop.f32.mrf.mxu1  ;;  %v4399_v46 = vsub.f32 %v8548_v13, %v9829_v36  ;;  %v10319_v36 = vld [vmem:[#allocation48_spill] sm:$0xff] }
 0x528   : > { %10310 = vst [vmem:[#allocation37_spill] sm:$0xff] %v8552_v0 }
 0x529   : > { %v8557_v34 = vadd.f32 %v3754_v29, %v3545_v56  ;;  %v8559_v18 = vpop.f32.mrf.mxu0  ;;  %v4032_v29 = vsel %vm354_vm0, %v3893_v8, 0  ;;  %v4400_v0 = vand.u32 4294901760, %v4399_v46 }
 0x52a   : > { %10313 = vst [vmem:[#allocation148_spill] sm:$0xff] %v8559_v18  ;;  %3821 = vmatmul.f32.gmra.mxu3 %v10314_v6  ;;  %4631 = vmatmul.f32.gmra.mxu1 %v8513_v3  ;;  %v8576_v18 = vand.u32 4294901760, %v4032_v29 }
 0x52b   : > { %10312 = vst [vmem:[#allocation147_spill] sm:$0xff] %v8557_v34  ;;  %3611 = vmatmul.f32.gmra.mxu2 %v10314_v6  ;;  %v9832_v6 = vand.u32 4294901760, %v8569_v30 }
 0x52c   : > { %4393 = vmatmul.f32.gmra.mxu0 %v4392_v60  ;;  %10316 = vst [vmem:[#allocation149_spill] sm:$0xff] %v8576_v18  ;;  %v8590_v8 = vsub.f32 %v4032_v29, %v8576_v18  ;;  %v3895_v29 = vld [vmem:[%s6221_s25 + $0x190] sm:$0xff] }
 0x52d   : > { %v3758_v38 = vpop.f32.mrf.mxu3 }
 0x52e   : > { %v3548_v1 = vpop.f32.mrf.mxu2 }
 0x52f   : > { %v3549_v56 = vadd.f32 %v3548_v1, %v7699_v28  ;;  %v8573_v34 = vpop.f32.mrf.mxu1  ;;  %v4407_v28 = vsub.f32 %v8569_v30, %v9832_v6  ;;  %v10323_v6 = vld [vmem:[#allocation40_spill] sm:$0xff] }
 0x530   : > { %10315 = vst [vmem:[#allocation36_spill] sm:$0xff] %v8573_v34 }
 0x531   : > { %v8578_v60 = vadd.f32 %v3758_v38, %v3549_v56  ;;  %v8580_v3 = vpop.f32.mrf.mxu0  ;;  %v4035_v38 = vsel %vm354_vm0, %v3894_v17, 0  ;;  %v4408_v34 = vand.u32 4294901760, %v4407_v28 }
 0x532   : > { %10318 = vst [vmem:[#allocation151_spill] sm:$0xff] %v8580_v3  ;;  %3825 = vmatmul.f32.gmra.mxu3 %v10319_v36  ;;  %4635 = vmatmul.f32.gmra.mxu1 %v8534_v21  ;;  %v8597_v3 = vand.u32 4294901760, %v4035_v38 }
 0x533   : > { %10317 = vst [vmem:[#allocation150_spill] sm:$0xff] %v8578_v60  ;;  %3615 = vmatmul.f32.gmra.mxu2 %v10319_v36  ;;  %v9835_v36 = vand.u32 4294901760, %v8590_v8 }
 0x534   : > { %4401 = vmatmul.f32.gmra.mxu0 %v4400_v0  ;;  %v8611_v17 = vsub.f32 %v4035_v38, %v8597_v3  ;;  %v3896_v38 = vld [vmem:[%s6221_s25 + $0x198] sm:$0xff] }
 0x535   : > { %v3762_v46 = vpop.f32.mrf.mxu3 }
 0x536   : > { %v3552_v1 = vpop.f32.mrf.mxu2 }
 0x537   : > { %v3553_v56 = vadd.f32 %v3552_v1, %v7708_v15  ;;  %v8594_v60 = vpop.f32.mrf.mxu1  ;;  %v4415_v15 = vsub.f32 %v8590_v8, %v9835_v36  ;;  %v10327_v36 = vld [vmem:[#allocation38_spill] sm:$0xff] }
 0x538   : > { %10320 = vst [vmem:[#allocation48_spill] sm:$0xff] %v8594_v60 }
 0x539   : > { %v8599_v0 = vadd.f32 %v3762_v46, %v3553_v56  ;;  %v8601_v21 = vpop.f32.mrf.mxu0  ;;  %v4038_v46 = vsel %vm354_vm0, %v3895_v29, 0  ;;  %v4416_v60 = vand.u32 4294901760, %v4415_v15 }
 0x53a   : > { %10322 = vst [vmem:[#allocation153_spill] sm:$0xff] %v8601_v21  ;;  %3829 = vmatmul.f32.gmra.mxu3 %v10323_v6  ;;  %4639 = vmatmul.f32.gmra.mxu1 %v8555_v45  ;;  %v8618_v21 = vand.u32 4294901760, %v4038_v46 }
 0x53b   : > { %10321 = vst [vmem:[#allocation152_spill] sm:$0xff] %v8599_v0  ;;  %3619 = vmatmul.f32.gmra.mxu2 %v10323_v6  ;;  %v9838_v6 = vand.u32 4294901760, %v8611_v17 }
 0x53c   : > { %4409 = vmatmul.f32.gmra.mxu0 %v4408_v34  ;;  %v8632_v29 = vsub.f32 %v4038_v46, %v8618_v21 }
 0x53d   : > { %v3766_v28 = vpop.f32.mrf.mxu3 }
 0x53e   : > { %v3556_v1 = vpop.f32.mrf.mxu2 }
 0x53f   : > { %v3557_v56 = vadd.f32 %v3556_v1, %v7717_v20  ;;  %v8615_v0 = vpop.f32.mrf.mxu1  ;;  %v4423_v20 = vsub.f32 %v8611_v17, %v9838_v6 }
 0x540   : > { %10324 = vst [vmem:[#allocation40_spill] sm:$0xff] %v8615_v0 }
 0x541   : > { %v8620_v34 = vadd.f32 %v3766_v28, %v3557_v56  ;;  %v8622_v45 = vpop.f32.mrf.mxu0  ;;  %v4041_v28 = vsel %vm354_vm0, %v3896_v38, 0  ;;  %v4424_v0 = vand.u32 4294901760, %v4423_v20 }
 0x542   : > { %10326 = vst [vmem:[#allocation155_spill] sm:$0xff] %v8622_v45  ;;  %3833 = vmatmul.f32.gmra.mxu3 %v10327_v36  ;;  %4643 = vmatmul.f32.gmra.mxu1 %v8576_v18  ;;  %v9839_v45 = vand.u32 4294901760, %v8632_v29 }
 0x543   : > { %10325 = vst [vmem:[#allocation154_spill] sm:$0xff] %v8620_v34  ;;  %3623 = vmatmul.f32.gmra.mxu2 %v10327_v36  ;;  %v8639_v36 = vand.u32 4294901760, %v4041_v28 }
 0x544   : > { %4417 = vmatmul.f32.gmra.mxu0 %v4416_v60 }
 0x545   : > { %v3770_v15 = vpop.f32.mrf.mxu3  ;;  %v8652_v46 = vsub.f32 %v4041_v28, %v8639_v36 }
 0x546   : > { %v3560_v1 = vpop.f32.mrf.mxu2 }
 0x547   : > { %v3561_v56 = vadd.f32 %v3560_v1, %v7725_v27  ;;  %v8636_v34 = vpop.f32.mrf.mxu1  ;;  %v4431_v27 = vsub.f32 %v8632_v29, %v9839_v45  ;;  %10329 = vst [vmem:[#allocation156_spill] sm:$0xff] %v8652_v46  ;;  %v9840_v6 = vand.u32 4294901760, %v8652_v46 }
 0x549   : > { %v8641_v60 = vadd.f32 %v3770_v15, %v3561_v56  ;;  %v8643_v18 = vpop.f32.mrf.mxu0  ;;  %v4432_v56 = vand.u32 4294901760, %v4431_v27 }
 0x54a   : > { %3837 = vmatmul.f32.gmra.mxu3 %v7702_v10  ;;  %4647 = vmatmul.f32.gmra.mxu1 %v8597_v3 }
 0x54b   : > { %10328 = vst [vmem:[#allocation38_spill] sm:$0xff] %v8641_v60  ;;  %3627 = vmatmul.f32.gmra.mxu2 %v7702_v10 }
 0x54c   : > { %4425 = vmatmul.f32.gmra.mxu0 %v4424_v0 }
 0x54d   : > { %v3774_v38 = vpop.f32.mrf.mxu3 }
 0x54e   : > { %v3564_v20 = vpop.f32.mrf.mxu2 }
 0x54f   : > { %v3565_v15 = vadd.f32 %v3564_v20, %v7736_v9  ;;  %v8655_v1 = vpop.f32.mrf.mxu1  ;;  %v4439_v9 = vsub.f32 %v8652_v46, %v9840_v6 }
 0x551   : > { %v8658_v60 = vadd.f32 %v3774_v38, %v3565_v15  ;;  %v8660_v10 = vpop.f32.mrf.mxu0  ;;  %v4440_v38 = vand.u32 4294901760, %v4439_v9 }
 0x552   : > { %3841 = vmatmul.f32.gmra.mxu3 %v7711_v58  ;;  %4651 = vmatmul.f32.gmra.mxu1 %v8618_v21 }
 0x553   : > { %3631 = vmatmul.f32.gmra.mxu2 %v7711_v58 }
 0x554   : > { %4433 = vmatmul.f32.gmra.mxu0 %v4432_v56 }
 0x555   : > { %v3778_v0 = vpop.f32.mrf.mxu3 }
 0x556   : > { %v3568_v28 = vpop.f32.mrf.mxu2 }
 0x557   : > { %v3569_v27 = vadd.f32 %v3568_v28, %v7751_v47  ;;  %v8669_v20 = vpop.f32.mrf.mxu1  ;;  %v10332_v28 = vld [vmem:[#allocation55_spill] sm:$0xff] }
 0x559   : > { %v8671_v15 = vadd.f32 %v3778_v0, %v3569_v27  ;;  %v8673_v45 = vpop.f32.mrf.mxu0  ;;  %v10331_v0 = vand.u32 4294901760, %v7734_v42 }
 0x55a   : > { %3845 = vmatmul.f32.gmra.mxu3 %v7720_v49  ;;  %4655 = vmatmul.f32.gmra.mxu1 %v8639_v36 }
 0x55b   : > { %3635 = vmatmul.f32.gmra.mxu2 %v7720_v49 }
 0x55c   : > { %4441 = vmatmul.f32.gmra.mxu0 %v4440_v38 }
 0x55d   : > { %v3782_v58 = vpop.f32.mrf.mxu3 }
 0x55e   : > { %v3572_v56 = vpop.f32.mrf.mxu2 }
 0x55f   : > { %v3573_v6 = vadd.f32 %v3572_v56, %v7768_v37  ;;  %v8679_v46 = vpop.f32.mrf.mxu1 }
 0x561   : > { %v8681_v47 = vadd.f32 %v3782_v58, %v3573_v6  ;;  %v8683_v9 = vpop.f32.mrf.mxu0  ;;  %v10335_v58 = vand.u32 4294901760, %v7749_v7 }
 0x562   : > { %4938 = vmatmul.f32.vlgmr.msra.gmra.mxu3 %v10331_v0  ;;  %5454 = vmatmul.f32.vlgmr.msra.gmra.mxu1 %v10332_v28  ;;  %v10336_v0 = vld [vmem:[#allocation46_spill] sm:$0xff] }
 0x563   : > { %10330 = vst [vmem:[#allocation157_spill] sm:$0xff] %v8681_v47  ;;  %4679 = vmatmul.f32.vlgmr.msra.gmra.mxu2 %v7734_v42 }
 0x564   : > { %5244 = vmatmul.f32.vlgmr.msra.gmra.mxu0 %v10332_v28 }
 0x565   : > { %v3786_v49 = vpop.f32.mrf.mxu3 }
 0x566   : > { %v3576_v27 = vpop.f32.mrf.mxu2 }
 0x567   : > { %v3577_v38 = vadd.f32 %v3576_v27, %v7785_v26  ;;  %v8691_v37 = vpop.f32.mrf.mxu1 }
 0x568   : > { %10333 = vst [vmem:[#allocation55_spill] sm:$0xff] %v8691_v37 }
 0x569   : > { %v8693_v56 = vadd.f32 %v3786_v49, %v3577_v38  ;;  %v8695_v6 = vpop.f32.mrf.mxu0  ;;  %v10340_v38 = vand.u32 4294901760, %v7766_v55 }
 0x56a   : > { %4944 = vmatmul.f32.gmra.mxu3 %v10335_v58  ;;  %5458 = vmatmul.f32.gmra.mxu1 %v10336_v0  ;;  %v10341_v58 = vld [vmem:[#allocation44_spill] sm:$0xff] }
 0x56b   : > { %10334 = vst [vmem:[#allocation158_spill] sm:$0xff] %v8693_v56  ;;  %4684 = vmatmul.f32.gmra.mxu2 %v7749_v7  ;;  %v10342_v56 = vld [vmem:[#allocation65_spill] sm:$0xff] }
 0x56c   : > { %5248 = vmatmul.f32.gmra.mxu0 %v10336_v0 }
 0x56d   : > { %v3790_v42 = vpop.f32.mrf.mxu3 }
 0x56e   : > { %v3580_v28 = vpop.f32.mrf.mxu2 }
 0x56f   : > { %v3581_v47 = vadd.f32 %v3580_v28, %v7802_v5  ;;  %v8703_v26 = vpop.f32.mrf.mxu1 }
 0x570   : > { %10337 = vst [vmem:[#allocation46_spill] sm:$0xff] %v8703_v26  ;;  %v10349_v26 = vld [vmem:[#allocation68_spill] sm:$0xff] }
 0x571   : > { %v8705_v27 = vadd.f32 %v3790_v42, %v3581_v47  ;;  %v8707_v49 = vpop.f32.mrf.mxu0  ;;  %v10346_v42 = vld [vmem:[#allocation53_spill] sm:$0xff] }
 0x572   : > { %10339 = vst [vmem:[#allocation160_spill] sm:$0xff] %v8707_v49  ;;  %4950 = vmatmul.f32.gmra.mxu3 %v10340_v38  ;;  %5462 = vmatmul.f32.gmra.mxu1 %v10341_v58  ;;  %v10348_v38 = vld [vmem:[#allocation61_spill] sm:$0xff] }
 0x573   : > { %10338 = vst [vmem:[#allocation159_spill] sm:$0xff] %v8705_v27  ;;  %4689 = vmatmul.f32.gmra.mxu2 %v7766_v55  ;;  %v10347_v27 = vand.u32 4294901760, %v10346_v42 }
 0x574   : > { %5252 = vmatmul.f32.gmra.mxu0 %v10341_v58 }
 0x575   : > { %v3794_v7 = vpop.f32.mrf.mxu3 }
 0x576   : > { %v3584_v0 = vpop.f32.mrf.mxu2 }
 0x577   : > { %v3585_v37 = vadd.f32 %v3584_v0, %v10342_v56  ;;  %v8715_v5 = vpop.f32.mrf.mxu1 }
 0x578   : > { %10343 = vst [vmem:[#allocation44_spill] sm:$0xff] %v8715_v5  ;;  %v10356_v5 = vld [vmem:[#allocation73_spill] sm:$0xff] }
 0x579   : > { %v8717_v28 = vadd.f32 %v3794_v7, %v3585_v37  ;;  %v8719_v47 = vpop.f32.mrf.mxu0  ;;  %v10353_v7 = vld [vmem:[#allocation66_spill] sm:$0xff] }
 0x57a   : > { %10345 = vst [vmem:[#allocation161_spill] sm:$0xff] %v8719_v47  ;;  %4956 = vmatmul.f32.gmra.mxu3 %v10347_v27  ;;  %5466 = vmatmul.f32.gmra.mxu1 %v10348_v38  ;;  %v10355_v27 = vld [vmem:[#allocation50_spill] sm:$0xff] }
 0x57b   : > { %10344 = vst [vmem:[#allocation65_spill] sm:$0xff] %v8717_v28  ;;  %4694 = vmatmul.f32.gmra.mxu2 %v10346_v42  ;;  %v10354_v28 = vand.u32 4294901760, %v10353_v7 }
 0x57c   : > { %5256 = vmatmul.f32.gmra.mxu0 %v10348_v38 }
 0x57d   : > { %v3798_v55 = vpop.f32.mrf.mxu3 }
 0x57e   : > { %v3588_v58 = vpop.f32.mrf.mxu2 }
 0x57f   : > { %v3589_v49 = vadd.f32 %v3588_v58, %v10349_v26  ;;  %v8727_v56 = vpop.f32.mrf.mxu1 }
 0x580   : > { %10350 = vst [vmem:[#allocation53_spill] sm:$0xff] %v8727_v56  ;;  %v10363_v56 = vld [vmem:[#allocation76_spill] sm:$0xff] }
 0x581   : > { %v8729_v0 = vadd.f32 %v3798_v55, %v3589_v49  ;;  %v8731_v37 = vpop.f32.mrf.mxu0  ;;  %v10360_v55 = vld [vmem:[#allocation57_spill] sm:$0xff] }
 0x582   : > { %10352 = vst [vmem:[#allocation68_spill] sm:$0xff] %v8731_v37  ;;  %4962 = vmatmul.f32.gmra.mxu3 %v10354_v28  ;;  %5470 = vmatmul.f32.gmra.mxu1 %v10355_v27  ;;  %v10362_v28 = vld [vmem:[#allocation59_spill] sm:$0xff] }
 0x583   : > { %10351 = vst [vmem:[#allocation61_spill] sm:$0xff] %v8729_v0  ;;  %4699 = vmatmul.f32.gmra.mxu2 %v10353_v7  ;;  %v10361_v0 = vand.u32 4294901760, %v10360_v55 }
 0x584   : > { %5260 = vmatmul.f32.gmra.mxu0 %v10355_v27 }
 0x585   : > { %v3802_v42 = vpop.f32.mrf.mxu3 }
 0x586   : > { %v3592_v38 = vpop.f32.mrf.mxu2 }
 0x587   : > { %v3593_v47 = vadd.f32 %v3592_v38, %v10356_v5  ;;  %v8739_v26 = vpop.f32.mrf.mxu1 }
 0x588   : > { %10357 = vst [vmem:[#allocation66_spill] sm:$0xff] %v8739_v26  ;;  %v10370_v26 = vld [vmem:[#allocation79_spill] sm:$0xff] }
 0x589   : > { %v8741_v58 = vadd.f32 %v3802_v42, %v3593_v47  ;;  %v8743_v49 = vpop.f32.mrf.mxu0  ;;  %v10367_v42 = vld [vmem:[#allocation70_spill] sm:$0xff] }
 0x58a   : > { %10359 = vst [vmem:[#allocation73_spill] sm:$0xff] %v8743_v49  ;;  %4968 = vmatmul.f32.gmra.mxu3 %v10361_v0  ;;  %5474 = vmatmul.f32.gmra.mxu1 %v10362_v28  ;;  %v10369_v0 = vld [vmem:[#allocation63_spill] sm:$0xff] }
 0x58b   : > { %10358 = vst [vmem:[#allocation50_spill] sm:$0xff] %v8741_v58  ;;  %4704 = vmatmul.f32.gmra.mxu2 %v10360_v55  ;;  %v10368_v58 = vand.u32 4294901760, %v10367_v42 }
 0x58c   : > { %5264 = vmatmul.f32.gmra.mxu0 %v10362_v28 }
 0x58d   : > { %v3806_v7 = vpop.f32.mrf.mxu3 }
 0x58e   : > { %v3596_v27 = vpop.f32.mrf.mxu2 }
 0x58f   : > { %v3597_v37 = vadd.f32 %v3596_v27, %v10363_v56  ;;  %v8751_v5 = vpop.f32.mrf.mxu1 }
 0x590   : > { %10364 = vst [vmem:[#allocation57_spill] sm:$0xff] %v8751_v5  ;;  %v10377_v5 = vld [vmem:[#allocation82_spill] sm:$0xff] }
 0x591   : > { %v8753_v38 = vadd.f32 %v3806_v7, %v3597_v37  ;;  %v8755_v47 = vpop.f32.mrf.mxu0  ;;  %v10374_v7 = vld [vmem:[#allocation72_spill] sm:$0xff] }
 0x592   : > { %10366 = vst [vmem:[#allocation76_spill] sm:$0xff] %v8755_v47  ;;  %4974 = vmatmul.f32.gmra.mxu3 %v10368_v58  ;;  %5478 = vmatmul.f32.gmra.mxu1 %v10369_v0  ;;  %v10376_v58 = vld [vmem:[#allocation71_spill] sm:$0xff] }
 0x593   : > { %10365 = vst [vmem:[#allocation59_spill] sm:$0xff] %v8753_v38  ;;  %4709 = vmatmul.f32.gmra.mxu2 %v10367_v42  ;;  %v10375_v38 = vand.u32 4294901760, %v10374_v7 }
 0x594   : > { %5268 = vmatmul.f32.gmra.mxu0 %v10369_v0 }
 0x595   : > { %v3810_v55 = vpop.f32.mrf.mxu3 }
 0x596   : > { %v3600_v28 = vpop.f32.mrf.mxu2 }
 0x597   : > { %v3601_v49 = vadd.f32 %v3600_v28, %v10370_v26  ;;  %v8763_v56 = vpop.f32.mrf.mxu1 }
 0x598   : > { %10371 = vst [vmem:[#allocation70_spill] sm:$0xff] %v8763_v56  ;;  %v10384_v56 = vld [vmem:[#allocation85_spill] sm:$0xff] }
 0x599   : > { %v8765_v27 = vadd.f32 %v3810_v55, %v3601_v49  ;;  %v8767_v37 = vpop.f32.mrf.mxu0  ;;  %v10381_v55 = vld [vmem:[#allocation75_spill] sm:$0xff] }
 0x59a   : > { %10373 = vst [vmem:[#allocation79_spill] sm:$0xff] %v8767_v37  ;;  %4980 = vmatmul.f32.gmra.mxu3 %v10375_v38  ;;  %5482 = vmatmul.f32.gmra.mxu1 %v10376_v58  ;;  %v10383_v38 = vld [vmem:[#allocation74_spill] sm:$0xff] }
 0x59b   : > { %10372 = vst [vmem:[#allocation63_spill] sm:$0xff] %v8765_v27  ;;  %4714 = vmatmul.f32.gmra.mxu2 %v10374_v7  ;;  %v10382_v27 = vand.u32 4294901760, %v10381_v55 }
 0x59c   : > { %5272 = vmatmul.f32.gmra.mxu0 %v10376_v58 }
 0x59d   : > { %v3814_v42 = vpop.f32.mrf.mxu3 }
 0x59e   : > { %v3604_v0 = vpop.f32.mrf.mxu2 }
 0x59f   : > { %v3605_v47 = vadd.f32 %v3604_v0, %v10377_v5  ;;  %v8775_v26 = vpop.f32.mrf.mxu1 }
 0x5a0   : > { %10378 = vst [vmem:[#allocation72_spill] sm:$0xff] %v8775_v26  ;;  %v10391_v26 = vld [vmem:[#allocation43_spill] sm:$0xff] }
 0x5a1   : > { %v8777_v28 = vadd.f32 %v3814_v42, %v3605_v47  ;;  %v8779_v49 = vpop.f32.mrf.mxu0  ;;  %v10388_v42 = vld [vmem:[#allocation78_spill] sm:$0xff] }
 0x5a2   : > { %10380 = vst [vmem:[#allocation82_spill] sm:$0xff] %v8779_v49  ;;  %4986 = vmatmul.f32.gmra.mxu3 %v10382_v27  ;;  %5486 = vmatmul.f32.gmra.mxu1 %v10383_v38  ;;  %v10390_v27 = vld [vmem:[#allocation77_spill] sm:$0xff] }
 0x5a3   : > { %10379 = vst [vmem:[#allocation71_spill] sm:$0xff] %v8777_v28  ;;  %4719 = vmatmul.f32.gmra.mxu2 %v10381_v55  ;;  %v10389_v28 = vand.u32 4294901760, %v10388_v42 }
 0x5a4   : > { %5276 = vmatmul.f32.gmra.mxu0 %v10383_v38 }
 0x5a5   : > { %v3818_v7 = vpop.f32.mrf.mxu3 }
 0x5a6   : > { %v3608_v58 = vpop.f32.mrf.mxu2 }
 0x5a7   : > { %v3609_v37 = vadd.f32 %v3608_v58, %v10384_v56  ;;  %v8787_v5 = vpop.f32.mrf.mxu1 }
 0x5a8   : > { %10385 = vst [vmem:[#allocation75_spill] sm:$0xff] %v8787_v5  ;;  %v10398_v5 = vld [vmem:[#allocation39_spill] sm:$0xff] }
 0x5a9   : > { %v8789_v0 = vadd.f32 %v3818_v7, %v3609_v37  ;;  %v8791_v47 = vpop.f32.mrf.mxu0  ;;  %v10395_v7 = vld [vmem:[#allocation81_spill] sm:$0xff] }
 0x5aa   : > { %10387 = vst [vmem:[#allocation85_spill] sm:$0xff] %v8791_v47  ;;  %4992 = vmatmul.f32.gmra.mxu3 %v10389_v28  ;;  %5490 = vmatmul.f32.gmra.mxu1 %v10390_v27  ;;  %v10397_v28 = vld [vmem:[#allocation80_spill] sm:$0xff] }
 0x5ab   : > { %10386 = vst [vmem:[#allocation74_spill] sm:$0xff] %v8789_v0  ;;  %4724 = vmatmul.f32.gmra.mxu2 %v10388_v42  ;;  %v10396_v0 = vand.u32 4294901760, %v10395_v7 }
 0x5ac   : > { %5280 = vmatmul.f32.gmra.mxu0 %v10390_v27 }
 0x5ad   : > { %v3822_v55 = vpop.f32.mrf.mxu3 }
 0x5ae   : > { %v3612_v38 = vpop.f32.mrf.mxu2 }
 0x5af   : > { %v3613_v49 = vadd.f32 %v3612_v38, %v10391_v26  ;;  %v8799_v56 = vpop.f32.mrf.mxu1 }
 0x5b0   : > { %10392 = vst [vmem:[#allocation78_spill] sm:$0xff] %v8799_v56  ;;  %v10405_v56 = vld [vmem:[#allocation54_spill] sm:$0xff] }
 0x5b1   : > { %v8801_v58 = vadd.f32 %v3822_v55, %v3613_v49  ;;  %v8803_v37 = vpop.f32.mrf.mxu0  ;;  %v10402_v55 = vld [vmem:[#allocation84_spill] sm:$0xff] }
 0x5b2   : > { %10394 = vst [vmem:[#allocation43_spill] sm:$0xff] %v8803_v37  ;;  %4998 = vmatmul.f32.gmra.mxu3 %v10396_v0  ;;  %5494 = vmatmul.f32.gmra.mxu1 %v10397_v28  ;;  %v10404_v0 = vld [vmem:[#allocation83_spill] sm:$0xff] }
 0x5b3   : > { %10393 = vst [vmem:[#allocation77_spill] sm:$0xff] %v8801_v58  ;;  %4729 = vmatmul.f32.gmra.mxu2 %v10395_v7  ;;  %v10403_v58 = vand.u32 4294901760, %v10402_v55 }
 0x5b4   : > { %5284 = vmatmul.f32.gmra.mxu0 %v10397_v28 }
 0x5b5   : > { %v3826_v42 = vpop.f32.mrf.mxu3 }
 0x5b6   : > { %v3616_v27 = vpop.f32.mrf.mxu2 }
 0x5b7   : > { %v3617_v47 = vadd.f32 %v3616_v27, %v10398_v5  ;;  %v8811_v26 = vpop.f32.mrf.mxu1 }
 0x5b8   : > { %10399 = vst [vmem:[#allocation81_spill] sm:$0xff] %v8811_v26  ;;  %v10411_v26 = vld [vmem:[#allocation45_spill] sm:$0xff] }
 0x5b9   : > { %v8813_v38 = vadd.f32 %v3826_v42, %v3617_v47  ;;  %v8815_v49 = vpop.f32.mrf.mxu0  ;;  %v10408_v42 = vld [vmem:[#allocation87_spill] sm:$0xff] }
 0x5ba   : > { %10401 = vst [vmem:[#allocation39_spill] sm:$0xff] %v8815_v49  ;;  %5004 = vmatmul.f32.gmra.mxu3 %v10403_v58  ;;  %5498 = vmatmul.f32.gmra.mxu1 %v10404_v0  ;;  %v10410_v58 = vld [vmem:[#allocation86_spill] sm:$0xff] }
 0x5bb   : > { %10400 = vst [vmem:[#allocation80_spill] sm:$0xff] %v8813_v38  ;;  %4734 = vmatmul.f32.gmra.mxu2 %v10402_v55  ;;  %v10409_v38 = vand.u32 4294901760, %v10408_v42 }
 0x5bc   : > { %5288 = vmatmul.f32.gmra.mxu0 %v10404_v0 }
 0x5bd   : > { %v3830_v7 = vpop.f32.mrf.mxu3 }
 0x5be   : > { %v3620_v28 = vpop.f32.mrf.mxu2 }
 0x5bf   : > { %v3621_v37 = vadd.f32 %v3620_v28, %v10405_v56  ;;  %v8823_v5 = vpop.f32.mrf.mxu1 }
 0x5c0   : > { %10406 = vst [vmem:[#allocation84_spill] sm:$0xff] %v8823_v5 }
 0x5c1   : > { %v8825_v27 = vadd.f32 %v3830_v7, %v3621_v37  ;;  %v8827_v47 = vpop.f32.mrf.mxu0  ;;  %v10414_v7 = vld [vmem:[#allocation47_spill] sm:$0xff] }
 0x5c2   : > { %5010 = vmatmul.f32.gmra.mxu3 %v10409_v38  ;;  %5502 = vmatmul.f32.gmra.mxu1 %v10410_v58  ;;  %v10416_v38 = vld [vmem:[#allocation41_spill] sm:$0xff] }
 0x5c3   : > { %10407 = vst [vmem:[#allocation83_spill] sm:$0xff] %v8825_v27  ;;  %4739 = vmatmul.f32.gmra.mxu2 %v10408_v42  ;;  %v10415_v27 = vand.u32 4294901760, %v10414_v7 }
 0x5c4   : > { %5292 = vmatmul.f32.gmra.mxu0 %v10410_v58 }
 0x5c5   : > { %v3834_v55 = vpop.f32.mrf.mxu3 }
 0x5c6   : > { %v3624_v0 = vpop.f32.mrf.mxu2 }
 0x5c7   : > { %v3625_v49 = vadd.f32 %v3624_v0, %v10411_v26  ;;  %v8835_v56 = vpop.f32.mrf.mxu1 }
 0x5c8   : > { %10412 = vst [vmem:[#allocation54_spill] sm:$0xff] %v8835_v56 }
 0x5c9   : > { %v8837_v28 = vadd.f32 %v3834_v55, %v3625_v49  ;;  %v8839_v37 = vpop.f32.mrf.mxu0  ;;  %v10420_v55 = vld [vmem:[#allocation52_spill] sm:$0xff] }
 0x5ca   : > { %5016 = vmatmul.f32.gmra.mxu3 %v10415_v27  ;;  %5506 = vmatmul.f32.gmra.mxu1 %v10416_v38  ;;  %v10422_v27 = vld [vmem:[#allocation58_spill] sm:$0xff] }
 0x5cb   : > { %10413 = vst [vmem:[#allocation87_spill] sm:$0xff] %v8837_v28  ;;  %4744 = vmatmul.f32.gmra.mxu2 %v10414_v7  ;;  %v10421_v28 = vand.u32 4294901760, %v10420_v55 }
 0x5cc   : > { %5296 = vmatmul.f32.gmra.mxu0 %v10416_v38 }
 0x5cd   : > { %v3838_v42 = vpop.f32.mrf.mxu3 }
 0x5ce   : > { %v3628_v58 = vpop.f32.mrf.mxu2 }
 0x5cf   : > { %v3629_v5 = vadd.f32 %v3628_v58, %v8006_v12  ;;  %v8847_v26 = vpop.f32.mrf.mxu1 }
 0x5d0   : > { %10417 = vst [vmem:[#allocation86_spill] sm:$0xff] %v8847_v26 }
 0x5d1   : > { %v8849_v0 = vadd.f32 %v3838_v42, %v3629_v5  ;;  %v8851_v49 = vpop.f32.mrf.mxu0  ;;  %v10426_v42 = vld [vmem:[#allocation64_spill] sm:$0xff] }
 0x5d2   : > { %10419 = vst [vmem:[#allocation47_spill] sm:$0xff] %v8851_v49  ;;  %5022 = vmatmul.f32.gmra.mxu3 %v10421_v28  ;;  %5510 = vmatmul.f32.gmra.mxu1 %v10422_v27  ;;  %v10428_v28 = vld [vmem:[#allocation49_spill] sm:$0xff] }
 0x5d3   : > { %10418 = vst [vmem:[#allocation45_spill] sm:$0xff] %v8849_v0  ;;  %4749 = vmatmul.f32.gmra.mxu2 %v10420_v55  ;;  %v10427_v0 = vand.u32 4294901760, %v10426_v42 }
 0x5d4   : > { %5300 = vmatmul.f32.gmra.mxu0 %v10422_v27 }
 0x5d5   : > { %v3842_v7 = vpop.f32.mrf.mxu3 }
 0x5d6   : > { %v3632_v38 = vpop.f32.mrf.mxu2 }
 0x5d7   : > { %v3633_v56 = vadd.f32 %v3632_v38, %v8023_v59  ;;  %v8859_v12 = vpop.f32.mrf.mxu1 }
 0x5d8   : > { %10423 = vst [vmem:[#allocation41_spill] sm:$0xff] %v8859_v12 }
 0x5d9   : > { %v8861_v58 = vadd.f32 %v3842_v7, %v3633_v56  ;;  %v8863_v5 = vpop.f32.mrf.mxu0  ;;  %v10430_v7 = vand.u32 4294901760, %v8004_v43 }
 0x5da   : > { %10425 = vst [vmem:[#allocation58_spill] sm:$0xff] %v8863_v5  ;;  %5028 = vmatmul.f32.gmra.mxu3 %v10427_v0  ;;  %5514 = vmatmul.f32.gmra.mxu1 %v10428_v28  ;;  %v10431_v0 = vld [vmem:[#allocation67_spill] sm:$0xff] }
 0x5db   : > { %10424 = vst [vmem:[#allocation52_spill] sm:$0xff] %v8861_v58  ;;  %4754 = vmatmul.f32.gmra.mxu2 %v10426_v42  ;;  %v10432_v42 = vld [vmem:[#allocation60_spill] sm:$0xff] }
 0x5dc   : > { %5304 = vmatmul.f32.gmra.mxu0 %v10428_v28  ;;  %v4469_v28 = vadd.f32 %v10432_v42, %v10431_v0 }
 0x5dd   : > { %v3846_v55 = vpop.f32.mrf.mxu3 }
 0x5de   : > { %v3636_v27 = vpop.f32.mrf.mxu2 }
 0x5df   : > { %v3637_v59 = vadd.f32 %v3636_v27, %v8044_v53  ;;  %v5455_v38 = vpop.f32.mrf.mxu1 }
 0x5e1   : > { %v8871_v12 = vadd.f32 %v3846_v55, %v3637_v59  ;;  %v5245_v56 = vpop.f32.mrf.mxu0  ;;  %v10433_v59 = vand.u32 4294901760, %v8021_v16 }
 0x5e2   : > { %5034 = vmatmul.f32.gmra.mxu3 %v10430_v7  ;;  %5518 = vmatmul.f32.gmra.mxu1 %v7994_v57 }
 0x5e3   : > { %10429 = vst [vmem:[#allocation64_spill] sm:$0xff] %v8871_v12  ;;  %4759 = vmatmul.f32.gmra.mxu2 %v8004_v43  ;;  %v10435_v43 = vld [vmem:[#allocation51_spill] sm:$0xff] }
 0x5e4   : > { %5308 = vmatmul.f32.gmra.mxu0 %v7994_v57  ;;  %v10434_v57 = vld [vmem:[#allocation3_spill] sm:$0xff] }
 0x5e5   : > { %v4939_v58 = vpop.f32.mrf.mxu3  ;;  %v4473_v0 = vadd.f32 %v10435_v43, %v10434_v57  ;;  %v10440_v57 = vld [vmem:[#allocation69_spill] sm:$0xff] }
 0x5e6   : > { %v4680_v5 = vpop.f32.mrf.mxu2 }
 0x5e7   : > { %v4681_v26 = vadd.f32 %v4680_v5, %v4469_v28  ;;  %v5459_v53 = vpop.f32.mrf.mxu1 }
 0x5e9   : > { %v4940_v27 = vadd.f32 %v4939_v58, %v4681_v26  ;;  %v5249_v55 = vpop.f32.mrf.mxu0  ;;  %v10436_v58 = vld [vmem:[#allocation62_spill] sm:$0xff] }
 0x5ea   : > { %5040 = vmatmul.f32.gmra.mxu3 %v10433_v59  ;;  %5522 = vmatmul.f32.gmra.mxu1 %v8011_v23 }
 0x5eb   : > { %v5246_v7 = vadd.f32 %v5245_v56, %v4940_v27  ;;  %4764 = vmatmul.f32.gmra.mxu2 %v8021_v16  ;;  %v10437_v27 = vand.u32 4294901760, %v8042_v33 }
 0x5ec   : > { %5312 = vmatmul.f32.gmra.mxu0 %v8011_v23 }
 0x5ed   : > { %v5456_v42 = vadd.f32 %v5455_v38, %v5246_v7  ;;  %v4945_v12 = vpop.f32.mrf.mxu3  ;;  %v10438_v38 = vld [vmem:[#allocation56_spill] sm:$0xff] }
 0x5ee   : > { %v4685_v26 = vpop.f32.mrf.mxu2  ;;  %v10439_v7 = vld [vmem:[#allocation8_spill] sm:$0xff] }
 0x5ef   : > { %v5646_v5 = vadd.f32 %v5456_v42, %v10436_v58  ;;  %v4686_v28 = vadd.f32 %v4685_v26, %v4473_v0  ;;  %v5463_v56 = vpop.f32.mrf.mxu1  ;;  %v4477_v43 = vadd.f32 %v10440_v57, %v10439_v7  ;;  %v10441_v58 = vld [vmem:[#allocation4_spill] sm:$0xff] }
 0x5f1   : > { %5694 = vst.msk [vmem:[%s8891_s29] sm:$0xff] %vm354_vm0, %v5646_v5  ;;  %v4946_v23 = vadd.f32 %v4945_v12, %v4686_v28  ;;  %v5253_v16 = vpop.f32.mrf.mxu0 }
 0x5f2   : > { %5046 = vmatmul.f32.gmra.mxu3 %v10437_v27  ;;  %5526 = vmatmul.f32.gmra.mxu1 %v10438_v38 }
 0x5f3   : > { %v5250_v59 = vadd.f32 %v5249_v55, %v4946_v23  ;;  %4769 = vmatmul.f32.gmra.mxu2 %v8042_v33  ;;  %v10442_v55 = vand.u32 4294901760, %v8065_v54  ;;  %v10443_v33 = vld [vmem:[#allocation2_spill] sm:$0xff] }
 0x5f4   : > { %5316 = vmatmul.f32.gmra.mxu0 %v10438_v38  ;;  %v10445_v38 = vld [vmem:[#allocation5_spill] sm:$0xff] }
 0x5f5   : > { %v5460_v0 = vadd.f32 %v5459_v53, %v5250_v59  ;;  %v4951_v42 = vpop.f32.mrf.mxu3  ;;  %v10444_v53 = vld [vmem:[#allocation12_spill] sm:$0xff] }
 0x5f6   : > { %v4690_v26 = vpop.f32.mrf.mxu2  ;;  %v4481_v59 = vadd.f32 %v10445_v38, %v10444_v53 }
 0x5f7   : > { %v5647_v5 = vadd.f32 %v5460_v0, %v10441_v58  ;;  %v4691_v12 = vadd.f32 %v4690_v26, %v4477_v43  ;;  %v5467_v28 = vpop.f32.mrf.mxu1  ;;  %v10446_v0 = vld [vmem:[#allocation7_spill] sm:$0xff] }
 0x5f9   : > { %5695 = vst.msk [vmem:[%s8891_s29 + $0x8] sm:$0xff] %vm354_vm0, %v5647_v5  ;;  %v4952_v27 = vadd.f32 %v4951_v42, %v4691_v12  ;;  %v5257_v49 = vpop.f32.mrf.mxu0 }
 0x5fa   : > { %5052 = vmatmul.f32.gmra.mxu3 %v10442_v55  ;;  %5530 = vmatmul.f32.gmra.mxu1 %v10443_v33  ;;  %v10450_v55 = vld [vmem:[#allocation9_spill] sm:$0xff] }
 0x5fb   : > { %v5254_v23 = vadd.f32 %v5253_v16, %v4952_v27  ;;  %4774 = vmatmul.f32.gmra.mxu2 %v8065_v54  ;;  %v10447_v16 = vand.u32 4294901760, %v8086_v25  ;;  %v10448_v54 = vld [vmem:[#allocation6_spill] sm:$0xff] }
 0x5fc   : > { %5320 = vmatmul.f32.gmra.mxu0 %v10443_v33 }
 0x5fd   : > { %v5464_v7 = vadd.f32 %v5463_v56, %v5254_v23  ;;  %v4957_v57 = vpop.f32.mrf.mxu3  ;;  %v10449_v56 = vld [vmem:[#allocation13_spill] sm:$0xff] }
 0x5fe   : > { %v4695_v43 = vpop.f32.mrf.mxu2  ;;  %v4485_v33 = vadd.f32 %v10450_v55, %v10449_v56  ;;  %v10456_v55 = vld [vmem:[#allocation16_spill] sm:$0xff] }
 0x5ff   : > { %v5648_v26 = vadd.f32 %v5464_v7, %v10446_v0  ;;  %v4696_v42 = vadd.f32 %v4695_v43, %v4481_v59  ;;  %v5471_v58 = vpop.f32.mrf.mxu1  ;;  %v10451_v59 = vld [vmem:[#allocation11_spill] sm:$0xff] }
 0x601   : > { %5696 = vst.msk [vmem:[%s8891_s29 + $0x10] sm:$0xff] %vm354_vm0, %v5648_v26  ;;  %v4958_v5 = vadd.f32 %v4957_v57, %v4696_v42  ;;  %v5261_v12 = vpop.f32.mrf.mxu0 }
 0x602   : > { %5058 = vmatmul.f32.gmra.mxu3 %v10447_v16  ;;  %5534 = vmatmul.f32.gmra.mxu1 %v10448_v54 }
 0x603   : > { %v5258_v27 = vadd.f32 %v5257_v49, %v4958_v5  ;;  %4779 = vmatmul.f32.gmra.mxu2 %v8086_v25  ;;  %v10452_v49 = vand.u32 4294901760, %v8107_v4  ;;  %v10453_v25 = vld [vmem:[#allocation10_spill] sm:$0xff]  ;;  %v10455_v5 = vld [vmem:[#allocation15_spill] sm:$0xff] }
 0x604   : > { %5324 = vmatmul.f32.gmra.mxu0 %v10448_v54 }
 0x605   : > { %v5468_v23 = vadd.f32 %v5467_v28, %v5258_v27  ;;  %v4963_v53 = vpop.f32.mrf.mxu3  ;;  %v10454_v28 = vld [vmem:[#allocation88_spill] sm:$0xff] }
 0x606   : > { %v4700_v38 = vpop.f32.mrf.mxu2  ;;  %v4489_v16 = vadd.f32 %v10455_v5, %v10454_v28  ;;  %v10461_v28 = vld [vmem:[#allocation90_spill] sm:$0xff] }
 0x607   : > { %v5649_v7 = vadd.f32 %v5468_v23, %v10451_v59  ;;  %v4701_v57 = vadd.f32 %v4700_v38, %v4485_v33  ;;  %v5475_v43 = vpop.f32.mrf.mxu1 }
 0x609   : > { %5697 = vst.msk [vmem:[%s8891_s29 + $0x18] sm:$0xff] %vm354_vm0, %v5649_v7  ;;  %v4964_v0 = vadd.f32 %v4963_v53, %v4701_v57  ;;  %v5265_v26 = vpop.f32.mrf.mxu0  ;;  %v10460_v57 = vld [vmem:[#allocation19_spill] sm:$0xff] }
 0x60a   : > { %5064 = vmatmul.f32.gmra.mxu3 %v10452_v49  ;;  %5538 = vmatmul.f32.gmra.mxu1 %v10453_v25 }
 0x60b   : > { %v5262_v42 = vadd.f32 %v5261_v12, %v4964_v0  ;;  %4784 = vmatmul.f32.gmra.mxu2 %v8107_v4  ;;  %v10457_v12 = vand.u32 4294901760, %v8128_v39  ;;  %v10458_v4 = vld [vmem:[#allocation14_spill] sm:$0xff] }
 0x60c   : > { %5328 = vmatmul.f32.gmra.mxu0 %v10453_v25 }
 0x60d   : > { %v5472_v54 = vadd.f32 %v5471_v58, %v5262_v42  ;;  %v4969_v27 = vpop.f32.mrf.mxu3  ;;  %v10459_v58 = vld [vmem:[#allocation91_spill] sm:$0xff] }
 0x60e   : > { %v4705_v56 = vpop.f32.mrf.mxu2  ;;  %v4493_v0 = vadd.f32 %v10460_v57, %v10459_v58 }
 0x60f   : > { %v5650_v33 = vadd.f32 %v5472_v54, %v10456_v55  ;;  %v4706_v23 = vadd.f32 %v4705_v56, %v4489_v16  ;;  %v5479_v53 = vpop.f32.mrf.mxu1 }
 0x611   : > { %5698 = vst.msk [vmem:[%s8891_s29 + $0x20] sm:$0xff] %vm354_vm0, %v5650_v33  ;;  %v4970_v38 = vadd.f32 %v4969_v27, %v4706_v23  ;;  %v5269_v59 = vpop.f32.mrf.mxu0  ;;  %v10465_v33 = vld [vmem:[#allocation18_spill] sm:$0xff] }
 0x612   : > { %5070 = vmatmul.f32.gmra.mxu3 %v10457_v12  ;;  %5542 = vmatmul.f32.gmra.mxu1 %v10458_v4 }
 0x613   : > { %v5266_v7 = vadd.f32 %v5265_v26, %v4970_v38  ;;  %4789 = vmatmul.f32.gmra.mxu2 %v8128_v39  ;;  %v10462_v26 = vand.u32 4294901760, %v8149_v61  ;;  %v10463_v39 = vld [vmem:[#allocation17_spill] sm:$0xff] }
 0x614   : > { %5332 = vmatmul.f32.gmra.mxu0 %v10458_v4 }
 0x615   : > { %v5476_v49 = vadd.f32 %v5475_v43, %v5266_v7  ;;  %v4975_v25 = vpop.f32.mrf.mxu3  ;;  %v10464_v43 = vld [vmem:[#allocation94_spill] sm:$0xff]  ;;  %v10466_v7 = vld [vmem:[#allocation93_spill] sm:$0xff] }
 0x616   : > { %v4710_v42 = vpop.f32.mrf.mxu2  ;;  %v4497_v23 = vadd.f32 %v10465_v33, %v10464_v43 }
 0x617   : > { %v5651_v5 = vadd.f32 %v5476_v49, %v10461_v28  ;;  %v4711_v16 = vadd.f32 %v4710_v42, %v4493_v0  ;;  %v5483_v54 = vpop.f32.mrf.mxu1  ;;  %v10470_v28 = vld [vmem:[#allocation21_spill] sm:$0xff] }
 0x619   : > { %5699 = vst.msk [vmem:[%s8891_s29 + $0x28] sm:$0xff] %vm354_vm0, %v5651_v5  ;;  %v4976_v27 = vadd.f32 %v4975_v25, %v4711_v16  ;;  %v5273_v56 = vpop.f32.mrf.mxu0 }
 0x61a   : > { %5076 = vmatmul.f32.gmra.mxu3 %v10462_v26  ;;  %5546 = vmatmul.f32.gmra.mxu1 %v10463_v39 }
 0x61b   : > { %v5270_v55 = vadd.f32 %v5269_v59, %v4976_v27  ;;  %4794 = vmatmul.f32.gmra.mxu2 %v8149_v61  ;;  %v10467_v59 = vand.u32 4294901760, %v8170_v14  ;;  %v10468_v61 = vld [vmem:[#allocation89_spill] sm:$0xff] }
 0x61c   : > { %5336 = vmatmul.f32.gmra.mxu0 %v10463_v39  ;;  %v10471_v39 = vld [vmem:[#allocation96_spill] sm:$0xff] }
 0x61d   : > { %v5480_v38 = vadd.f32 %v5479_v53, %v5270_v55  ;;  %v4981_v12 = vpop.f32.mrf.mxu3  ;;  %v10469_v53 = vld [vmem:[#allocation97_spill] sm:$0xff] }
 0x61e   : > { %v4715_v4 = vpop.f32.mrf.mxu2  ;;  %v4501_v5 = vadd.f32 %v10470_v28, %v10469_v53 }
 0x61f   : > { %v5652_v58 = vadd.f32 %v5480_v38, %v10466_v7  ;;  %v4716_v57 = vadd.f32 %v4715_v4, %v4497_v23  ;;  %v5487_v0 = vpop.f32.mrf.mxu1  ;;  %v10475_v4 = vld [vmem:[#allocation20_spill] sm:$0xff] }
 0x621   : > { %5700 = vst.msk [vmem:[%s8891_s29 + $0x30] sm:$0xff] %vm354_vm0, %v5652_v58  ;;  %v4982_v49 = vadd.f32 %v4981_v12, %v4716_v57  ;;  %v5277_v25 = vpop.f32.mrf.mxu0 }
 0x622   : > { %5082 = vmatmul.f32.gmra.mxu3 %v10467_v59  ;;  %5550 = vmatmul.f32.gmra.mxu1 %v10468_v61  ;;  %v10476_v59 = vld [vmem:[#allocation99_spill] sm:$0xff] }
 0x623   : > { %v5274_v42 = vadd.f32 %v5273_v56, %v4982_v49  ;;  %4799 = vmatmul.f32.gmra.mxu2 %v8170_v14  ;;  %v10472_v56 = vand.u32 4294901760, %v8191_v50  ;;  %v10473_v14 = vld [vmem:[#allocation92_spill] sm:$0xff] }
 0x624   : > { %5340 = vmatmul.f32.gmra.mxu0 %v10468_v61 }
 0x625   : > { %v5484_v16 = vadd.f32 %v5483_v54, %v5274_v42  ;;  %v4987_v27 = vpop.f32.mrf.mxu3  ;;  %v10474_v54 = vld [vmem:[#allocation100_spill] sm:$0xff] }
 0x626   : > { %v4720_v26 = vpop.f32.mrf.mxu2  ;;  %v4505_v7 = vadd.f32 %v10475_v4, %v10474_v54 }
 0x627   : > { %v5653_v55 = vadd.f32 %v5484_v16, %v10471_v39  ;;  %v4721_v43 = vadd.f32 %v4720_v26, %v4501_v5  ;;  %v5491_v33 = vpop.f32.mrf.mxu1 }
 0x629   : > { %5701 = vst.msk [vmem:[%s8891_s29 + $0x38] sm:$0xff] %vm354_vm0, %v5653_v55  ;;  %v4988_v23 = vadd.f32 %v4987_v27, %v4721_v43  ;;  %v5281_v38 = vpop.f32.mrf.mxu0  ;;  %v10480_v27 = vld [vmem:[#allocation23_spill] sm:$0xff] }
 0x62a   : > { %5088 = vmatmul.f32.gmra.mxu3 %v10472_v56  ;;  %5554 = vmatmul.f32.gmra.mxu1 %v10473_v14 }
 0x62b   : > { %v5278_v12 = vadd.f32 %v5277_v25, %v4988_v23  ;;  %4804 = vmatmul.f32.gmra.mxu2 %v8191_v50  ;;  %v10477_v25 = vand.u32 4294901760, %v8212_v2  ;;  %v10478_v50 = vld [vmem:[#allocation95_spill] sm:$0xff]  ;;  %v10481_v23 = vld [vmem:[#allocation102_spill] sm:$0xff] }
 0x62c   : > { %5344 = vmatmul.f32.gmra.mxu0 %v10473_v14 }
 0x62d   : > { %v5488_v58 = vadd.f32 %v5487_v0, %v5278_v12  ;;  %v4993_v57 = vpop.f32.mrf.mxu3  ;;  %v10479_v0 = vld [vmem:[#allocation103_spill] sm:$0xff] }
 0x62e   : > { %v4725_v49 = vpop.f32.mrf.mxu2  ;;  %v4509_v26 = vadd.f32 %v10480_v27, %v10479_v0 }
 0x62f   : > { %v5654_v61 = vadd.f32 %v5488_v58, %v10476_v59  ;;  %v4726_v42 = vadd.f32 %v4725_v49, %v4505_v7  ;;  %v5495_v53 = vpop.f32.mrf.mxu1  ;;  %v10485_v58 = vld [vmem:[#allocation22_spill] sm:$0xff] }
 0x631   : > { %5702 = vst.msk [vmem:[%s8891_s29 + $0x40] sm:$0xff] %vm354_vm0, %v5654_v61  ;;  %v4994_v28 = vadd.f32 %v4993_v57, %v4726_v42  ;;  %v5285_v5 = vpop.f32.mrf.mxu0  ;;  %v10486_v42 = vld [vmem:[#allocation105_spill] sm:$0xff] }
 0x632   : > { %5094 = vmatmul.f32.gmra.mxu3 %v10477_v25  ;;  %5558 = vmatmul.f32.gmra.mxu1 %v10478_v50 }
 0x633   : > { %v5282_v16 = vadd.f32 %v5281_v38, %v4994_v28  ;;  %4809 = vmatmul.f32.gmra.mxu2 %v8212_v2  ;;  %v10482_v38 = vand.u32 4294901760, %v8233_v31  ;;  %v10483_v2 = vld [vmem:[#allocation98_spill] sm:$0xff] }
 0x634   : > { %5348 = vmatmul.f32.gmra.mxu0 %v10478_v50 }
 0x635   : > { %v5492_v39 = vadd.f32 %v5491_v33, %v5282_v16  ;;  %v4999_v55 = vpop.f32.mrf.mxu3  ;;  %v10484_v33 = vld [vmem:[#allocation106_spill] sm:$0xff] }
 0x636   : > { %v4730_v43 = vpop.f32.mrf.mxu2  ;;  %v4513_v57 = vadd.f32 %v10485_v58, %v10484_v33  ;;  %v10495_v58 = vld [vmem:[#allocation24_spill] sm:$0xff] }
 0x637   : > { %v5655_v56 = vadd.f32 %v5492_v39, %v10481_v23  ;;  %v4731_v14 = vadd.f32 %v4730_v43, %v4509_v26  ;;  %v5499_v12 = vpop.f32.mrf.mxu1  ;;  %v10490_v26 = vld [vmem:[#allocation25_spill] sm:$0xff] }
 0x639   : > { %5703 = vst.msk [vmem:[%s8891_s29 + $0x48] sm:$0xff] %vm354_vm0, %v5655_v56  ;;  %v5000_v54 = vadd.f32 %v4999_v55, %v4731_v14  ;;  %v5289_v4 = vpop.f32.mrf.mxu0  ;;  %v10491_v56 = vld [vmem:[#allocation108_spill] sm:$0xff] }
 0x63a   : > { %5100 = vmatmul.f32.gmra.mxu3 %v10482_v38  ;;  %5562 = vmatmul.f32.gmra.mxu1 %v10483_v2 }
 0x63b   : > { %v5286_v7 = vadd.f32 %v5285_v5, %v5000_v54  ;;  %4814 = vmatmul.f32.gmra.mxu2 %v8233_v31  ;;  %v10487_v5 = vand.u32 4294901760, %v8254_v48  ;;  %v10488_v31 = vld [vmem:[#allocation101_spill] sm:$0xff] }
 0x63c   : > { %5352 = vmatmul.f32.gmra.mxu0 %v10483_v2 }
 0x63d   : > { %v5496_v49 = vadd.f32 %v5495_v53, %v5286_v7  ;;  %v5005_v59 = vpop.f32.mrf.mxu3  ;;  %v10489_v53 = vld [vmem:[#allocation109_spill] sm:$0xff] }
 0x63e   : > { %v4735_v61 = vpop.f32.mrf.mxu2  ;;  %v4517_v39 = vadd.f32 %v10490_v26, %v10489_v53  ;;  %v10500_v53 = vld [vmem:[#allocation27_spill] sm:$0xff] }
 0x63f   : > { %v5656_v28 = vadd.f32 %v5496_v49, %v10486_v42  ;;  %v4736_v25 = vadd.f32 %v4735_v61, %v4513_v57  ;;  %v5503_v50 = vpop.f32.mrf.mxu1  ;;  %v10496_v42 = vld [vmem:[#allocation111_spill] sm:$0xff] }
 0x641   : > { %5704 = vst.msk [vmem:[%s8891_s29 + $0x50] sm:$0xff] %vm354_vm0, %v5656_v28  ;;  %v5006_v16 = vadd.f32 %v5005_v59, %v4736_v25  ;;  %v5293_v0 = vpop.f32.mrf.mxu0 }
 0x642   : > { %5106 = vmatmul.f32.gmra.mxu3 %v10487_v5  ;;  %5566 = vmatmul.f32.gmra.mxu1 %v10488_v31 }
 0x643   : > { %v5290_v27 = vadd.f32 %v5289_v4, %v5006_v16  ;;  %4819 = vmatmul.f32.gmra.mxu2 %v8254_v48  ;;  %v10492_v4 = vand.u32 4294901760, %v8275_v52  ;;  %v10493_v48 = vld [vmem:[#allocation104_spill] sm:$0xff] }
 0x644   : > { %5356 = vmatmul.f32.gmra.mxu0 %v10488_v31 }
 0x645   : > { %v5500_v55 = vadd.f32 %v5499_v12, %v5290_v27  ;;  %v5011_v43 = vpop.f32.mrf.mxu3  ;;  %v10494_v12 = vld [vmem:[#allocation112_spill] sm:$0xff] }
 0x646   : > { %v4740_v23 = vpop.f32.mrf.mxu2  ;;  %v4521_v57 = vadd.f32 %v10495_v58, %v10494_v12 }
 0x647   : > { %v5657_v14 = vadd.f32 %v5500_v55, %v10491_v56  ;;  %v4741_v54 = vadd.f32 %v4740_v23, %v4517_v39  ;;  %v5507_v38 = vpop.f32.mrf.mxu1  ;;  %v10501_v23 = vld [vmem:[#allocation114_spill] sm:$0xff] }
 0x649   : > { %5705 = vst.msk [vmem:[%s8891_s29 + $0x58] sm:$0xff] %vm354_vm0, %v5657_v14  ;;  %v5012_v2 = vadd.f32 %v5011_v43, %v4741_v54  ;;  %v5297_v7 = vpop.f32.mrf.mxu0 }
 0x64a   : > { %5112 = vmatmul.f32.gmra.mxu3 %v10492_v4  ;;  %5570 = vmatmul.f32.gmra.mxu1 %v10493_v48 }
 0x64b   : > { %v5294_v33 = vadd.f32 %v5293_v0, %v5012_v2  ;;  %4824 = vmatmul.f32.gmra.mxu2 %v8275_v52  ;;  %v10497_v0 = vand.u32 4294901760, %v8296_v41  ;;  %v10498_v52 = vld [vmem:[#allocation107_spill] sm:$0xff] }
 0x64c   : > { %5360 = vmatmul.f32.gmra.mxu0 %v10493_v48 }
 0x64d   : > { %v5504_v49 = vadd.f32 %v5503_v50, %v5294_v33  ;;  %v5017_v59 = vpop.f32.mrf.mxu3  ;;  %v10499_v50 = vld [vmem:[#allocation115_spill] sm:$0xff]  ;;  %v10505_v33 = vld [vmem:[#allocation26_spill] sm:$0xff] }
 0x64e   : > { %v4745_v61 = vpop.f32.mrf.mxu2  ;;  %v4525_v26 = vadd.f32 %v10500_v53, %v10499_v50 }
 0x64f   : > { %v5658_v28 = vadd.f32 %v5504_v49, %v10496_v42  ;;  %v4746_v25 = vadd.f32 %v4745_v61, %v4521_v57  ;;  %v5511_v16 = vpop.f32.mrf.mxu1 }
 0x651   : > { %5706 = vst.msk [vmem:[%s8891_s29 + $0x60] sm:$0xff] %vm354_vm0, %v5658_v28  ;;  %v5018_v5 = vadd.f32 %v5017_v59, %v4746_v25  ;;  %v5301_v31 = vpop.f32.mrf.mxu0  ;;  %v10506_v59 = vld [vmem:[#allocation117_spill] sm:$0xff] }
 0x652   : > { %5118 = vmatmul.f32.gmra.mxu3 %v10497_v0  ;;  %5574 = vmatmul.f32.gmra.mxu1 %v10498_v52 }
 0x653   : > { %v5298_v27 = vadd.f32 %v5297_v7, %v5018_v5  ;;  %4829 = vmatmul.f32.gmra.mxu2 %v8296_v41  ;;  %v10502_v7 = vand.u32 4294901760, %v8317_v51  ;;  %v10503_v41 = vld [vmem:[#allocation110_spill] sm:$0xff] }
 0x654   : > { %5364 = vmatmul.f32.gmra.mxu0 %v10498_v52  ;;  %v10510_v52 = vld [vmem:[#allocation29_spill] sm:$0xff] }
 0x655   : > { %v5508_v39 = vadd.f32 %v5507_v38, %v5298_v27  ;;  %v5023_v55 = vpop.f32.mrf.mxu3  ;;  %v10504_v38 = vld [vmem:[#allocation118_spill] sm:$0xff] }
 0x656   : > { %v4750_v43 = vpop.f32.mrf.mxu2  ;;  %v4529_v12 = vadd.f32 %v10505_v33, %v10504_v38 }
 0x657   : > { %v5659_v56 = vadd.f32 %v5508_v39, %v10501_v23  ;;  %v4751_v14 = vadd.f32 %v4750_v43, %v4525_v26  ;;  %v5515_v54 = vpop.f32.mrf.mxu1  ;;  %v10511_v39 = vld [vmem:[#allocation120_spill] sm:$0xff] }
 0x659   : > { %5707 = vst.msk [vmem:[%s8891_s29 + $0x68] sm:$0xff] %vm354_vm0, %v5659_v56  ;;  %v5024_v2 = vadd.f32 %v5023_v55, %v4751_v14  ;;  %v5305_v4 = vpop.f32.mrf.mxu0 }
 0x65a   : > { %5124 = vmatmul.f32.gmra.mxu3 %v10502_v7  ;;  %5578 = vmatmul.f32.gmra.mxu1 %v10503_v41  ;;  %v10515_v7 = vld [vmem:[#allocation28_spill] sm:$0xff] }
 0x65b   : > { %v5302_v48 = vadd.f32 %v5301_v31, %v5024_v2  ;;  %4834 = vmatmul.f32.gmra.mxu2 %v8317_v51  ;;  %v10507_v31 = vand.u32 4294901760, %v8338_v11  ;;  %v10508_v51 = vld [vmem:[#allocation113_spill] sm:$0xff]  ;;  %v10512_v2 = vand.u32 4294901760, %v8359_v40 }
 0x65c   : > { %5368 = vmatmul.f32.gmra.mxu0 %v10503_v41 }
 0x65d   : > { %v5512_v58 = vadd.f32 %v5511_v16, %v5302_v48  ;;  %v5029_v57 = vpop.f32.mrf.mxu3  ;;  %v10509_v16 = vld [vmem:[#allocation121_spill] sm:$0xff] }
 0x65e   : > { %v4755_v49 = vpop.f32.mrf.mxu2  ;;  %v4533_v27 = vadd.f32 %v10510_v52, %v10509_v16  ;;  %v10521_v52 = vld [vmem:[#allocation126_spill] sm:$0xff] }
 0x65f   : > { %v5660_v61 = vadd.f32 %v5512_v58, %v10506_v59  ;;  %v4756_v42 = vadd.f32 %v4755_v49, %v4529_v12  ;;  %v5519_v28 = vpop.f32.mrf.mxu1  ;;  %v10516_v12 = vld [vmem:[#allocation123_spill] sm:$0xff] }
 0x661   : > { %5708 = vst.msk [vmem:[%s8891_s29 + $0x70] sm:$0xff] %vm354_vm0, %v5660_v61  ;;  %v5030_v25 = vadd.f32 %v5029_v57, %v4756_v42  ;;  %v5309_v5 = vpop.f32.mrf.mxu0  ;;  %v10517_v42 = vand.u32 4294901760, %v8380_v24 }
 0x662   : > { %5130 = vmatmul.f32.gmra.mxu3 %v10507_v31  ;;  %5582 = vmatmul.f32.gmra.mxu1 %v10508_v51 }
 0x663   : > { %v5306_v0 = vadd.f32 %v5305_v4, %v5030_v25  ;;  %4839 = vmatmul.f32.gmra.mxu2 %v8338_v11  ;;  %v10513_v11 = vld [vmem:[#allocation116_spill] sm:$0xff] }
 0x664   : > { %5372 = vmatmul.f32.gmra.mxu0 %v10508_v51 }
 0x665   : > { %v5516_v50 = vadd.f32 %v5515_v54, %v5306_v0  ;;  %v5035_v53 = vpop.f32.mrf.mxu3  ;;  %v10514_v54 = vld [vmem:[#allocation124_spill] sm:$0xff] }
 0x666   : > { %v4760_v26 = vpop.f32.mrf.mxu2  ;;  %v4537_v41 = vadd.f32 %v10515_v7, %v10514_v54  ;;  %v10526_v54 = vld [vmem:[#allocation129_spill] sm:$0xff] }
 0x667   : > { %v5661_v55 = vadd.f32 %v5516_v50, %v10511_v39  ;;  %v4761_v43 = vadd.f32 %v4760_v26, %v4533_v27  ;;  %v5523_v23 = vpop.f32.mrf.mxu1 }
 0x669   : > { %5709 = vst.msk [vmem:[%s8891_s29 + $0x78] sm:$0xff] %vm354_vm0, %v5661_v55  ;;  %v5036_v56 = vadd.f32 %v5035_v53, %v4761_v43  ;;  %v5313_v14 = vpop.f32.mrf.mxu0  ;;  %v10522_v55 = vand.u32 4294901760, %v8401_v62 }
 0x66a   : > { %5136 = vmatmul.f32.gmra.mxu3 %v10512_v2  ;;  %5586 = vmatmul.f32.gmra.mxu1 %v10513_v11 }
 0x66b   : > { %v5310_v4 = vadd.f32 %v5309_v5, %v5036_v56  ;;  %4844 = vmatmul.f32.gmra.mxu2 %v8359_v40  ;;  %v10518_v40 = vld [vmem:[#allocation119_spill] sm:$0xff]  ;;  %v10525_v56 = vld [vmem:[#allocation30_spill] sm:$0xff] }
 0x66c   : > { %5376 = vmatmul.f32.gmra.mxu0 %v10513_v11  ;;  %v10520_v5 = vld [vmem:[#allocation31_spill] sm:$0xff] }
 0x66d   : > { %v5520_v48 = vadd.f32 %v5519_v28, %v5310_v4  ;;  %v5041_v38 = vpop.f32.mrf.mxu3  ;;  %v10519_v28 = vld [vmem:[#allocation127_spill] sm:$0xff] }
 0x66e   : > { %v4765_v33 = vpop.f32.mrf.mxu2  ;;  %v4541_v31 = vadd.f32 %v10520_v5, %v10519_v28 }
 0x66f   : > { %v5662_v58 = vadd.f32 %v5520_v48, %v10516_v12  ;;  %v4766_v57 = vadd.f32 %v4765_v33, %v4537_v41  ;;  %v5527_v49 = vpop.f32.mrf.mxu1  ;;  %v10527_v12 = vand.u32 4294901760, %v8422_v22 }
 0x671   : > { %5710 = vst.msk [vmem:[%s8891_s29 + $0x80] sm:$0xff] %vm354_vm0, %v5662_v58  ;;  %v5042_v59 = vadd.f32 %v5041_v38, %v4766_v57  ;;  %v5317_v61 = vpop.f32.mrf.mxu0  ;;  %v10529_v57 = vld [vmem:[#allocation133_spill] sm:$0xff] }
 0x672   : > { %5142 = vmatmul.f32.gmra.mxu3 %v10517_v42  ;;  %5590 = vmatmul.f32.gmra.mxu1 %v10518_v40 }
 0x673   : > { %v5314_v25 = vadd.f32 %v5313_v14, %v5042_v59  ;;  %4849 = vmatmul.f32.gmra.mxu2 %v8380_v24  ;;  %v10523_v24 = vld [vmem:[#allocation122_spill] sm:$0xff] }
 0x674   : > { %5380 = vmatmul.f32.gmra.mxu0 %v10518_v40 }
 0x675   : > { %v5524_v51 = vadd.f32 %v5523_v23, %v5314_v25  ;;  %v5047_v0 = vpop.f32.mrf.mxu3  ;;  %v10524_v23 = vld [vmem:[#allocation130_spill] sm:$0xff]  ;;  %v10531_v25 = vld [vmem:[#allocation132_spill] sm:$0xff] }
 0x676   : > { %v4770_v16 = vpop.f32.mrf.mxu2  ;;  %v4545_v14 = vadd.f32 %v10525_v56, %v10524_v23 }
 0x677   : > { %v5663_v27 = vadd.f32 %v5524_v51, %v10521_v52  ;;  %v4771_v50 = vadd.f32 %v4770_v16, %v4541_v31  ;;  %v5531_v53 = vpop.f32.mrf.mxu1  ;;  %v10532_v16 = vand.u32 4294901760, %v8443_v35 }
 0x679   : > { %5711 = vst.msk [vmem:[%s8891_s29 + $0x88] sm:$0xff] %vm354_vm0, %v5663_v27  ;;  %v5048_v26 = vadd.f32 %v5047_v0, %v4771_v50  ;;  %v5321_v39 = vpop.f32.mrf.mxu0  ;;  %v10534_v27 = vld [vmem:[#allocation136_spill] sm:$0xff] }
 0x67a   : > { %5148 = vmatmul.f32.gmra.mxu3 %v10522_v55  ;;  %5594 = vmatmul.f32.gmra.mxu1 %v10523_v24  ;;  %v10535_v50 = vld [vmem:[#allocation32_spill] sm:$0xff] }
 0x67b   : > { %v5318_v43 = vadd.f32 %v5317_v61, %v5048_v26  ;;  %4854 = vmatmul.f32.gmra.mxu2 %v8401_v62  ;;  %v10528_v62 = vld [vmem:[#allocation125_spill] sm:$0xff] }
 0x67c   : > { %5384 = vmatmul.f32.gmra.mxu0 %v10523_v24  ;;  %v10536_v24 = vld [vmem:[#allocation135_spill] sm:$0xff] }
 0x67d   : > { %v5528_v2 = vadd.f32 %v5527_v49, %v5318_v43  ;;  %v5053_v11 = vpop.f32.mrf.mxu3  ;;  %v10530_v49 = vld [vmem:[#allocation33_spill] sm:$0xff] }
 0x67e   : > { %v4775_v4 = vpop.f32.mrf.mxu2  ;;  %v4549_v59 = vadd.f32 %v10530_v49, %v10529_v57 }
 0x67f   : > { %v5664_v7 = vadd.f32 %v5528_v2, %v10526_v54  ;;  %v4776_v41 = vadd.f32 %v4775_v4, %v4545_v14  ;;  %v5535_v48 = vpop.f32.mrf.mxu1  ;;  %v10539_v54 = vld [vmem:[#allocation139_spill] sm:$0xff] }
 0x681   : > { %5712 = vst.msk [vmem:[%s8891_s29 + $0x90] sm:$0xff] %vm354_vm0, %v5664_v7  ;;  %v5054_v38 = vadd.f32 %v5053_v11, %v4776_v41  ;;  %v5325_v33 = vpop.f32.mrf.mxu0  ;;  %v10537_v11 = vand.u32 4294901760, %v8464_v63  ;;  %v10540_v7 = vld [vmem:[#allocation35_spill] sm:$0xff] }
 0x682   : > { %5154 = vmatmul.f32.gmra.mxu3 %v10527_v12  ;;  %5598 = vmatmul.f32.gmra.mxu1 %v10528_v62  ;;  %v4557_v41 = vadd.f32 %v10540_v7, %v10539_v54  ;;  %v10541_v12 = vld [vmem:[#allocation138_spill] sm:$0xff]  ;;  %v10552_v7 = vand.u32 4294901760, %v8527_v19 }
 0x683   : > { %v5322_v58 = vadd.f32 %v5321_v39, %v5054_v38  ;;  %4859 = vmatmul.f32.gmra.mxu2 %v8422_v22  ;;  %v10533_v22 = vld [vmem:[#allocation128_spill] sm:$0xff] }
 0x684   : > { %5388 = vmatmul.f32.gmra.mxu0 %v10528_v62 }
 0x685   : > { %v5532_v61 = vadd.f32 %v5531_v53, %v5322_v58  ;;  %v5059_v42 = vpop.f32.mrf.mxu3  ;;  %v4553_v53 = vadd.f32 %v10535_v50, %v10534_v27 }
 0x686   : > { %v4780_v40 = vpop.f32.mrf.mxu2 }
 0x687   : > { %v5665_v28 = vadd.f32 %v5532_v61, %v10531_v25  ;;  %v4781_v5 = vadd.f32 %v4780_v40, %v4549_v59  ;;  %v5539_v31 = vpop.f32.mrf.mxu1  ;;  %v10542_v61 = vand.u32 4294901760, %v8485_v32  ;;  %v10544_v40 = vld [vmem:[#allocation142_spill] sm:$0xff] }
 0x688   : > { %v10545_v25 = vld [vmem:[#allocation34_spill] sm:$0xff] }
 0x689   : > { %5713 = vst.msk [vmem:[%s8891_s29 + $0x98] sm:$0xff] %vm354_vm0, %v5665_v28  ;;  %v5060_v51 = vadd.f32 %v5059_v42, %v4781_v5  ;;  %v5329_v0 = vpop.f32.mrf.mxu0  ;;  %v4561_v28 = vadd.f32 %v10545_v25, %v10544_v40  ;;  %v10557_v40 = vand.u32 4294901760, %v8548_v13 }
 0x68a   : > { %5160 = vmatmul.f32.gmra.mxu3 %v10532_v16  ;;  %5602 = vmatmul.f32.gmra.mxu1 %v10533_v22 }
 0x68b   : > { %v5326_v52 = vadd.f32 %v5325_v33, %v5060_v51  ;;  %4864 = vmatmul.f32.gmra.mxu2 %v8443_v35  ;;  %v10538_v35 = vld [vmem:[#allocation131_spill] sm:$0xff] }
 0x68c   : > { %5392 = vmatmul.f32.gmra.mxu0 %v10533_v22 }
 0x68d   : > { %v5536_v26 = vadd.f32 %v5535_v48, %v5326_v52  ;;  %v5065_v39 = vpop.f32.mrf.mxu3 }
 0x68e   : > { %v4785_v55 = vpop.f32.mrf.mxu2 }
 0x68f   : > { %v5666_v43 = vadd.f32 %v5536_v26, %v10536_v24  ;;  %v4786_v23 = vadd.f32 %v4785_v55, %v4553_v53  ;;  %v5543_v56 = vpop.f32.mrf.mxu1  ;;  %v10547_v53 = vand.u32 4294901760, %v8506_v44  ;;  %v10550_v55 = vld [vmem:[#allocation42_spill] sm:$0xff] }
 0x691   : > { %5714 = vst.msk [vmem:[%s8891_s29 + $0xa0] sm:$0xff] %vm354_vm0, %v5666_v43  ;;  %v5066_v14 = vadd.f32 %v5065_v39, %v4786_v23  ;;  %v5333_v2 = vpop.f32.mrf.mxu0  ;;  %v10549_v39 = vld [vmem:[#allocation145_spill] sm:$0xff] }
 0x692   : > { %5166 = vmatmul.f32.gmra.mxu3 %v10537_v11  ;;  %5606 = vmatmul.f32.gmra.mxu1 %v10538_v35  ;;  %v4565_v24 = vadd.f32 %v10550_v55, %v10549_v39  ;;  %v10564_v55 = vld [vmem:[#allocation153_spill] sm:$0xff] }
 0x693   : > { %v5330_v4 = vadd.f32 %v5329_v0, %v5066_v14  ;;  %4869 = vmatmul.f32.gmra.mxu2 %v8464_v63  ;;  %v10543_v63 = vld [vmem:[#allocation134_spill] sm:$0xff]  ;;  %v10546_v0 = vld [vmem:[#allocation141_spill] sm:$0xff]  ;;  %v10551_v14 = vld [vmem:[#allocation144_spill] sm:$0xff] }
 0x694   : > { %5396 = vmatmul.f32.gmra.mxu0 %v10538_v35 }
 0x695   : > { %v5540_v48 = vadd.f32 %v5539_v31, %v5330_v4  ;;  %v5071_v38 = vpop.f32.mrf.mxu3 }
 0x696   : > { %v4790_v33 = vpop.f32.mrf.mxu2 }
 0x697   : > { %v5667_v62 = vadd.f32 %v5540_v48, %v10541_v12  ;;  %v4791_v58 = vadd.f32 %v4790_v33, %v4557_v41  ;;  %v5547_v57 = vpop.f32.mrf.mxu1  ;;  %v10554_v48 = vld [vmem:[#allocation148_spill] sm:$0xff] }
 0x699   : > { %5715 = vst.msk [vmem:[%s8891_s29 + $0xa8] sm:$0xff] %vm354_vm0, %v5667_v62  ;;  %v5072_v49 = vadd.f32 %v5071_v38, %v4791_v58  ;;  %v5337_v59 = vpop.f32.mrf.mxu0  ;;  %v10555_v38 = vld [vmem:[#allocation37_spill] sm:$0xff] }
 0x69a   : > { %5172 = vmatmul.f32.gmra.mxu3 %v10542_v61  ;;  %5610 = vmatmul.f32.gmra.mxu1 %v10543_v63  ;;  %v4569_v33 = vadd.f32 %v10555_v38, %v10554_v48  ;;  %v10569_v48 = vld [vmem:[#allocation155_spill] sm:$0xff]  ;;  %v10570_v38 = vld [vmem:[#allocation40_spill] sm:$0xff] }
 0x69b   : > { %v5334_v42 = vadd.f32 %v5333_v2, %v5072_v49  ;;  %4874 = vmatmul.f32.gmra.mxu2 %v8485_v32  ;;  %v10548_v32 = vld [vmem:[#allocation137_spill] sm:$0xff] }
 0x69c   : > { %5400 = vmatmul.f32.gmra.mxu0 %v10543_v63 }
 0x69d   : > { %v5544_v5 = vadd.f32 %v5543_v56, %v5334_v42  ;;  %v5077_v31 = vpop.f32.mrf.mxu3 }
 0x69e   : > { %v4795_v51 = vpop.f32.mrf.mxu2 }
 0x69f   : > { %v5668_v16 = vadd.f32 %v5544_v5, %v10546_v0  ;;  %v4796_v22 = vadd.f32 %v4795_v51, %v4561_v28  ;;  %v5551_v52 = vpop.f32.mrf.mxu1  ;;  %v10559_v28 = vld [vmem:[#allocation151_spill] sm:$0xff]  ;;  %v10560_v5 = vld [vmem:[#allocation36_spill] sm:$0xff] }
 0x6a1   : > { %5716 = vst.msk [vmem:[%s8891_s29 + $0xb0] sm:$0xff] %vm354_vm0, %v5668_v16  ;;  %v5078_v27 = vadd.f32 %v5077_v31, %v4796_v22  ;;  %v5341_v50 = vpop.f32.mrf.mxu0  ;;  %v4573_v31 = vadd.f32 %v10560_v5, %v10559_v28  ;;  %v10561_v22 = vld [vmem:[#allocation150_spill] sm:$0xff] }
 0x6a2   : > { %5178 = vmatmul.f32.gmra.mxu3 %v10547_v53  ;;  %5614 = vmatmul.f32.gmra.mxu1 %v10548_v32 }
 0x6a3   : > { %v5338_v26 = vadd.f32 %v5337_v59, %v5078_v27  ;;  %4879 = vmatmul.f32.gmra.mxu2 %v8506_v44  ;;  %v10553_v44 = vld [vmem:[#allocation140_spill] sm:$0xff] }
 0x6a4   : > { %5404 = vmatmul.f32.gmra.mxu0 %v10548_v32 }
 0x6a5   : > { %v5548_v43 = vadd.f32 %v5547_v57, %v5338_v26  ;;  %v5083_v23 = vpop.f32.mrf.mxu3  ;;  %v10556_v57 = vld [vmem:[#allocation147_spill] sm:$0xff]  ;;  %v10562_v26 = vand.u32 4294901760, %v8569_v30 }
 0x6a6   : > { %v4800_v56 = vpop.f32.mrf.mxu2 }
 0x6a7   : > { %v5669_v2 = vadd.f32 %v5548_v43, %v10551_v14  ;;  %v4801_v11 = vadd.f32 %v4800_v56, %v4565_v24  ;;  %v5555_v35 = vpop.f32.mrf.mxu1  ;;  %v10565_v24 = vld [vmem:[#allocation48_spill] sm:$0xff] }
 0x6a8   : > { %v4577_v43 = vadd.f32 %v10565_v24, %v10564_v55  ;;  %v10575_v55 = vld [vmem:[#allocation156_spill] sm:$0xff] }
 0x6a9   : > { %5717 = vst.msk [vmem:[%s8891_s29 + $0xb8] sm:$0xff] %vm354_vm0, %v5669_v2  ;;  %v5084_v4 = vadd.f32 %v5083_v23, %v4801_v11  ;;  %v5345_v54 = vpop.f32.mrf.mxu0  ;;  %v10566_v2 = vld [vmem:[#allocation152_spill] sm:$0xff]  ;;  %v10576_v24 = vand.u32 4294901760, %v10575_v55 }
 0x6aa   : > { %5184 = vmatmul.f32.gmra.mxu3 %v10552_v7  ;;  %5618 = vmatmul.f32.gmra.mxu1 %v10553_v44 }
 0x6ab   : > { %v5342_v41 = vadd.f32 %v5341_v50, %v5084_v4  ;;  %4884 = vmatmul.f32.gmra.mxu2 %v8527_v19  ;;  %v10558_v19 = vld [vmem:[#allocation143_spill] sm:$0xff] }
 0x6ac   : > { %5408 = vmatmul.f32.gmra.mxu0 %v10553_v44  ;;  %v10567_v44 = vand.u32 4294901760, %v8590_v8 }
 0x6ad   : > { %v5552_v12 = vadd.f32 %v5551_v52, %v5342_v41  ;;  %v5089_v62 = vpop.f32.mrf.mxu3 }
 0x6ae   : > { %v4805_v58 = vpop.f32.mrf.mxu2 }
 0x6af   : > { %v5670_v49 = vadd.f32 %v5552_v12, %v10556_v57  ;;  %v4806_v59 = vadd.f32 %v4805_v58, %v4569_v33  ;;  %v5559_v61 = vpop.f32.mrf.mxu1  ;;  %v4581_v33 = vadd.f32 %v10570_v38, %v10569_v48  ;;  %v10571_v57 = vld [vmem:[#allocation154_spill] sm:$0xff]  ;;  %v10578_v48 = vld [vmem:[#allocation55_spill] sm:$0xff] }
 0x6b0   : > { %v4601_v38 = vadd.f32 %v10578_v48, %v8695_v6 }
 0x6b1   : > { %5718 = vst.msk [vmem:[%s8891_s29 + $0xc0] sm:$0xff] %vm354_vm0, %v5670_v49  ;;  %v5090_v63 = vadd.f32 %v5089_v62, %v4806_v59  ;;  %v5349_v42 = vpop.f32.mrf.mxu0 }
 0x6b2   : > { %5190 = vmatmul.f32.gmra.mxu3 %v10557_v40  ;;  %5622 = vmatmul.f32.gmra.mxu1 %v10558_v19  ;;  %v10572_v40 = vand.u32 4294901760, %v8611_v17 }
 0x6b3   : > { %v5346_v25 = vadd.f32 %v5345_v54, %v5090_v63  ;;  %4889 = vmatmul.f32.gmra.mxu2 %v8548_v13  ;;  %v10563_v13 = vld [vmem:[#allocation146_spill] sm:$0xff] }
 0x6b4   : > { %5412 = vmatmul.f32.gmra.mxu0 %v10558_v19  ;;  %v4585_v19 = vadd.f32 %v8636_v34, %v8643_v18  ;;  %v4589_v18 = vadd.f32 %v8655_v1, %v8660_v10 }
 0x6b5   : > { %v5556_v51 = vadd.f32 %v5555_v35, %v5346_v25  ;;  %v5095_v0 = vpop.f32.mrf.mxu3 }
 0x6b6   : > { %v4810_v16 = vpop.f32.mrf.mxu2 }
 0x6b7   : > { %v5671_v52 = vadd.f32 %v5556_v51, %v10561_v22  ;;  %v4811_v27 = vadd.f32 %v4810_v16, %v4573_v31  ;;  %v5563_v50 = vpop.f32.mrf.mxu1  ;;  %v10573_v31 = vld [vmem:[#allocation38_spill] sm:$0xff] }
 0x6b9   : > { %5719 = vst.msk [vmem:[%s8891_s29 + $0xc8] sm:$0xff] %vm354_vm0, %v5671_v52  ;;  %v5096_v53 = vadd.f32 %v5095_v0, %v4811_v27  ;;  %v5353_v32 = vpop.f32.mrf.mxu0  ;;  %v10574_v27 = vand.u32 4294901760, %v8632_v29 }
 0x6ba   : > { %5196 = vmatmul.f32.gmra.mxu3 %v10562_v26  ;;  %5626 = vmatmul.f32.gmra.mxu1 %v10563_v13 }
 0x6bb   : > { %v5350_v39 = vadd.f32 %v5349_v42, %v5096_v53  ;;  %4894 = vmatmul.f32.gmra.mxu2 %v8569_v30  ;;  %v10568_v30 = vld [vmem:[#allocation149_spill] sm:$0xff] }
 0x6bc   : > { %5416 = vmatmul.f32.gmra.mxu0 %v10563_v13 }
 0x6bd   : > { %v5560_v23 = vadd.f32 %v5559_v61, %v5350_v39  ;;  %v5101_v56 = vpop.f32.mrf.mxu3 }
 0x6be   : > { %v4815_v14 = vpop.f32.mrf.mxu2 }
 0x6bf   : > { %v5672_v11 = vadd.f32 %v5560_v23, %v10566_v2  ;;  %v4816_v35 = vadd.f32 %v4815_v14, %v4577_v43  ;;  %v5567_v4 = vpop.f32.mrf.mxu1 }
 0x6c1   : > { %5720 = vst.msk [vmem:[%s8891_s29 + $0xd0] sm:$0xff] %vm354_vm0, %v5672_v11  ;;  %v5102_v54 = vadd.f32 %v5101_v56, %v4816_v35  ;;  %v5357_v7 = vpop.f32.mrf.mxu0  ;;  %v4597_v35 = vadd.f32 %v8679_v46, %v8683_v9  ;;  %v10579_v9 = vld [vmem:[#allocation158_spill] sm:$0xff] }
 0x6c2   : > { %5202 = vmatmul.f32.gmra.mxu3 %v10567_v44  ;;  %5630 = vmatmul.f32.gmra.mxu1 %v10568_v30 }
 0x6c3   : > { %v5354_v41 = vadd.f32 %v5353_v32, %v5102_v54  ;;  %4899 = vmatmul.f32.gmra.mxu2 %v8590_v8 }
 0x6c4   : > { %5420 = vmatmul.f32.gmra.mxu0 %v10568_v30 }
 0x6c5   : > { %v5564_v12 = vadd.f32 %v5563_v50, %v5354_v41  ;;  %v5107_v62 = vpop.f32.mrf.mxu3 }
 0x6c6   : > { %v4820_v58 = vpop.f32.mrf.mxu2 }
 0x6c7   : > { %v5673_v49 = vadd.f32 %v5564_v12, %v10571_v57  ;;  %v4821_v59 = vadd.f32 %v4820_v58, %v4581_v33  ;;  %v5571_v61 = vpop.f32.mrf.mxu1 }
 0x6c9   : > { %5721 = vst.msk [vmem:[%s8891_s29 + $0xd8] sm:$0xff] %vm354_vm0, %v5673_v49  ;;  %v5108_v63 = vadd.f32 %v5107_v62, %v4821_v59  ;;  %v5361_v42 = vpop.f32.mrf.mxu0 }
 0x6ca   : > { %5208 = vmatmul.f32.gmra.mxu3 %v10572_v40  ;;  %5634 = vmatmul.f32.gmra.mxu1 %v8597_v3 }
 0x6cb   : > { %v5358_v8 = vadd.f32 %v5357_v7, %v5108_v63  ;;  %4904 = vmatmul.f32.gmra.mxu2 %v8611_v17  ;;  %v10580_v63 = vld [vmem:[#allocation160_spill] sm:$0xff] }
 0x6cc   : > { %5424 = vmatmul.f32.gmra.mxu0 %v8597_v3 }
 0x6cd   : > { %v5568_v25 = vadd.f32 %v5567_v4, %v5358_v8  ;;  %v5113_v28 = vpop.f32.mrf.mxu3 }
 0x6ce   : > { %v4825_v5 = vpop.f32.mrf.mxu2 }
 0x6cf   : > { %v5674_v51 = vadd.f32 %v5568_v25, %v10573_v31  ;;  %v4826_v0 = vadd.f32 %v4825_v5, %v4585_v19  ;;  %v5575_v16 = vpop.f32.mrf.mxu1  ;;  %v10582_v25 = vld [vmem:[#allocation159_spill] sm:$0xff] }
 0x6d1   : > { %5722 = vst.msk [vmem:[%s8891_s29 + $0xe0] sm:$0xff] %vm354_vm0, %v5674_v51  ;;  %v5114_v22 = vadd.f32 %v5113_v28, %v4826_v0  ;;  %v5365_v52 = vpop.f32.mrf.mxu0 }
 0x6d2   : > { %5214 = vmatmul.f32.gmra.mxu3 %v10574_v27  ;;  %5638 = vmatmul.f32.gmra.mxu1 %v8618_v21 }
 0x6d3   : > { %v5362_v3 = vadd.f32 %v5361_v42, %v5114_v22  ;;  %4909 = vmatmul.f32.gmra.mxu2 %v8632_v29  ;;  %v4593_v29 = vadd.f32 %v8669_v20, %v8673_v45  ;;  %v10577_v20 = vld [vmem:[#allocation157_spill] sm:$0xff]  ;;  %v10581_v42 = vld [vmem:[#allocation46_spill] sm:$0xff] }
 0x6d4   : > { %5428 = vmatmul.f32.gmra.mxu0 %v8618_v21  ;;  %v4605_v40 = vadd.f32 %v10581_v42, %v10580_v63  ;;  %v10583_v22 = vld [vmem:[#allocation161_spill] sm:$0xff] }
 0x6d5   : > { %v5572_v17 = vadd.f32 %v5571_v61, %v5362_v3  ;;  %v5119_v34 = vpop.f32.mrf.mxu3 }
 0x6d6   : > { %v4830_v50 = vpop.f32.mrf.mxu2 }
 0x6d7   : > { %v5675_v53 = vadd.f32 %v5572_v17, %v8658_v60  ;;  %v4831_v32 = vadd.f32 %v4830_v50, %v4589_v18  ;;  %v5579_v26 = vpop.f32.mrf.mxu1 }
 0x6d9   : > { %5723 = vst.msk [vmem:[%s8891_s29 + $0xe8] sm:$0xff] %vm354_vm0, %v5675_v53  ;;  %v5120_v13 = vadd.f32 %v5119_v34, %v4831_v32  ;;  %v5369_v39 = vpop.f32.mrf.mxu0  ;;  %v10585_v34 = vld [vmem:[#allocation65_spill] sm:$0xff] }
 0x6da   : > { %5220 = vmatmul.f32.gmra.mxu3 %v10576_v24  ;;  %5642 = vmatmul.f32.gmra.mxu1 %v8639_v36  ;;  %v10587_v24 = vld [vmem:[#allocation53_spill] sm:$0xff] }
 0x6db   : > { %v5366_v21 = vadd.f32 %v5365_v52, %v5120_v13  ;;  %4914 = vmatmul.f32.gmra.mxu2 %v10575_v55  ;;  %v10584_v52 = vld [vmem:[#allocation44_spill] sm:$0xff] }
 0x6dc   : > { %5432 = vmatmul.f32.gmra.mxu0 %v8639_v36  ;;  %v4609_v27 = vadd.f32 %v10584_v52, %v10583_v22  ;;  %v10586_v55 = vld [vmem:[#allocation68_spill] sm:$0xff] }
 0x6dd   : > { %v5576_v60 = vadd.f32 %v5575_v16, %v5366_v21  ;;  %v5125_v1 = vpop.f32.mrf.mxu3  ;;  %v4613_v21 = vadd.f32 %v10587_v24, %v10586_v55 }
 0x6de   : > { %v4835_v10 = vpop.f32.mrf.mxu2 }
 0x6df   : > { %v5676_v43 = vadd.f32 %v5576_v60, %v8671_v15  ;;  %v4836_v23 = vadd.f32 %v4835_v10, %v4593_v29  ;;  %v5583_v56 = vpop.f32.mrf.mxu1  ;;  %v10588_v10 = vld [vmem:[#allocation61_spill] sm:$0xff] }
 0x6e1   : > { %5724 = vst.msk [vmem:[%s8891_s29 + $0xf0] sm:$0xff] %vm354_vm0, %v5676_v43  ;;  %v5126_v14 = vadd.f32 %v5125_v1, %v4836_v23  ;;  %v5373_v2 = vpop.f32.mrf.mxu0 }
 0x6e3   : > { %v5370_v11 = vadd.f32 %v5369_v39, %v5126_v14 }
 0x6e5   : > { %v5580_v36 = vadd.f32 %v5579_v26, %v5370_v11  ;;  %v5131_v4 = vpop.f32.mrf.mxu3 }
 0x6e6   : > { %v4840_v45 = vpop.f32.mrf.mxu2 }
 0x6e7   : > { %v5677_v54 = vadd.f32 %v5580_v36, %v10577_v20  ;;  %v4841_v7 = vadd.f32 %v4840_v45, %v4597_v35  ;;  %v5587_v44 = vpop.f32.mrf.mxu1  ;;  %v10589_v35 = vld [vmem:[#allocation73_spill] sm:$0xff]  ;;  %v10590_v36 = vld [vmem:[#allocation66_spill] sm:$0xff] }
 0x6e9   : > { %5725 = vst.msk [vmem:[%s8891_s29 + $0xf8] sm:$0xff] %vm354_vm0, %v5677_v54  ;;  %v5132_v15 = vadd.f32 %v5131_v4, %v4841_v7  ;;  %v5377_v30 = vpop.f32.mrf.mxu0  ;;  %v4617_v4 = vadd.f32 %v10590_v36, %v10589_v35  ;;  %v10591_v7 = vld [vmem:[#allocation50_spill] sm:$0xff] }
 0x6eb   : > { %v5374_v41 = vadd.f32 %v5373_v2, %v5132_v15 }
 0x6ed   : > { %v5584_v33 = vadd.f32 %v5583_v56, %v5374_v41  ;;  %v5137_v12 = vpop.f32.mrf.mxu3 }
 0x6ee   : > { %v4845_v46 = vpop.f32.mrf.mxu2 }
 0x6ef   : > { %v5678_v62 = vadd.f32 %v5584_v33, %v10579_v9  ;;  %v4846_v58 = vadd.f32 %v4845_v46, %v4601_v38  ;;  %v5591_v57 = vpop.f32.mrf.mxu1  ;;  %v10592_v33 = vld [vmem:[#allocation76_spill] sm:$0xff] }
 0x6f1   : > { %5726 = vst.msk [vmem:[%s8891_s29 + $0x100] sm:$0xff] %vm354_vm0, %v5678_v62  ;;  %v5138_v49 = vadd.f32 %v5137_v12, %v4846_v58  ;;  %v5381_v59 = vpop.f32.mrf.mxu0  ;;  %v10593_v12 = vld [vmem:[#allocation57_spill] sm:$0xff] }
 0x6f2   : > { %v4621_v46 = vadd.f32 %v10593_v12, %v10592_v33 }
 0x6f3   : > { %v5378_v61 = vadd.f32 %v5377_v30, %v5138_v49 }
 0x6f5   : > { %v5588_v8 = vadd.f32 %v5587_v44, %v5378_v61  ;;  %v5143_v19 = vpop.f32.mrf.mxu3 }
 0x6f6   : > { %v4850_v6 = vpop.f32.mrf.mxu2 }
 0x6f7   : > { %v5679_v28 = vadd.f32 %v5588_v8, %v10582_v25  ;;  %v4851_v5 = vadd.f32 %v4850_v6, %v4605_v40  ;;  %v5595_v31 = vpop.f32.mrf.mxu1  ;;  %v10595_v8 = vld [vmem:[#allocation79_spill] sm:$0xff] }
 0x6f9   : > { %5727 = vst.msk [vmem:[%s8891_s29 + $0x108] sm:$0xff] %vm354_vm0, %v5679_v28  ;;  %v5144_v51 = vadd.f32 %v5143_v19, %v4851_v5  ;;  %v5385_v0 = vpop.f32.mrf.mxu0  ;;  %v10596_v19 = vld [vmem:[#allocation70_spill] sm:$0xff] }
 0x6fa   : > { %v4625_v6 = vadd.f32 %v10596_v19, %v10595_v8 }
 0x6fb   : > { %v5382_v16 = vadd.f32 %v5381_v59, %v5144_v51 }
 0x6fd   : > { %v5592_v3 = vadd.f32 %v5591_v57, %v5382_v16  ;;  %v5149_v18 = vpop.f32.mrf.mxu3  ;;  %v10594_v57 = vld [vmem:[#allocation59_spill] sm:$0xff] }
 0x6fe   : > { %v4855_v17 = vpop.f32.mrf.mxu2 }
 0x6ff   : > { %v5680_v50 = vadd.f32 %v5592_v3, %v10585_v34  ;;  %v4856_v53 = vadd.f32 %v4855_v17, %v4609_v27  ;;  %v5599_v32 = vpop.f32.mrf.mxu1  ;;  %v10598_v3 = vld [vmem:[#allocation82_spill] sm:$0xff] }
 0x701   : > { %5728 = vst.msk [vmem:[%s8891_s29 + $0x110] sm:$0xff] %vm354_vm0, %v5680_v50  ;;  %v5150_v26 = vadd.f32 %v5149_v18, %v4856_v53  ;;  %v5389_v13 = vpop.f32.mrf.mxu0  ;;  %v10599_v18 = vld [vmem:[#allocation72_spill] sm:$0xff] }
 0x702   : > { %v4629_v17 = vadd.f32 %v10599_v18, %v10598_v3  ;;  %v10612_v18 = vld [vmem:[#allocation54_spill] sm:$0xff] }
 0x703   : > { %v5386_v39 = vadd.f32 %v5385_v0, %v5150_v26 }
 0x705   : > { %v5596_v29 = vadd.f32 %v5595_v31, %v5386_v39  ;;  %v5155_v60 = vpop.f32.mrf.mxu3  ;;  %v10597_v31 = vld [vmem:[#allocation63_spill] sm:$0xff] }
 0x706   : > { %v4860_v1 = vpop.f32.mrf.mxu2 }
 0x707   : > { %v5681_v43 = vadd.f32 %v5596_v29, %v10588_v10  ;;  %v4861_v23 = vadd.f32 %v4860_v1, %v4613_v21  ;;  %v5603_v56 = vpop.f32.mrf.mxu1  ;;  %v10601_v29 = vld [vmem:[#allocation85_spill] sm:$0xff] }
 0x709   : > { %5729 = vst.msk [vmem:[%s8891_s29 + $0x118] sm:$0xff] %vm354_vm0, %v5681_v43  ;;  %v5156_v14 = vadd.f32 %v5155_v60, %v4861_v23  ;;  %v5393_v2 = vpop.f32.mrf.mxu0  ;;  %v10602_v60 = vld [vmem:[#allocation75_spill] sm:$0xff] }
 0x70a   : > { %v4633_v1 = vadd.f32 %v10602_v60, %v10601_v29 }
 0x70b   : > { %v5390_v11 = vadd.f32 %v5389_v13, %v5156_v14 }
 0x70d   : > { %v5600_v45 = vadd.f32 %v5599_v32, %v5390_v11  ;;  %v5161_v20 = vpop.f32.mrf.mxu3  ;;  %v10600_v32 = vld [vmem:[#allocation71_spill] sm:$0xff] }
 0x70e   : > { %v4865_v54 = vpop.f32.mrf.mxu2 }
 0x70f   : > { %v5682_v44 = vadd.f32 %v5600_v45, %v10591_v7  ;;  %v4866_v15 = vadd.f32 %v4865_v54, %v4617_v4  ;;  %v5607_v30 = vpop.f32.mrf.mxu1  ;;  %v10604_v45 = vld [vmem:[#allocation43_spill] sm:$0xff] }
 0x711   : > { %5730 = vst.msk [vmem:[%s8891_s29 + $0x120] sm:$0xff] %vm354_vm0, %v5682_v44  ;;  %v5162_v41 = vadd.f32 %v5161_v20, %v4866_v15  ;;  %v5397_v48 = vpop.f32.mrf.mxu0  ;;  %v10605_v20 = vld [vmem:[#allocation78_spill] sm:$0xff] }
 0x712   : > { %v4637_v54 = vadd.f32 %v10605_v20, %v10604_v45 }
 0x713   : > { %v5394_v38 = vadd.f32 %v5393_v2, %v5162_v41 }
 0x715   : > { %v5604_v9 = vadd.f32 %v5603_v56, %v5394_v38  ;;  %v5167_v62 = vpop.f32.mrf.mxu3  ;;  %v10603_v56 = vld [vmem:[#allocation74_spill] sm:$0xff] }
 0x716   : > { %v4870_v58 = vpop.f32.mrf.mxu2 }
 0x717   : > { %v5683_v49 = vadd.f32 %v5604_v9, %v10594_v57  ;;  %v4871_v59 = vadd.f32 %v4870_v58, %v4621_v46  ;;  %v5611_v61 = vpop.f32.mrf.mxu1  ;;  %v10607_v9 = vld [vmem:[#allocation39_spill] sm:$0xff] }
 0x719   : > { %5731 = vst.msk [vmem:[%s8891_s29 + $0x128] sm:$0xff] %vm354_vm0, %v5683_v49  ;;  %v5168_v63 = vadd.f32 %v5167_v62, %v4871_v59  ;;  %v5401_v42 = vpop.f32.mrf.mxu0  ;;  %v10608_v62 = vld [vmem:[#allocation81_spill] sm:$0xff] }
 0x71a   : > { %v4641_v58 = vadd.f32 %v10608_v62, %v10607_v9 }
 0x71b   : > { %v5398_v40 = vadd.f32 %v5397_v48, %v5168_v63 }
 0x71d   : > { %v5608_v25 = vadd.f32 %v5607_v30, %v5398_v40  ;;  %v5173_v28 = vpop.f32.mrf.mxu3  ;;  %v10606_v30 = vld [vmem:[#allocation77_spill] sm:$0xff] }
 0x71e   : > { %v4875_v5 = vpop.f32.mrf.mxu2 }
 0x71f   : > { %v5684_v51 = vadd.f32 %v5608_v25, %v10597_v31  ;;  %v4876_v0 = vadd.f32 %v4875_v5, %v4625_v6  ;;  %v5615_v16 = vpop.f32.mrf.mxu1  ;;  %v10610_v25 = vld [vmem:[#allocation84_spill] sm:$0xff] }
 0x721   : > { %5732 = vst.msk [vmem:[%s8891_s29 + $0x130] sm:$0xff] %vm354_vm0, %v5684_v51  ;;  %v5174_v22 = vadd.f32 %v5173_v28, %v4876_v0  ;;  %v5405_v52 = vpop.f32.mrf.mxu0  ;;  %v4645_v28 = vadd.f32 %v10610_v25, %v8827_v47  ;;  %v10611_v0 = vld [vmem:[#allocation83_spill] sm:$0xff] }
 0x723   : > { %v5402_v27 = vadd.f32 %v5401_v42, %v5174_v22 }
 0x725   : > { %v5612_v34 = vadd.f32 %v5611_v61, %v5402_v27  ;;  %v5179_v50 = vpop.f32.mrf.mxu3  ;;  %v10609_v61 = vld [vmem:[#allocation80_spill] sm:$0xff]  ;;  %v6162_v27 = vmov 0.0  }
 0x726   : > { %v4880_v53 = vpop.f32.mrf.mxu2  ;;  %6026 = vst.msk [vmem:[%s8891_s29 + $0x180] sm:$0xff] %vm354_vm0, %v6162_v27 }
 0x727   : > { %v5685_v26 = vadd.f32 %v5612_v34, %v10600_v32  ;;  %v4881_v13 = vadd.f32 %v4880_v53, %v4629_v17  ;;  %v5619_v39 = vpop.f32.mrf.mxu1  ;;  %6027 = vst.msk [vmem:[%s8891_s29 + $0x188] sm:$0xff] %vm354_vm0, %v6162_v27  ;;  %v4649_v17 = vadd.f32 %v10612_v18, %v8839_v37 }
 0x728   : > { %6028 = vst.msk [vmem:[%s8891_s29 + $0x190] sm:$0xff] %vm354_vm0, %v6162_v27 }
 0x729   : > { %5733 = vst.msk [vmem:[%s8891_s29 + $0x138] sm:$0xff] %vm354_vm0, %v5685_v26  ;;  %v5180_v55 = vadd.f32 %v5179_v50, %v4881_v13  ;;  %v5409_v24 = vpop.f32.mrf.mxu0  ;;  %v10613_v26 = vld [vmem:[#allocation87_spill] sm:$0xff] }
 0x72a   : > { %6029 = vst.msk [vmem:[%s8891_s29 + $0x198] sm:$0xff] %vm354_vm0, %v6162_v27 }
 0x72b   : > { %v5406_v21 = vadd.f32 %v5405_v52, %v5180_v55  ;;  %6030 = vst.msk [vmem:[%s8891_s29 + $0x1a0] sm:$0xff] %vm354_vm0, %v6162_v27 }
 0x72c   : > { %6031 = vst.msk [vmem:[%s8891_s29 + $0x1a8] sm:$0xff] %vm354_vm0, %v6162_v27 }
 0x72d   : > { %v5616_v10 = vadd.f32 %v5615_v16, %v5406_v21  ;;  %v5185_v43 = vpop.f32.mrf.mxu3  ;;  %6032 = vst.msk [vmem:[%s8891_s29 + $0x1b0] sm:$0xff] %vm354_vm0, %v6162_v27  ;;  %v10615_v21 = vld [vmem:[#allocation86_spill] sm:$0xff] }
 0x72e   : > { %v4885_v23 = vpop.f32.mrf.mxu2  ;;  %6033 = vst.msk [vmem:[%s8891_s29 + $0x1b8] sm:$0xff] %vm354_vm0, %v6162_v27 }
 0x72f   : > { %v5686_v14 = vadd.f32 %v5616_v10, %v10603_v56  ;;  %v4886_v2 = vadd.f32 %v4885_v23, %v4633_v1  ;;  %v5623_v11 = vpop.f32.mrf.mxu1  ;;  %6034 = vst.msk [vmem:[%s8891_s29 + $0x1c0] sm:$0xff] %vm354_vm0, %v6162_v27  ;;  %v10616_v23 = vld [vmem:[#allocation45_spill] sm:$0xff] }
 0x730   : > { %6035 = vst.msk [vmem:[%s8891_s29 + $0x1c8] sm:$0xff] %vm354_vm0, %v6162_v27 }
 0x731   : > { %5734 = vst.msk [vmem:[%s8891_s29 + $0x140] sm:$0xff] %vm354_vm0, %v5686_v14  ;;  %v5186_v35 = vadd.f32 %v5185_v43, %v4886_v2  ;;  %v5413_v36 = vpop.f32.mrf.mxu0 }
 0x732   : > { %6036 = vst.msk [vmem:[%s8891_s29 + $0x1d0] sm:$0xff] %vm354_vm0, %v6162_v27 }
 0x733   : > { %v5410_v4 = vadd.f32 %v5409_v24, %v5186_v35  ;;  %v10614_v24 = vld [vmem:[#allocation47_spill] sm:$0xff]  ;;  %6037 = vst.msk [vmem:[%s8891_s29 + $0x1d8] sm:$0xff] %vm354_vm0, %v6162_v27 }
 0x734   : > { %v4653_v29 = vadd.f32 %v10615_v21, %v10614_v24  ;;  %6038 = vst.msk [vmem:[%s8891_s29 + $0x1e0] sm:$0xff] %vm354_vm0, %v6162_v27 }
 0x735   : > { %v5620_v7 = vadd.f32 %v5619_v39, %v5410_v4  ;;  %v5191_v44 = vpop.f32.mrf.mxu3  ;;  %6039 = vst.msk [vmem:[%s8891_s29 + $0x1e8] sm:$0xff] %vm354_vm0, %v6162_v27  ;;  %v10618_v4 = vld [vmem:[#allocation41_spill] sm:$0xff] }
 0x736   : > { %v4890_v15 = vpop.f32.mrf.mxu2  ;;  %6040 = vst.msk [vmem:[%s8891_s29 + $0x1f0] sm:$0xff] %vm354_vm0, %v6162_v27 }
 0x737   : > { %v5687_v41 = vadd.f32 %v5620_v7, %v10606_v30  ;;  %v4891_v48 = vadd.f32 %v4890_v15, %v4637_v54  ;;  %v5627_v12 = vpop.f32.mrf.mxu1  ;;  %6041 = vst.msk [vmem:[%s8891_s29 + $0x1f8] sm:$0xff] %vm354_vm0, %v6162_v27 }
 0x738   : > { %6042 = vst.msk [vmem:[%s8891_s29 + $0x200] sm:$0xff] %vm354_vm0, %v6162_v27 }
 0x739   : > { %5735 = vst.msk [vmem:[%s8891_s29 + $0x148] sm:$0xff] %vm354_vm0, %v5687_v41  ;;  %v5192_v38 = vadd.f32 %v5191_v44, %v4891_v48  ;;  %v5417_v33 = vpop.f32.mrf.mxu0  ;;  %v10619_v44 = vld [vmem:[#allocation52_spill] sm:$0xff] }
 0x73a   : > { %6043 = vst.msk [vmem:[%s8891_s29 + $0x208] sm:$0xff] %vm354_vm0, %v6162_v27 }
 0x73b   : > { %v5414_v46 = vadd.f32 %v5413_v36, %v5192_v38  ;;  %v10617_v36 = vld [vmem:[#allocation58_spill] sm:$0xff]  ;;  %6044 = vst.msk [vmem:[%s8891_s29 + $0x210] sm:$0xff] %vm354_vm0, %v6162_v27 }
 0x73c   : > { %v4657_v45 = vadd.f32 %v10618_v4, %v10617_v36  ;;  %6045 = vst.msk [vmem:[%s8891_s29 + $0x218] sm:$0xff] %vm354_vm0, %v6162_v27 }
 0x73d   : > { %v5624_v57 = vadd.f32 %v5623_v11, %v5414_v46  ;;  %v5197_v49 = vpop.f32.mrf.mxu3  ;;  %6046 = vst.msk [vmem:[%s8891_s29 + $0x220] sm:$0xff] %vm354_vm0, %v6162_v27  ;;  %v10620_v46 = vld [vmem:[#allocation64_spill] sm:$0xff] }
 0x73e   : > { %v4895_v59 = vpop.f32.mrf.mxu2  ;;  %6047 = vst.msk [vmem:[%s8891_s29 + $0x228] sm:$0xff] %vm354_vm0, %v6162_v27 }
 0x73f   : > { %v5688_v63 = vadd.f32 %v5624_v57, %v10609_v61  ;;  %v4896_v42 = vadd.f32 %v4895_v59, %v4641_v58  ;;  %v5631_v6 = vpop.f32.mrf.mxu1  ;;  %6048 = vst.msk [vmem:[%s8891_s29 + $0x230] sm:$0xff] %vm354_vm0, %v6162_v27 }
 0x740   : > { %6049 = vst.msk [vmem:[%s8891_s29 + $0x238] sm:$0xff] %vm354_vm0, %v6162_v27 }
 0x741   : > { %5736 = vst.msk [vmem:[%s8891_s29 + $0x150] sm:$0xff] %vm354_vm0, %v5688_v63  ;;  %v5198_v40 = vadd.f32 %v5197_v49, %v4896_v42  ;;  %v5421_v8 = vpop.f32.mrf.mxu0 }
 0x742   : > { %6050 = vst.msk [vmem:[%s8891_s29 + $0x240] sm:$0xff] %vm354_vm0, %v6162_v27 }
 0x743   : > { %v5418_v19 = vadd.f32 %v5417_v33, %v5198_v40  ;;  %6051 = vst.msk [vmem:[%s8891_s29 + $0x248] sm:$0xff] %vm354_vm0, %v6162_v27 }
 0x744   : > { %6052 = vst.msk [vmem:[%s8891_s29 + $0x250] sm:$0xff] %vm354_vm0, %v6162_v27 }
 0x745   : > { %v5628_v5 = vadd.f32 %v5627_v12, %v5418_v19  ;;  %v5203_v31 = vpop.f32.mrf.mxu3  ;;  %6053 = vst.msk [vmem:[%s8891_s29 + $0x258] sm:$0xff] %vm354_vm0, %v6162_v27 }
 0x746   : > { %v4900_v51 = vpop.f32.mrf.mxu2  ;;  %6054 = vst.msk [vmem:[%s8891_s29 + $0x260] sm:$0xff] %vm354_vm0, %v6162_v27 }
 0x747   : > { %v5689_v16 = vadd.f32 %v5628_v5, %v10611_v0  ;;  %v4901_v22 = vadd.f32 %v4900_v51, %v4645_v28  ;;  %v5635_v32 = vpop.f32.mrf.mxu1  ;;  %6055 = vst.msk [vmem:[%s8891_s29 + $0x268] sm:$0xff] %vm354_vm0, %v6162_v27 }
 0x748   : > { %6056 = vst.msk [vmem:[%s8891_s29 + $0x270] sm:$0xff] %vm354_vm0, %v6162_v27 }
 0x749   : > { %5737 = vst.msk [vmem:[%s8891_s29 + $0x158] sm:$0xff] %vm354_vm0, %v5689_v16  ;;  %v5204_v52 = vadd.f32 %v5203_v31, %v4901_v22  ;;  %v5425_v47 = vpop.f32.mrf.mxu0 }
 0x74a   : > { %6057 = vst.msk [vmem:[%s8891_s29 + $0x278] sm:$0xff] %vm354_vm0, %v6162_v27 }
 0x74b   : > { %v5422_v3 = vadd.f32 %v5421_v8, %v5204_v52  ;;  %6058 = vst.msk [vmem:[%s8891_s29 + $0x280] sm:$0xff] %vm354_vm0, %v6162_v27 }
 0x74c   : > { %6059 = vst.msk [vmem:[%s8891_s29 + $0x288] sm:$0xff] %vm354_vm0, %v6162_v27 }
 0x74d   : > { %v5632_v34 = vadd.f32 %v5631_v6, %v5422_v3  ;;  %v5209_v50 = vpop.f32.mrf.mxu3  ;;  %6060 = vst.msk [vmem:[%s8891_s29 + $0x290] sm:$0xff] %vm354_vm0, %v6162_v27 }
 0x74e   : > { %v4905_v53 = vpop.f32.mrf.mxu2  ;;  %6061 = vst.msk [vmem:[%s8891_s29 + $0x298] sm:$0xff] %vm354_vm0, %v6162_v27 }
 0x74f   : > { %v5690_v13 = vadd.f32 %v5632_v34, %v10613_v26  ;;  %v4906_v39 = vadd.f32 %v4905_v53, %v4649_v17  ;;  %v5639_v2 = vpop.f32.mrf.mxu1  ;;  %6062 = vst.msk [vmem:[%s8891_s29 + $0x2a0] sm:$0xff] %vm354_vm0, %v6162_v27 }
 0x750   : > { %6063 = vst.msk [vmem:[%s8891_s29 + $0x2a8] sm:$0xff] %vm354_vm0, %v6162_v27 }
 0x751   : > { %5738 = vst.msk [vmem:[%s8891_s29 + $0x160] sm:$0xff] %vm354_vm0, %v5690_v13  ;;  %v5210_v37 = vadd.f32 %v5209_v50, %v4906_v39  ;;  %v5429_v43 = vpop.f32.mrf.mxu0 }
 0x752   : > { %6064 = vst.msk [vmem:[%s8891_s29 + $0x2b0] sm:$0xff] %vm354_vm0, %v6162_v27 }
 0x753   : > { %v5426_v55 = vadd.f32 %v5425_v47, %v5210_v37  ;;  %6065 = vst.msk [vmem:[%s8891_s29 + $0x2b8] sm:$0xff] %vm354_vm0, %v6162_v27 }
 0x754   : > { %6066 = vst.msk [vmem:[%s8891_s29 + $0x2c0] sm:$0xff] %vm354_vm0, %v6162_v27 }
 0x755   : > { %v5636_v60 = vadd.f32 %v5635_v32, %v5426_v55  ;;  %v5215_v1 = vpop.f32.mrf.mxu3  ;;  %6067 = vst.msk [vmem:[%s8891_s29 + $0x2c8] sm:$0xff] %vm354_vm0, %v6162_v27 }
 0x756   : > { %v4910_v10 = vpop.f32.mrf.mxu2  ;;  %6068 = vst.msk [vmem:[%s8891_s29 + $0x2d0] sm:$0xff] %vm354_vm0, %v6162_v27 }
 0x757   : > { %v5691_v56 = vadd.f32 %v5636_v60, %v10616_v23  ;;  %v4911_v14 = vadd.f32 %v4910_v10, %v4653_v29  ;;  %v5643_v38 = vpop.f32.mrf.mxu1  ;;  %6069 = vst.msk [vmem:[%s8891_s29 + $0x2d8] sm:$0xff] %vm354_vm0, %v6162_v27 }
 0x758   : > { %6070 = vst.msk [vmem:[%s8891_s29 + $0x2e0] sm:$0xff] %vm354_vm0, %v6162_v27 }
 0x759   : > { %5739 = vst.msk [vmem:[%s8891_s29 + $0x168] sm:$0xff] %vm354_vm0, %v5691_v56  ;;  %v5216_v11 = vadd.f32 %v5215_v1, %v4911_v14  ;;  %v5433_v41 = vpop.f32.mrf.mxu0 }
 0x75a   : > { %6071 = vst.msk [vmem:[%s8891_s29 + $0x2e8] sm:$0xff] %vm354_vm0, %v6162_v27 }
 0x75b   : > { %v5430_v35 = vadd.f32 %v5429_v43, %v5216_v11  ;;  %6072 = vst.msk [vmem:[%s8891_s29 + $0x2f0] sm:$0xff] %vm354_vm0, %v6162_v27 }
 0x75c   : > { %6073 = vst.msk [vmem:[%s8891_s29 + $0x2f8] sm:$0xff] %vm354_vm0, %v6162_v27 }
 0x75d   : > { %v5640_v20 = vadd.f32 %v5639_v2, %v5430_v35  ;;  %v5221_v7 = vpop.f32.mrf.mxu3 }
 0x75e   : > { %v4915_v54 = vpop.f32.mrf.mxu2 }
 0x75f   : > { %v5692_v15 = vadd.f32 %v5640_v20, %v10619_v44  ;;  %v4916_v30 = vadd.f32 %v4915_v54, %v4657_v45 }
 0x761   : > { %5740 = vst.msk [vmem:[%s8891_s29 + $0x170] sm:$0xff] %vm354_vm0, %v5692_v15  ;;  %v5222_v48 = vadd.f32 %v5221_v7, %v4916_v30 }
 0x763   : > { %v5434_v33 = vadd.f32 %v5433_v41, %v5222_v48 }
 0x765   : > { %v5644_v12 = vadd.f32 %v5643_v38, %v5434_v33 }
 0x767   : > { %v5693_v9 = vadd.f32 %v5644_v12, %v10620_v46 }
 0x769   : > { %5741 = vst.msk [vmem:[%s8891_s29 + $0x178] sm:$0xff] %vm354_vm0, %v5693_v9 }
 0x76a PF: > { %s12_s13 = sadd.s32 1, %s6160_s13   ;;  %s10621_s9 = smov %s6152_s11 }
 0x76b   : > { %p9_p6 = scmp.ge.s32.totalorder %s12_s13, 8   ;;  %s10622_s10 = smov %s6156_s12 }
 0x76c   : > { %s10623_s11 = smov %s10626_s14  ;;  %s10624_s12 = smov %s10630_s15 }
 0x76d   :  { %11 = sbr.rel (!%p9_p6) target bundleno = 3 (0x3), region = 66 }

</bundles_post_ra>
